<compile_context>
chip_gen: v7x
topology: tpu7x:2x2x1
jax: 0.10.0
libtpu: 0.0.40
codegen_flags: <defaults>
</compile_context>

<pallas_src>
import math
import functools

import jax
import jax.numpy as jnp
from jax.experimental import pallas as pl
from jax.experimental.pallas import tpu as pltpu


_VMEM = pl.BlockSpec(memory_space=pltpu.MemorySpace.VMEM)
_VMEM_LIMIT = 32 * 1024 * 1024  # safe on v5e/v6e/v7x; our tiles are far smaller


# ----------------------------------------------------------------------------
# Pallas kernels
# ----------------------------------------------------------------------------
def _apply_act(y, act):
    if act == "relu":
        return jnp.maximum(y, 0.0)
    if act == "leaky_relu":                       # PyTorch default slope 0.01
        return jnp.where(y > 0.0, y, 0.01 * y)
    if act == "sigmoid":
        return jax.nn.sigmoid(y)                  # EUP
    if act == "none":
        return y
    raise ValueError(f"unknown activation {act}")


def _dot(a, b):
    return jnp.dot(a, b, preferred_element_type=jnp.float32)


def _conv_kernel(w_ref, b_ref, x_ref, o_ref, *, act):
    """One M-tile of o = act(W @ X + b); W:(Cout,K) bf16, X:(K,TILE_M) bf16,
    b:(Cout,1) f32.  f32 accumulation + f32 epilogue, bf16 store."""
    y = _dot(w_ref[...], x_ref[...]) + b_ref[...]
    o_ref[...] = _apply_act(y, act).astype(o_ref.dtype)


def conv_mm(w, b, x, act, *, tile_m=4096, out_dtype=jnp.bfloat16):
    """Conv/convT-as-matmul, gridded over the pixel axis M (lane axis) so the
    big layers get double-buffered DMA pipelining and megacore sharding."""
    cout, _ = w.shape
    k, m = x.shape
    tm = m if m <= tile_m else tile_m             # ragged last block is fine
    return pl.pallas_call(
        functools.partial(_conv_kernel, act=act),
        out_shape=jax.ShapeDtypeStruct((cout, m), out_dtype),
        grid=(pl.cdiv(m, tm),),
        in_specs=[pl.BlockSpec((cout, w.shape[1]), lambda i: (0, 0)),  # weights
                  pl.BlockSpec((cout, 1), lambda i: (0, 0)),           # bias
                  pl.BlockSpec((k, tm), lambda i: (0, i))],            # X tile
        out_specs=pl.BlockSpec((cout, tm), lambda i: (0, i)),
        compiler_params=pltpu.CompilerParams(
            dimension_semantics=("parallel",),
            vmem_limit_bytes=_VMEM_LIMIT),
    )(w, b, x)


def _mid_kernel(p4_ref, w4_ref, b4_ref, w5_ref, b5_ref,
                we1_ref, be1_ref, we2_ref, be2_ref,
                wf1_ref, bf1_ref, wf2_ref, bf2_ref,
                wd1_ref, bd1_ref, m2_ref, b2_ref, w3_ref, b3_ref,
                h_ref, y3_ref):
    """Fused middle of the network (everything with <= 400*N elements):
       enc4 + enc5 + fc_enc + fc_dec + decT1 + decT2(+overlap-add) + decT3.

    p4_ref : (576, N) bf16  enc4 patches stacked per output pixel on sublanes
    h_ref  : (2, N)   f32   latent (transposed)
    y3_ref : (25, 128, N) bf16  decT3 output, rows (pixel, (i, j, cout))
    """
    relu = lambda v: jnp.maximum(v, 0.0)
    lrelu = lambda v: jnp.where(v > 0.0, v, 0.01 * v)

    p4 = p4_ref[...].astype(jnp.float32)                    # (576, N)

    # encoder conv4 (16->32, k3 s2, 5x5 -> 2x2): ONE block-diagonal matmul
    a4 = lrelu(_dot(w4_ref[...], p4) + b4_ref[...])         # (128, N) rows (q,c)
    # encoder conv5 (32->64, k2 s1, 2x2 -> 1x1): ONE matmul, NO activation
    # (matches the PyTorch ConvEncoder, whose Sequential ends with the conv)
    xf = _dot(w5_ref[...], a4) + b5_ref[...]                # (64, N)

    # fc encoder -> latent
    h1 = relu(_dot(we1_ref[...], xf) + be1_ref[...])        # (16, N)
    h = _dot(we2_ref[...], h1) + be2_ref[...]               # (2, N)
    h_ref[...] = h.astype(h_ref.dtype)

    # fc decoder
    z1 = relu(_dot(wf1_ref[...], h) + bf1_ref[...])         # (16, N)
    z = relu(_dot(wf2_ref[...], z1) + bf2_ref[...])         # (64, N)

    # decoder convT1 (64->32, k2 s1, 1x1 -> 2x2): ONE matmul on stacked weights
    a1 = relu(_dot(wd1_ref[...], z) + bd1_ref[...])         # (128, N) rows (p,c)

    # decoder convT2 (32->16, k3 s2, 2x2 -> 5x5): matmul + overlap-add folded
    # into a single dense (400,128) operator at pack time; bias+ReLU applied
    # exactly once, AFTER the (now implicit) overlap-add.
    xr = relu(_dot(m2_ref[...], a1) + b2_ref[...])          # (400, N) rows (pix,c)

    # decoder convT3 (16->8, k4 s4, 5x5 -> 20x20): stride == kernel, so bias +
    # ReLU per contribution is exact.  Per-pixel matmuls use only 16-aligned
    # sublane slices and static leading-index stores.
    w3 = w3_ref[...]                                        # (128, 16)
    b3 = b3_ref[...]                                        # (128, 1)
    for k in range(25):
        xk = xr[k * 16:(k + 1) * 16, :]                     # (16, N)
        y3_ref[k] = relu(_dot(w3, xk) + b3).astype(y3_ref.dtype)


def mid_fused(q, p4s, n):
    args = (p4s, q["e4_wbd"], q["e4_bc"], q["e5_w"], q["e5_b"],
            q["fce1_w"], q["fce1_b"], q["fce2_w"], q["fce2_b"],
            q["fcd1_w"], q["fcd1_b"], q["fcd2_w"], q["fcd2_b"],
            q["d1_w"], q["d1_b"], q["d2_m"], q["d2_b"], q["d3_w"], q["d3_b"])
    return pl.pallas_call(
        _mid_kernel,
        out_shape=(jax.ShapeDtypeStruct((2, n), jnp.float32),
                   jax.ShapeDtypeStruct((25, 128, n), jnp.bfloat16)),
        in_specs=[_VMEM] * len(args),
        out_specs=(_VMEM, _VMEM),
        compiler_params=pltpu.CompilerParams(vmem_limit_bytes=_VMEM_LIMIT),
    )(*args)


# ----------------------------------------------------------------------------
# Pure-layout XLA glue (index plumbing only — no compute)
# ----------------------------------------------------------------------------
def _im2col(x, kh, kw, stride):
    """x: (C, N, H, W) -> (kh*kw*C, N*Ho*Wo); rows ordered (i, j, cin)."""
    c, n, h, w = x.shape
    ho = (h - kh) // stride + 1
    wo = (w - kw) // stride + 1
    cols = []
    for i in range(kh):
        for j in range(kw):
            cols.append(x[:, :, i:i + (ho - 1) * stride + 1:stride,
                          j:j + (wo - 1) * stride + 1:stride])
    p = jnp.stack(cols, axis=0)                     # (kh*kw, C, N, Ho, Wo)
    return p.reshape(kh * kw * c, n * ho * wo)


def _interleave(y, kh, kw, cout, n, h, w):
    """Inverse of the no-overlap convT matmul: (kh*kw*Cout, N*H*W) with rows
    (i, j, c) and cols (n, h, w) -> (Cout, N, H*kh, W*kw) (stride == kernel)."""
    yr = y.reshape(kh, kw, cout, n, h, w)
    out = jnp.transpose(yr, (2, 3, 4, 0, 5, 1))     # (c, n, h, i, w, j)
    return out.reshape(cout, n, h * kh, w * kw)


# ----------------------------------------------------------------------------
# Deterministic parameter init (PyTorch layouts) + one-time packing
# ----------------------------------------------------------------------------
def init_params(key):
    keys = iter(jax.random.split(key, 64))

    def conv_w(cout, cin, k, gain):
        fan_in, fan_out = cin * k * k, cout * k * k
        a = gain * math.sqrt(6.0 / (fan_in + fan_out))      # xavier_uniform
        return jax.random.uniform(next(keys), (cout, cin, k, k), jnp.float32, -a, a)

    def conv_b(cout, cin, k):
        bound = 1.0 / math.sqrt(cin * k * k)
        return jax.random.uniform(next(keys), (cout,), jnp.float32, -bound, bound)

    def convT_w(cin, cout, k):
        bound = 1.0 / math.sqrt(cout * k * k)
        return jax.random.uniform(next(keys), (cin, cout, k, k), jnp.float32, -bound, bound)

    def convT_b(cin, cout, k):
        bound = 1.0 / math.sqrt(cout * k * k)
        return jax.random.uniform(next(keys), (cout,), jnp.float32, -bound, bound)

    def lin_w(din, dout):
        std = math.sqrt(2.0 / (din + dout))                 # xavier_normal
        return std * jax.random.normal(next(keys), (din, dout), jnp.float32)

    g_lrelu = math.sqrt(2.0 / (1.0 + 0.01 ** 2))
    p = {}
    enc = [(4, 1, 2), (8, 4, 2), (16, 8, 4), (32, 16, 3), (64, 32, 2)]
    for idx, (co, ci, k) in enumerate(enc, 1):
        p[f"e{idx}_w"] = conv_w(co, ci, k, g_lrelu)
        p[f"e{idx}_b"] = conv_b(co, ci, k)
    p["fce1_w"], p["fce1_b"] = lin_w(64, 16), jnp.zeros((16,), jnp.float32)
    p["fce2_w"], p["fce2_b"] = lin_w(16, 2), jnp.zeros((2,), jnp.float32)
    p["fcd1_w"], p["fcd1_b"] = lin_w(2, 16), jnp.zeros((16,), jnp.float32)
    p["fcd2_w"], p["fcd2_b"] = lin_w(16, 64), jnp.zeros((64,), jnp.float32)
    dec = [(64, 32, 2), (32, 16, 3), (16, 8, 4), (8, 4, 2), (4, 1, 2)]
    for idx, (ci, co, k) in enumerate(dec, 1):
        p[f"d{idx}_w"] = convT_w(ci, co, k)
        p[f"d{idx}_b"] = convT_b(ci, co, k)
    return p


def pack_params(p):
    """Pre-pack everything into kernel matmul layout — done ONCE at init."""
    q = {}
    bf16 = jnp.bfloat16
    f32 = jnp.float32

    # encoder convs 1..3: (Cout, kh*kw*Cin) bf16, cols ordered (i, j, cin)
    for idx in (1, 2, 3):
        w = p[f"e{idx}_w"]                                  # (Cout, Cin, k, k)
        co, ci, k, _ = w.shape
        q[f"e{idx}_w"] = jnp.transpose(w, (0, 2, 3, 1)).reshape(co, k * k * ci).astype(bf16)
        q[f"e{idx}_b"] = p[f"e{idx}_b"].reshape(co, 1).astype(f32)

    # encoder conv4: block-diagonal over the 4 output pixels -> ONE matmul
    w4 = jnp.transpose(p["e4_w"], (0, 2, 3, 1)).reshape(32, 144)    # cols (i,j,ci)
    w4bd = jnp.zeros((128, 576), f32)
    for qq in range(4):
        w4bd = w4bd.at[qq * 32:(qq + 1) * 32, qq * 144:(qq + 1) * 144].set(w4)
    q["e4_wbd"] = w4bd
    q["e4_bc"] = jnp.tile(p["e4_b"], 4).reshape(128, 1)

    # encoder conv5: (64, 128), cols ordered (q = i*2+j, cin)
    q["e5_w"] = jnp.transpose(p["e5_w"], (0, 2, 3, 1)).reshape(64, 128)
    q["e5_b"] = p["e5_b"].reshape(64, 1)

    # fc layers: (dout, din)
    for nm in ("fce1", "fce2", "fcd1", "fcd2"):
        q[nm + "_w"] = p[nm + "_w"].T
        q[nm + "_b"] = p[nm + "_b"].reshape(-1, 1)

    # decoder convT1: stacked per output position -> (128, 64), rows (p, cout)
    q["d1_w"] = jnp.transpose(p["d1_w"], (2, 3, 1, 0)).reshape(128, 64)
    q["d1_b"] = jnp.tile(p["d1_b"], 4).reshape(128, 1)

    # decoder convT2 (k3 s2, 2x2 -> 5x5): dense operator with the overlap-add
    # folded in:  X2[(oh*5+ow)*16+co, n] = sum M2 @ A1,  bias applied after.
    w2 = p["d2_w"]                                          # (32, 16, 3, 3)
    m2 = jnp.zeros((400, 128), f32)
    for ih in range(2):
        for iw in range(2):
            pp = ih * 2 + iw
            for i in range(3):
                for j in range(3):
                    oh, ow = 2 * ih + i, 2 * iw + j
                    r = (oh * 5 + ow) * 16
                    c = pp * 32
                    m2 = m2.at[r:r + 16, c:c + 32].add(w2[:, :, i, j].T)
    q["d2_m"] = m2
    q["d2_b"] = jnp.tile(p["d2_b"], 25).reshape(400, 1)

    # decoder convT3: (128, 16), rows (i, j, cout); bias tiled per (i, j)
    q["d3_w"] = jnp.transpose(p["d3_w"], (2, 3, 1, 0)).reshape(128, 16)
    q["d3_b"] = jnp.tile(p["d3_b"], 16).reshape(128, 1)

    # decoder convT4/5 (stride == kernel): (k*k*Cout, Cin) bf16, bias tiled
    for idx, (ci, co, k) in ((4, (8, 4, 2)), (5, (4, 1, 2))):
        w = p[f"d{idx}_w"]                                  # (Cin, Cout, k, k)
        q[f"d{idx}_w"] = jnp.transpose(w, (2, 3, 1, 0)).reshape(k * k * co, ci).astype(bf16)
        q[f"d{idx}_b"] = jnp.tile(p[f"d{idx}_b"], k * k).reshape(k * k * co, 1).astype(f32)
    return q


# ----------------------------------------------------------------------------
# Full forward pass (matches VanillaAutoEncoder.forward)
# ----------------------------------------------------------------------------
def autoencoder_forward(q, x_nchw):
    n = x_nchw.shape[0]
    x0 = jnp.transpose(x_nchw.astype(jnp.bfloat16), (1, 0, 2, 3))    # (1, N, 80, 80)

    # --- encoder convs 1..3 (gridded, bias + LeakyReLU fused, bf16 out) ---
    a1 = conv_mm(q["e1_w"], q["e1_b"], _im2col(x0, 2, 2, 2), "leaky_relu")
    a2 = conv_mm(q["e2_w"], q["e2_b"],
                 _im2col(a1.reshape(4, n, 40, 40), 2, 2, 2), "leaky_relu")
    a3 = conv_mm(q["e3_w"], q["e3_b"],
                 _im2col(a2.reshape(8, n, 20, 20), 4, 4, 4), "leaky_relu")

    # --- fused middle: enc4+enc5+fc_enc+fc_dec+decT1+decT2(+overlap)+decT3 ---
    p4 = _im2col(a3.reshape(16, n, 5, 5), 3, 3, 2)           # (144, N*4) cols (n,q)
    p4s = jnp.transpose(p4.reshape(144, n, 4), (2, 0, 1)).reshape(576, n)
    h, y3 = mid_fused(q, p4s, n)                             # (2,N), (25,128,N)

    # --- decT3 interleave (pure layout): (25,128,N) -> (8, N*400) ---
    x3 = jnp.transpose(y3.reshape(5, 5, 4, 4, 8, n),
                       (4, 5, 0, 2, 1, 3)).reshape(8, n * 400)

    # --- decoder convT4/5 (gridded; stride == kernel: bias + act fused) ---
    y4 = conv_mm(q["d4_w"], q["d4_b"], x3, "relu")           # (16, N*400)
    x4 = _interleave(y4, 2, 2, 4, n, 20, 20).reshape(4, n * 1600)
    y5 = conv_mm(q["d5_w"], q["d5_b"], x4, "sigmoid")        # (4, N*1600)
    out = _interleave(y5, 2, 2, 1, n, 40, 40)                # (1, N, 80, 80)
    out = jnp.transpose(out, (1, 0, 2, 3)).astype(jnp.float32)
    return out, h.T.astype(jnp.float32)                      # (N,1,80,80), (N,2)


if __name__ == "__main__":
    key = jax.random.PRNGKey(0)
    pkey, xkey = jax.random.split(key)
    params = pack_params(init_params(pkey))          # weight packing done once
    # Encoder geometry requires 80x80 single-channel input (-> 1x1x64 bottleneck).
    x = jax.random.uniform(xkey, (2, 1, 80, 80), jnp.float32)
    fwd = jax.jit(autoencoder_forward)
    recon, latent = fwd(params, x)
    jax.block_until_ready((recon, latent))
    assert recon.shape == (2, 1, 80, 80), recon.shape
    assert latent.shape == (2, 2), latent.shape
    assert bool(jnp.all(jnp.isfinite(recon))) and bool(jnp.all(jnp.isfinite(latent)))
    print("KERNEL_OK")
</pallas_src>

<mosaic_0001>
module attributes {stable_mosaic.version = 11 : i64} {
  func.func @_conv_kernel(%arg0: i32, %arg1: memref<4x4xbf16, #tpu.memory_space<vmem>>, %arg2: memref<4x1xf32, #tpu.memory_space<vmem>>, %arg3: memref<4x3200xbf16, #tpu.memory_space<vmem>>, %arg4: memref<4x3200xbf16, #tpu.memory_space<vmem>>) attributes {dimension_semantics = [#tpu.dimension_semantics<parallel>], iteration_bounds = array<i64: 1>, scalar_prefetch = 0 : i64, scratch_operands = 0 : i64, tpu.core_type = #tpu.core_type<tc>, window_params = [{pipeline_mode = #tpu.pipeline_mode<synchronous>, transform_indices = @transform_0, window_bounds = array<i64: 4, 4>}, {pipeline_mode = #tpu.pipeline_mode<synchronous>, transform_indices = @transform_1, window_bounds = array<i64: 4, 1>}, {transform_indices = @transform_2, window_bounds = array<i64: 4, 3200>}, {transform_indices = @transform_3, window_bounds = array<i64: 4, 3200>}]} {
    %c0 = arith.constant 0 : index
    %c0_0 = arith.constant 0 : index
    %0 = vector.load %arg1[%c0, %c0_0] : memref<4x4xbf16, #tpu.memory_space<vmem>>, vector<4x4xbf16>
    %c0_1 = arith.constant 0 : index
    %c0_2 = arith.constant 0 : index
    %1 = vector.load %arg3[%c0_1, %c0_2] : memref<4x3200xbf16, #tpu.memory_space<vmem>>, vector<4x3200xbf16>
    %cst = arith.constant dense<0.000000e+00> : vector<4x3200xf32>
    %2 = tpu.matmul %0, %1, %cst {dimension_numbers = #tpu.dot_dimension_numbers<[1], [0], [0], [1], [0, 0, 1, 1], [], []>} : vector<4x4xbf16>, vector<4x3200xbf16>, vector<4x3200xf32> -> vector<4x3200xf32>
    %c0_3 = arith.constant 0 : index
    %c0_4 = arith.constant 0 : index
    %3 = vector.load %arg2[%c0_3, %c0_4] : memref<4x1xf32, #tpu.memory_space<vmem>>, vector<4x1xf32>
    %4 = vector.broadcast %3 : vector<4x1xf32> to vector<4x3200xf32>
    %5 = arith.addf %2, %4 : vector<4x3200xf32>
    %cst_5 = arith.constant 0.000000e+00 : f32
    %6 = vector.broadcast %cst_5 : f32 to vector<4x3200xf32>
    %7 = arith.cmpf ogt, %5, %6 : vector<4x3200xf32>
    %cst_6 = arith.constant 0.00999999977 : f32
    %8 = vector.broadcast %cst_6 : f32 to vector<4x3200xf32>
    %9 = arith.mulf %8, %5 : vector<4x3200xf32>
    %10 = arith.select %7, %5, %9 : vector<4x3200xi1>, vector<4x3200xf32>
    %11 = arith.truncf %10 : vector<4x3200xf32> to vector<4x3200xbf16>
    %c0_7 = arith.constant 0 : index
    %c0_8 = arith.constant 0 : index
    %12 = vector.load %arg4[%c0_7, %c0_8] : memref<4x3200xbf16, #tpu.memory_space<vmem>>, vector<4x3200xbf16>
    tpu.vector_store %arg4[%c0_7, %c0_8], %11 {strides = array<i32>} : memref<4x3200xbf16, #tpu.memory_space<vmem>>, vector<4x3200xbf16>,
    return
  }
  func.func @transform_0(%arg0: i32) -> (i32, i32) {
    %c0_i32 = arith.constant 0 : i32
    %c0_i32_0 = arith.constant 0 : i32
    %c0_i32_1 = arith.constant 0 : i32
    return %c0_i32, %c0_i32_0 : i32, i32
  }
  func.func @transform_1(%arg0: i32) -> (i32, i32) {
    %c0_i32 = arith.constant 0 : i32
    %c0_i32_0 = arith.constant 0 : i32
    %c0_i32_1 = arith.constant 0 : i32
    return %c0_i32, %c0_i32_0 : i32, i32
  }
  func.func @transform_2(%arg0: i32) -> (i32, i32) {
    %c0_i32 = arith.constant 0 : i32
    %c0_i32_0 = arith.constant 0 : i32
    return %c0_i32, %arg0 : i32, i32
  }
  func.func @transform_3(%arg0: i32) -> (i32, i32) {
    %c0_i32 = arith.constant 0 : i32
    %c0_i32_0 = arith.constant 0 : i32
    return %c0_i32, %arg0 : i32, i32
  }
}

module attributes {stable_mosaic.version = 11 : i64} {
  func.func @_conv_kernel(%arg0: i32, %arg1: memref<8x16xbf16, #tpu.memory_space<vmem>>, %arg2: memref<8x1xf32, #tpu.memory_space<vmem>>, %arg3: memref<16x800xbf16, #tpu.memory_space<vmem>>, %arg4: memref<8x800xbf16, #tpu.memory_space<vmem>>) attributes {dimension_semantics = [#tpu.dimension_semantics<parallel>], iteration_bounds = array<i64: 1>, scalar_prefetch = 0 : i64, scratch_operands = 0 : i64, tpu.core_type = #tpu.core_type<tc>, window_params = [{pipeline_mode = #tpu.pipeline_mode<synchronous>, transform_indices = @transform_0, window_bounds = array<i64: 8, 16>}, {pipeline_mode = #tpu.pipeline_mode<synchronous>, transform_indices = @transform_1, window_bounds = array<i64: 8, 1>}, {transform_indices = @transform_2, window_bounds = array<i64: 16, 800>}, {transform_indices = @transform_3, window_bounds = array<i64: 8, 800>}]} {
    %c0 = arith.constant 0 : index
    %c0_0 = arith.constant 0 : index
    %0 = vector.load %arg1[%c0, %c0_0] : memref<8x16xbf16, #tpu.memory_space<vmem>>, vector<8x16xbf16>
    %c0_1 = arith.constant 0 : index
    %c0_2 = arith.constant 0 : index
    %1 = vector.load %arg3[%c0_1, %c0_2] : memref<16x800xbf16, #tpu.memory_space<vmem>>, vector<16x800xbf16>
    %cst = arith.constant dense<0.000000e+00> : vector<8x800xf32>
    %2 = tpu.matmul %0, %1, %cst {dimension_numbers = #tpu.dot_dimension_numbers<[1], [0], [0], [1], [0, 0, 1, 1], [], []>} : vector<8x16xbf16>, vector<16x800xbf16>, vector<8x800xf32> -> vector<8x800xf32>
    %c0_3 = arith.constant 0 : index
    %c0_4 = arith.constant 0 : index
    %3 = vector.load %arg2[%c0_3, %c0_4] : memref<8x1xf32, #tpu.memory_space<vmem>>, vector<8x1xf32>
    %4 = vector.broadcast %3 : vector<8x1xf32> to vector<8x800xf32>
    %5 = arith.addf %2, %4 : vector<8x800xf32>
    %cst_5 = arith.constant 0.000000e+00 : f32
    %6 = vector.broadcast %cst_5 : f32 to vector<8x800xf32>
    %7 = arith.cmpf ogt, %5, %6 : vector<8x800xf32>
    %cst_6 = arith.constant 0.00999999977 : f32
    %8 = vector.broadcast %cst_6 : f32 to vector<8x800xf32>
    %9 = arith.mulf %8, %5 : vector<8x800xf32>
    %10 = arith.select %7, %5, %9 : vector<8x800xi1>, vector<8x800xf32>
    %11 = arith.truncf %10 : vector<8x800xf32> to vector<8x800xbf16>
    %c0_7 = arith.constant 0 : index
    %c0_8 = arith.constant 0 : index
    %12 = vector.load %arg4[%c0_7, %c0_8] : memref<8x800xbf16, #tpu.memory_space<vmem>>, vector<8x800xbf16>
    tpu.vector_store %arg4[%c0_7, %c0_8], %11 {strides = array<i32>} : memref<8x800xbf16, #tpu.memory_space<vmem>>, vector<8x800xbf16>,
    return
  }
  func.func @transform_0(%arg0: i32) -> (i32, i32) {
    %c0_i32 = arith.constant 0 : i32
    %c0_i32_0 = arith.constant 0 : i32
    %c0_i32_1 = arith.constant 0 : i32
    return %c0_i32, %c0_i32_0 : i32, i32
  }
  func.func @transform_1(%arg0: i32) -> (i32, i32) {
    %c0_i32 = arith.constant 0 : i32
    %c0_i32_0 = arith.constant 0 : i32
    %c0_i32_1 = arith.constant 0 : i32
    return %c0_i32, %c0_i32_0 : i32, i32
  }
  func.func @transform_2(%arg0: i32) -> (i32, i32) {
    %c0_i32 = arith.constant 0 : i32
    %c0_i32_0 = arith.constant 0 : i32
    return %c0_i32, %arg0 : i32, i32
  }
  func.func @transform_3(%arg0: i32) -> (i32, i32) {
    %c0_i32 = arith.constant 0 : i32
    %c0_i32_0 = arith.constant 0 : i32
    return %c0_i32, %arg0 : i32, i32
  }
}

module attributes {stable_mosaic.version = 11 : i64} {
  func.func @_conv_kernel(%arg0: i32, %arg1: memref<16x128xbf16, #tpu.memory_space<vmem>>, %arg2: memref<16x1xf32, #tpu.memory_space<vmem>>, %arg3: memref<128x50xbf16, #tpu.memory_space<vmem>>, %arg4: memref<16x50xbf16, #tpu.memory_space<vmem>>) attributes {dimension_semantics = [#tpu.dimension_semantics<parallel>], iteration_bounds = array<i64: 1>, scalar_prefetch = 0 : i64, scratch_operands = 0 : i64, tpu.core_type = #tpu.core_type<tc>, window_params = [{pipeline_mode = #tpu.pipeline_mode<synchronous>, transform_indices = @transform_0, window_bounds = array<i64: 16, 128>}, {pipeline_mode = #tpu.pipeline_mode<synchronous>, transform_indices = @transform_1, window_bounds = array<i64: 16, 1>}, {transform_indices = @transform_2, window_bounds = array<i64: 128, 50>}, {transform_indices = @transform_3, window_bounds = array<i64: 16, 50>}]} {
    %c0 = arith.constant 0 : index
    %c0_0 = arith.constant 0 : index
    %0 = vector.load %arg1[%c0, %c0_0] : memref<16x128xbf16, #tpu.memory_space<vmem>>, vector<16x128xbf16>
    %c0_1 = arith.constant 0 : index
    %c0_2 = arith.constant 0 : index
    %1 = vector.load %arg3[%c0_1, %c0_2] : memref<128x50xbf16, #tpu.memory_space<vmem>>, vector<128x50xbf16>
    %cst = arith.constant dense<0.000000e+00> : vector<16x50xf32>
    %2 = tpu.matmul %0, %1, %cst {dimension_numbers = #tpu.dot_dimension_numbers<[1], [0], [0], [1], [0, 0, 1, 1], [], []>} : vector<16x128xbf16>, vector<128x50xbf16>, vector<16x50xf32> -> vector<16x50xf32>
    %c0_3 = arith.constant 0 : index
    %c0_4 = arith.constant 0 : index
    %3 = vector.load %arg2[%c0_3, %c0_4] : memref<16x1xf32, #tpu.memory_space<vmem>>, vector<16x1xf32>
    %4 = vector.broadcast %3 : vector<16x1xf32> to vector<16x50xf32>
    %5 = arith.addf %2, %4 : vector<16x50xf32>
    %cst_5 = arith.constant 0.000000e+00 : f32
    %6 = vector.broadcast %cst_5 : f32 to vector<16x50xf32>
    %7 = arith.cmpf ogt, %5, %6 : vector<16x50xf32>
    %cst_6 = arith.constant 0.00999999977 : f32
    %8 = vector.broadcast %cst_6 : f32 to vector<16x50xf32>
    %9 = arith.mulf %8, %5 : vector<16x50xf32>
    %10 = arith.select %7, %5, %9 : vector<16x50xi1>, vector<16x50xf32>
    %11 = arith.truncf %10 : vector<16x50xf32> to vector<16x50xbf16>
    %c0_7 = arith.constant 0 : index
    %c0_8 = arith.constant 0 : index
    %12 = vector.load %arg4[%c0_7, %c0_8] : memref<16x50xbf16, #tpu.memory_space<vmem>>, vector<16x50xbf16>
    tpu.vector_store %arg4[%c0_7, %c0_8], %11 {strides = array<i32>} : memref<16x50xbf16, #tpu.memory_space<vmem>>, vector<16x50xbf16>,
    return
  }
  func.func @transform_0(%arg0: i32) -> (i32, i32) {
    %c0_i32 = arith.constant 0 : i32
    %c0_i32_0 = arith.constant 0 : i32
    %c0_i32_1 = arith.constant 0 : i32
    return %c0_i32, %c0_i32_0 : i32, i32
  }
  func.func @transform_1(%arg0: i32) -> (i32, i32) {
    %c0_i32 = arith.constant 0 : i32
    %c0_i32_0 = arith.constant 0 : i32
    %c0_i32_1 = arith.constant 0 : i32
    return %c0_i32, %c0_i32_0 : i32, i32
  }
  func.func @transform_2(%arg0: i32) -> (i32, i32) {
    %c0_i32 = arith.constant 0 : i32
    %c0_i32_0 = arith.constant 0 : i32
    return %c0_i32, %arg0 : i32, i32
  }
  func.func @transform_3(%arg0: i32) -> (i32, i32) {
    %c0_i32 = arith.constant 0 : i32
    %c0_i32_0 = arith.constant 0 : i32
    return %c0_i32, %arg0 : i32, i32
  }
}

module attributes {stable_mosaic.version = 11 : i64} {
  func.func @_mid_kernel(%arg0: memref<576x2xbf16, #tpu.memory_space<vmem>>, %arg1: memref<128x576xf32, #tpu.memory_space<vmem>>, %arg2: memref<128x1xf32, #tpu.memory_space<vmem>>, %arg3: memref<64x128xf32, #tpu.memory_space<vmem>>, %arg4: memref<64x1xf32, #tpu.memory_space<vmem>>, %arg5: memref<16x64xf32, #tpu.memory_space<vmem>>, %arg6: memref<16x1xf32, #tpu.memory_space<vmem>>, %arg7: memref<2x16xf32, #tpu.memory_space<vmem>>, %arg8: memref<2x1xf32, #tpu.memory_space<vmem>>, %arg9: memref<16x2xf32, #tpu.memory_space<vmem>>, %arg10: memref<16x1xf32, #tpu.memory_space<vmem>>, %arg11: memref<64x16xf32, #tpu.memory_space<vmem>>, %arg12: memref<64x1xf32, #tpu.memory_space<vmem>>, %arg13: memref<128x64xf32, #tpu.memory_space<vmem>>, %arg14: memref<128x1xf32, #tpu.memory_space<vmem>>, %arg15: memref<400x128xf32, #tpu.memory_space<vmem>>, %arg16: memref<400x1xf32, #tpu.memory_space<vmem>>, %arg17: memref<128x16xf32, #tpu.memory_space<vmem>>, %arg18: memref<128x1xf32, #tpu.memory_space<vmem>>, %arg19: memref<2x2xf32, #tpu.memory_space<vmem>>, %arg20: memref<25x128x2xbf16, #tpu.memory_space<vmem>>) attributes {dimension_semantics = [], scalar_prefetch = 0 : i64, scratch_operands = 0 : i64, tpu.core_type = #tpu.core_type<tc>} {
    %c0 = arith.constant 0 : index
    %c0_0 = arith.constant 0 : index
    %0 = vector.load %arg0[%c0, %c0_0] : memref<576x2xbf16, #tpu.memory_space<vmem>>, vector<576x2xbf16>
    %1 = arith.extf %0 : vector<576x2xbf16> to vector<576x2xf32>
    %c0_1 = arith.constant 0 : index
    %c0_2 = arith.constant 0 : index
    %2 = vector.load %arg1[%c0_1, %c0_2] : memref<128x576xf32, #tpu.memory_space<vmem>>, vector<128x576xf32>
    %cst = arith.constant dense<0.000000e+00> : vector<128x2xf32>
    %3 = tpu.matmul %2, %1, %cst {dimension_numbers = #tpu.dot_dimension_numbers<[1], [0], [0], [1], [0, 0, 1, 1], [], []>} : vector<128x576xf32>, vector<576x2xf32>, vector<128x2xf32> -> vector<128x2xf32>
    %c0_3 = arith.constant 0 : index
    %c0_4 = arith.constant 0 : index
    %4 = vector.load %arg2[%c0_3, %c0_4] : memref<128x1xf32, #tpu.memory_space<vmem>>, vector<128x1xf32>
    %5 = vector.broadcast %4 : vector<128x1xf32> to vector<128x2xf32>
    %6 = arith.addf %3, %5 : vector<128x2xf32>
    %cst_5 = arith.constant 0.000000e+00 : f32
    %7 = vector.broadcast %cst_5 : f32 to vector<128x2xf32>
    %8 = arith.cmpf ogt, %6, %7 : vector<128x2xf32>
    %cst_6 = arith.constant 0.00999999977 : f32
    %9 = vector.broadcast %cst_6 : f32 to vector<128x2xf32>
    %10 = arith.mulf %9, %6 : vector<128x2xf32>
    %11 = arith.select %8, %6, %10 : vector<128x2xi1>, vector<128x2xf32>
    %c0_7 = arith.constant 0 : index
    %c0_8 = arith.constant 0 : index
    %12 = vector.load %arg3[%c0_7, %c0_8] : memref<64x128xf32, #tpu.memory_space<vmem>>, vector<64x128xf32>
    %cst_9 = arith.constant dense<0.000000e+00> : vector<64x2xf32>
    %13 = tpu.matmul %12, %11, %cst_9 {dimension_numbers = #tpu.dot_dimension_numbers<[1], [0], [0], [1], [0, 0, 1, 1], [], []>} : vector<64x128xf32>, vector<128x2xf32>, vector<64x2xf32> -> vector<64x2xf32>
    %c0_10 = arith.constant 0 : index
    %c0_11 = arith.constant 0 : index
    %14 = vector.load %arg4[%c0_10, %c0_11] : memref<64x1xf32, #tpu.memory_space<vmem>>, vector<64x1xf32>
    %15 = vector.broadcast %14 : vector<64x1xf32> to vector<64x2xf32>
    %16 = arith.addf %13, %15 : vector<64x2xf32>
    %c0_12 = arith.constant 0 : index
    %c0_13 = arith.constant 0 : index
    %17 = vector.load %arg5[%c0_12, %c0_13] : memref<16x64xf32, #tpu.memory_space<vmem>>, vector<16x64xf32>
    %cst_14 = arith.constant dense<0.000000e+00> : vector<16x2xf32>
    %18 = tpu.matmul %17, %16, %cst_14 {dimension_numbers = #tpu.dot_dimension_numbers<[1], [0], [0], [1], [0, 0, 1, 1], [], []>} : vector<16x64xf32>, vector<64x2xf32>, vector<16x2xf32> -> vector<16x2xf32>
    %c0_15 = arith.constant 0 : index
    %c0_16 = arith.constant 0 : index
    %19 = vector.load %arg6[%c0_15, %c0_16] : memref<16x1xf32, #tpu.memory_space<vmem>>, vector<16x1xf32>
    %20 = vector.broadcast %19 : vector<16x1xf32> to vector<16x2xf32>
    %21 = arith.addf %18, %20 : vector<16x2xf32>
    %cst_17 = arith.constant 0.000000e+00 : f32
    %22 = vector.broadcast %cst_17 : f32 to vector<16x2xf32>
    %23 = arith.maximumf %21, %22 : vector<16x2xf32>
    %c0_18 = arith.constant 0 : index
    %c0_19 = arith.constant 0 : index
    %24 = vector.load %arg7[%c0_18, %c0_19] : memref<2x16xf32, #tpu.memory_space<vmem>>, vector<2x16xf32>
    %cst_20 = arith.constant dense<0.000000e+00> : vector<2x2xf32>
    %25 = tpu.matmul %24, %23, %cst_20 {dimension_numbers = #tpu.dot_dimension_numbers<[1], [0], [0], [1], [0, 0, 1, 1], [], []>} : vector<2x16xf32>, vector<16x2xf32>, vector<2x2xf32> -> vector<2x2xf32>
    %c0_21 = arith.constant 0 : index
    %c0_22 = arith.constant 0 : index
    %26 = vector.load %arg8[%c0_21, %c0_22] : memref<2x1xf32, #tpu.memory_space<vmem>>, vector<2x1xf32>
    %27 = vector.broadcast %26 : vector<2x1xf32> to vector<2x2xf32>
    %28 = arith.addf %25, %27 : vector<2x2xf32>
    %c0_23 = arith.constant 0 : index
    %c0_24 = arith.constant 0 : index
    %29 = vector.load %arg19[%c0_23, %c0_24] : memref<2x2xf32, #tpu.memory_space<vmem>>, vector<2x2xf32>
    tpu.vector_store %arg19[%c0_23, %c0_24], %28 {strides = array<i32>} : memref<2x2xf32, #tpu.memory_space<vmem>>, vector<2x2xf32>,
    %c0_25 = arith.constant 0 : index
    %c0_26 = arith.constant 0 : index
    %30 = vector.load %arg9[%c0_25, %c0_26] : memref<16x2xf32, #tpu.memory_space<vmem>>, vector<16x2xf32>
    %cst_27 = arith.constant dense<0.000000e+00> : vector<16x2xf32>
    %31 = tpu.matmul %30, %28, %cst_27 {dimension_numbers = #tpu.dot_dimension_numbers<[1], [0], [0], [1], [0, 0, 1, 1], [], []>} : vector<16x2xf32>, vector<2x2xf32>, vector<16x2xf32> -> vector<16x2xf32>
    %c0_28 = arith.constant 0 : index
    %c0_29 = arith.constant 0 : index
    %32 = vector.load %arg10[%c0_28, %c0_29] : memref<16x1xf32, #tpu.memory_space<vmem>>, vector<16x1xf32>
    %33 = vector.broadcast %32 : vector<16x1xf32> to vector<16x2xf32>
    %34 = arith.addf %31, %33 : vector<16x2xf32>
    %cst_30 = arith.constant 0.000000e+00 : f32
    %35 = vector.broadcast %cst_30 : f32 to vector<16x2xf32>
    %36 = arith.maximumf %34, %35 : vector<16x2xf32>
    %c0_31 = arith.constant 0 : index
    %c0_32 = arith.constant 0 : index
    %37 = vector.load %arg11[%c0_31, %c0_32] : memref<64x16xf32, #tpu.memory_space<vmem>>, vector<64x16xf32>
    %cst_33 = arith.constant dense<0.000000e+00> : vector<64x2xf32>
    %38 = tpu.matmul %37, %36, %cst_33 {dimension_numbers = #tpu.dot_dimension_numbers<[1], [0], [0], [1], [0, 0, 1, 1], [], []>} : vector<64x16xf32>, vector<16x2xf32>, vector<64x2xf32> -> vector<64x2xf32>
    %c0_34 = arith.constant 0 : index
    %c0_35 = arith.constant 0 : index
    %39 = vector.load %arg12[%c0_34, %c0_35] : memref<64x1xf32, #tpu.memory_space<vmem>>, vector<64x1xf32>
    %40 = vector.broadcast %39 : vector<64x1xf32> to vector<64x2xf32>
    %41 = arith.addf %38, %40 : vector<64x2xf32>
    %cst_36 = arith.constant 0.000000e+00 : f32
    %42 = vector.broadcast %cst_36 : f32 to vector<64x2xf32>
    %43 = arith.maximumf %41, %42 : vector<64x2xf32>
    %c0_37 = arith.constant 0 : index
    %c0_38 = arith.constant 0 : index
    %44 = vector.load %arg13[%c0_37, %c0_38] : memref<128x64xf32, #tpu.memory_space<vmem>>, vector<128x64xf32>
    %cst_39 = arith.constant dense<0.000000e+00> : vector<128x2xf32>
    %45 = tpu.matmul %44, %43, %cst_39 {dimension_numbers = #tpu.dot_dimension_numbers<[1], [0], [0], [1], [0, 0, 1, 1], [], []>} : vector<128x64xf32>, vector<64x2xf32>, vector<128x2xf32> -> vector<128x2xf32>
    %c0_40 = arith.constant 0 : index
    %c0_41 = arith.constant 0 : index
    %46 = vector.load %arg14[%c0_40, %c0_41] : memref<128x1xf32, #tpu.memory_space<vmem>>, vector<128x1xf32>
    %47 = vector.broadcast %46 : vector<128x1xf32> to vector<128x2xf32>
    %48 = arith.addf %45, %47 : vector<128x2xf32>
    %cst_42 = arith.constant 0.000000e+00 : f32
    %49 = vector.broadcast %cst_42 : f32 to vector<128x2xf32>
    %50 = arith.maximumf %48, %49 : vector<128x2xf32>
    %c0_43 = arith.constant 0 : index
    %c0_44 = arith.constant 0 : index
    %51 = vector.load %arg15[%c0_43, %c0_44] : memref<400x128xf32, #tpu.memory_space<vmem>>, vector<400x128xf32>
    %cst_45 = arith.constant dense<0.000000e+00> : vector<400x2xf32>
    %52 = tpu.matmul %51, %50, %cst_45 {dimension_numbers = #tpu.dot_dimension_numbers<[1], [0], [0], [1], [0, 0, 1, 1], [], []>} : vector<400x128xf32>, vector<128x2xf32>, vector<400x2xf32> -> vector<400x2xf32>
    %c0_46 = arith.constant 0 : index
    %c0_47 = arith.constant 0 : index
    %53 = vector.load %arg16[%c0_46, %c0_47] : memref<400x1xf32, #tpu.memory_space<vmem>>, vector<400x1xf32>
    %54 = vector.broadcast %53 : vector<400x1xf32> to vector<400x2xf32>
    %55 = arith.addf %52, %54 : vector<400x2xf32>
    %cst_48 = arith.constant 0.000000e+00 : f32
    %56 = vector.broadcast %cst_48 : f32 to vector<400x2xf32>
    %57 = arith.maximumf %55, %56 : vector<400x2xf32>
    %c0_49 = arith.constant 0 : index
    %c0_50 = arith.constant 0 : index
    %58 = vector.load %arg17[%c0_49, %c0_50] : memref<128x16xf32, #tpu.memory_space<vmem>>, vector<128x16xf32>
    %c0_51 = arith.constant 0 : index
    %c0_52 = arith.constant 0 : index
    %59 = vector.load %arg18[%c0_51, %c0_52] : memref<128x1xf32, #tpu.memory_space<vmem>>, vector<128x1xf32>
    %60 = vector.extract_strided_slice %57 {offsets = [0, 0], sizes = [16, 2], strides = [1, 1]} : vector<400x2xf32> to vector<16x2xf32>
    %cst_53 = arith.constant dense<0.000000e+00> : vector<128x2xf32>
    %61 = tpu.matmul %58, %60, %cst_53 {dimension_numbers = #tpu.dot_dimension_numbers<[1], [0], [0], [1], [0, 0, 1, 1], [], []>} : vector<128x16xf32>, vector<16x2xf32>, vector<128x2xf32> -> vector<128x2xf32>
    %62 = vector.broadcast %59 : vector<128x1xf32> to vector<128x2xf32>
    %63 = arith.addf %61, %62 : vector<128x2xf32>
    %cst_54 = arith.constant 0.000000e+00 : f32
    %64 = vector.broadcast %cst_54 : f32 to vector<128x2xf32>
    %65 = arith.maximumf %63, %64 : vector<128x2xf32>
    %66 = arith.truncf %65 : vector<128x2xf32> to vector<128x2xbf16>
    %c0_55 = arith.constant 0 : index
    %c0_56 = arith.constant 0 : index
    %c0_57 = arith.constant 0 : index
    %67 = vector.load %arg20[%c0_55, %c0_56, %c0_57] : memref<25x128x2xbf16, #tpu.memory_space<vmem>>, vector<1x128x2xbf16>
    %68 = vector.shape_cast %67 : vector<1x128x2xbf16> to vector<128x2xbf16>
    %69 = vector.shape_cast %66 : vector<128x2xbf16> to vector<1x128x2xbf16>
    tpu.vector_store %arg20[%c0_55, %c0_56, %c0_57], %69 {strides = array<i32>} : memref<25x128x2xbf16, #tpu.memory_space<vmem>>, vector<1x128x2xbf16>,
    %70 = vector.extract_strided_slice %57 {offsets = [16, 0], sizes = [16, 2], strides = [1, 1]} : vector<400x2xf32> to vector<16x2xf32>
    %cst_58 = arith.constant dense<0.000000e+00> : vector<128x2xf32>
    %71 = tpu.matmul %58, %70, %cst_58 {dimension_numbers = #tpu.dot_dimension_numbers<[1], [0], [0], [1], [0, 0, 1, 1], [], []>} : vector<128x16xf32>, vector<16x2xf32>, vector<128x2xf32> -> vector<128x2xf32>
    %72 = vector.broadcast %59 : vector<128x1xf32> to vector<128x2xf32>
    %73 = arith.addf %71, %72 : vector<128x2xf32>
    %cst_59 = arith.constant 0.000000e+00 : f32
    %74 = vector.broadcast %cst_59 : f32 to vector<128x2xf32>
    %75 = arith.maximumf %73, %74 : vector<128x2xf32>
    %76 = arith.truncf %75 : vector<128x2xf32> to vector<128x2xbf16>
    %c1 = arith.constant 1 : index
    %c0_60 = arith.constant 0 : index
    %c0_61 = arith.constant 0 : index
    %77 = vector.load %arg20[%c1, %c0_60, %c0_61] : memref<25x128x2xbf16, #tpu.memory_space<vmem>>, vector<1x128x2xbf16>
    %78 = vector.shape_cast %77 : vector<1x128x2xbf16> to vector<128x2xbf16>
    %79 = vector.shape_cast %76 : vector<128x2xbf16> to vector<1x128x2xbf16>
    tpu.vector_store %arg20[%c1, %c0_60, %c0_61], %79 {strides = array<i32>} : memref<25x128x2xbf16, #tpu.memory_space<vmem>>, vector<1x128x2xbf16>,
    %80 = vector.extract_strided_slice %57 {offsets = [32, 0], sizes = [16, 2], strides = [1, 1]} : vector<400x2xf32> to vector<16x2xf32>
    %cst_62 = arith.constant dense<0.000000e+00> : vector<128x2xf32>
    %81 = tpu.matmul %58, %80, %cst_62 {dimension_numbers = #tpu.dot_dimension_numbers<[1], [0], [0], [1], [0, 0, 1, 1], [], []>} : vector<128x16xf32>, vector<16x2xf32>, vector<128x2xf32> -> vector<128x2xf32>
    %82 = vector.broadcast %59 : vector<128x1xf32> to vector<128x2xf32>
    %83 = arith.addf %81, %82 : vector<128x2xf32>
    %cst_63 = arith.constant 0.000000e+00 : f32
    %84 = vector.broadcast %cst_63 : f32 to vector<128x2xf32>
    %85 = arith.maximumf %83, %84 : vector<128x2xf32>
    %86 = arith.truncf %85 : vector<128x2xf32> to vector<128x2xbf16>
    %c2 = arith.constant 2 : index
    %c0_64 = arith.constant 0 : index
    %c0_65 = arith.constant 0 : index
    %87 = vector.load %arg20[%c2, %c0_64, %c0_65] : memref<25x128x2xbf16, #tpu.memory_space<vmem>>, vector<1x128x2xbf16>
    %88 = vector.shape_cast %87 : vector<1x128x2xbf16> to vector<128x2xbf16>
    %89 = vector.shape_cast %86 : vector<128x2xbf16> to vector<1x128x2xbf16>
    tpu.vector_store %arg20[%c2, %c0_64, %c0_65], %89 {strides = array<i32>} : memref<25x128x2xbf16, #tpu.memory_space<vmem>>, vector<1x128x2xbf16>,
    %90 = vector.extract_strided_slice %57 {offsets = [48, 0], sizes = [16, 2], strides = [1, 1]} : vector<400x2xf32> to vector<16x2xf32>
    %cst_66 = arith.constant dense<0.000000e+00> : vector<128x2xf32>
    %91 = tpu.matmul %58, %90, %cst_66 {dimension_numbers = #tpu.dot_dimension_numbers<[1], [0], [0], [1], [0, 0, 1, 1], [], []>} : vector<128x16xf32>, vector<16x2xf32>, vector<128x2xf32> -> vector<128x2xf32>
    %92 = vector.broadcast %59 : vector<128x1xf32> to vector<128x2xf32>
    %93 = arith.addf %91, %92 : vector<128x2xf32>
    %cst_67 = arith.constant 0.000000e+00 : f32
    %94 = vector.broadcast %cst_67 : f32 to vector<128x2xf32>
    %95 = arith.maximumf %93, %94 : vector<128x2xf32>
    %96 = arith.truncf %95 : vector<128x2xf32> to vector<128x2xbf16>
    %c3 = arith.constant 3 : index
    %c0_68 = arith.constant 0 : index
    %c0_69 = arith.constant 0 : index
    %97 = vector.load %arg20[%c3, %c0_68, %c0_69] : memref<25x128x2xbf16, #tpu.memory_space<vmem>>, vector<1x128x2xbf16>
    %98 = vector.shape_cast %97 : vector<1x128x2xbf16> to vector<128x2xbf16>
    %99 = vector.shape_cast %96 : vector<128x2xbf16> to vector<1x128x2xbf16>
    tpu.vector_store %arg20[%c3, %c0_68, %c0_69], %99 {strides = array<i32>} : memref<25x128x2xbf16, #tpu.memory_space<vmem>>, vector<1x128x2xbf16>,
    %100 = vector.extract_strided_slice %57 {offsets = [64, 0], sizes = [16, 2], strides = [1, 1]} : vector<400x2xf32> to vector<16x2xf32>
    %cst_70 = arith.constant dense<0.000000e+00> : vector<128x2xf32>
    %101 = tpu.matmul %58, %100, %cst_70 {dimension_numbers = #tpu.dot_dimension_numbers<[1], [0], [0], [1], [0, 0, 1, 1], [], []>} : vector<128x16xf32>, vector<16x2xf32>, vector<128x2xf32> -> vector<128x2xf32>
    %102 = vector.broadcast %59 : vector<128x1xf32> to vector<128x2xf32>
    %103 = arith.addf %101, %102 : vector<128x2xf32>
    %cst_71 = arith.constant 0.000000e+00 : f32
    %104 = vector.broadcast %cst_71 : f32 to vector<128x2xf32>
    %105 = arith.maximumf %103, %104 : vector<128x2xf32>
    %106 = arith.truncf %105 : vector<128x2xf32> to vector<128x2xbf16>
    %c4 = arith.constant 4 : index
    %c0_72 = arith.constant 0 : index
    %c0_73 = arith.constant 0 : index
    %107 = vector.load %arg20[%c4, %c0_72, %c0_73] : memref<25x128x2xbf16, #tpu.memory_space<vmem>>, vector<1x128x2xbf16>
    %108 = vector.shape_cast %107 : vector<1x128x2xbf16> to vector<128x2xbf16>
    %109 = vector.shape_cast %106 : vector<128x2xbf16> to vector<1x128x2xbf16>
    tpu.vector_store %arg20[%c4, %c0_72, %c0_73], %109 {strides = array<i32>} : memref<25x128x2xbf16, #tpu.memory_space<vmem>>, vector<1x128x2xbf16>,
    %110 = vector.extract_strided_slice %57 {offsets = [80, 0], sizes = [16, 2], strides = [1, 1]} : vector<400x2xf32> to vector<16x2xf32>
    %cst_74 = arith.constant dense<0.000000e+00> : vector<128x2xf32>
    %111 = tpu.matmul %58, %110, %cst_74 {dimension_numbers = #tpu.dot_dimension_numbers<[1], [0], [0], [1], [0, 0, 1, 1], [], []>} : vector<128x16xf32>, vector<16x2xf32>, vector<128x2xf32> -> vector<128x2xf32>
    %112 = vector.broadcast %59 : vector<128x1xf32> to vector<128x2xf32>
    %113 = arith.addf %111, %112 : vector<128x2xf32>
    %cst_75 = arith.constant 0.000000e+00 : f32
    %114 = vector.broadcast %cst_75 : f32 to vector<128x2xf32>
    %115 = arith.maximumf %113, %114 : vector<128x2xf32>
    %116 = arith.truncf %115 : vector<128x2xf32> to vector<128x2xbf16>
    %c5 = arith.constant 5 : index
    %c0_76 = arith.constant 0 : index
    %c0_77 = arith.constant 0 : index
    %117 = vector.load %arg20[%c5, %c0_76, %c0_77] : memref<25x128x2xbf16, #tpu.memory_space<vmem>>, vector<1x128x2xbf16>
    %118 = vector.shape_cast %117 : vector<1x128x2xbf16> to vector<128x2xbf16>
    %119 = vector.shape_cast %116 : vector<128x2xbf16> to vector<1x128x2xbf16>
    tpu.vector_store %arg20[%c5, %c0_76, %c0_77], %119 {strides = array<i32>} : memref<25x128x2xbf16, #tpu.memory_space<vmem>>, vector<1x128x2xbf16>,
    %120 = vector.extract_strided_slice %57 {offsets = [96, 0], sizes = [16, 2], strides = [1, 1]} : vector<400x2xf32> to vector<16x2xf32>
    %cst_78 = arith.constant dense<0.000000e+00> : vector<128x2xf32>
    %121 = tpu.matmul %58, %120, %cst_78 {dimension_numbers = #tpu.dot_dimension_numbers<[1], [0], [0], [1], [0, 0, 1, 1], [], []>} : vector<128x16xf32>, vector<16x2xf32>, vector<128x2xf32> -> vector<128x2xf32>
    %122 = vector.broadcast %59 : vector<128x1xf32> to vector<128x2xf32>
    %123 = arith.addf %121, %122 : vector<128x2xf32>
    %cst_79 = arith.constant 0.000000e+00 : f32
    %124 = vector.broadcast %cst_79 : f32 to vector<128x2xf32>
    %125 = arith.maximumf %123, %124 : vector<128x2xf32>
    %126 = arith.truncf %125 : vector<128x2xf32> to vector<128x2xbf16>
    %c6 = arith.constant 6 : index
    %c0_80 = arith.constant 0 : index
    %c0_81 = arith.constant 0 : index
    %127 = vector.load %arg20[%c6, %c0_80, %c0_81] : memref<25x128x2xbf16, #tpu.memory_space<vmem>>, vector<1x128x2xbf16>
    %128 = vector.shape_cast %127 : vector<1x128x2xbf16> to vector<128x2xbf16>
    %129 = vector.shape_cast %126 : vector<128x2xbf16> to vector<1x128x2xbf16>
    tpu.vector_store %arg20[%c6, %c0_80, %c0_81], %129 {strides = array<i32>} : memref<25x128x2xbf16, #tpu.memory_space<vmem>>, vector<1x128x2xbf16>,
    %130 = vector.extract_strided_slice %57 {offsets = [112, 0], sizes = [16, 2], strides = [1, 1]} : vector<400x2xf32> to vector<16x2xf32>
    %cst_82 = arith.constant dense<0.000000e+00> : vector<128x2xf32>
    %131 = tpu.matmul %58, %130, %cst_82 {dimension_numbers = #tpu.dot_dimension_numbers<[1], [0], [0], [1], [0, 0, 1, 1], [], []>} : vector<128x16xf32>, vector<16x2xf32>, vector<128x2xf32> -> vector<128x2xf32>
    %132 = vector.broadcast %59 : vector<128x1xf32> to vector<128x2xf32>
    %133 = arith.addf %131, %132 : vector<128x2xf32>
    %cst_83 = arith.constant 0.000000e+00 : f32
    %134 = vector.broadcast %cst_83 : f32 to vector<128x2xf32>
    %135 = arith.maximumf %133, %134 : vector<128x2xf32>
    %136 = arith.truncf %135 : vector<128x2xf32> to vector<128x2xbf16>
    %c7 = arith.constant 7 : index
    %c0_84 = arith.constant 0 : index
    %c0_85 = arith.constant 0 : index
    %137 = vector.load %arg20[%c7, %c0_84, %c0_85] : memref<25x128x2xbf16, #tpu.memory_space<vmem>>, vector<1x128x2xbf16>
    %138 = vector.shape_cast %137 : vector<1x128x2xbf16> to vector<128x2xbf16>
    %139 = vector.shape_cast %136 : vector<128x2xbf16> to vector<1x128x2xbf16>
    tpu.vector_store %arg20[%c7, %c0_84, %c0_85], %139 {strides = array<i32>} : memref<25x128x2xbf16, #tpu.memory_space<vmem>>, vector<1x128x2xbf16>,
    %140 = vector.extract_strided_slice %57 {offsets = [128, 0], sizes = [16, 2], strides = [1, 1]} : vector<400x2xf32> to vector<16x2xf32>
    %cst_86 = arith.constant dense<0.000000e+00> : vector<128x2xf32>
    %141 = tpu.matmul %58, %140, %cst_86 {dimension_numbers = #tpu.dot_dimension_numbers<[1], [0], [0], [1], [0, 0, 1, 1], [], []>} : vector<128x16xf32>, vector<16x2xf32>, vector<128x2xf32> -> vector<128x2xf32>
    %142 = vector.broadcast %59 : vector<128x1xf32> to vector<128x2xf32>
    %143 = arith.addf %141, %142 : vector<128x2xf32>
    %cst_87 = arith.constant 0.000000e+00 : f32
    %144 = vector.broadcast %cst_87 : f32 to vector<128x2xf32>
    %145 = arith.maximumf %143, %144 : vector<128x2xf32>
    %146 = arith.truncf %145 : vector<128x2xf32> to vector<128x2xbf16>
    %c8 = arith.constant 8 : index
    %c0_88 = arith.constant 0 : index
    %c0_89 = arith.constant 0 : index
    %147 = vector.load %arg20[%c8, %c0_88, %c0_89] : memref<25x128x2xbf16, #tpu.memory_space<vmem>>, vector<1x128x2xbf16>
    %148 = vector.shape_cast %147 : vector<1x128x2xbf16> to vector<128x2xbf16>
    %149 = vector.shape_cast %146 : vector<128x2xbf16> to vector<1x128x2xbf16>
    tpu.vector_store %arg20[%c8, %c0_88, %c0_89], %149 {strides = array<i32>} : memref<25x128x2xbf16, #tpu.memory_space<vmem>>, vector<1x128x2xbf16>,
    %150 = vector.extract_strided_slice %57 {offsets = [144, 0], sizes = [16, 2], strides = [1, 1]} : vector<400x2xf32> to vector<16x2xf32>
    %cst_90 = arith.constant dense<0.000000e+00> : vector<128x2xf32>
    %151 = tpu.matmul %58, %150, %cst_90 {dimension_numbers = #tpu.dot_dimension_numbers<[1], [0], [0], [1], [0, 0, 1, 1], [], []>} : vector<128x16xf32>, vector<16x2xf32>, vector<128x2xf32> -> vector<128x2xf32>
    %152 = vector.broadcast %59 : vector<128x1xf32> to vector<128x2xf32>
    %153 = arith.addf %151, %152 : vector<128x2xf32>
    %cst_91 = arith.constant 0.000000e+00 : f32
    %154 = vector.broadcast %cst_91 : f32 to vector<128x2xf32>
    %155 = arith.maximumf %153, %154 : vector<128x2xf32>
    %156 = arith.truncf %155 : vector<128x2xf32> to vector<128x2xbf16>
    %c9 = arith.constant 9 : index
    %c0_92 = arith.constant 0 : index
    %c0_93 = arith.constant 0 : index
    %157 = vector.load %arg20[%c9, %c0_92, %c0_93] : memref<25x128x2xbf16, #tpu.memory_space<vmem>>, vector<1x128x2xbf16>
    %158 = vector.shape_cast %157 : vector<1x128x2xbf16> to vector<128x2xbf16>
    %159 = vector.shape_cast %156 : vector<128x2xbf16> to vector<1x128x2xbf16>
    tpu.vector_store %arg20[%c9, %c0_92, %c0_93], %159 {strides = array<i32>} : memref<25x128x2xbf16, #tpu.memory_space<vmem>>, vector<1x128x2xbf16>,
    %160 = vector.extract_strided_slice %57 {offsets = [160, 0], sizes = [16, 2], strides = [1, 1]} : vector<400x2xf32> to vector<16x2xf32>
    %cst_94 = arith.constant dense<0.000000e+00> : vector<128x2xf32>
    %161 = tpu.matmul %58, %160, %cst_94 {dimension_numbers = #tpu.dot_dimension_numbers<[1], [0], [0], [1], [0, 0, 1, 1], [], []>} : vector<128x16xf32>, vector<16x2xf32>, vector<128x2xf32> -> vector<128x2xf32>
    %162 = vector.broadcast %59 : vector<128x1xf32> to vector<128x2xf32>
    %163 = arith.addf %161, %162 : vector<128x2xf32>
    %cst_95 = arith.constant 0.000000e+00 : f32
    %164 = vector.broadcast %cst_95 : f32 to vector<128x2xf32>
    %165 = arith.maximumf %163, %164 : vector<128x2xf32>
    %166 = arith.truncf %165 : vector<128x2xf32> to vector<128x2xbf16>
    %c10 = arith.constant 10 : index
    %c0_96 = arith.constant 0 : index
    %c0_97 = arith.constant 0 : index
    %167 = vector.load %arg20[%c10, %c0_96, %c0_97] : memref<25x128x2xbf16, #tpu.memory_space<vmem>>, vector<1x128x2xbf16>
    %168 = vector.shape_cast %167 : vector<1x128x2xbf16> to vector<128x2xbf16>
    %169 = vector.shape_cast %166 : vector<128x2xbf16> to vector<1x128x2xbf16>
    tpu.vector_store %arg20[%c10, %c0_96, %c0_97], %169 {strides = array<i32>} : memref<25x128x2xbf16, #tpu.memory_space<vmem>>, vector<1x128x2xbf16>,
    %170 = vector.extract_strided_slice %57 {offsets = [176, 0], sizes = [16, 2], strides = [1, 1]} : vector<400x2xf32> to vector<16x2xf32>
    %cst_98 = arith.constant dense<0.000000e+00> : vector<128x2xf32>
    %171 = tpu.matmul %58, %170, %cst_98 {dimension_numbers = #tpu.dot_dimension_numbers<[1], [0], [0], [1], [0, 0, 1, 1], [], []>} : vector<128x16xf32>, vector<16x2xf32>, vector<128x2xf32> -> vector<128x2xf32>
    %172 = vector.broadcast %59 : vector<128x1xf32> to vector<128x2xf32>
    %173 = arith.addf %171, %172 : vector<128x2xf32>
    %cst_99 = arith.constant 0.000000e+00 : f32
    %174 = vector.broadcast %cst_99 : f32 to vector<128x2xf32>
    %175 = arith.maximumf %173, %174 : vector<128x2xf32>
    %176 = arith.truncf %175 : vector<128x2xf32> to vector<128x2xbf16>
    %c11 = arith.constant 11 : index
    %c0_100 = arith.constant 0 : index
    %c0_101 = arith.constant 0 : index
    %177 = vector.load %arg20[%c11, %c0_100, %c0_101] : memref<25x128x2xbf16, #tpu.memory_space<vmem>>, vector<1x128x2xbf16>
    %178 = vector.shape_cast %177 : vector<1x128x2xbf16> to vector<128x2xbf16>
    %179 = vector.shape_cast %176 : vector<128x2xbf16> to vector<1x128x2xbf16>
    tpu.vector_store %arg20[%c11, %c0_100, %c0_101], %179 {strides = array<i32>} : memref<25x128x2xbf16, #tpu.memory_space<vmem>>, vector<1x128x2xbf16>,
    %180 = vector.extract_strided_slice %57 {offsets = [192, 0], sizes = [16, 2], strides = [1, 1]} : vector<400x2xf32> to vector<16x2xf32>
    %cst_102 = arith.constant dense<0.000000e+00> : vector<128x2xf32>
    %181 = tpu.matmul %58, %180, %cst_102 {dimension_numbers = #tpu.dot_dimension_numbers<[1], [0], [0], [1], [0, 0, 1, 1], [], []>} : vector<128x16xf32>, vector<16x2xf32>, vector<128x2xf32> -> vector<128x2xf32>
    %182 = vector.broadcast %59 : vector<128x1xf32> to vector<128x2xf32>
    %183 = arith.addf %181, %182 : vector<128x2xf32>
    %cst_103 = arith.constant 0.000000e+00 : f32
    %184 = vector.broadcast %cst_103 : f32 to vector<128x2xf32>
    %185 = arith.maximumf %183, %184 : vector<128x2xf32>
    %186 = arith.truncf %185 : vector<128x2xf32> to vector<128x2xbf16>
    %c12 = arith.constant 12 : index
    %c0_104 = arith.constant 0 : index
    %c0_105 = arith.constant 0 : index
    %187 = vector.load %arg20[%c12, %c0_104, %c0_105] : memref<25x128x2xbf16, #tpu.memory_space<vmem>>, vector<1x128x2xbf16>
    %188 = vector.shape_cast %187 : vector<1x128x2xbf16> to vector<128x2xbf16>
    %189 = vector.shape_cast %186 : vector<128x2xbf16> to vector<1x128x2xbf16>
    tpu.vector_store %arg20[%c12, %c0_104, %c0_105], %189 {strides = array<i32>} : memref<25x128x2xbf16, #tpu.memory_space<vmem>>, vector<1x128x2xbf16>,
    %190 = vector.extract_strided_slice %57 {offsets = [208, 0], sizes = [16, 2], strides = [1, 1]} : vector<400x2xf32> to vector<16x2xf32>
    %cst_106 = arith.constant dense<0.000000e+00> : vector<128x2xf32>
    %191 = tpu.matmul %58, %190, %cst_106 {dimension_numbers = #tpu.dot_dimension_numbers<[1], [0], [0], [1], [0, 0, 1, 1], [], []>} : vector<128x16xf32>, vector<16x2xf32>, vector<128x2xf32> -> vector<128x2xf32>
    %192 = vector.broadcast %59 : vector<128x1xf32> to vector<128x2xf32>
    %193 = arith.addf %191, %192 : vector<128x2xf32>
    %cst_107 = arith.constant 0.000000e+00 : f32
    %194 = vector.broadcast %cst_107 : f32 to vector<128x2xf32>
    %195 = arith.maximumf %193, %194 : vector<128x2xf32>
    %196 = arith.truncf %195 : vector<128x2xf32> to vector<128x2xbf16>
    %c13 = arith.constant 13 : index
    %c0_108 = arith.constant 0 : index
    %c0_109 = arith.constant 0 : index
    %197 = vector.load %arg20[%c13, %c0_108, %c0_109] : memref<25x128x2xbf16, #tpu.memory_space<vmem>>, vector<1x128x2xbf16>
    %198 = vector.shape_cast %197 : vector<1x128x2xbf16> to vector<128x2xbf16>
    %199 = vector.shape_cast %196 : vector<128x2xbf16> to vector<1x128x2xbf16>
    tpu.vector_store %arg20[%c13, %c0_108, %c0_109], %199 {strides = array<i32>} : memref<25x128x2xbf16, #tpu.memory_space<vmem>>, vector<1x128x2xbf16>,
    %200 = vector.extract_strided_slice %57 {offsets = [224, 0], sizes = [16, 2], strides = [1, 1]} : vector<400x2xf32> to vector<16x2xf32>
    %cst_110 = arith.constant dense<0.000000e+00> : vector<128x2xf32>
    %201 = tpu.matmul %58, %200, %cst_110 {dimension_numbers = #tpu.dot_dimension_numbers<[1], [0], [0], [1], [0, 0, 1, 1], [], []>} : vector<128x16xf32>, vector<16x2xf32>, vector<128x2xf32> -> vector<128x2xf32>
    %202 = vector.broadcast %59 : vector<128x1xf32> to vector<128x2xf32>
    %203 = arith.addf %201, %202 : vector<128x2xf32>
    %cst_111 = arith.constant 0.000000e+00 : f32
    %204 = vector.broadcast %cst_111 : f32 to vector<128x2xf32>
    %205 = arith.maximumf %203, %204 : vector<128x2xf32>
    %206 = arith.truncf %205 : vector<128x2xf32> to vector<128x2xbf16>
    %c14 = arith.constant 14 : index
    %c0_112 = arith.constant 0 : index
    %c0_113 = arith.constant 0 : index
    %207 = vector.load %arg20[%c14, %c0_112, %c0_113] : memref<25x128x2xbf16, #tpu.memory_space<vmem>>, vector<1x128x2xbf16>
    %208 = vector.shape_cast %207 : vector<1x128x2xbf16> to vector<128x2xbf16>
    %209 = vector.shape_cast %206 : vector<128x2xbf16> to vector<1x128x2xbf16>
    tpu.vector_store %arg20[%c14, %c0_112, %c0_113], %209 {strides = array<i32>} : memref<25x128x2xbf16, #tpu.memory_space<vmem>>, vector<1x128x2xbf16>,
    %210 = vector.extract_strided_slice %57 {offsets = [240, 0], sizes = [16, 2], strides = [1, 1]} : vector<400x2xf32> to vector<16x2xf32>
    %cst_114 = arith.constant dense<0.000000e+00> : vector<128x2xf32>
    %211 = tpu.matmul %58, %210, %cst_114 {dimension_numbers = #tpu.dot_dimension_numbers<[1], [0], [0], [1], [0, 0, 1, 1], [], []>} : vector<128x16xf32>, vector<16x2xf32>, vector<128x2xf32> -> vector<128x2xf32>
    %212 = vector.broadcast %59 : vector<128x1xf32> to vector<128x2xf32>
    %213 = arith.addf %211, %212 : vector<128x2xf32>
    %cst_115 = arith.constant 0.000000e+00 : f32
    %214 = vector.broadcast %cst_115 : f32 to vector<128x2xf32>
    %215 = arith.maximumf %213, %214 : vector<128x2xf32>
    %216 = arith.truncf %215 : vector<128x2xf32> to vector<128x2xbf16>
    %c15 = arith.constant 15 : index
    %c0_116 = arith.constant 0 : index
    %c0_117 = arith.constant 0 : index
    %217 = vector.load %arg20[%c15, %c0_116, %c0_117] : memref<25x128x2xbf16, #tpu.memory_space<vmem>>, vector<1x128x2xbf16>
    %218 = vector.shape_cast %217 : vector<1x128x2xbf16> to vector<128x2xbf16>
    %219 = vector.shape_cast %216 : vector<128x2xbf16> to vector<1x128x2xbf16>
    tpu.vector_store %arg20[%c15, %c0_116, %c0_117], %219 {strides = array<i32>} : memref<25x128x2xbf16, #tpu.memory_space<vmem>>, vector<1x128x2xbf16>,
    %220 = vector.extract_strided_slice %57 {offsets = [256, 0], sizes = [16, 2], strides = [1, 1]} : vector<400x2xf32> to vector<16x2xf32>
    %cst_118 = arith.constant dense<0.000000e+00> : vector<128x2xf32>
    %221 = tpu.matmul %58, %220, %cst_118 {dimension_numbers = #tpu.dot_dimension_numbers<[1], [0], [0], [1], [0, 0, 1, 1], [], []>} : vector<128x16xf32>, vector<16x2xf32>, vector<128x2xf32> -> vector<128x2xf32>
    %222 = vector.broadcast %59 : vector<128x1xf32> to vector<128x2xf32>
    %223 = arith.addf %221, %222 : vector<128x2xf32>
    %cst_119 = arith.constant 0.000000e+00 : f32
    %224 = vector.broadcast %cst_119 : f32 to vector<128x2xf32>
    %225 = arith.maximumf %223, %224 : vector<128x2xf32>
    %226 = arith.truncf %225 : vector<128x2xf32> to vector<128x2xbf16>
    %c16 = arith.constant 16 : index
    %c0_120 = arith.constant 0 : index
    %c0_121 = arith.constant 0 : index
    %227 = vector.load %arg20[%c16, %c0_120, %c0_121] : memref<25x128x2xbf16, #tpu.memory_space<vmem>>, vector<1x128x2xbf16>
    %228 = vector.shape_cast %227 : vector<1x128x2xbf16> to vector<128x2xbf16>
    %229 = vector.shape_cast %226 : vector<128x2xbf16> to vector<1x128x2xbf16>
    tpu.vector_store %arg20[%c16, %c0_120, %c0_121], %229 {strides = array<i32>} : memref<25x128x2xbf16, #tpu.memory_space<vmem>>, vector<1x128x2xbf16>,
    %230 = vector.extract_strided_slice %57 {offsets = [272, 0], sizes = [16, 2], strides = [1, 1]} : vector<400x2xf32> to vector<16x2xf32>
    %cst_122 = arith.constant dense<0.000000e+00> : vector<128x2xf32>
    %231 = tpu.matmul %58, %230, %cst_122 {dimension_numbers = #tpu.dot_dimension_numbers<[1], [0], [0], [1], [0, 0, 1, 1], [], []>} : vector<128x16xf32>, vector<16x2xf32>, vector<128x2xf32> -> vector<128x2xf32>
    %232 = vector.broadcast %59 : vector<128x1xf32> to vector<128x2xf32>
    %233 = arith.addf %231, %232 : vector<128x2xf32>
    %cst_123 = arith.constant 0.000000e+00 : f32
    %234 = vector.broadcast %cst_123 : f32 to vector<128x2xf32>
    %235 = arith.maximumf %233, %234 : vector<128x2xf32>
    %236 = arith.truncf %235 : vector<128x2xf32> to vector<128x2xbf16>
    %c17 = arith.constant 17 : index
    %c0_124 = arith.constant 0 : index
    %c0_125 = arith.constant 0 : index
    %237 = vector.load %arg20[%c17, %c0_124, %c0_125] : memref<25x128x2xbf16, #tpu.memory_space<vmem>>, vector<1x128x2xbf16>
    %238 = vector.shape_cast %237 : vector<1x128x2xbf16> to vector<128x2xbf16>
    %239 = vector.shape_cast %236 : vector<128x2xbf16> to vector<1x128x2xbf16>
    tpu.vector_store %arg20[%c17, %c0_124, %c0_125], %239 {strides = array<i32>} : memref<25x128x2xbf16, #tpu.memory_space<vmem>>, vector<1x128x2xbf16>,
    %240 = vector.extract_strided_slice %57 {offsets = [288, 0], sizes = [16, 2], strides = [1, 1]} : vector<400x2xf32> to vector<16x2xf32>
    %cst_126 = arith.constant dense<0.000000e+00> : vector<128x2xf32>
    %241 = tpu.matmul %58, %240, %cst_126 {dimension_numbers = #tpu.dot_dimension_numbers<[1], [0], [0], [1], [0, 0, 1, 1], [], []>} : vector<128x16xf32>, vector<16x2xf32>, vector<128x2xf32> -> vector<128x2xf32>
    %242 = vector.broadcast %59 : vector<128x1xf32> to vector<128x2xf32>
    %243 = arith.addf %241, %242 : vector<128x2xf32>
    %cst_127 = arith.constant 0.000000e+00 : f32
    %244 = vector.broadcast %cst_127 : f32 to vector<128x2xf32>
    %245 = arith.maximumf %243, %244 : vector<128x2xf32>
    %246 = arith.truncf %245 : vector<128x2xf32> to vector<128x2xbf16>
    %c18 = arith.constant 18 : index
    %c0_128 = arith.constant 0 : index
    %c0_129 = arith.constant 0 : index
    %247 = vector.load %arg20[%c18, %c0_128, %c0_129] : memref<25x128x2xbf16, #tpu.memory_space<vmem>>, vector<1x128x2xbf16>
    %248 = vector.shape_cast %247 : vector<1x128x2xbf16> to vector<128x2xbf16>
    %249 = vector.shape_cast %246 : vector<128x2xbf16> to vector<1x128x2xbf16>
    tpu.vector_store %arg20[%c18, %c0_128, %c0_129], %249 {strides = array<i32>} : memref<25x128x2xbf16, #tpu.memory_space<vmem>>, vector<1x128x2xbf16>,
    %250 = vector.extract_strided_slice %57 {offsets = [304, 0], sizes = [16, 2], strides = [1, 1]} : vector<400x2xf32> to vector<16x2xf32>
    %cst_130 = arith.constant dense<0.000000e+00> : vector<128x2xf32>
    %251 = tpu.matmul %58, %250, %cst_130 {dimension_numbers = #tpu.dot_dimension_numbers<[1], [0], [0], [1], [0, 0, 1, 1], [], []>} : vector<128x16xf32>, vector<16x2xf32>, vector<128x2xf32> -> vector<128x2xf32>
    %252 = vector.broadcast %59 : vector<128x1xf32> to vector<128x2xf32>
    %253 = arith.addf %251, %252 : vector<128x2xf32>
    %cst_131 = arith.constant 0.000000e+00 : f32
    %254 = vector.broadcast %cst_131 : f32 to vector<128x2xf32>
    %255 = arith.maximumf %253, %254 : vector<128x2xf32>
    %256 = arith.truncf %255 : vector<128x2xf32> to vector<128x2xbf16>
    %c19 = arith.constant 19 : index
    %c0_132 = arith.constant 0 : index
    %c0_133 = arith.constant 0 : index
    %257 = vector.load %arg20[%c19, %c0_132, %c0_133] : memref<25x128x2xbf16, #tpu.memory_space<vmem>>, vector<1x128x2xbf16>
    %258 = vector.shape_cast %257 : vector<1x128x2xbf16> to vector<128x2xbf16>
    %259 = vector.shape_cast %256 : vector<128x2xbf16> to vector<1x128x2xbf16>
    tpu.vector_store %arg20[%c19, %c0_132, %c0_133], %259 {strides = array<i32>} : memref<25x128x2xbf16, #tpu.memory_space<vmem>>, vector<1x128x2xbf16>,
    %260 = vector.extract_strided_slice %57 {offsets = [320, 0], sizes = [16, 2], strides = [1, 1]} : vector<400x2xf32> to vector<16x2xf32>
    %cst_134 = arith.constant dense<0.000000e+00> : vector<128x2xf32>
    %261 = tpu.matmul %58, %260, %cst_134 {dimension_numbers = #tpu.dot_dimension_numbers<[1], [0], [0], [1], [0, 0, 1, 1], [], []>} : vector<128x16xf32>, vector<16x2xf32>, vector<128x2xf32> -> vector<128x2xf32>
    %262 = vector.broadcast %59 : vector<128x1xf32> to vector<128x2xf32>
    %263 = arith.addf %261, %262 : vector<128x2xf32>
    %cst_135 = arith.constant 0.000000e+00 : f32
    %264 = vector.broadcast %cst_135 : f32 to vector<128x2xf32>
    %265 = arith.maximumf %263, %264 : vector<128x2xf32>
    %266 = arith.truncf %265 : vector<128x2xf32> to vector<128x2xbf16>
    %c20 = arith.constant 20 : index
    %c0_136 = arith.constant 0 : index
    %c0_137 = arith.constant 0 : index
    %267 = vector.load %arg20[%c20, %c0_136, %c0_137] : memref<25x128x2xbf16, #tpu.memory_space<vmem>>, vector<1x128x2xbf16>
    %268 = vector.shape_cast %267 : vector<1x128x2xbf16> to vector<128x2xbf16>
    %269 = vector.shape_cast %266 : vector<128x2xbf16> to vector<1x128x2xbf16>
    tpu.vector_store %arg20[%c20, %c0_136, %c0_137], %269 {strides = array<i32>} : memref<25x128x2xbf16, #tpu.memory_space<vmem>>, vector<1x128x2xbf16>,
    %270 = vector.extract_strided_slice %57 {offsets = [336, 0], sizes = [16, 2], strides = [1, 1]} : vector<400x2xf32> to vector<16x2xf32>
    %cst_138 = arith.constant dense<0.000000e+00> : vector<128x2xf32>
    %271 = tpu.matmul %58, %270, %cst_138 {dimension_numbers = #tpu.dot_dimension_numbers<[1], [0], [0], [1], [0, 0, 1, 1], [], []>} : vector<128x16xf32>, vector<16x2xf32>, vector<128x2xf32> -> vector<128x2xf32>
    %272 = vector.broadcast %59 : vector<128x1xf32> to vector<128x2xf32>
    %273 = arith.addf %271, %272 : vector<128x2xf32>
    %cst_139 = arith.constant 0.000000e+00 : f32
    %274 = vector.broadcast %cst_139 : f32 to vector<128x2xf32>
    %275 = arith.maximumf %273, %274 : vector<128x2xf32>
    %276 = arith.truncf %275 : vector<128x2xf32> to vector<128x2xbf16>
    %c21 = arith.constant 21 : index
    %c0_140 = arith.constant 0 : index
    %c0_141 = arith.constant 0 : index
    %277 = vector.load %arg20[%c21, %c0_140, %c0_141] : memref<25x128x2xbf16, #tpu.memory_space<vmem>>, vector<1x128x2xbf16>
    %278 = vector.shape_cast %277 : vector<1x128x2xbf16> to vector<128x2xbf16>
    %279 = vector.shape_cast %276 : vector<128x2xbf16> to vector<1x128x2xbf16>
    tpu.vector_store %arg20[%c21, %c0_140, %c0_141], %279 {strides = array<i32>} : memref<25x128x2xbf16, #tpu.memory_space<vmem>>, vector<1x128x2xbf16>,
    %280 = vector.extract_strided_slice %57 {offsets = [352, 0], sizes = [16, 2], strides = [1, 1]} : vector<400x2xf32> to vector<16x2xf32>
    %cst_142 = arith.constant dense<0.000000e+00> : vector<128x2xf32>
    %281 = tpu.matmul %58, %280, %cst_142 {dimension_numbers = #tpu.dot_dimension_numbers<[1], [0], [0], [1], [0, 0, 1, 1], [], []>} : vector<128x16xf32>, vector<16x2xf32>, vector<128x2xf32> -> vector<128x2xf32>
    %282 = vector.broadcast %59 : vector<128x1xf32> to vector<128x2xf32>
    %283 = arith.addf %281, %282 : vector<128x2xf32>
    %cst_143 = arith.constant 0.000000e+00 : f32
    %284 = vector.broadcast %cst_143 : f32 to vector<128x2xf32>
    %285 = arith.maximumf %283, %284 : vector<128x2xf32>
    %286 = arith.truncf %285 : vector<128x2xf32> to vector<128x2xbf16>
    %c22 = arith.constant 22 : index
    %c0_144 = arith.constant 0 : index
    %c0_145 = arith.constant 0 : index
    %287 = vector.load %arg20[%c22, %c0_144, %c0_145] : memref<25x128x2xbf16, #tpu.memory_space<vmem>>, vector<1x128x2xbf16>
    %288 = vector.shape_cast %287 : vector<1x128x2xbf16> to vector<128x2xbf16>
    %289 = vector.shape_cast %286 : vector<128x2xbf16> to vector<1x128x2xbf16>
    tpu.vector_store %arg20[%c22, %c0_144, %c0_145], %289 {strides = array<i32>} : memref<25x128x2xbf16, #tpu.memory_space<vmem>>, vector<1x128x2xbf16>,
    %290 = vector.extract_strided_slice %57 {offsets = [368, 0], sizes = [16, 2], strides = [1, 1]} : vector<400x2xf32> to vector<16x2xf32>
    %cst_146 = arith.constant dense<0.000000e+00> : vector<128x2xf32>
    %291 = tpu.matmul %58, %290, %cst_146 {dimension_numbers = #tpu.dot_dimension_numbers<[1], [0], [0], [1], [0, 0, 1, 1], [], []>} : vector<128x16xf32>, vector<16x2xf32>, vector<128x2xf32> -> vector<128x2xf32>
    %292 = vector.broadcast %59 : vector<128x1xf32> to vector<128x2xf32>
    %293 = arith.addf %291, %292 : vector<128x2xf32>
    %cst_147 = arith.constant 0.000000e+00 : f32
    %294 = vector.broadcast %cst_147 : f32 to vector<128x2xf32>
    %295 = arith.maximumf %293, %294 : vector<128x2xf32>
    %296 = arith.truncf %295 : vector<128x2xf32> to vector<128x2xbf16>
    %c23 = arith.constant 23 : index
    %c0_148 = arith.constant 0 : index
    %c0_149 = arith.constant 0 : index
    %297 = vector.load %arg20[%c23, %c0_148, %c0_149] : memref<25x128x2xbf16, #tpu.memory_space<vmem>>, vector<1x128x2xbf16>
    %298 = vector.shape_cast %297 : vector<1x128x2xbf16> to vector<128x2xbf16>
    %299 = vector.shape_cast %296 : vector<128x2xbf16> to vector<1x128x2xbf16>
    tpu.vector_store %arg20[%c23, %c0_148, %c0_149], %299 {strides = array<i32>} : memref<25x128x2xbf16, #tpu.memory_space<vmem>>, vector<1x128x2xbf16>,
    %300 = vector.extract_strided_slice %57 {offsets = [384, 0], sizes = [16, 2], strides = [1, 1]} : vector<400x2xf32> to vector<16x2xf32>
    %cst_150 = arith.constant dense<0.000000e+00> : vector<128x2xf32>
    %301 = tpu.matmul %58, %300, %cst_150 {dimension_numbers = #tpu.dot_dimension_numbers<[1], [0], [0], [1], [0, 0, 1, 1], [], []>} : vector<128x16xf32>, vector<16x2xf32>, vector<128x2xf32> -> vector<128x2xf32>
    %302 = vector.broadcast %59 : vector<128x1xf32> to vector<128x2xf32>
    %303 = arith.addf %301, %302 : vector<128x2xf32>
    %cst_151 = arith.constant 0.000000e+00 : f32
    %304 = vector.broadcast %cst_151 : f32 to vector<128x2xf32>
    %305 = arith.maximumf %303, %304 : vector<128x2xf32>
    %306 = arith.truncf %305 : vector<128x2xf32> to vector<128x2xbf16>
    %c24 = arith.constant 24 : index
    %c0_152 = arith.constant 0 : index
    %c0_153 = arith.constant 0 : index
    %307 = vector.load %arg20[%c24, %c0_152, %c0_153] : memref<25x128x2xbf16, #tpu.memory_space<vmem>>, vector<1x128x2xbf16>
    %308 = vector.shape_cast %307 : vector<1x128x2xbf16> to vector<128x2xbf16>
    %309 = vector.shape_cast %306 : vector<128x2xbf16> to vector<1x128x2xbf16>
    tpu.vector_store %arg20[%c24, %c0_152, %c0_153], %309 {strides = array<i32>} : memref<25x128x2xbf16, #tpu.memory_space<vmem>>, vector<1x128x2xbf16>,
    return
  }
}

module attributes {stable_mosaic.version = 11 : i64} {
  func.func @_conv_kernel(%arg0: i32, %arg1: memref<16x8xbf16, #tpu.memory_space<vmem>>, %arg2: memref<16x1xf32, #tpu.memory_space<vmem>>, %arg3: memref<8x800xbf16, #tpu.memory_space<vmem>>, %arg4: memref<16x800xbf16, #tpu.memory_space<vmem>>) attributes {dimension_semantics = [#tpu.dimension_semantics<parallel>], iteration_bounds = array<i64: 1>, scalar_prefetch = 0 : i64, scratch_operands = 0 : i64, tpu.core_type = #tpu.core_type<tc>, window_params = [{pipeline_mode = #tpu.pipeline_mode<synchronous>, transform_indices = @transform_0, window_bounds = array<i64: 16, 8>}, {pipeline_mode = #tpu.pipeline_mode<synchronous>, transform_indices = @transform_1, window_bounds = array<i64: 16, 1>}, {transform_indices = @transform_2, window_bounds = array<i64: 8, 800>}, {transform_indices = @transform_3, window_bounds = array<i64: 16, 800>}]} {
    %c0 = arith.constant 0 : index
    %c0_0 = arith.constant 0 : index
    %0 = vector.load %arg1[%c0, %c0_0] : memref<16x8xbf16, #tpu.memory_space<vmem>>, vector<16x8xbf16>
    %c0_1 = arith.constant 0 : index
    %c0_2 = arith.constant 0 : index
    %1 = vector.load %arg3[%c0_1, %c0_2] : memref<8x800xbf16, #tpu.memory_space<vmem>>, vector<8x800xbf16>
    %cst = arith.constant dense<0.000000e+00> : vector<16x800xf32>
    %2 = tpu.matmul %0, %1, %cst {dimension_numbers = #tpu.dot_dimension_numbers<[1], [0], [0], [1], [0, 0, 1, 1], [], []>} : vector<16x8xbf16>, vector<8x800xbf16>, vector<16x800xf32> -> vector<16x800xf32>
    %c0_3 = arith.constant 0 : index
    %c0_4 = arith.constant 0 : index
    %3 = vector.load %arg2[%c0_3, %c0_4] : memref<16x1xf32, #tpu.memory_space<vmem>>, vector<16x1xf32>
    %4 = vector.broadcast %3 : vector<16x1xf32> to vector<16x800xf32>
    %5 = arith.addf %2, %4 : vector<16x800xf32>
    %cst_5 = arith.constant 0.000000e+00 : f32
    %6 = vector.broadcast %cst_5 : f32 to vector<16x800xf32>
    %7 = arith.maximumf %5, %6 : vector<16x800xf32>
    %8 = arith.truncf %7 : vector<16x800xf32> to vector<16x800xbf16>
    %c0_6 = arith.constant 0 : index
    %c0_7 = arith.constant 0 : index
    %9 = vector.load %arg4[%c0_6, %c0_7] : memref<16x800xbf16, #tpu.memory_space<vmem>>, vector<16x800xbf16>
    tpu.vector_store %arg4[%c0_6, %c0_7], %8 {strides = array<i32>} : memref<16x800xbf16, #tpu.memory_space<vmem>>, vector<16x800xbf16>,
    return
  }
  func.func @transform_0(%arg0: i32) -> (i32, i32) {
    %c0_i32 = arith.constant 0 : i32
    %c0_i32_0 = arith.constant 0 : i32
    %c0_i32_1 = arith.constant 0 : i32
    return %c0_i32, %c0_i32_0 : i32, i32
  }
  func.func @transform_1(%arg0: i32) -> (i32, i32) {
    %c0_i32 = arith.constant 0 : i32
    %c0_i32_0 = arith.constant 0 : i32
    %c0_i32_1 = arith.constant 0 : i32
    return %c0_i32, %c0_i32_0 : i32, i32
  }
  func.func @transform_2(%arg0: i32) -> (i32, i32) {
    %c0_i32 = arith.constant 0 : i32
    %c0_i32_0 = arith.constant 0 : i32
    return %c0_i32, %arg0 : i32, i32
  }
  func.func @transform_3(%arg0: i32) -> (i32, i32) {
    %c0_i32 = arith.constant 0 : i32
    %c0_i32_0 = arith.constant 0 : i32
    return %c0_i32, %arg0 : i32, i32
  }
}

module attributes {stable_mosaic.version = 11 : i64} {
  func.func @_conv_kernel(%arg0: i32, %arg1: memref<4x4xbf16, #tpu.memory_space<vmem>>, %arg2: memref<4x1xf32, #tpu.memory_space<vmem>>, %arg3: memref<4x3200xbf16, #tpu.memory_space<vmem>>, %arg4: memref<4x3200xbf16, #tpu.memory_space<vmem>>) attributes {dimension_semantics = [#tpu.dimension_semantics<parallel>], iteration_bounds = array<i64: 1>, scalar_prefetch = 0 : i64, scratch_operands = 0 : i64, tpu.core_type = #tpu.core_type<tc>, window_params = [{pipeline_mode = #tpu.pipeline_mode<synchronous>, transform_indices = @transform_0, window_bounds = array<i64: 4, 4>}, {pipeline_mode = #tpu.pipeline_mode<synchronous>, transform_indices = @transform_1, window_bounds = array<i64: 4, 1>}, {transform_indices = @transform_2, window_bounds = array<i64: 4, 3200>}, {transform_indices = @transform_3, window_bounds = array<i64: 4, 3200>}]} {
    %c0 = arith.constant 0 : index
    %c0_0 = arith.constant 0 : index
    %0 = vector.load %arg1[%c0, %c0_0] : memref<4x4xbf16, #tpu.memory_space<vmem>>, vector<4x4xbf16>
    %c0_1 = arith.constant 0 : index
    %c0_2 = arith.constant 0 : index
    %1 = vector.load %arg3[%c0_1, %c0_2] : memref<4x3200xbf16, #tpu.memory_space<vmem>>, vector<4x3200xbf16>
    %cst = arith.constant dense<0.000000e+00> : vector<4x3200xf32>
    %2 = tpu.matmul %0, %1, %cst {dimension_numbers = #tpu.dot_dimension_numbers<[1], [0], [0], [1], [0, 0, 1, 1], [], []>} : vector<4x4xbf16>, vector<4x3200xbf16>, vector<4x3200xf32> -> vector<4x3200xf32>
    %c0_3 = arith.constant 0 : index
    %c0_4 = arith.constant 0 : index
    %3 = vector.load %arg2[%c0_3, %c0_4] : memref<4x1xf32, #tpu.memory_space<vmem>>, vector<4x1xf32>
    %4 = vector.broadcast %3 : vector<4x1xf32> to vector<4x3200xf32>
    %5 = arith.addf %2, %4 : vector<4x3200xf32>
    %6 = arith.negf %5 : vector<4x3200xf32>
    %7 = math.exp %6 : vector<4x3200xf32>
    %cst_5 = arith.constant 1.000000e+00 : f32
    %8 = vector.broadcast %cst_5 : f32 to vector<4x3200xf32>
    %9 = arith.addf %8, %7 : vector<4x3200xf32>
    %10 = arith.divf %8, %9 : vector<4x3200xf32>
    %11 = arith.truncf %10 : vector<4x3200xf32> to vector<4x3200xbf16>
    %c0_6 = arith.constant 0 : index
    %c0_7 = arith.constant 0 : index
    %12 = vector.load %arg4[%c0_6, %c0_7] : memref<4x3200xbf16, #tpu.memory_space<vmem>>, vector<4x3200xbf16>
    tpu.vector_store %arg4[%c0_6, %c0_7], %11 {strides = array<i32>} : memref<4x3200xbf16, #tpu.memory_space<vmem>>, vector<4x3200xbf16>,
    return
  }
  func.func @transform_0(%arg0: i32) -> (i32, i32) {
    %c0_i32 = arith.constant 0 : i32
    %c0_i32_0 = arith.constant 0 : i32
    %c0_i32_1 = arith.constant 0 : i32
    return %c0_i32, %c0_i32_0 : i32, i32
  }
  func.func @transform_1(%arg0: i32) -> (i32, i32) {
    %c0_i32 = arith.constant 0 : i32
    %c0_i32_0 = arith.constant 0 : i32
    %c0_i32_1 = arith.constant 0 : i32
    return %c0_i32, %c0_i32_0 : i32, i32
  }
  func.func @transform_2(%arg0: i32) -> (i32, i32) {
    %c0_i32 = arith.constant 0 : i32
    %c0_i32_0 = arith.constant 0 : i32
    return %c0_i32, %arg0 : i32, i32
  }
  func.func @transform_3(%arg0: i32) -> (i32, i32) {
    %c0_i32 = arith.constant 0 : i32
    %c0_i32_0 = arith.constant 0 : i32
    return %c0_i32, %arg0 : i32, i32
  }
}

</mosaic_0001>

<bundles_post_ra>
// kernel: autoencoder_forward.6
= control target key start
LH: loop header
LB: loop body
LE: loop exit
PB: predicated region body
PF: predicated region fallthrough
CT: control target
= control target key end

     0   :  { %8 = vsyncpa [#allocation3], 0  ;;  %s1105_s12 = smov [#allocation2]   ;;  %s1306_s0 = inlined_call_operand.hbm [shape: bf16[4,4], index: 0, kind: input, shape index: {}]   ;;  %s1307_s1 = inlined_call_operand.vmem [shape: f32[4,1], index: 1, kind: input, shape index: {}]   ;;  %s1308_s2 = inlined_call_operand.vmem [shape: bf16[4,3200], index: 2, kind: input, shape index: {}]   ;;  %s1309_s3 = inlined_call_operand.vmem [shape: bf16[4,3200], index: 3, kind: output, shape index: {}]  }
   0x1   :  { %s15_s13 = sshll.u32 %s1105_s12, 4  ;;  %s1081_s16 = scalar_lea.hbm %s1306_s0, 32  ;;  %s16_s13 = int_to_ptr.vmem [resolvable:$true] %s15_s13 }
   0x2   :  { %p1082_p0 = scmp.ne.s32.totalorder %s1306_s0, %s1081_s16  ;;  %p1085_p1 = scmp.lt.u32.totalorder %s1081_s16, %s1306_s0 }
   0x4   :  { %p1087_p2 = pnand %p1085_p1, %p1082_p0 }
   0x6   :  { %1090 = shalt.err (!%p1087_p2)
}
   0x7   :  { %s1091_s21 = scalar_lea.vmem %s16_s13, 32  ;;  %p1096_p4 = scmp.lt.s32.totalorder %s16_s13, %s16_s13 }
   0x8   :  { %p1092_p3 = scmp.ne.s32.totalorder %s16_s13, %s1091_s21  ;;  %p1097_p5 = scmp.lt.s32.totalorder %s1091_s21, %s1091_s21 }
   0xa   :  { %p1098_p6 = por %p1097_p5, %p1096_p4 }
   0xc   :  { %p1099_p7 = pnand %p1098_p6, %p1092_p3 }
   0xe   :  { %1102 = shalt.err (!%p1099_p7)
}
   0xf   :  { %18 = dma.hbm_to_vmem [thread:$0]  %s1306_s0, 32, %s16_s13, [#allocation3]  }
  0x10   :  { %1103 = dma.done.wait [#allocation3], 32  }
  0x11   :  { %1104 = vsyncadd [#allocation3], 4294967264  ;;  %v52_v0 = vlaneseq  ;;  %v1106_v1 = vmov 1983009808   ;;  %v1107_v3 = vmov 0   ;;  %v28_v7 = vld [vmem:[%s1308_s2] sm:$0xff] }
  0x12   :  { %v50_v2 = vunpack.c.l.s4 %v1106_v1  ;;  %269 = vmatprep.mubr.bf16.mxu0 %v1107_v3  ;;  %310 = vmatprep.mubr.bf16.mxu1 %v1107_v3  ;;  %vm161_vm0 = vcmask 1041408   ;;  %v29_v8 = vld [vmem:[%s1308_s2 + $0x8] sm:$0xff]  ;;  %v48_v10 = vcombine.high %v28_v7, %v28_v7  ;;  %v30_v13 = vld [vmem:[%s1308_s2 + $0x10] sm:$0xff]  ;;  %v35_v20 = vld [vmem:[%s1307_s1] sm:$0xf]  ;;  %vm157_vm1 = vcmask 31744  }
  0x13   :  { %v53_v4 = vshrl.u32 %v52_v0, 7  ;;  %1074 = vset.pattern.permute.xlu0 %v1107_v3  ;;  %v65_v12 = vcombine.high %v29_v8, %v29_v8  ;;  %v82_v15 = vcombine.high %v30_v13, %v30_v13  ;;  %v1168_v25 = vld [vmem:[#allocation2] sm:$0x3]  ;;  %v31_v27 = vld [vmem:[%s1308_s2 + $0x18] sm:$0xff]  ;;  %v33_v43 = vld [vmem:[%s1308_s2 + $0x28] sm:$0xff]  ;;  %v1108_v57 = vmov 0.0  }
  0x14   :  { %v51_v5 = vunpack.c.0.s8 %v50_v2  ;;  %38 = vperm.xlu0 %1074, %v35_v20   ;;  %v99_v32 = vcombine.high %v31_v27, %v31_v27  ;;  %v32_v35 = vld [vmem:[%s1308_s2 + $0x20] sm:$0xff]  ;;  %v133_v48 = vcombine.high %v33_v43, %v33_v43  ;;  %v1022_v58 = vld.sshfl [vmem:[%s1308_s2 + $0x30] sm:$0x3 pattern:$0x76325410]  ;;  %vm1109_vm2 = vmmov 0  }
  0x15   :  { %v116_v40 = vcombine.high %v32_v35, %v32_v35  ;;  %v235_v59 = vsel %vm161_vm0, %v1022_v58, 0 }
  0x16   :  { %v1145_v6 = vsub.s32 %v51_v5, %v53_v4 }
  0x18   :  { %v55_v9 = vrot.slane %v28_v7, %v1145_v6  ;;  %v72_v11 = vrot.slane %v29_v8, %v1145_v6  ;;  %v89_v14 = vrot.slane %v30_v13, %v1145_v6  ;;  %v62_v18 = vrot.slane %v48_v10, %v1145_v6 }
  0x19   :  { %v79_v21 = vrot.slane %v65_v12, %v1145_v6  ;;  %v96_v24 = vrot.slane %v82_v15, %v1145_v6  ;;  %v106_v33 = vrot.slane %v31_v27, %v1145_v6  ;;  %v113_v34 = vrot.slane %v99_v32, %v1145_v6 }
  0x1a   :  { %v63_v16 = vcombine.high %v55_v9, %v55_v9  ;;  %v163_v17 = vsel %vm161_vm0, %v55_v9, 0  ;;  %v80_v19 = vcombine.high %v72_v11, %v72_v11  ;;  %v64_v22 = vcombine.high %v62_v18, %v62_v18 }
  0x1b   :  { %v169_v23 = vsel %vm161_vm0, %v62_v18, 0  ;;  %v81_v26 = vcombine.high %v79_v21, %v79_v21  ;;  %v175_v28 = vsel %vm161_vm0, %v72_v11, 0  ;;  %v97_v29 = vcombine.high %v89_v14, %v89_v14 }
  0x1c   :  { %1023 = vmatprep.subr.msk.bf16.mxu0 %vm161_vm0, %v63_v16  ;;  %1025 = vmatprep.subr.msk.bf16.mxu1 %vm161_vm0, %v64_v22  ;;  %v181_v30 = vsel %vm161_vm0, %v79_v21, 0  ;;  %v98_v31 = vcombine.high %v96_v24, %v96_v24  ;;  %v187_v36 = vsel %vm161_vm0, %v89_v14, 0  ;;  %v114_v37 = vcombine.high %v106_v33, %v106_v33 }
  0x1d   :  { %238 = vmatpush1.bf16.msra.mxu0 %v163_v17  ;;  %279 = vmatpush1.bf16.msra.mxu1 %v169_v23  ;;  %v193_v38 = vsel %vm161_vm0, %v96_v24, 0  ;;  %v115_v39 = vcombine.high %v113_v34, %v113_v34  ;;  %v123_v41 = vrot.slane %v32_v35, %v1145_v6  ;;  %v130_v42 = vrot.slane %v116_v40, %v1145_v6 }
  0x1e   :  { %1027 = vmatprep.subr.msk.bf16.mxu0 %vm161_vm0, %v80_v19  ;;  %1029 = vmatprep.subr.msk.bf16.mxu1 %vm161_vm0, %v81_v26  ;;  %v199_v44 = vsel %vm161_vm0, %v106_v33, 0  ;;  %v205_v46 = vsel %vm161_vm0, %v113_v34, 0  ;;  %v140_v49 = vrot.slane %v33_v43, %v1145_v6  ;;  %v147_v50 = vrot.slane %v133_v48, %v1145_v6 }
  0x1f   :  { %v131_v45 = vcombine.high %v123_v41, %v123_v41  ;;  %v132_v47 = vcombine.high %v130_v42, %v130_v42  ;;  %v211_v51 = vsel %vm161_vm0, %v123_v41, 0  ;;  %v217_v53 = vsel %vm161_vm0, %v130_v42, 0 }
  0x20   :  { %1024 = vmatmul.mubr.msk.bf16.vlgmr.msra.gmra.mrb[0].mxu0 %vm157_vm1, %v1168_v25  ;;  %1026 = vmatmul.mubr.msk.bf16.vlgmr.msra.gmra.mrb[0].mxu1 %vm157_vm1, %v1168_v25  ;;  %v148_v52 = vcombine.high %v140_v49, %v140_v49  ;;  %v149_v54 = vcombine.high %v147_v50, %v147_v50  ;;  %v223_v55 = vsel %vm161_vm0, %v140_v49, 0  ;;  %v229_v56 = vsel %vm161_vm0, %v147_v50, 0 }
  0x21   :  { %320 = vmatpush1.bf16.msra.mxu0 %v175_v28  ;;  %351 = vmatprep.mubr.bf16.mxu0 %v1107_v3 }
  0x22   :  { %1031 = vmatprep.subr.msk.bf16.mxu0 %vm161_vm0, %v97_v29  ;;  %361 = vmatpush1.bf16.msra.mxu1 %v181_v30 }
  0x23   :  { %392 = vmatprep.mubr.bf16.mxu1 %v1107_v3  ;;  %1033 = vmatprep.subr.msk.bf16.mxu1 %vm161_vm0, %v98_v31 }
  0x28   :  { %1028 = vmatmul.mubr.msk.bf16.vlgmr.msra.gmra.mrb[4].mxu0 %vm157_vm1, %v1168_v25  ;;  %1030 = vmatmul.mubr.msk.bf16.vlgmr.msra.gmra.mrb[4].mxu1 %vm157_vm1, %v1168_v25 }
  0x29   :  { %402 = vmatpush1.bf16.msra.mxu0 %v187_v36  ;;  %433 = vmatprep.mubr.bf16.mxu0 %v1107_v3 }
  0x2a   :  { %1035 = vmatprep.subr.msk.bf16.mxu0 %vm161_vm0, %v114_v37  ;;  %443 = vmatpush1.bf16.msra.mxu1 %v193_v38 }
  0x2b   :  { %474 = vmatprep.mubr.bf16.mxu1 %v1107_v3  ;;  %1037 = vmatprep.subr.msk.bf16.mxu1 %vm161_vm0, %v115_v39 }
  0x30   :  { %1032 = vmatmul.mubr.msk.bf16.vlgmr.msra.gmra.mrb[8].mxu0 %vm157_vm1, %v1168_v25  ;;  %1034 = vmatmul.mubr.msk.bf16.vlgmr.msra.gmra.mrb[8].mxu1 %vm157_vm1, %v1168_v25 }
  0x31   :  { %484 = vmatpush1.bf16.msra.mxu0 %v199_v44  ;;  %515 = vmatprep.mubr.bf16.mxu0 %v1107_v3 }
  0x32   :  { %1039 = vmatprep.subr.msk.bf16.mxu0 %vm161_vm0, %v131_v45  ;;  %525 = vmatpush1.bf16.msra.mxu1 %v205_v46 }
  0x33   :  { %556 = vmatprep.mubr.bf16.mxu1 %v1107_v3  ;;  %1041 = vmatprep.subr.msk.bf16.mxu1 %vm161_vm0, %v132_v47 }
  0x38   :  { %1036 = vmatmul.mubr.msk.bf16.vlgmr.msra.gmra.mrb[12].mxu0 %vm157_vm1, %v1168_v25  ;;  %1038 = vmatmul.mubr.msk.bf16.vlgmr.msra.gmra.mrb[12].mxu1 %vm157_vm1, %v1168_v25 }
  0x39   :  { %566 = vmatpush1.bf16.msra.mxu0 %v211_v51  ;;  %597 = vmatprep.mubr.bf16.mxu0 %v1107_v3 }
  0x3a   :  { %1043 = vmatprep.subr.msk.bf16.mxu0 %vm161_vm0, %v148_v52  ;;  %607 = vmatpush1.bf16.msra.mxu1 %v217_v53 }
  0x3b   :  { %638 = vmatprep.mubr.bf16.mxu1 %v1107_v3  ;;  %1045 = vmatprep.subr.msk.bf16.mxu1 %vm161_vm0, %v149_v54 }
  0x40   :  { %1040 = vmatmul.mubr.msk.bf16.vlgmr.msra.gmra.mrb[16].mxu0 %vm157_vm1, %v1168_v25  ;;  %1042 = vmatmul.mubr.msk.bf16.vlgmr.msra.gmra.mrb[16].mxu1 %vm157_vm1, %v1168_v25 }
  0x41   :  { %648 = vmatpush1.bf16.msra.mxu0 %v223_v55  ;;  %679 = vmatprep.mubr.bf16.mxu0 %v1107_v3 }
  0x42   :  { %1063 = vmatprep.subr.bf16.mxu0 %v1108_v57  ;;  %689 = vmatpush1.bf16.msra.mxu1 %v229_v56 }
  0x43   :  { %720 = vmatprep.mubr.bf16.mxu1 %v1107_v3 }
  0x48   :  { %1044 = vmatmul.mubr.msk.bf16.vlgmr.msra.gmra.mrb[20].mxu0 %vm157_vm1, %v1168_v25  ;;  %1046 = vmatmul.mubr.msk.bf16.vlgmr.msra.gmra.mrb[20].mxu1 %vm157_vm1, %v1168_v25 }
  0x49   :  { %1064 = vmatpush3.bf16.msra.mxu0 %v235_v59  ;;  %1065 = vmatprep.mubr.msk.bf16.mxu0 %vm1109_vm2, %v1108_v57 }
  0x50   :  { %1066 = vmatmul.mubr.msk.bf16.vlgmr.msra.gmra.mrb[24].mxu0 %vm157_vm1, %v1168_v25 }
  0x93   :  { %v1246_v60 = vpop.permute.xlu0 %38 }
  0xf3   :  { %v271_v61 = vpop.f32.mrb[0].mxu0  ;;  %v312_v2 = vpop.f32.mrb[0].mxu1 }
  0xf4   :  { %v272_v62 = vadd.f32 %v271_v61, %v1246_v60  ;;  %v273_v63 = vpop.f32.mrb[1].mxu0  ;;  %v313_v4 = vadd.f32 %v312_v2, %v1246_v60  ;;  %v314_v7 = vpop.f32.mrb[1].mxu1 }
  0xf5   :  { %v274_v0 = vadd.f32 %v273_v63, %v1246_v60  ;;  %v275_v1 = vpop.f32.mrb[2].mxu0  ;;  %v315_v9 = vadd.f32 %v314_v7, %v1246_v60  ;;  %v316_v10 = vpop.f32.mrb[2].mxu1 }
  0xf6   :  { %vm769_vm3 = vcmp.gt.f32.partialorder %v272_v62, 0.0  ;;  %v794_v3 = vmul.f32 0.01, %v272_v62  ;;  %v276_v5 = vpop.f32.mrb[3].mxu0  ;;  %vm771_vm5 = vcmp.gt.f32.partialorder %v313_v4, 0.0  ;;  %v317_v13 = vpop.f32.mrb[3].mxu1 }
  0xf7   :  { %vm770_vm4 = vcmp.gt.f32.partialorder %v274_v0, 0.0  ;;  %v795_v8 = vmul.f32 0.01, %v274_v0  ;;  %v796_v12 = vmul.f32 0.01, %v313_v4  ;;  %vm772_vm6 = vcmp.gt.f32.partialorder %v315_v9, 0.0 }
  0xf8   :  { %v819_v11 = vsel %vm769_vm3, %v272_v62, %v794_v3  ;;  %v797_v15 = vmul.f32 0.01, %v315_v9 }
  0xf9   :  { %v820_v14 = vsel %vm770_vm4, %v274_v0, %v795_v8  ;;  %v821_v17 = vsel %vm771_vm5, %v313_v4, %v796_v12 }
  0xfa   :  { %v1048_v16 = vpack.c.bf16 %v820_v14, %v819_v11  ;;  %v822_v18 = vsel %vm772_vm6, %v315_v9, %v797_v15 }
  0xfb   :  { %v353_v19 = vpop.f32.mrb[4].mxu0  ;;  %v1049_v20 = vpack.c.bf16 %v822_v18, %v821_v17  ;;  %v394_v26 = vpop.f32.mrb[4].mxu1 }
  0xfc   :  { %v354_v21 = vadd.f32 %v353_v19, %v1246_v60  ;;  %v355_v22 = vpop.f32.mrb[5].mxu0  ;;  %v902_v23 = vrot.slane %v1048_v16, %v1145_v6  ;;  %v395_v29 = vadd.f32 %v394_v26, %v1246_v60  ;;  %v396_v31 = vpop.f32.mrb[5].mxu1 }
  0xfd   :  { %v356_v24 = vadd.f32 %v355_v22, %v1246_v60  ;;  %v357_v25 = vpop.f32.mrb[6].mxu0  ;;  %v909_v27 = vrot.slane %v1049_v20, %v1145_v6  ;;  %v397_v33 = vadd.f32 %v396_v31, %v1246_v60  ;;  %v398_v34 = vpop.f32.mrb[6].mxu1 }
  0xfe   :  { %vm773_vm7 = vcmp.gt.f32.partialorder %v354_v21, 0.0  ;;  %v798_v28 = vmul.f32 0.01, %v354_v21  ;;  %v358_v30 = vpop.f32.mrb[7].mxu0  ;;  %vm775_vm9 = vcmp.gt.f32.partialorder %v395_v29, 0.0  ;;  %v399_v38 = vpop.f32.mrb[7].mxu1 }
  0xff   :  { %vm774_vm8 = vcmp.gt.f32.partialorder %v356_v24, 0.0  ;;  %v799_v32 = vmul.f32 0.01, %v356_v24  ;;  %v910_v35 = vcombine.low %v902_v23, %v909_v27  ;;  %v800_v37 = vmul.f32 0.01, %v395_v29 }
 0x100   :  { %v823_v36 = vsel %vm773_vm7, %v354_v21, %v798_v28  ;;  %vm776_vm10 = vcmp.gt.f32.partialorder %v397_v33, 0.0  ;;  %v801_v40 = vmul.f32 0.01, %v397_v33 }
 0x101   :  { %v824_v39 = vsel %vm774_vm8, %v356_v24, %v799_v32  ;;  %1010 = vst [vmem:[%s1309_s3] sm:$0xff] %v910_v35  ;;  %v825_v42 = vsel %vm775_vm9, %v395_v29, %v800_v37 }
 0x102   :  { %v1050_v41 = vpack.c.bf16 %v824_v39, %v823_v36  ;;  %v826_v43 = vsel %vm776_vm10, %v397_v33, %v801_v40 }
 0x103   :  { %v435_v44 = vpop.f32.mrb[8].mxu0  ;;  %v1051_v45 = vpack.c.bf16 %v826_v43, %v825_v42  ;;  %v476_v51 = vpop.f32.mrb[8].mxu1 }
 0x104   :  { %v436_v46 = vadd.f32 %v435_v44, %v1246_v60  ;;  %v437_v47 = vpop.f32.mrb[9].mxu0  ;;  %v919_v48 = vrot.slane %v1050_v41, %v1145_v6  ;;  %v477_v54 = vadd.f32 %v476_v51, %v1246_v60  ;;  %v478_v56 = vpop.f32.mrb[9].mxu1 }
 0x105   :  { %v438_v49 = vadd.f32 %v437_v47, %v1246_v60  ;;  %v439_v50 = vpop.f32.mrb[10].mxu0  ;;  %v926_v52 = vrot.slane %v1051_v45, %v1145_v6  ;;  %v479_v58 = vadd.f32 %v478_v56, %v1246_v60  ;;  %v480_v59 = vpop.f32.mrb[10].mxu1 }
 0x106   :  { %vm777_vm11 = vcmp.gt.f32.partialorder %v436_v46, 0.0  ;;  %v802_v53 = vmul.f32 0.01, %v436_v46  ;;  %v440_v55 = vpop.f32.mrb[11].mxu0  ;;  %vm779_vm13 = vcmp.gt.f32.partialorder %v477_v54, 0.0  ;;  %v481_v0 = vpop.f32.mrb[11].mxu1 }
 0x107   :  { %vm778_vm12 = vcmp.gt.f32.partialorder %v438_v49, 0.0  ;;  %v803_v57 = vmul.f32 0.01, %v438_v49  ;;  %v927_v61 = vcombine.low %v919_v48, %v926_v52  ;;  %v804_v63 = vmul.f32 0.01, %v477_v54 }
 0x108   :  { %v827_v62 = vsel %vm777_vm11, %v436_v46, %v802_v53  ;;  %vm780_vm14 = vcmp.gt.f32.partialorder %v479_v58, 0.0  ;;  %v805_v2 = vmul.f32 0.01, %v479_v58 }
 0x109   :  { %v828_v1 = vsel %vm778_vm12, %v438_v49, %v803_v57  ;;  %1011 = vst [vmem:[%s1309_s3 + $0x8] sm:$0xff] %v927_v61  ;;  %v829_v4 = vsel %vm779_vm13, %v477_v54, %v804_v63 }
 0x10a   :  { %v1052_v3 = vpack.c.bf16 %v828_v1, %v827_v62  ;;  %v830_v5 = vsel %vm780_vm14, %v479_v58, %v805_v2 }
 0x10b   :  { %v517_v7 = vpop.f32.mrb[12].mxu0  ;;  %v1053_v8 = vpack.c.bf16 %v830_v5, %v829_v4  ;;  %v558_v14 = vpop.f32.mrb[12].mxu1 }
 0x10c   :  { %v518_v9 = vadd.f32 %v517_v7, %v1246_v60  ;;  %v519_v10 = vpop.f32.mrb[13].mxu0  ;;  %v936_v11 = vrot.slane %v1052_v3, %v1145_v6  ;;  %v559_v17 = vadd.f32 %v558_v14, %v1246_v60  ;;  %v560_v19 = vpop.f32.mrb[13].mxu1 }
 0x10d   :  { %v520_v12 = vadd.f32 %v519_v10, %v1246_v60  ;;  %v521_v13 = vpop.f32.mrb[14].mxu0  ;;  %v943_v15 = vrot.slane %v1053_v8, %v1145_v6  ;;  %v561_v21 = vadd.f32 %v560_v19, %v1246_v60  ;;  %v562_v22 = vpop.f32.mrb[14].mxu1 }
 0x10e   :  { %vm781_vm15 = vcmp.gt.f32.partialorder %v518_v9, 0.0  ;;  %v806_v16 = vmul.f32 0.01, %v518_v9  ;;  %v522_v18 = vpop.f32.mrb[15].mxu0  ;;  %vm783_vm1 = vcmp.gt.f32.partialorder %v559_v17, 0.0  ;;  %v563_v26 = vpop.f32.mrb[15].mxu1 }
 0x10f   :  { %vm782_vm0 = vcmp.gt.f32.partialorder %v520_v12, 0.0  ;;  %v807_v20 = vmul.f32 0.01, %v520_v12  ;;  %v944_v23 = vcombine.low %v936_v11, %v943_v15  ;;  %v808_v25 = vmul.f32 0.01, %v559_v17 }
 0x110   :  { %v831_v24 = vsel %vm781_vm15, %v518_v9, %v806_v16  ;;  %vm784_vm2 = vcmp.gt.f32.partialorder %v561_v21, 0.0  ;;  %v809_v28 = vmul.f32 0.01, %v561_v21 }
 0x111   :  { %v832_v27 = vsel %vm782_vm0, %v520_v12, %v807_v20  ;;  %1012 = vst [vmem:[%s1309_s3 + $0x10] sm:$0xff] %v944_v23  ;;  %v833_v30 = vsel %vm783_vm1, %v559_v17, %v808_v25 }
 0x112   :  { %v1054_v29 = vpack.c.bf16 %v832_v27, %v831_v24  ;;  %v834_v31 = vsel %vm784_vm2, %v561_v21, %v809_v28 }
 0x113   :  { %v599_v32 = vpop.f32.mrb[16].mxu0  ;;  %v1055_v33 = vpack.c.bf16 %v834_v31, %v833_v30  ;;  %v640_v39 = vpop.f32.mrb[16].mxu1 }
 0x114   :  { %v600_v34 = vadd.f32 %v599_v32, %v1246_v60  ;;  %v601_v35 = vpop.f32.mrb[17].mxu0  ;;  %v953_v36 = vrot.slane %v1054_v29, %v1145_v6  ;;  %v641_v42 = vadd.f32 %v640_v39, %v1246_v60  ;;  %v642_v44 = vpop.f32.mrb[17].mxu1 }
 0x115   :  { %v602_v37 = vadd.f32 %v601_v35, %v1246_v60  ;;  %v603_v38 = vpop.f32.mrb[18].mxu0  ;;  %v960_v40 = vrot.slane %v1055_v33, %v1145_v6  ;;  %v643_v46 = vadd.f32 %v642_v44, %v1246_v60  ;;  %v644_v47 = vpop.f32.mrb[18].mxu1 }
 0x116   :  { %vm785_vm3 = vcmp.gt.f32.partialorder %v600_v34, 0.0  ;;  %v810_v41 = vmul.f32 0.01, %v600_v34  ;;  %v604_v43 = vpop.f32.mrb[19].mxu0  ;;  %vm787_vm5 = vcmp.gt.f32.partialorder %v641_v42, 0.0  ;;  %v645_v51 = vpop.f32.mrb[19].mxu1 }
 0x117   :  { %vm786_vm4 = vcmp.gt.f32.partialorder %v602_v37, 0.0  ;;  %v811_v45 = vmul.f32 0.01, %v602_v37  ;;  %v961_v48 = vcombine.low %v953_v36, %v960_v40  ;;  %v812_v50 = vmul.f32 0.01, %v641_v42 }
 0x118   :  { %v835_v49 = vsel %vm785_vm3, %v600_v34, %v810_v41  ;;  %vm788_vm6 = vcmp.gt.f32.partialorder %v643_v46, 0.0  ;;  %v813_v53 = vmul.f32 0.01, %v643_v46 }
 0x119   :  { %v836_v52 = vsel %vm786_vm4, %v602_v37, %v811_v45  ;;  %1013 = vst [vmem:[%s1309_s3 + $0x18] sm:$0xff] %v961_v48  ;;  %v837_v55 = vsel %vm787_vm5, %v641_v42, %v812_v50 }
 0x11a   :  { %v1056_v54 = vpack.c.bf16 %v836_v52, %v835_v49  ;;  %v838_v56 = vsel %vm788_vm6, %v643_v46, %v813_v53 }
 0x11b   :  { %v681_v57 = vpop.f32.mrb[20].mxu0  ;;  %v1057_v58 = vpack.c.bf16 %v838_v56, %v837_v55  ;;  %v722_v1 = vpop.f32.mrb[20].mxu1 }
 0x11c   :  { %v682_v59 = vadd.f32 %v681_v57, %v1246_v60  ;;  %v683_v61 = vpop.f32.mrb[21].mxu0  ;;  %v970_v62 = vrot.slane %v1056_v54, %v1145_v6  ;;  %v723_v4 = vadd.f32 %v722_v1, %v1246_v60  ;;  %v724_v7 = vpop.f32.mrb[21].mxu1 }
 0x11d   :  { %v684_v63 = vadd.f32 %v683_v61, %v1246_v60  ;;  %v685_v0 = vpop.f32.mrb[22].mxu0  ;;  %v977_v2 = vrot.slane %v1057_v58, %v1145_v6  ;;  %v725_v9 = vadd.f32 %v724_v7, %v1246_v60  ;;  %v726_v10 = vpop.f32.mrb[22].mxu1 }
 0x11e   :  { %vm789_vm7 = vcmp.gt.f32.partialorder %v682_v59, 0.0  ;;  %v814_v3 = vmul.f32 0.01, %v682_v59  ;;  %v686_v5 = vpop.f32.mrb[23].mxu0  ;;  %vm791_vm9 = vcmp.gt.f32.partialorder %v723_v4, 0.0  ;;  %v727_v14 = vpop.f32.mrb[23].mxu1 }
 0x11f   :  { %vm790_vm8 = vcmp.gt.f32.partialorder %v684_v63, 0.0  ;;  %v815_v8 = vmul.f32 0.01, %v684_v63  ;;  %v978_v11 = vcombine.low %v970_v62, %v977_v2  ;;  %v816_v13 = vmul.f32 0.01, %v723_v4 }
 0x120   :  { %v839_v12 = vsel %vm789_vm7, %v682_v59, %v814_v3  ;;  %vm792_vm10 = vcmp.gt.f32.partialorder %v725_v9, 0.0  ;;  %v817_v16 = vmul.f32 0.01, %v725_v9 }
 0x121   :  { %v840_v15 = vsel %vm790_vm8, %v684_v63, %v815_v8  ;;  %1014 = vst [vmem:[%s1309_s3 + $0x20] sm:$0xff] %v978_v11  ;;  %v841_v18 = vsel %vm791_vm9, %v723_v4, %v816_v13 }
 0x122   :  { %v1058_v17 = vpack.c.bf16 %v840_v15, %v839_v12  ;;  %v842_v19 = vsel %vm792_vm10, %v725_v9, %v817_v16 }
 0x123   :  { %v763_v20 = vpop.f32.mrb[24].mxu0  ;;  %v1059_v21 = vpack.c.bf16 %v842_v19, %v841_v18 }
 0x124   :  { %v764_v22 = vadd.f32 %v763_v20, %v1246_v60  ;;  %v1067_v23 = vpop.f32.mrb[25].mxu0  ;;  %v987_v25 = vrot.slane %v1058_v17, %v1145_v6 }
 0x125   :  { %v766_v24 = vpop.f32.mrb[26].mxu0  ;;  %v994_v26 = vrot.slane %v1059_v21, %v1145_v6 }
 0x126   :  { %vm793_vm11 = vcmp.gt.f32.partialorder %v764_v22, 0.0  ;;  %v818_v27 = vmul.f32 0.01, %v764_v22  ;;  %v1068_v28 = vpop.f32.mrb[27].mxu0 }
 0x127   :  { %v995_v29 = vcombine.low %v987_v25, %v994_v26 }
 0x128   :  { %v843_v30 = vsel %vm793_vm11, %v764_v22, %v818_v27 }
 0x129   :  { %v868_v31 = vpack.c.bf16 %v843_v30, %v843_v30  ;;  %1015 = vst [vmem:[%s1309_s3 + $0x28] sm:$0xff] %v995_v29 }
 0x12b   :  { %1060 = vst.sshfl [vmem:[%s1309_s3 + $0x30] sm:$0x3 pattern:$0x76325410] %v868_v31 }
 0x12c   :  { %1021 = vsyncpa [#allocation3], 1 }

// kernel: autoencoder_forward.7
= control target key start
LH: loop header
LB: loop body
LE: loop exit
PB: predicated region body
PF: predicated region fallthrough
CT: control target
= control target key end

     0   :  { %8 = vsyncpa [#allocation3], 0  ;;  %s371_s12 = smov [#allocation2]   ;;  %s447_s0 = inlined_call_operand.hbm [shape: bf16[8,16], index: 0, kind: input, shape index: {}]   ;;  %s448_s1 = inlined_call_operand.vmem [shape: f32[8,1], index: 1, kind: input, shape index: {}]   ;;  %s449_s2 = inlined_call_operand.vmem [shape: bf16[16,800], index: 2, kind: input, shape index: {}]   ;;  %s450_s3 = inlined_call_operand.vmem [shape: bf16[8,800], index: 3, kind: output, shape index: {}]  }
   0x1   :  { %s15_s13 = sshll.u32 %s371_s12, 4  ;;  %s347_s16 = scalar_lea.hbm %s447_s0, 64  ;;  %s16_s13 = int_to_ptr.vmem [resolvable:$true] %s15_s13 }
   0x2   :  { %p348_p0 = scmp.ne.s32.totalorder %s447_s0, %s347_s16  ;;  %p351_p1 = scmp.lt.u32.totalorder %s347_s16, %s447_s0 }
   0x4   :  { %p353_p2 = pnand %p351_p1, %p348_p0 }
   0x6   :  { %356 = shalt.err (!%p353_p2)
}
   0x7   :  { %s357_s21 = scalar_lea.vmem %s16_s13, 64  ;;  %p362_p4 = scmp.lt.s32.totalorder %s16_s13, %s16_s13 }
   0x8   :  { %p358_p3 = scmp.ne.s32.totalorder %s16_s13, %s357_s21  ;;  %p363_p5 = scmp.lt.s32.totalorder %s357_s21, %s357_s21 }
   0xa   :  { %p364_p6 = por %p363_p5, %p362_p4 }
   0xc   :  { %p365_p7 = pnand %p364_p6, %p358_p3 }
   0xe   :  { %368 = shalt.err (!%p365_p7)
}
   0xf   :  { %18 = dma.hbm_to_vmem [thread:$0]  %s447_s0, 64, %s16_s13, [#allocation3]  }
  0x10   :  { %369 = dma.done.wait [#allocation3], 64  }
  0x11   :  { %370 = vsyncadd [#allocation3], 4294967232  ;;  %v372_v0 = vmov 0   ;;  %v337_v1 = vld [vmem:[%s449_s2 + $0x4] ss:$28 sps:$4 sm:$0xff]   ;;  %vm78_vm0 = vcmask 130048  }
  0x12   :  { %114 = vmatprep.mubr.bf16.mxu0 %v372_v0  ;;  %155 = vmatprep.mubr.bf16.mxu1 %v372_v0  ;;  %v339_v2 = vld [vmem:[%s449_s2 + $0xc] ss:$28 sps:$4 sm:$0xff]   ;;  %v341_v3 = vld [vmem:[%s449_s2] ss:$28 sps:$4 sm:$0xff]   ;;  %v345_v7 = vld [vmem:[%s449_s2 + $0x14] ss:$28 sps:$4 sm:$0xff]  }
  0x13   :  { %336 = vset.pattern.permute.xlu0 %v372_v0  ;;  %82 = vmatprep.subr.bf16.mxu0 %v337_v1  ;;  %v342_v4 = vld [vmem:[%s449_s2 + $0x8] ss:$28 sps:$4 sm:$0xff]   ;;  %v27_v5 = vld [vmem:[#allocation2] sm:$0xf]  ;;  %v343_v6 = vld [vmem:[%s449_s2 + $0x10] ss:$28 sps:$4 sm:$0xff]  }
  0x14   :  { %123 = vmatprep.subr.bf16.mxu1 %v339_v2  ;;  %83 = vmatpush1.bf16.msra.mxu0 %v341_v3  ;;  %v373_v8 = vmov 0.0   ;;  %v346_v9 = vld [vmem:[%s449_s2 + $0x18] ss:$28 sps:$4 sm:$0xff]   ;;  %v36_v10 = vld [vmem:[%s448_s1] sm:$0xff]  ;;  %vm374_vm1 = vmmov 0   ;;  %vm298_vm9 = vcmask 257024  }
  0x15   :  { %124 = vmatpush1.bf16.msra.mxu1 %v342_v4  ;;  %164 = vmatprep.subr.bf16.mxu0 %v345_v7 }
  0x16   :  { %326 = vmatprep.subr.bf16.mxu1 %v373_v8  ;;  %39 = vperm.xlu0 %336, %v36_v10  }
  0x17   :  { %312 = vmatmul.mubr.msk.bf16.vlgmr.msra.gmra.mrb[0].mxu0 %vm78_vm0, %v27_v5 }
  0x18   :  { %313 = vmatmul.mubr.msk.bf16.vlgmr.msra.gmra.mrb[0].mxu1 %vm78_vm0, %v27_v5  ;;  %165 = vmatpush1.bf16.msra.mxu0 %v343_v6 }
  0x19   :  { %327 = vmatpush3.bf16.msra.mxu1 %v346_v9  ;;  %196 = vmatprep.mubr.bf16.mxu0 %v372_v0 }
  0x1a   :  { %328 = vmatprep.mubr.msk.bf16.mxu1 %vm374_vm1, %v373_v8 }
  0x1f   :  { %314 = vmatmul.mubr.msk.bf16.vlgmr.msra.gmra.mrb[4].mxu0 %vm78_vm0, %v27_v5 }
  0x20   :  { %329 = vmatmul.mubr.msk.bf16.vlgmr.msra.gmra.mrb[4].mxu1 %vm78_vm0, %v27_v5 }
  0x95   :  { %v40_v11 = vpop.permute.xlu0 %39 }
  0xea   :  { %v116_v12 = vpop.f32.mrb[0].mxu0 }
  0xeb   :  { %v157_v13 = vpop.f32.mrb[0].mxu1  ;;  %v117_v14 = vadd.f32 %v116_v12, %v40_v11  ;;  %v118_v16 = vpop.f32.mrb[1].mxu0 }
  0xec   :  { %v158_v15 = vadd.f32 %v157_v13, %v40_v11  ;;  %v159_v17 = vpop.f32.mrb[1].mxu1  ;;  %v119_v18 = vadd.f32 %v118_v16, %v40_v11  ;;  %v120_v20 = vpop.f32.mrb[2].mxu0 }
  0xed   :  { %v160_v19 = vadd.f32 %v159_v17, %v40_v11  ;;  %v161_v21 = vpop.f32.mrb[2].mxu1  ;;  %vm245_vm2 = vcmp.gt.f32.partialorder %v117_v14, 0.0  ;;  %v252_v22 = vmul.f32 0.01, %v117_v14  ;;  %v121_v28 = vpop.f32.mrb[3].mxu0 }
  0xee   :  { %vm247_vm3 = vcmp.gt.f32.partialorder %v158_v15, 0.0  ;;  %v254_v23 = vmul.f32 0.01, %v158_v15  ;;  %vm246_vm4 = vcmp.gt.f32.partialorder %v119_v18, 0.0  ;;  %v253_v24 = vmul.f32 0.01, %v119_v18 }
  0xef   :  { %vm248_vm5 = vcmp.gt.f32.partialorder %v160_v19, 0.0  ;;  %v255_v25 = vmul.f32 0.01, %v160_v19  ;;  %v259_v26 = vsel %vm245_vm2, %v117_v14, %v252_v22  ;;  %v162_v29 = vpop.f32.mrb[3].mxu1 }
  0xf0   :  { %v261_v27 = vsel %vm247_vm3, %v158_v15, %v254_v23  ;;  %v260_v30 = vsel %vm246_vm4, %v119_v18, %v253_v24 }
  0xf1   :  { %v262_v31 = vsel %vm248_vm5, %v160_v19, %v255_v25  ;;  %v320_v32 = vpack.c.bf16 %v260_v30, %v259_v26 }
  0xf2   :  { %v321_v33 = vpack.c.bf16 %v262_v31, %v261_v27  ;;  %v198_v34 = vpop.f32.mrb[4].mxu0 }
  0xf3   :  { %v239_v35 = vpop.f32.mrb[4].mxu1  ;;  %295 = vst [vmem:[%s450_s3] sm:$0xff] %v320_v32  ;;  %v199_v36 = vadd.f32 %v198_v34, %v40_v11  ;;  %v200_v38 = vpop.f32.mrb[5].mxu0 }
  0xf4   :  { %296 = vst [vmem:[%s450_s3 + $0x8] sm:$0xff] %v321_v33  ;;  %v240_v37 = vadd.f32 %v239_v35, %v40_v11  ;;  %v330_v39 = vpop.f32.mrb[5].mxu1  ;;  %v201_v40 = vadd.f32 %v200_v38, %v40_v11  ;;  %v202_v41 = vpop.f32.mrb[6].mxu0 }
  0xf5   :  { %v242_v42 = vpop.f32.mrb[6].mxu1  ;;  %vm249_vm6 = vcmp.gt.f32.partialorder %v199_v36, 0.0  ;;  %v256_v43 = vmul.f32 0.01, %v199_v36  ;;  %v203_v46 = vpop.f32.mrb[7].mxu0 }
  0xf6   :  { %vm251_vm7 = vcmp.gt.f32.partialorder %v240_v37, 0.0  ;;  %v258_v44 = vmul.f32 0.01, %v240_v37  ;;  %vm250_vm8 = vcmp.gt.f32.partialorder %v201_v40, 0.0  ;;  %v257_v45 = vmul.f32 0.01, %v201_v40 }
  0xf7   :  { %v331_v47 = vpop.f32.mrb[7].mxu1  ;;  %v263_v48 = vsel %vm249_vm6, %v199_v36, %v256_v43 }
  0xf8   :  { %v265_v49 = vsel %vm251_vm7, %v240_v37, %v258_v44  ;;  %v264_v51 = vsel %vm250_vm8, %v201_v40, %v257_v45 }
  0xf9   :  { %v323_v50 = vpack.c.bf16 %v265_v49, %v265_v49  ;;  %v322_v52 = vpack.c.bf16 %v264_v51, %v263_v48 }
  0xfb   :  { %299 = vst.msk [vmem:[%s450_s3 + $0x18] sm:$0xf] %vm298_vm9, %v323_v50  ;;  %297 = vst [vmem:[%s450_s3 + $0x10] sm:$0xff] %v322_v52 }
  0xfc   :  { %304 = vsyncpa [#allocation3], 1 }

// kernel: autoencoder_forward.8
= control target key start
LH: loop header
LB: loop body
LE: loop exit
PB: predicated region body
PF: predicated region fallthrough
CT: control target
= control target key end

     0   :  { %v216_v0 = vmov 0.0   ;;  %vm217_vm0 = vmmov 0   ;;  %v218_v2 = vmov 0   ;;  %vm154_vm2 = vcmask 404480   ;;  %s278_s2 = inlined_call_operand.vmem [shape: bf16[128,50], index: 2, kind: input, shape index: {}]   ;;  %s279_s1 = inlined_call_operand.vmem [shape: f32[16,1], index: 1, kind: input, shape index: {}]   ;;  %s280_s0 = inlined_call_operand.vmem [shape: bf16[16,128], index: 0, kind: input, shape index: {}]   ;;  %s281_s3 = inlined_call_operand.vmem [shape: bf16[16,50], index: 3, kind: output, shape index: {}]  }
   0x1   :  { %183 = vmatprep.subr.bf16.mxu0 %v216_v0  ;;  %v207_v1 = vld [vmem:[%s278_s2] sm:$0xff]   ;;  %199 = vmatprep.mubr.msk.bf16.mxu0 %vm217_vm0, %v216_v0  ;;  %v208_v3 = vld [vmem:[%s278_s2 + $0x8] sm:$0xff]   ;;  %v209_v4 = vld [vmem:[%s278_s2 + $0x10] sm:$0xff]  }
   0x2   :  { %206 = vset.pattern.permute.xlu0 %v218_v2  ;;  %184 = vmatpush3.bf16.msra.mxu0 %v207_v1  ;;  %v33_v5 = vld [vmem:[%s279_s1] sm:$0xff]  ;;  %v210_v6 = vld [vmem:[%s278_s2 + $0x18] sm:$0xff]   ;;  %v34_v7 = vld [vmem:[%s279_s1 + $0x8] sm:$0xff] }
   0x3   :  { %185 = vmatprep.subr.bf16.mxu0 %v216_v0  ;;  %37 = vperm.xlu0 %206, %v33_v5   ;;  %v211_v8 = vld [vmem:[%s278_s2 + $0x20] sm:$0xff]   ;;  %v212_v9 = vld [vmem:[%s278_s2 + $0x28] sm:$0xff]   ;;  %v213_v10 = vld [vmem:[%s278_s2 + $0x30] sm:$0xff]  }
   0x4   :  { %v214_v11 = vld [vmem:[%s278_s2 + $0x38] sm:$0xff]   ;;  %v215_v12 = vld [vmem:[%s280_s0] sm:$0xff]  }
   0x6   :  { %186 = vmatpush3.bf16.msra.mxu0 %v208_v3 }
   0x7   :  { %187 = vmatprep.subr.bf16.mxu0 %v216_v0  ;;  %42 = vperm.xlu0 %206, %v34_v7  }
   0xa   :  { %188 = vmatpush3.bf16.msra.mxu0 %v209_v4 }
   0xb   :  { %189 = vmatprep.subr.bf16.mxu0 %v216_v0 }
   0xe   :  { %190 = vmatpush3.bf16.msra.mxu0 %v210_v6 }
   0xf   :  { %191 = vmatprep.subr.bf16.mxu0 %v216_v0 }
  0x12   :  { %192 = vmatpush3.bf16.msra.mxu0 %v211_v8 }
  0x13   :  { %193 = vmatprep.subr.bf16.mxu0 %v216_v0 }
  0x16   :  { %194 = vmatpush3.bf16.msra.mxu0 %v212_v9 }
  0x17   :  { %195 = vmatprep.subr.bf16.mxu0 %v216_v0 }
  0x1a   :  { %196 = vmatpush3.bf16.msra.mxu0 %v213_v10 }
  0x1b   :  { %197 = vmatprep.subr.bf16.mxu0 %v216_v0 }
  0x1e   :  { %198 = vmatpush3.bf16.msra.mxu0 %v214_v11 }
  0x21   :  { %200 = vmatmul.mubr.bf16.vlgmr.msra.gmra.mrb[0].mxu0 %v215_v12 }
  0x82   :  { %v38_v13 = vpop.permute.xlu0 %37 }
  0x86   :  { %v43_v17 = vpop.permute.xlu0 %42 }
  0xf4   :  { %v133_v14 = vpop.f32.mrb[0].mxu0 }
  0xf5   :  { %v134_v15 = vadd.f32 %v133_v14, %v38_v13  ;;  %v201_v16 = vpop.f32.mrb[1].mxu0 }
  0xf6   :  { %v136_v18 = vpop.f32.mrb[2].mxu0 }
  0xf7   :  { %vm140_vm1 = vcmp.gt.f32.partialorder %v134_v15, 0.0  ;;  %v142_v19 = vmul.f32 0.01, %v134_v15  ;;  %v137_v20 = vadd.f32 %v136_v18, %v43_v17  ;;  %v202_v21 = vpop.f32.mrb[3].mxu0 }
  0xf9   :  { %v144_v22 = vsel %vm140_vm1, %v134_v15, %v142_v19  ;;  %vm141_vm3 = vcmp.gt.f32.partialorder %v137_v20, 0.0  ;;  %v143_v23 = vmul.f32 0.01, %v137_v20 }
  0xfa   :  { %v172_v24 = vpack.c.bf16 %v144_v22, %v144_v22 }
  0xfb   :  { %v145_v25 = vsel %vm141_vm3, %v137_v20, %v143_v23 }
  0xfc   :  { %155 = vst.msk [vmem:[%s281_s3] sm:$0xf] %vm154_vm2, %v172_v24  ;;  %v173_v26 = vpack.c.bf16 %v145_v25, %v145_v25 }
  0xfe   :  { %156 = vst.msk [vmem:[%s281_s3 + $0x4] sm:$0xf] %vm154_vm2, %v173_v26 }

// kernel: autoencoder_forward.10
= control target key start
LH: loop header
LB: loop body
LE: loop exit
PB: predicated region body
PF: predicated region fallthrough
CT: control target
= control target key end

     0   :  { %vm60_vm0 = vcmask 1043456   ;;  %v374_v2 = vmov 0   ;;  %vm56_vm1 = vcmask 64512   ;;  %v375_v16 = vmov 0.0   ;;  %s453_s2 = inlined_call_operand.vmem [shape: bf16[8,800], index: 2, kind: input, shape index: {}]   ;;  %s454_s0 = inlined_call_operand.vmem [shape: bf16[16,8], index: 0, kind: input, shape index: {}]   ;;  %s455_s1 = inlined_call_operand.vmem [shape: f32[16,1], index: 1, kind: input, shape index: {}]   ;;  %s456_s3 = inlined_call_operand.vmem [shape: bf16[16,800], index: 3, kind: output, shape index: {}]  }
   0x1   :  { %v17_v0 = vld [vmem:[%s453_s2] sm:$0xff]  ;;  %v18_v1 = vld [vmem:[%s453_s2 + $0x8] sm:$0xff]  ;;  %114 = vmatprep.mubr.bf16.mxu0 %v374_v2  ;;  %157 = vmatprep.mubr.bf16.mxu1 %v374_v2  ;;  %v19_v7 = vld [vmem:[%s453_s2 + $0x10] sm:$0xff]  ;;  %vm376_vm2 = vmmov 0   ;;  %vm313_vm3 = vcmask 257024  }
   0x2   :  { %v325_v3 = vcombine.high %v17_v0, %v17_v0  ;;  %v327_v4 = vcombine.high %v18_v1, %v18_v1  ;;  %v324_v5 = vcombine.low %v17_v0, %v17_v0  ;;  %v326_v6 = vcombine.low %v18_v1, %v18_v1  ;;  %365 = vset.pattern.permute.xlu0 %v374_v2  ;;  %v373_v10 = vld [vmem:[%s453_s2 + $0x18] ss:$0 sps:$4 sm:$0xff]   ;;  %v370_v13 = vld [vmem:[%s454_s0] sm:$0xff]   ;;  %v22_v18 = vld [vmem:[%s455_s1 + $0x8] sm:$0xff] }
   0x3   :  { %v329_v8 = vcombine.high %v19_v7, %v19_v7  ;;  %v328_v9 = vcombine.low %v19_v7, %v19_v7  ;;  %v21_v14 = vld [vmem:[%s455_s1] sm:$0xff]  ;;  %v80_v17 = vsel %vm60_vm0, %v373_v10, 0 }
   0x4   :  { %331 = vmatprep.subr.msk.bf16.mxu0 %vm60_vm0, %v325_v3  ;;  %333 = vmatprep.subr.msk.bf16.mxu1 %vm60_vm0, %v327_v4  ;;  %v62_v11 = vsel %vm60_vm0, %v324_v5, 0  ;;  %v68_v12 = vsel %vm60_vm0, %v326_v6, 0 }
   0x5   :  { %83 = vmatpush1.bf16.msra.mxu0 %v62_v11  ;;  %126 = vmatpush1.bf16.msra.mxu1 %v68_v12  ;;  %v74_v15 = vsel %vm60_vm0, %v328_v9, 0 }
   0x6   :  { %335 = vmatprep.subr.msk.bf16.mxu0 %vm60_vm0, %v329_v8  ;;  %356 = vmatprep.subr.bf16.mxu1 %v375_v16 }
   0x7   :  { %25 = vperm.xlu0 %365, %v21_v14  }
   0x8   :  { %332 = vmatmul.mubr.msk.bf16.vlgmr.msra.gmra.mrb[0].mxu0 %vm56_vm1, %v370_v13  ;;  %334 = vmatmul.mubr.msk.bf16.vlgmr.msra.gmra.mrb[0].mxu1 %vm56_vm1, %v370_v13 }
   0x9   :  { %169 = vmatpush1.bf16.msra.mxu0 %v74_v15  ;;  %357 = vmatpush3.bf16.msra.mxu1 %v80_v17 }
   0xa   :  { %200 = vmatprep.mubr.bf16.mxu0 %v374_v2  ;;  %358 = vmatprep.mubr.msk.bf16.mxu1 %vm376_vm2, %v375_v16 }
   0xb   :  { %30 = vperm.xlu0 %365, %v22_v18  }
  0x10   :  { %336 = vmatmul.mubr.msk.bf16.vlgmr.msra.gmra.mrb[4].mxu0 %vm56_vm1, %v370_v13  ;;  %359 = vmatmul.mubr.msk.bf16.vlgmr.msra.gmra.mrb[4].mxu1 %vm56_vm1, %v370_v13 }
  0x86   :  { %v26_v19 = vpop.permute.xlu0 %25 }
  0x8a   :  { %v31_v20 = vpop.permute.xlu0 %30 }
  0xdb   :  { %v116_v21 = vpop.f32.mrb[0].mxu0  ;;  %v159_v22 = vpop.f32.mrb[0].mxu1 }
  0xdc   :  { %v117_v23 = vadd.f32 %v116_v21, %v26_v19  ;;  %v160_v24 = vadd.f32 %v159_v22, %v26_v19  ;;  %v118_v25 = vpop.f32.mrb[1].mxu0  ;;  %v161_v26 = vpop.f32.mrb[1].mxu1 }
  0xdd   :  { %v119_v27 = vadd.f32 %v118_v25, %v26_v19  ;;  %v162_v28 = vadd.f32 %v161_v26, %v26_v19  ;;  %v120_v29 = vpop.f32.mrb[2].mxu0  ;;  %v163_v30 = vpop.f32.mrb[2].mxu1 }
  0xde   :  { %v252_v31 = vmax.f32 %v117_v23, 0.0  ;;  %v254_v32 = vmax.f32 %v160_v24, 0.0  ;;  %v121_v33 = vadd.f32 %v120_v29, %v31_v20  ;;  %v164_v34 = vadd.f32 %v163_v30, %v31_v20  ;;  %v122_v35 = vpop.f32.mrb[3].mxu0  ;;  %v165_v36 = vpop.f32.mrb[3].mxu1 }
  0xdf   :  { %v253_v37 = vmax.f32 %v119_v27, 0.0  ;;  %v255_v38 = vmax.f32 %v162_v28, 0.0  ;;  %v123_v39 = vadd.f32 %v122_v35, %v31_v20  ;;  %v166_v40 = vadd.f32 %v165_v36, %v31_v20 }
  0xe0   :  { %v259_v41 = vmax.f32 %v121_v33, 0.0  ;;  %v261_v42 = vmax.f32 %v164_v34, 0.0 }
  0xe1   :  { %v346_v43 = vpack.c.bf16 %v253_v37, %v252_v31  ;;  %v347_v44 = vpack.c.bf16 %v255_v38, %v254_v32  ;;  %v260_v45 = vmax.f32 %v123_v39, 0.0  ;;  %v262_v46 = vmax.f32 %v166_v40, 0.0 }
  0xe3   :  { %310 = vst [vmem:[%s456_s3] sm:$0xff] %v346_v43  ;;  %311 = vst [vmem:[%s456_s3 + $0x8] sm:$0xff] %v347_v44  ;;  %v350_v47 = vpack.c.bf16 %v260_v45, %v259_v41  ;;  %v351_v48 = vpack.c.bf16 %v262_v46, %v261_v42  ;;  %v202_v49 = vpop.f32.mrb[4].mxu0  ;;  %v245_v50 = vpop.f32.mrb[4].mxu1 }
  0xe4   :  { %v203_v51 = vadd.f32 %v202_v49, %v26_v19  ;;  %v246_v52 = vadd.f32 %v245_v50, %v26_v19  ;;  %v204_v53 = vpop.f32.mrb[5].mxu0  ;;  %v360_v54 = vpop.f32.mrb[5].mxu1 }
  0xe5   :  { %315 = vst [vmem:[%s456_s3 + $0x1c] sm:$0xff] %v350_v47  ;;  %316 = vst [vmem:[%s456_s3 + $0x24] sm:$0xff] %v351_v48  ;;  %v205_v55 = vadd.f32 %v204_v53, %v26_v19  ;;  %v206_v56 = vpop.f32.mrb[6].mxu0  ;;  %v248_v57 = vpop.f32.mrb[6].mxu1 }
  0xe6   :  { %v256_v58 = vmax.f32 %v203_v51, 0.0  ;;  %v258_v59 = vmax.f32 %v246_v52, 0.0  ;;  %v207_v60 = vadd.f32 %v206_v56, %v31_v20  ;;  %v249_v61 = vadd.f32 %v248_v57, %v31_v20  ;;  %v208_v62 = vpop.f32.mrb[7].mxu0  ;;  %v361_v63 = vpop.f32.mrb[7].mxu1 }
  0xe7   :  { %v257_v0 = vmax.f32 %v205_v55, 0.0  ;;  %v209_v1 = vadd.f32 %v208_v62, %v31_v20 }
  0xe8   :  { %v349_v2 = vpack.c.bf16 %v258_v59, %v258_v59  ;;  %v263_v3 = vmax.f32 %v207_v60, 0.0  ;;  %v265_v4 = vmax.f32 %v249_v61, 0.0 }
  0xe9   :  { %v348_v5 = vpack.c.bf16 %v257_v0, %v256_v58  ;;  %v264_v6 = vmax.f32 %v209_v1, 0.0 }
  0xea   :  { %314 = vst.msk [vmem:[%s456_s3 + $0x18] sm:$0xf] %vm313_vm3, %v349_v2  ;;  %v353_v7 = vpack.c.bf16 %v265_v4, %v265_v4 }
  0xeb   :  { %312 = vst [vmem:[%s456_s3 + $0x10] sm:$0xff] %v348_v5  ;;  %v352_v8 = vpack.c.bf16 %v264_v6, %v263_v3 }
  0xec   :  { %318 = vst.msk [vmem:[%s456_s3 + $0x34] sm:$0xf] %vm313_vm3, %v353_v7 }
  0xed   :  { %317 = vst [vmem:[%s456_s3 + $0x2c] sm:$0xff] %v352_v8 }

// kernel: autoencoder_forward.9
= control target key start
LH: loop header
LB: loop body
LE: loop exit
PB: predicated region body
PF: predicated region fallthrough
CT: control target
= control target key end

     0   :  { %v12699_v0 = vmov 0   ;;  %vm384_vm0 = vcmask 523264   ;;  %s17172_s2 = inlined_call_operand.vmem [shape: f32[128,1], index: 2, kind: input, shape index: {}]   ;;  %s17173_s0 = inlined_call_operand.vmem [shape: bf16[576,2], index: 0, kind: input, shape index: {}]   ;;  %s17174_s1 = inlined_call_operand.vmem [shape: f32[128,576], index: 1, kind: input, shape index: {}]   ;;  %s17175_s4 = inlined_call_operand.vmem [shape: f32[64,1], index: 4, kind: input, shape index: {}]   ;;  %s17176_s6 = inlined_call_operand.vmem [shape: f32[16,1], index: 6, kind: input, shape index: {}]   ;;  %s17177_s10 = inlined_call_operand.vmem [shape: f32[16,1], index: 10, kind: input, shape index: {}]   ;;  %s17178_s8 = inlined_call_operand.vmem [shape: f32[2,1], index: 8, kind: input, shape index: {}]   ;;  %s17179_s12 = inlined_call_operand.vmem [shape: f32[64,1], index: 12, kind: input, shape index: {}]   ;;  %s17180_s14 = inlined_call_operand.vmem [shape: f32[128,1], index: 14, kind: input, shape index: {}]   ;;  %s17181_s16 = inlined_call_operand.vmem [shape: f32[400,1], index: 16, kind: input, shape index: {}]   ;;  %s17182_s18 = inlined_call_operand.vmem [shape: f32[128,1], index: 18, kind: input, shape index: {}]   ;;  %s17183_s3 = inlined_call_operand.vmem [shape: f32[64,128], index: 3, kind: input, shape index: {}]   ;;  %s17184_s5 = inlined_call_operand.vmem [shape: f32[16,64], index: 5, kind: input, shape index: {}]   ;;  %s17185_s7 = inlined_call_operand.vmem [shape: f32[2,16], index: 7, kind: input, shape index: {}]   ;;  %s17186_s9 = inlined_call_operand.vmem [shape: f32[16,2], index: 9, kind: input, shape index: {}]   ;;  %s17187_s19 = inlined_call_operand.vmem [shape: f32[2,2], index: 19, kind: output, shape index: {0}]   ;;  %s17188_s11 = inlined_call_operand.vmem [shape: f32[64,16], index: 11, kind: input, shape index: {}]   ;;  %s17189_s13 = inlined_call_operand.vmem [shape: f32[128,64], index: 13, kind: input, shape index: {}]   ;;  %s17190_s15 = inlined_call_operand.vmem [shape: f32[400,128], index: 15, kind: input, shape index: {}]   ;;  %s17191_s17 = inlined_call_operand.vmem [shape: f32[128,16], index: 17, kind: input, shape index: {}]   ;;  %s17192_s20 = inlined_call_operand.vmem [shape: bf16[25,128,2], index: 20, kind: output, shape index: {1}]  }
   0x1   :  { %17198 = sst [smem:[#allocation2_spill]] %s17172_s2  ;;  %12655 = vset.pattern.permute.xlu1 %v12699_v0  ;;  %12654 = vset.pattern.permute.xlu0 %v12699_v0 }
   0x2   :  { %17199 = sst [smem:[#allocation3_spill]] %s17173_s0  ;;  %s17203_s23 = sld [smem:[#allocation2_spill]] }
   0x3   :  { %17200 = sst [smem:[#allocation4_spill]] %s17174_s1  ;;  %s17204_s26 = sld [smem:[#allocation3_spill]] }
   0x4   :  { %17201 = sst [smem:[#allocation5_spill]] %s17175_s4  ;;  %s17205_s27 = sld [smem:[#allocation4_spill]] }
   0x5   :  { %17202 = sst [smem:[#allocation6_spill]] %s17176_s6  ;;  %s17206_s24 = sld [smem:[#allocation5_spill]] }
   0x6   :  { %s17207_s4 = sld [smem:[#allocation6_spill]] }
   0x8   :  { %v290_v1 = vld [vmem:[%s17203_s23 + $0x10] sm:$0xff]  ;;  %v288_v2 = vld [vmem:[%s17203_s23] sm:$0xff]  ;;  %v291_v7 = vld [vmem:[%s17203_s23 + $0x18] sm:$0xff] }
   0x9   :  { %v10587_v3 = vld [vmem:[%s17204_s26 + $0x40] sm:$0xff]   ;;  %316 = vperm.xlu1 %12655, %v290_v1   ;;  %306 = vperm.xlu0 %12654, %v288_v2   ;;  %v289_v8 = vld [vmem:[%s17203_s23 + $0x8] sm:$0xff]  ;;  %v10589_v13 = vld [vmem:[%s17204_s26 + $0x50] sm:$0xff]  }
   0xa   :  { %v10437_v4 = vld [vmem:[%s17204_s26] sm:$0xff]   ;;  %12368 = vmatprep.subr.bf16.mxu0 %v10587_v3  ;;  %v10588_v9 = vld [vmem:[%s17204_s26 + $0x48] sm:$0xff]   ;;  %v10605_v14 = vld [vmem:[%s17204_s26 + $0xd0] sm:$0xff]  }
   0xb   :  { %v10603_v5 = vld [vmem:[%s17204_s26 + $0xc0] sm:$0xff]   ;;  %12370 = vmatpush3.bf16.msra.mxu0 %v10437_v4  ;;  %v10604_v10 = vld [vmem:[%s17204_s26 + $0xc8] sm:$0xff]   ;;  %v10581_v17 = vld [vmem:[%s17204_s26 + $0x10] sm:$0xff]  }
   0xc   :  { %v10595_v6 = vld [vmem:[%s17204_s26 + $0x80] sm:$0xff]   ;;  %12400 = vmatprep.subr.bf16.mxu1 %v10603_v5  ;;  %12372 = vmatprep.subr.bf16.mxu0 %v10588_v9  ;;  %v10580_v11 = vld [vmem:[%s17204_s26 + $0x8] sm:$0xff]   ;;  %v10597_v18 = vld [vmem:[%s17204_s26 + $0x90] sm:$0xff]  }
   0xd   :  { %12402 = vmatpush3.bf16.msra.mxu1 %v10595_v6  ;;  %v10596_v12 = vld [vmem:[%s17204_s26 + $0x88] sm:$0xff]   ;;  %321 = vperm.xlu1 %12655, %v291_v7   ;;  %v292_v16 = vld [vmem:[%s17203_s23 + $0x20] sm:$0xff]  ;;  %v10590_v19 = vld [vmem:[%s17204_s26 + $0x58] sm:$0xff]  }
   0xe   :  { %12404 = vmatprep.subr.bf16.mxu1 %v10604_v10  ;;  %311 = vperm.xlu0 %12654, %v289_v8   ;;  %v293_v15 = vld [vmem:[%s17203_s23 + $0x28] sm:$0xff]  ;;  %v10606_v20 = vld [vmem:[%s17204_s26 + $0xd8] sm:$0xff]   ;;  %v294_v22 = vld [vmem:[%s17203_s23 + $0x30] sm:$0xff] }
   0xf   :  { %12374 = vmatpush3.bf16.msra.mxu0 %v10580_v11  ;;  %v295_v21 = vld [vmem:[%s17203_s23 + $0x38] sm:$0xff]  ;;  %v10591_v25 = vld [vmem:[%s17204_s26 + $0x60] sm:$0xff]   ;;  %v297_v27 = vld [vmem:[%s17203_s23 + $0x48] sm:$0xff] }
  0x10   :  { %12376 = vmatprep.subr.bf16.mxu0 %v10589_v13  ;;  %v10582_v23 = vld [vmem:[%s17204_s26 + $0x18] sm:$0xff]   ;;  %v10607_v26 = vld [vmem:[%s17204_s26 + $0xe0] sm:$0xff]   ;;  %v209_v29 = vld [vmem:[%s17205_s27 + $0x8] sm:$0xff] }
  0x11   :  { %12406 = vmatpush3.bf16.msra.mxu1 %v10596_v12  ;;  %331 = vperm.xlu1 %12655, %v293_v15   ;;  %v10598_v24 = vld [vmem:[%s17204_s26 + $0x98] sm:$0xff]   ;;  %v296_v28 = vld [vmem:[%s17203_s23 + $0x40] sm:$0xff]  ;;  %v10592_v32 = vld [vmem:[%s17204_s26 + $0x68] sm:$0xff]  }
  0x12   :  { %12408 = vmatprep.subr.bf16.mxu1 %v10605_v14  ;;  %326 = vperm.xlu0 %12654, %v292_v16   ;;  %v10583_v30 = vld [vmem:[%s17204_s26 + $0x20] sm:$0xff]   ;;  %v10608_v33 = vld [vmem:[%s17204_s26 + $0xe8] sm:$0xff]   ;;  %v211_v34 = vld [vmem:[%s17205_s27 + $0x18] sm:$0xff] }
  0x13   :  { %12378 = vmatpush3.bf16.msra.mxu0 %v10581_v17  ;;  %v10599_v31 = vld [vmem:[%s17204_s26 + $0xa0] sm:$0xff]   ;;  %v299_v35 = vld [vmem:[%s17203_s23 + $0x58] sm:$0xff]  ;;  %v298_v36 = vld [vmem:[%s17203_s23 + $0x50] sm:$0xff]  ;;  %497 = vmatprep.mubr.f32.mxu0 %v209_v29 }
  0x14   :  { %12380 = vmatprep.subr.bf16.mxu0 %v10590_v19  ;;  %642 = vmatprep.mubr.f32.mxu1 %v211_v34  ;;  %v10584_v37 = vld [vmem:[%s17204_s26 + $0x28] sm:$0xff]   ;;  %v10593_v39 = vld [vmem:[%s17204_s26 + $0x70] sm:$0xff]   ;;  %v300_v42 = vld [vmem:[%s17203_s23 + $0x60] sm:$0xff] }
  0x15   :  { %12410 = vmatpush3.bf16.msra.mxu1 %v10597_v18  ;;  %341 = vperm.xlu1 %12655, %v295_v21   ;;  %v10600_v38 = vld [vmem:[%s17204_s26 + $0xa8] sm:$0xff]   ;;  %v10609_v40 = vld [vmem:[%s17204_s26 + $0xf0] sm:$0xff]   ;;  %v10594_v45 = vld [vmem:[%s17204_s26 + $0x78] sm:$0xff]  }
  0x16   :  { %12412 = vmatprep.subr.bf16.mxu1 %v10606_v20  ;;  %336 = vperm.xlu0 %12654, %v294_v22   ;;  %v301_v41 = vld [vmem:[%s17203_s23 + $0x68] sm:$0xff]  ;;  %v10585_v43 = vld [vmem:[%s17204_s26 + $0x30] sm:$0xff]   ;;  %v10610_v46 = vld [vmem:[%s17204_s26 + $0xf8] sm:$0xff]  }
  0x17   :  { %12382 = vmatpush3.bf16.msra.mxu0 %v10582_v23  ;;  %v10601_v44 = vld [vmem:[%s17204_s26 + $0xb0] sm:$0xff]   ;;  %v303_v47 = vld [vmem:[%s17203_s23 + $0x78] sm:$0xff]  ;;  %v925_v51 = vld [vmem:[%s17206_s24 + $0x8] sm:$0xff] }
  0x18   :  { %12384 = vmatprep.subr.bf16.mxu0 %v10591_v25  ;;  %v302_v48 = vld [vmem:[%s17203_s23 + $0x70] sm:$0xff]  ;;  %v10586_v49 = vld [vmem:[%s17204_s26 + $0x38] sm:$0xff]   ;;  %v924_v52 = vld [vmem:[%s17206_s24] sm:$0xff] }
  0x19   :  { %12414 = vmatpush3.bf16.msra.mxu1 %v10598_v24  ;;  %351 = vperm.xlu1 %12655, %v297_v27   ;;  %v10602_v50 = vld [vmem:[%s17204_s26 + $0xb8] sm:$0xff]   ;;  %v208_v53 = vld [vmem:[%s17205_s27] sm:$0xff]  ;;  %v210_v54 = vld [vmem:[%s17205_s27 + $0x10] sm:$0xff] }
  0x1a   :  { %12416 = vmatprep.subr.bf16.mxu1 %v10607_v26  ;;  %346 = vperm.xlu0 %12654, %v296_v28   ;;  %v214_v55 = vld [vmem:[%s17205_s27 + $0x30] sm:$0xff]  ;;  %v216_v56 = vld [vmem:[%s17205_s27 + $0x40] sm:$0xff]  ;;  %v927_v58 = vld [vmem:[%s17206_s24 + $0x18] sm:$0xff] }
  0x1b   :  { %12386 = vmatpush3.bf16.msra.mxu0 %v10583_v30  ;;  %v10611_v57 = vld [vmem:[%s17204_s26 + $0x100] sm:$0xff]   ;;  %v926_v59 = vld [vmem:[%s17206_s24 + $0x10] sm:$0xff]  ;;  %v213_v60 = vld [vmem:[%s17205_s27 + $0x28] sm:$0xff] }
  0x1c   :  { %12388 = vmatprep.subr.bf16.mxu0 %v10592_v32  ;;  %v215_v61 = vld [vmem:[%s17205_s27 + $0x38] sm:$0xff]  ;;  %v221_v63 = vld [vmem:[%s17205_s27 + $0x68] sm:$0xff]  ;;  %v928_v1 = vld [vmem:[%s17206_s24 + $0x20] sm:$0xff] }
  0x1d   :  { %12418 = vmatpush3.bf16.msra.mxu1 %v10599_v31  ;;  %361 = vperm.xlu1 %12655, %v299_v35   ;;  %v219_v62 = vld [vmem:[%s17205_s27 + $0x58] sm:$0xff]  ;;  %v929_v0 = vld [vmem:[%s17206_s24 + $0x28] sm:$0xff]  ;;  %v218_v2 = vld [vmem:[%s17205_s27 + $0x50] sm:$0xff] }
  0x1e   :  { %12420 = vmatprep.subr.bf16.mxu1 %v10608_v33  ;;  %356 = vperm.xlu0 %12654, %v298_v36   ;;  %v220_v3 = vld [vmem:[%s17205_s27 + $0x60] sm:$0xff]  ;;  %v226_v5 = vld [vmem:[%s17205_s27 + $0x90] sm:$0xff]  ;;  %v10612_v6 = vld [vmem:[%s17204_s26 + $0x108] sm:$0xff]  }
  0x1f   :  { %12390 = vmatpush3.bf16.msra.mxu0 %v10584_v37  ;;  %v224_v4 = vld [vmem:[%s17205_s27 + $0x80] sm:$0xff]  ;;  %v931_v7 = vld [vmem:[%s17206_s24 + $0x38] sm:$0xff]  ;;  %v930_v8 = vld [vmem:[%s17206_s24 + $0x30] sm:$0xff] }
  0x20   :  { %12392 = vmatprep.subr.bf16.mxu0 %v10593_v39  ;;  %v223_v9 = vld [vmem:[%s17205_s27 + $0x78] sm:$0xff]  ;;  %v225_v10 = vld [vmem:[%s17205_s27 + $0x88] sm:$0xff]  ;;  %v1079_v14 = vld [vmem:[%s17207_s4] sm:$0xff] }
  0x21   :  { %12422 = vmatpush3.bf16.msra.mxu1 %v10600_v38  ;;  %371 = vperm.xlu1 %12655, %v301_v41   ;;  %v229_v11 = vld [vmem:[%s17205_s27 + $0xa8] sm:$0xff]  ;;  %v231_v12 = vld [vmem:[%s17205_s27 + $0xb8] sm:$0xff]  ;;  %v228_v15 = vld [vmem:[%s17205_s27 + $0xa0] sm:$0xff] }
  0x22   :  { %12424 = vmatprep.subr.bf16.mxu1 %v10609_v40  ;;  %366 = vperm.xlu0 %12654, %v300_v42   ;;  %v1080_v13 = vld [vmem:[%s17207_s4 + $0x8] sm:$0xff]  ;;  %v230_v16 = vld [vmem:[%s17205_s27 + $0xb0] sm:$0xff]  ;;  %v236_v18 = vld [vmem:[%s17205_s27 + $0xe0] sm:$0xff] }
  0x23   :  { %12394 = vmatpush3.bf16.msra.mxu0 %v10585_v43  ;;  %v234_v17 = vld [vmem:[%s17205_s27 + $0xd0] sm:$0xff]  ;;  %v1259_v20 = vld [vmem:[%s17177_s10] sm:$0xff]  ;;  %v233_v22 = vld [vmem:[%s17205_s27 + $0xc8] sm:$0xff] }
  0x24   :  { %12396 = vmatprep.subr.bf16.mxu0 %v10594_v45  ;;  %v10613_v19 = vld [vmem:[%s17204_s26 + $0x110] sm:$0xff]   ;;  %v1175_v21 = vld [vmem:[%s17178_s8] sm:$0x3]  ;;  %v235_v23 = vld [vmem:[%s17205_s27 + $0xd8] sm:$0xff] }
  0x25   :  { %12426 = vmatpush3.bf16.msra.mxu1 %v10601_v44  ;;  %381 = vperm.xlu1 %12655, %v303_v47   ;;  %v239_v24 = vld [vmem:[%s17205_s27 + $0xf8] sm:$0xff]  ;;  %v241_v25 = vld [vmem:[%s17205_s27 + $0x108] sm:$0xff]  ;;  %v1367_v26 = vld [vmem:[%s17179_s12] sm:$0xff] }
  0x26   :  { %12428 = vmatprep.subr.bf16.mxu1 %v10610_v46  ;;  %376 = vperm.xlu0 %12654, %v302_v48   ;;  %v1260_v27 = vld [vmem:[%s17177_s10 + $0x8] sm:$0xff]  ;;  %v238_v28 = vld [vmem:[%s17205_s27 + $0xf0] sm:$0xff]  ;;  %v240_v29 = vld [vmem:[%s17205_s27 + $0x100] sm:$0xff] }
  0x27   :  { %12398 = vmatpush3.bf16.msra.mxu0 %v10586_v49  ;;  %v244_v30 = vld [vmem:[%s17205_s27 + $0x120] sm:$0xff]  ;;  %v246_v31 = vld [vmem:[%s17205_s27 + $0x130] sm:$0xff]  ;;  %v10614_v32 = vld [vmem:[%s17204_s26 + $0x118] sm:$0xff]  }
  0x28   :  { %12432 = vmatprep.subr.bf16.mxu0 %v10611_v57  ;;  %v1369_v33 = vld [vmem:[%s17179_s12 + $0x10] sm:$0xff]  ;;  %v1368_v34 = vld [vmem:[%s17179_s12 + $0x8] sm:$0xff]  ;;  %v243_v35 = vld [vmem:[%s17205_s27 + $0x118] sm:$0xff] }
  0x29   :  { %12430 = vmatpush3.bf16.msra.mxu1 %v10602_v50  ;;  %939 = vperm.xlu1 %12655, %v925_v51   ;;  %v245_v36 = vld [vmem:[%s17205_s27 + $0x128] sm:$0xff]  ;;  %v251_v38 = vld [vmem:[%s17205_s27 + $0x158] sm:$0xff]  ;;  %v1371_v39 = vld [vmem:[%s17179_s12 + $0x20] sm:$0xff] }
  0x2a   :  { %934 = vperm.xlu0 %12654, %v924_v52   ;;  %498 = vmatmul.mubr.f32.vlgmr.msra.gmra.mrb[0].mxu0 %v208_v53  ;;  %v249_v37 = vld [vmem:[%s17205_s27 + $0x148] sm:$0xff]  ;;  %v1370_v40 = vld [vmem:[%s17179_s12 + $0x18] sm:$0xff]  ;;  %v248_v41 = vld [vmem:[%s17205_s27 + $0x140] sm:$0xff] }
  0x2b   :  { %502 = vmatprep.mubr.f32.mxu0 %v214_v55  ;;  %12434 = vmatpush3.bf16.msra.mxu0 %v10611_v57  ;;  %v250_v42 = vld [vmem:[%s17205_s27 + $0x150] sm:$0xff]  ;;  %v256_v44 = vld [vmem:[%s17205_s27 + $0x180] sm:$0xff]  ;;  %v1372_v46 = vld [vmem:[%s17179_s12 + $0x28] sm:$0xff] }
  0x2c   :  { %643 = vmatmul.mubr.f32.vlgmr.msra.gmra.mrb[0].mxu1 %v210_v54  ;;  %12436 = vmatprep.subr.bf16.mxu0 %v10612_v6  ;;  %v254_v43 = vld [vmem:[%s17205_s27 + $0x170] sm:$0xff]  ;;  %v253_v47 = vld [vmem:[%s17205_s27 + $0x168] sm:$0xff]  ;;  %v255_v48 = vld [vmem:[%s17205_s27 + $0x178] sm:$0xff] }
  0x2d   :  { %647 = vmatprep.mubr.f32.mxu1 %v216_v56  ;;  %949 = vperm.xlu1 %12655, %v927_v58   ;;  %v1373_v45 = vld [vmem:[%s17179_s12 + $0x30] sm:$0xff]  ;;  %v259_v49 = vld [vmem:[%s17205_s27 + $0x198] sm:$0xff]  ;;  %v261_v50 = vld [vmem:[%s17205_s27 + $0x1a8] sm:$0xff] }
  0x2e   :  { %944 = vperm.xlu0 %12654, %v926_v59   ;;  %503 = vmatmul.mubr.f32.gmra.mrb[2].mxu0 %v213_v60  ;;  %v1568_v51 = vld [vmem:[%s17180_s14] sm:$0xff]  ;;  %v1374_v52 = vld [vmem:[%s17179_s12 + $0x38] sm:$0xff]  ;;  %v258_v53 = vld [vmem:[%s17205_s27 + $0x190] sm:$0xff] }
  0x2f   :  { %507 = vmatprep.mubr.f32.mxu0 %v219_v62  ;;  %12438 = vmatpush3.bf16.msra.mxu0 %v10612_v6  ;;  %v260_v54 = vld [vmem:[%s17205_s27 + $0x1a0] sm:$0xff]  ;;  %v266_v56 = vld [vmem:[%s17205_s27 + $0x1d0] sm:$0xff]  ;;  %v1569_v58 = vld [vmem:[%s17180_s14 + $0x8] sm:$0xff] }
  0x30   :  { %648 = vmatmul.mubr.f32.gmra.mrb[2].mxu1 %v215_v61  ;;  %12440 = vmatprep.subr.bf16.mxu0 %v10613_v19  ;;  %v264_v55 = vld [vmem:[%s17205_s27 + $0x1c0] sm:$0xff]  ;;  %v1570_v57 = vld [vmem:[%s17180_s14 + $0x10] sm:$0xff]  ;;  %v263_v59 = vld [vmem:[%s17205_s27 + $0x1b8] sm:$0xff] }
  0x31   :  { %652 = vmatprep.mubr.f32.mxu1 %v221_v63  ;;  %959 = vperm.xlu1 %12655, %v929_v0   ;;  %v265_v60 = vld [vmem:[%s17205_s27 + $0x1c8] sm:$0xff]  ;;  %v271_v62 = vld [vmem:[%s17205_s27 + $0x1f8] sm:$0xff]  ;;  %v1572_v63 = vld [vmem:[%s17180_s14 + $0x20] sm:$0xff] }
  0x32   :  { %954 = vperm.xlu0 %12654, %v928_v1   ;;  %508 = vmatmul.mubr.f32.gmra.mrb[4].mxu0 %v218_v2  ;;  %v269_v61 = vld [vmem:[%s17205_s27 + $0x1e8] sm:$0xff]  ;;  %v1571_v0 = vld [vmem:[%s17180_s14 + $0x18] sm:$0xff]  ;;  %v268_v1 = vld [vmem:[%s17205_s27 + $0x1e0] sm:$0xff] }
  0x33   :  { %512 = vmatprep.mubr.f32.mxu0 %v224_v4  ;;  %12442 = vmatpush3.bf16.msra.mxu0 %v10613_v19  ;;  %v270_v2 = vld [vmem:[%s17205_s27 + $0x1f0] sm:$0xff]  ;;  %v276_v4 = vld [vmem:[%s17205_s27 + $0x220] sm:$0xff]  ;;  %v1573_v6 = vld [vmem:[%s17180_s14 + $0x28] sm:$0xff] }
  0x34   :  { %653 = vmatmul.mubr.f32.gmra.mrb[4].mxu1 %v220_v3  ;;  %12444 = vmatprep.subr.bf16.mxu0 %v10614_v32  ;;  %v274_v3 = vld [vmem:[%s17205_s27 + $0x210] sm:$0xff]  ;;  %v283_v19 = vld [vmem:[%s17205_s27 + $0x258] sm:$0xff] }
  0x35   :  { %657 = vmatprep.mubr.f32.mxu1 %v226_v5  ;;  %969 = vperm.xlu1 %12655, %v931_v7   ;;  %v1574_v5 = vld [vmem:[%s17180_s14 + $0x30] sm:$0xff]  ;;  %v273_v7 = vld [vmem:[%s17205_s27 + $0x208] sm:$0xff] }
  0x36   :  { %964 = vperm.xlu0 %12654, %v930_v8   ;;  %513 = vmatmul.mubr.f32.gmra.mrb[6].mxu0 %v223_v9  ;;  %v275_v8 = vld [vmem:[%s17205_s27 + $0x218] sm:$0xff] }
  0x37   :  { %517 = vmatprep.mubr.f32.mxu0 %v229_v11  ;;  %12446 = vmatpush3.bf16.msra.mxu0 %v10614_v32  ;;  %v279_v9 = vld [vmem:[%s17205_s27 + $0x238] sm:$0xff]  ;;  %v1576_v11 = vld [vmem:[%s17180_s14 + $0x40] sm:$0xff]  ;;  %v237_v32 = vld [vmem:[%s17205_s27 + $0xe8] sm:$0xff] }
  0x38   :  { %658 = vmatmul.mubr.f32.gmra.mrb[6].mxu1 %v225_v10  ;;  %v281_v10 = vld [vmem:[%s17205_s27 + $0x248] sm:$0xff] }
  0x39   :  { %662 = vmatprep.mubr.f32.mxu1 %v231_v12  ;;  %1088 = vperm.xlu1 %12655, %v1080_v13   ;;  %v1575_v12 = vld [vmem:[%s17180_s14 + $0x38] sm:$0xff]  ;;  %v278_v13 = vld [vmem:[%s17205_s27 + $0x230] sm:$0xff] }
  0x3a   :  { %1083 = vperm.xlu0 %12654, %v1079_v14   ;;  %518 = vmatmul.mubr.f32.gmra.mrb[8].mxu0 %v228_v15  ;;  %v280_v14 = vld [vmem:[%s17205_s27 + $0x240] sm:$0xff] }
  0x3b   :  { %522 = vmatprep.mubr.f32.mxu0 %v234_v17  ;;  %v284_v15 = vld [vmem:[%s17205_s27 + $0x260] sm:$0xff]  ;;  %v1578_v17 = vld [vmem:[%s17180_s14 + $0x50] sm:$0xff] }
  0x3c   :  { %663 = vmatmul.mubr.f32.gmra.mrb[8].mxu1 %v230_v16  ;;  %v286_v16 = vld [vmem:[%s17205_s27 + $0x270] sm:$0xff] }
  0x3d   :  { %667 = vmatprep.mubr.f32.mxu1 %v236_v18  ;;  %1263 = vperm.xlu1 %12655, %v1259_v20   ;;  %v1577_v18 = vld [vmem:[%s17180_s14 + $0x48] sm:$0xff] }
  0x3e   :  { %1178 = vperm.xlu0 %12654, %v1175_v21   ;;  %523 = vmatmul.mubr.f32.gmra.mrb[10].mxu0 %v233_v22  ;;  %v285_v20 = vld [vmem:[%s17205_s27 + $0x268] sm:$0xff]  ;;  %v212_v21 = vld [vmem:[%s17205_s27 + $0x20] sm:$0xff] }
  0x3f   :  { %527 = vmatprep.mubr.f32.mxu0 %v239_v24  ;;  %v1580_v22 = vld [vmem:[%s17180_s14 + $0x60] sm:$0xff]  ;;  %v217_v24 = vld [vmem:[%s17205_s27 + $0x48] sm:$0xff] }
  0x40   :  { %668 = vmatmul.mubr.f32.gmra.mrb[10].mxu1 %v235_v23  ;;  %v1579_v23 = vld [vmem:[%s17180_s14 + $0x58] sm:$0xff] }
  0x41   :  { %672 = vmatprep.mubr.f32.mxu1 %v241_v25  ;;  %1377 = vperm.xlu1 %12655, %v1367_v26   ;;  %v222_v25 = vld [vmem:[%s17205_s27 + $0x70] sm:$0xff] }
  0x42   :  { %1268 = vperm.xlu0 %12654, %v1260_v27   ;;  %528 = vmatmul.mubr.f32.gmra.mrb[12].mxu0 %v238_v28  ;;  %v1582_v26 = vld [vmem:[%s17180_s14 + $0x70] sm:$0xff]  ;;  %v1581_v27 = vld [vmem:[%s17180_s14 + $0x68] sm:$0xff]  ;;  %v227_v28 = vld [vmem:[%s17205_s27 + $0x98] sm:$0xff] }
  0x43   :  { %532 = vmatprep.mubr.f32.mxu0 %v244_v30  ;;  %v1923_v30 = vld [vmem:[%s17181_s16] sm:$0xff] }
  0x44   :  { %673 = vmatmul.mubr.f32.gmra.mrb[12].mxu1 %v240_v29  ;;  %v232_v29 = vld [vmem:[%s17205_s27 + $0xc0] sm:$0xff] }
  0x45   :  { %677 = vmatprep.mubr.f32.mxu1 %v246_v31  ;;  %1387 = vperm.xlu1 %12655, %v1369_v33   ;;  %v1583_v31 = vld [vmem:[%s17180_s14 + $0x78] sm:$0xff]  ;;  %v242_v33 = vld [vmem:[%s17205_s27 + $0x110] sm:$0xff] }
  0x46   :  { %1382 = vperm.xlu0 %12654, %v1368_v34   ;;  %533 = vmatmul.mubr.f32.gmra.mrb[14].mxu0 %v243_v35  ;;  %v1925_v34 = vld [vmem:[%s17181_s16 + $0x10] sm:$0xff]  ;;  %v1924_v35 = vld [vmem:[%s17181_s16 + $0x8] sm:$0xff] }
  0x47   :  { %537 = vmatprep.mubr.f32.mxu0 %v249_v37  ;;  %v252_v37 = vld [vmem:[%s17205_s27 + $0x160] sm:$0xff] }
  0x48   :  { %678 = vmatmul.mubr.f32.gmra.mrb[14].mxu1 %v245_v36  ;;  %v247_v36 = vld [vmem:[%s17205_s27 + $0x138] sm:$0xff] }
  0x49   :  { %682 = vmatprep.mubr.f32.mxu1 %v251_v38  ;;  %1397 = vperm.xlu1 %12655, %v1371_v39   ;;  %v1927_v38 = vld [vmem:[%s17181_s16 + $0x20] sm:$0xff]  ;;  %v1926_v39 = vld [vmem:[%s17181_s16 + $0x18] sm:$0xff] }
  0x4a   :  { %1392 = vperm.xlu0 %12654, %v1370_v40   ;;  %538 = vmatmul.mubr.f32.gmra.mrb[16].mxu0 %v248_v41  ;;  %v257_v40 = vld [vmem:[%s17205_s27 + $0x188] sm:$0xff]  ;;  %v262_v41 = vld [vmem:[%s17205_s27 + $0x1b0] sm:$0xff] }
  0x4b   :  { %542 = vmatprep.mubr.f32.mxu0 %v254_v43  ;;  %v1928_v43 = vld [vmem:[%s17181_s16 + $0x28] sm:$0xff] }
  0x4c   :  { %683 = vmatmul.mubr.f32.gmra.mrb[16].mxu1 %v250_v42  ;;  %v1929_v42 = vld [vmem:[%s17181_s16 + $0x30] sm:$0xff] }
  0x4d   :  { %687 = vmatprep.mubr.f32.mxu1 %v256_v44  ;;  %1407 = vperm.xlu1 %12655, %v1373_v45   ;;  %v267_v44 = vld [vmem:[%s17205_s27 + $0x1d8] sm:$0xff]  ;;  %v272_v45 = vld [vmem:[%s17205_s27 + $0x200] sm:$0xff] }
  0x4e   :  { %1402 = vperm.xlu0 %12654, %v1372_v46   ;;  %543 = vmatmul.mubr.f32.gmra.mrb[18].mxu0 %v253_v47  ;;  %v1931_v46 = vld [vmem:[%s17181_s16 + $0x40] sm:$0xff]  ;;  %v1930_v47 = vld [vmem:[%s17181_s16 + $0x38] sm:$0xff] }
  0x4f   :  { %547 = vmatprep.mubr.f32.mxu0 %v259_v49  ;;  %v282_v49 = vld [vmem:[%s17205_s27 + $0x250] sm:$0xff] }
  0x50   :  { %688 = vmatmul.mubr.f32.gmra.mrb[18].mxu1 %v255_v48  ;;  %v277_v48 = vld [vmem:[%s17205_s27 + $0x228] sm:$0xff] }
  0x51   :  { %692 = vmatprep.mubr.f32.mxu1 %v261_v50  ;;  %1586 = vperm.xlu1 %12655, %v1568_v51   ;;  %v1933_v50 = vld [vmem:[%s17181_s16 + $0x50] sm:$0xff]  ;;  %v1932_v51 = vld [vmem:[%s17181_s16 + $0x48] sm:$0xff] }
  0x52   :  { %1412 = vperm.xlu0 %12654, %v1374_v52   ;;  %548 = vmatmul.mubr.f32.gmra.mrb[20].mxu0 %v258_v53  ;;  %v287_v52 = vld [vmem:[%s17205_s27 + $0x278] sm:$0xff]  ;;  %v1935_v53 = vld [vmem:[%s17181_s16 + $0x60] sm:$0xff] }
  0x53   :  { %552 = vmatprep.mubr.f32.mxu0 %v264_v55  ;;  %v1937_v55 = vld [vmem:[%s17181_s16 + $0x70] sm:$0xff] }
  0x54   :  { %693 = vmatmul.mubr.f32.gmra.mrb[20].mxu1 %v260_v54  ;;  %v1934_v54 = vld [vmem:[%s17181_s16 + $0x58] sm:$0xff] }
  0x55   :  { %697 = vmatprep.mubr.f32.mxu1 %v266_v56  ;;  %1596 = vperm.xlu1 %12655, %v1570_v57   ;;  %v1936_v56 = vld [vmem:[%s17181_s16 + $0x68] sm:$0xff]  ;;  %v1939_v57 = vld [vmem:[%s17181_s16 + $0x80] sm:$0xff] }
  0x56   :  { %1591 = vperm.xlu0 %12654, %v1569_v58   ;;  %553 = vmatmul.mubr.f32.gmra.mrb[22].mxu0 %v263_v59  ;;  %v1938_v58 = vld [vmem:[%s17181_s16 + $0x78] sm:$0xff]  ;;  %v1941_v59 = vld [vmem:[%s17181_s16 + $0x90] sm:$0xff] }
  0x57   :  { %557 = vmatprep.mubr.f32.mxu0 %v269_v61  ;;  %v1943_v61 = vld [vmem:[%s17181_s16 + $0xa0] sm:$0xff] }
  0x58   :  { %698 = vmatmul.mubr.f32.gmra.mrb[22].mxu1 %v265_v60  ;;  %v1940_v60 = vld [vmem:[%s17181_s16 + $0x88] sm:$0xff] }
  0x59   :  { %702 = vmatprep.mubr.f32.mxu1 %v271_v62  ;;  %1606 = vperm.xlu1 %12655, %v1572_v63   ;;  %v1942_v62 = vld [vmem:[%s17181_s16 + $0x98] sm:$0xff]  ;;  %v1945_v63 = vld [vmem:[%s17181_s16 + $0xb0] sm:$0xff] }
  0x5a   :  { %1601 = vperm.xlu0 %12654, %v1571_v0   ;;  %558 = vmatmul.mubr.f32.gmra.mrb[24].mxu0 %v268_v1  ;;  %v1944_v0 = vld [vmem:[%s17181_s16 + $0xa8] sm:$0xff]  ;;  %v1947_v1 = vld [vmem:[%s17181_s16 + $0xc0] sm:$0xff] }
  0x5b   :  { %562 = vmatprep.mubr.f32.mxu0 %v274_v3  ;;  %v1949_v3 = vld [vmem:[%s17181_s16 + $0xd0] sm:$0xff] }
  0x5c   :  { %703 = vmatmul.mubr.f32.gmra.mrb[24].mxu1 %v270_v2  ;;  %v1946_v2 = vld [vmem:[%s17181_s16 + $0xb8] sm:$0xff] }
  0x5d   :  { %707 = vmatprep.mubr.f32.mxu1 %v276_v4  ;;  %1616 = vperm.xlu1 %12655, %v1574_v5   ;;  %v1948_v4 = vld [vmem:[%s17181_s16 + $0xc8] sm:$0xff]  ;;  %v1951_v5 = vld [vmem:[%s17181_s16 + $0xe0] sm:$0xff] }
  0x5e   :  { %1611 = vperm.xlu0 %12654, %v1573_v6   ;;  %563 = vmatmul.mubr.f32.gmra.mrb[26].mxu0 %v273_v7  ;;  %v1950_v6 = vld [vmem:[%s17181_s16 + $0xd8] sm:$0xff]  ;;  %v1953_v7 = vld [vmem:[%s17181_s16 + $0xf0] sm:$0xff] }
  0x5f   :  { %567 = vmatprep.mubr.f32.mxu0 %v279_v9  ;;  %v1955_v9 = vld [vmem:[%s17181_s16 + $0x100] sm:$0xff] }
  0x60   :  { %708 = vmatmul.mubr.f32.gmra.mrb[26].mxu1 %v275_v8  ;;  %v1952_v8 = vld [vmem:[%s17181_s16 + $0xe8] sm:$0xff] }
  0x61   :  { %712 = vmatprep.mubr.f32.mxu1 %v281_v10  ;;  %1626 = vperm.xlu1 %12655, %v1576_v11   ;;  %v1954_v10 = vld [vmem:[%s17181_s16 + $0xf8] sm:$0xff]  ;;  %v1957_v11 = vld [vmem:[%s17181_s16 + $0x110] sm:$0xff] }
  0x62   :  { %1621 = vperm.xlu0 %12654, %v1575_v12   ;;  %568 = vmatmul.mubr.f32.gmra.mrb[28].mxu0 %v278_v13  ;;  %v1956_v12 = vld [vmem:[%s17181_s16 + $0x108] sm:$0xff]  ;;  %v1959_v13 = vld [vmem:[%s17181_s16 + $0x120] sm:$0xff] }
  0x63   :  { %572 = vmatprep.mubr.f32.mxu0 %v284_v15 }
  0x64   :  { %713 = vmatmul.mubr.f32.gmra.mrb[28].mxu1 %v280_v14  ;;  %v1958_v14 = vld [vmem:[%s17181_s16 + $0x118] sm:$0xff] }
  0x65   :  { %717 = vmatprep.mubr.f32.mxu1 %v286_v16  ;;  %1636 = vperm.xlu1 %12655, %v1578_v17   ;;  %v1961_v16 = vld [vmem:[%s17181_s16 + $0x130] sm:$0xff]  ;;  %v1960_v17 = vld [vmem:[%s17181_s16 + $0x128] sm:$0xff] }
  0x66   :  { %1631 = vperm.xlu0 %12654, %v1577_v18   ;;  %573 = vmatmul.mubr.f32.gmra.mrb[30].mxu0 %v283_v19  ;;  %v1963_v19 = vld [vmem:[%s17181_s16 + $0x140] sm:$0xff] }
  0x67   :  { %11405 = vmatprep.mubr.msk.f32.mxu0 %vm384_vm0, %v212_v21 }
  0x68   :  { %718 = vmatmul.mubr.f32.gmra.mrb[30].mxu1 %v285_v20  ;;  %v1962_v20 = vld [vmem:[%s17181_s16 + $0x138] sm:$0xff] }
  0x69   :  { %1646 = vperm.xlu1 %12655, %v1580_v22  }
  0x6a   :  { %1641 = vperm.xlu0 %12654, %v1579_v23   ;;  %11406 = vmatmul.mubr.msk.f32.vlgmr.msra.gmra.mrb[32].mxu0 %vm384_vm0, %v217_v24  ;;  %v1965_v23 = vld [vmem:[%s17181_s16 + $0x150] sm:$0xff]  ;;  %v1964_v24 = vld [vmem:[%s17181_s16 + $0x148] sm:$0xff] }
  0x6b   :  { %11408 = vmatprep.mubr.msk.f32.mxu0 %vm384_vm0, %v222_v25 }
  0x6d   :  { %1656 = vperm.xlu1 %12655, %v1582_v26   ;;  %v1967_v26 = vld [vmem:[%s17181_s16 + $0x160] sm:$0xff] }
  0x6e   :  { %1651 = vperm.xlu0 %12654, %v1581_v27   ;;  %11409 = vmatmul.mubr.msk.f32.gmra.mrb[34].mxu0 %vm384_vm0, %v227_v28  ;;  %v1966_v27 = vld [vmem:[%s17181_s16 + $0x158] sm:$0xff] }
  0x6f   :  { %11411 = vmatprep.mubr.msk.f32.mxu0 %vm384_vm0, %v232_v29  ;;  %v1969_v29 = vld [vmem:[%s17181_s16 + $0x170] sm:$0xff] }
  0x71   :  { %1975 = vperm.xlu1 %12655, %v1923_v30   ;;  %v1968_v30 = vld [vmem:[%s17181_s16 + $0x168] sm:$0xff] }
  0x72   :  { %1661 = vperm.xlu0 %12654, %v1583_v31   ;;  %11412 = vmatmul.mubr.msk.f32.gmra.mrb[36].mxu0 %vm384_vm0, %v237_v32 }
  0x73   :  { %11414 = vmatprep.mubr.msk.f32.mxu0 %vm384_vm0, %v242_v33  ;;  %v1971_v33 = vld [vmem:[%s17181_s16 + $0x180] sm:$0xff] }
  0x75   :  { %1985 = vperm.xlu1 %12655, %v1925_v34   ;;  %v1970_v34 = vld [vmem:[%s17181_s16 + $0x178] sm:$0xff] }
  0x76   :  { %1980 = vperm.xlu0 %12654, %v1924_v35   ;;  %11415 = vmatmul.mubr.msk.f32.gmra.mrb[38].mxu0 %vm384_vm0, %v247_v36  ;;  %v2604_v36 = vld [vmem:[%s17182_s18] sm:$0xff] }
  0x77   :  { %11417 = vmatprep.mubr.msk.f32.mxu0 %vm384_vm0, %v252_v37  ;;  %v1972_v37 = vld [vmem:[%s17181_s16 + $0x188] sm:$0xff] }
  0x79   :  { %1995 = vperm.xlu1 %12655, %v1927_v38  }
  0x7a   :  { %1990 = vperm.xlu0 %12654, %v1926_v39   ;;  %11418 = vmatmul.mubr.msk.f32.gmra.mrb[40].mxu0 %vm384_vm0, %v257_v40  ;;  %v2606_v39 = vld [vmem:[%s17182_s18 + $0x10] sm:$0xff]  ;;  %v2605_v40 = vld [vmem:[%s17182_s18 + $0x8] sm:$0xff] }
  0x7b   :  { %11420 = vmatprep.mubr.msk.f32.mxu0 %vm384_vm0, %v262_v41 }
  0x7d   :  { %2005 = vperm.xlu1 %12655, %v1929_v42  }
  0x7e   :  { %2000 = vperm.xlu0 %12654, %v1928_v43   ;;  %11421 = vmatmul.mubr.msk.f32.gmra.mrb[42].mxu0 %vm384_vm0, %v267_v44  ;;  %v2608_v43 = vld [vmem:[%s17182_s18 + $0x20] sm:$0xff]  ;;  %v2607_v44 = vld [vmem:[%s17182_s18 + $0x18] sm:$0xff] }
  0x7f   :  { %11423 = vmatprep.mubr.msk.f32.mxu0 %vm384_vm0, %v272_v45 }
  0x81   :  { %2015 = vperm.xlu1 %12655, %v1931_v46   ;;  %v2610_v46 = vld [vmem:[%s17182_s18 + $0x30] sm:$0xff] }
  0x82   :  { %2010 = vperm.xlu0 %12654, %v1930_v47   ;;  %11424 = vmatmul.mubr.msk.f32.gmra.mrb[44].mxu0 %vm384_vm0, %v277_v48  ;;  %v2609_v47 = vld [vmem:[%s17182_s18 + $0x28] sm:$0xff] }
  0x83   :  { %11426 = vmatprep.mubr.msk.f32.mxu0 %vm384_vm0, %v282_v49  ;;  %v2612_v49 = vld [vmem:[%s17182_s18 + $0x40] sm:$0xff] }
  0x85   :  { %2025 = vperm.xlu1 %12655, %v1933_v50   ;;  %v2611_v50 = vld [vmem:[%s17182_s18 + $0x38] sm:$0xff] }
  0x86   :  { %2020 = vperm.xlu0 %12654, %v1932_v51   ;;  %11427 = vmatmul.mubr.msk.f32.gmra.mrb[46].mxu0 %vm384_vm0, %v287_v52  ;;  %v916_v52 = vld [vmem:[%s17183_s3] sm:$0xff] }
  0x87   :  { %11461 = vmatprep.mubr.f32.mxu1 %v916_v52 }
  0x88   :  { %v13442_v15 = vpop.permute.xlu0 %306  ;;  %v13450_v18 = vpop.permute.xlu1 %316 }
  0x89   :  { %2035 = vperm.xlu1 %12655, %v1935_v53  }
  0x8a   :  { %2030 = vperm.xlu0 %12654, %v1934_v54   ;;  %v2614_v54 = vld [vmem:[%s17182_s18 + $0x50] sm:$0xff] }
  0x8c   :  { %v13460_v22 = vpop.permute.xlu1 %321 }
  0x8d   :  { %2045 = vperm.xlu1 %12655, %v1937_v55   ;;  %v13458_v21 = vpop.permute.xlu0 %311  ;;  %v2613_v55 = vld [vmem:[%s17182_s18 + $0x48] sm:$0xff] }
  0x8e   :  { %2040 = vperm.xlu0 %12654, %v1936_v56  }
  0x90   :  { %v13476_v28 = vpop.permute.xlu1 %331 }
  0x91   :  { %2055 = vperm.xlu1 %12655, %v1939_v57   ;;  %v13468_v25 = vpop.permute.xlu0 %326  ;;  %v2616_v57 = vld [vmem:[%s17182_s18 + $0x60] sm:$0xff] }
  0x92   :  { %2050 = vperm.xlu0 %12654, %v1938_v58   ;;  %v2615_v58 = vld [vmem:[%s17182_s18 + $0x58] sm:$0xff] }
  0x94   :  { %v13486_v32 = vpop.permute.xlu1 %341 }
  0x95   :  { %2065 = vperm.xlu1 %12655, %v1941_v59   ;;  %v13484_v31 = vpop.permute.xlu0 %336 }
  0x96   :  { %2060 = vperm.xlu0 %12654, %v1940_v60   ;;  %v2618_v60 = vld [vmem:[%s17182_s18 + $0x70] sm:$0xff] }
  0x98   :  { %v13502_v38 = vpop.permute.xlu1 %351 }
  0x99   :  { %2075 = vperm.xlu1 %12655, %v1943_v61   ;;  %v13494_v35 = vpop.permute.xlu0 %346  ;;  %v2617_v61 = vld [vmem:[%s17182_s18 + $0x68] sm:$0xff] }
  0x9a   :  { %2070 = vperm.xlu0 %12654, %v1942_v62  }
  0x9c   :  { %v13512_v42 = vpop.permute.xlu1 %361 }
  0x9d   :  { %2085 = vperm.xlu1 %12655, %v1945_v63   ;;  %v13510_v41 = vpop.permute.xlu0 %356 }
  0x9e   :  { %2080 = vperm.xlu0 %12654, %v1944_v0   ;;  %v2619_v0 = vld [vmem:[%s17182_s18 + $0x78] sm:$0xff] }
  0xa0   :  { %v13528_v48 = vpop.permute.xlu1 %371 }
  0xa1   :  { %2095 = vperm.xlu1 %12655, %v1947_v1   ;;  %v13520_v45 = vpop.permute.xlu0 %366 }
  0xa2   :  { %2090 = vperm.xlu0 %12654, %v1946_v2  }
  0xa4   :  { %v13541_v53 = vpop.permute.xlu1 %381 }
  0xa5   :  { %2105 = vperm.xlu1 %12655, %v1949_v3   ;;  %v13536_v51 = vpop.permute.xlu0 %376 }
  0xa6   :  { %2100 = vperm.xlu0 %12654, %v1948_v4  }
  0xa8   :  { %v13557_v59 = vpop.permute.xlu1 %939 }
  0xa9   :  { %2115 = vperm.xlu1 %12655, %v1951_v5   ;;  %v13549_v56 = vpop.permute.xlu0 %934 }
  0xaa   :  { %2110 = vperm.xlu0 %12654, %v1950_v6  }
  0xac   :  { %v13567_v63 = vpop.permute.xlu1 %949 }
  0xad   :  { %2125 = vperm.xlu1 %12655, %v1953_v7   ;;  %v13565_v62 = vpop.permute.xlu0 %944 }
  0xae   :  { %2120 = vperm.xlu0 %12654, %v1952_v8  }
  0xb1   :  { %2135 = vperm.xlu1 %12655, %v1955_v9   ;;  %v13572_v1 = vpop.permute.xlu0 %954 }
  0xb2   :  { %2130 = vperm.xlu0 %12654, %v1954_v10  }
  0xb5   :  { %2145 = vperm.xlu1 %12655, %v1957_v11  }
  0xb6   :  { %2140 = vperm.xlu0 %12654, %v1956_v12  }
  0xb9   :  { %2155 = vperm.xlu1 %12655, %v1959_v13  }
  0xba   :  { %2150 = vperm.xlu0 %12654, %v1958_v14  }
  0xbd   :  { %2165 = vperm.xlu1 %12655, %v1961_v16  }
  0xbe   :  { %2160 = vperm.xlu0 %12654, %v1960_v17  }
  0xc1   :  { %2175 = vperm.xlu1 %12655, %v1963_v19  }
  0xc2   :  { %2170 = vperm.xlu0 %12654, %v1962_v20  }
  0xc5   :  { %2185 = vperm.xlu1 %12655, %v1965_v23  }
  0xc6   :  { %2180 = vperm.xlu0 %12654, %v1964_v24  }
  0xc9   :  { %2195 = vperm.xlu1 %12655, %v1967_v26  }
  0xca   :  { %2190 = vperm.xlu0 %12654, %v1966_v27  }
  0xcd   :  { %2205 = vperm.xlu1 %12655, %v1969_v29  }
  0xce   :  { %2200 = vperm.xlu0 %12654, %v1968_v30  }
  0xd1   :  { %2215 = vperm.xlu1 %12655, %v1971_v33  }
  0xd2   :  { %2210 = vperm.xlu0 %12654, %v1970_v34  }
  0xd5   :  { %2622 = vperm.xlu1 %12655, %v2604_v36  }
  0xd6   :  { %2220 = vperm.xlu0 %12654, %v1972_v37  }
  0xd9   :  { %2632 = vperm.xlu1 %12655, %v2606_v39  }
  0xda   :  { %2627 = vperm.xlu0 %12654, %v2605_v40  }
  0xdd   :  { %2642 = vperm.xlu1 %12655, %v2608_v43  }
  0xde   :  { %2637 = vperm.xlu0 %12654, %v2607_v44  }
  0xe1   :  { %2652 = vperm.xlu1 %12655, %v2610_v46  }
  0xe2   :  { %2647 = vperm.xlu0 %12654, %v2609_v47  }
  0xe5   :  { %2662 = vperm.xlu1 %12655, %v2612_v49  }
  0xe6   :  { %2657 = vperm.xlu0 %12654, %v2611_v50  }
  0xe9   :  { %2672 = vperm.xlu1 %12655, %v2614_v54  }
  0xea   :  { %2667 = vperm.xlu0 %12654, %v2613_v55  }
  0xed   :  { %2682 = vperm.xlu1 %12655, %v2616_v57  }
  0xee   :  { %2677 = vperm.xlu0 %12654, %v2615_v58  }
  0xf1   :  { %2692 = vperm.xlu1 %12655, %v2618_v60  }
  0xf2   :  { %2687 = vperm.xlu0 %12654, %v2617_v61  }
  0xf6   :  { %2697 = vperm.xlu0 %12654, %v2619_v0  }
  0xfd   :  { %v10647_v2 = vpop.f32.mrb[0].mxu0 }
  0xfe   :  { %v10648_v4 = vpop.f32.mrb[1].mxu0 }
  0xff   :  { %v10727_v3 = vpop.f32.mrb[0].mxu1  ;;  %v10649_v6 = vadd.f32 %v10648_v4, %v10647_v2 }
 0x100   :  { %v10728_v5 = vpop.f32.mrb[1].mxu1 }
 0x101   :  { %v10729_v7 = vadd.f32 %v10728_v5, %v10727_v3  ;;  %v10650_v8 = vpop.f32.mrb[2].mxu0  ;;  %v500_v10 = vadd.f32 %v10649_v6, %v13442_v15 }
 0x102   :  { %v10651_v11 = vpop.f32.mrb[3].mxu0 }
 0x103   :  { %v10730_v9 = vpop.f32.mrb[2].mxu1  ;;  %v10652_v13 = vadd.f32 %v10651_v11, %v10650_v8  ;;  %v13575_v16 = vadd.f32 %v10729_v7, %v500_v10 }
 0x104   :  { %v10731_v12 = vpop.f32.mrb[3].mxu1 }
 0x105   :  { %v10732_v14 = vadd.f32 %v10731_v12, %v10730_v9  ;;  %v10653_v17 = vpop.f32.mrb[4].mxu0  ;;  %v505_v20 = vadd.f32 %v10652_v13, %v13458_v21 }
 0x106   :  { %v10654_v23 = vpop.f32.mrb[5].mxu0 }
 0x107   :  { %v10733_v19 = vpop.f32.mrb[4].mxu1  ;;  %v10655_v26 = vadd.f32 %v10654_v23, %v10653_v17  ;;  %v13578_v29 = vadd.f32 %v10732_v14, %v505_v20 }
 0x108   :  { %v10734_v24 = vpop.f32.mrb[5].mxu1 }
 0x109   :  { %v10735_v27 = vadd.f32 %v10734_v24, %v10733_v19  ;;  %v10656_v30 = vpop.f32.mrb[6].mxu0  ;;  %v510_v15 = vadd.f32 %v10655_v26, %v13450_v18 }
 0x10a   :  { %v10657_v34 = vpop.f32.mrb[7].mxu0 }
 0x10b   :  { %v10736_v33 = vpop.f32.mrb[6].mxu1  ;;  %v10658_v37 = vadd.f32 %v10657_v34, %v10656_v30  ;;  %v13581_v40 = vadd.f32 %v10735_v27, %v510_v15 }
 0x10c   :  { %v10737_v36 = vpop.f32.mrb[7].mxu1 }
 0x10d   :  { %v10738_v39 = vadd.f32 %v10737_v36, %v10736_v33  ;;  %v10659_v43 = vpop.f32.mrb[8].mxu0  ;;  %v515_v21 = vadd.f32 %v10658_v37, %v13460_v22 }
 0x10e   :  { %v10660_v46 = vpop.f32.mrb[9].mxu0 }
 0x10f   :  { %v10739_v44 = vpop.f32.mrb[8].mxu1  ;;  %v10661_v49 = vadd.f32 %v10660_v46, %v10659_v43  ;;  %v13584_v52 = vadd.f32 %v10738_v39, %v515_v21 }
 0x110   :  { %v10740_v47 = vpop.f32.mrb[9].mxu1 }
 0x111   :  { %v10741_v50 = vadd.f32 %v10740_v47, %v10739_v44  ;;  %v10662_v54 = vpop.f32.mrb[10].mxu0  ;;  %v520_v18 = vadd.f32 %v10661_v49, %v13468_v25 }
 0x112   :  { %v10663_v57 = vpop.f32.mrb[11].mxu0 }
 0x113   :  { %v10742_v55 = vpop.f32.mrb[10].mxu1  ;;  %v10664_v60 = vadd.f32 %v10663_v57, %v10662_v54  ;;  %v13587_v0 = vadd.f32 %v10741_v50, %v520_v18 }
 0x114   :  { %v10743_v58 = vpop.f32.mrb[11].mxu1 }
 0x115   :  { %v10744_v61 = vadd.f32 %v10743_v58, %v10742_v55  ;;  %v10665_v2 = vpop.f32.mrb[12].mxu0  ;;  %v525_v22 = vadd.f32 %v10664_v60, %v13476_v28 }
 0x116   :  { %v10666_v4 = vpop.f32.mrb[13].mxu0 }
 0x117   :  { %v10745_v3 = vpop.f32.mrb[12].mxu1  ;;  %v10667_v6 = vadd.f32 %v10666_v4, %v10665_v2  ;;  %v13590_v8 = vadd.f32 %v10744_v61, %v525_v22 }
 0x118   :  { %v10746_v5 = vpop.f32.mrb[13].mxu1 }
 0x119   :  { %v10747_v7 = vadd.f32 %v10746_v5, %v10745_v3  ;;  %v10668_v9 = vpop.f32.mrb[14].mxu0  ;;  %v530_v25 = vadd.f32 %v10667_v6, %v13484_v31 }
 0x11a   :  { %v10669_v11 = vpop.f32.mrb[15].mxu0 }
 0x11b   :  { %v10748_v10 = vpop.f32.mrb[14].mxu1  ;;  %v10670_v13 = vadd.f32 %v10669_v11, %v10668_v9  ;;  %v13593_v17 = vadd.f32 %v10747_v7, %v530_v25 }
 0x11c   :  { %v10749_v12 = vpop.f32.mrb[15].mxu1 }
 0x11d   :  { %v10750_v14 = vadd.f32 %v10749_v12, %v10748_v10  ;;  %v10671_v19 = vpop.f32.mrb[16].mxu0  ;;  %v535_v28 = vadd.f32 %v10670_v13, %v13486_v32 }
 0x11e   :  { %v10672_v23 = vpop.f32.mrb[17].mxu0 }
 0x11f   :  { %v10751_v20 = vpop.f32.mrb[16].mxu1  ;;  %v10673_v26 = vadd.f32 %v10672_v23, %v10671_v19  ;;  %v13596_v30 = vadd.f32 %v10750_v14, %v535_v28 }
 0x120   :  { %v10752_v24 = vpop.f32.mrb[17].mxu1 }
 0x121   :  { %v10753_v27 = vadd.f32 %v10752_v24, %v10751_v20  ;;  %v10674_v33 = vpop.f32.mrb[18].mxu0  ;;  %v540_v31 = vadd.f32 %v10673_v26, %v13494_v35 }
 0x122   :  { %v10675_v34 = vpop.f32.mrb[19].mxu0 }
 0x123   :  { %v10754_v15 = vpop.f32.mrb[18].mxu1  ;;  %v10676_v37 = vadd.f32 %v10675_v34, %v10674_v33  ;;  %v13599_v43 = vadd.f32 %v10753_v27, %v540_v31 }
 0x124   :  { %v10755_v36 = vpop.f32.mrb[19].mxu1 }
 0x125   :  { %v10756_v39 = vadd.f32 %v10755_v36, %v10754_v15  ;;  %v10677_v44 = vpop.f32.mrb[20].mxu0  ;;  %v545_v32 = vadd.f32 %v10676_v37, %v13502_v38 }
 0x126   :  { %v10678_v46 = vpop.f32.mrb[21].mxu0 }
 0x127   :  { %v10757_v21 = vpop.f32.mrb[20].mxu1  ;;  %v10679_v49 = vadd.f32 %v10678_v46, %v10677_v44  ;;  %v13602_v54 = vadd.f32 %v10756_v39, %v545_v32 }
 0x128   :  { %v10758_v47 = vpop.f32.mrb[21].mxu1 }
 0x129   :  { %v10759_v50 = vadd.f32 %v10758_v47, %v10757_v21  ;;  %v10680_v55 = vpop.f32.mrb[22].mxu0  ;;  %v550_v35 = vadd.f32 %v10679_v49, %v13510_v41 }
 0x12a   :  { %v10681_v57 = vpop.f32.mrb[23].mxu0 }
 0x12b   :  { %v10760_v18 = vpop.f32.mrb[22].mxu1  ;;  %v10682_v60 = vadd.f32 %v10681_v57, %v10680_v55  ;;  %v13605_v2 = vadd.f32 %v10759_v50, %v550_v35 }
 0x12c   :  { %v10761_v58 = vpop.f32.mrb[23].mxu1 }
 0x12d   :  { %v10762_v61 = vadd.f32 %v10761_v58, %v10760_v18  ;;  %v10683_v3 = vpop.f32.mrb[24].mxu0  ;;  %v555_v38 = vadd.f32 %v10682_v60, %v13512_v42 }
 0x12e   :  { %v10684_v4 = vpop.f32.mrb[25].mxu0 }
 0x12f   :  { %v10763_v22 = vpop.f32.mrb[24].mxu1  ;;  %v10685_v6 = vadd.f32 %v10684_v4, %v10683_v3  ;;  %v13608_v9 = vadd.f32 %v10762_v61, %v555_v38 }
 0x130   :  { %v10764_v5 = vpop.f32.mrb[25].mxu1 }
 0x131   :  { %v10765_v7 = vadd.f32 %v10764_v5, %v10763_v22  ;;  %v10686_v10 = vpop.f32.mrb[26].mxu0  ;;  %v560_v41 = vadd.f32 %v10685_v6, %v13520_v45 }
 0x132   :  { %v10687_v11 = vpop.f32.mrb[27].mxu0 }
 0x133   :  { %v10766_v25 = vpop.f32.mrb[26].mxu1  ;;  %v10688_v13 = vadd.f32 %v10687_v11, %v10686_v10  ;;  %v13611_v19 = vadd.f32 %v10765_v7, %v560_v41 }
 0x134   :  { %v10767_v12 = vpop.f32.mrb[27].mxu1 }
 0x135   :  { %v10768_v14 = vadd.f32 %v10767_v12, %v10766_v25  ;;  %v10689_v20 = vpop.f32.mrb[28].mxu0  ;;  %v565_v42 = vadd.f32 %v10688_v13, %v13528_v48 }
 0x136   :  { %v10690_v23 = vpop.f32.mrb[29].mxu0 }
 0x137   :  { %v10769_v28 = vpop.f32.mrb[28].mxu1  ;;  %v10691_v26 = vadd.f32 %v10690_v23, %v10689_v20  ;;  %v13614_v33 = vadd.f32 %v10768_v14, %v565_v42 }
 0x138   :  { %v10770_v24 = vpop.f32.mrb[29].mxu1 }
 0x139   :  { %v10771_v27 = vadd.f32 %v10770_v24, %v10769_v28  ;;  %v10692_v15 = vpop.f32.mrb[30].mxu0  ;;  %v570_v45 = vadd.f32 %v10691_v26, %v13536_v51 }
 0x13a   :  { %v10693_v34 = vpop.f32.mrb[31].mxu0 }
 0x13b   :  { %v10772_v31 = vpop.f32.mrb[30].mxu1  ;;  %v10694_v37 = vadd.f32 %v10693_v34, %v10692_v15  ;;  %v13617_v44 = vadd.f32 %v10771_v27, %v570_v45 }
 0x13c   :  { %v10773_v36 = vpop.f32.mrb[31].mxu1 }
 0x13d   :  { %v10774_v39 = vadd.f32 %v10773_v36, %v10772_v31  ;;  %v11407_v21 = vpop.f32.mrb[32].mxu0  ;;  %v575_v32 = vadd.f32 %v10694_v37, %v13541_v53 }
 0x13e   :  { %v795_v48 = vadd.f32 %v11407_v21, %v13578_v29  ;;  %v789_v46 = vpop.f32.mrb[33].mxu0 }
 0x13f   :  { %v790_v47 = vadd.f32 %v789_v46, %v13575_v16  ;;  %v13622_v49 = vadd.f32 %v10774_v39, %v575_v32 }
 0x140   :  { %vm869_vm1 = vcmp.gt.f32.partialorder %v795_v48, 0.0  ;;  %v885_v50 = vmul.f32 0.01, %v795_v48 }
 0x141   :  { %vm868_vm2 = vcmp.gt.f32.partialorder %v790_v47, 0.0  ;;  %v884_v51 = vmul.f32 0.01, %v790_v47  ;;  %v11410_v55 = vpop.f32.mrb[34].mxu0 }
 0x142   :  { %v805_v18 = vadd.f32 %v11410_v55, %v13584_v52  ;;  %v799_v35 = vpop.f32.mrb[35].mxu0  ;;  %v901_v57 = vsel %vm869_vm1, %v795_v48, %v885_v50 }
 0x143   :  { %v800_v58 = vadd.f32 %v799_v35, %v13581_v40  ;;  %v900_v60 = vsel %vm868_vm2, %v790_v47, %v884_v51  ;;  %vm12701_vm2 = vmmov 0  }
 0x144   :  { %vm871_vm3 = vcmp.gt.f32.partialorder %v805_v18, 0.0  ;;  %v887_v53 = vmul.f32 0.01, %v805_v18  ;;  %v12447_v29 = vpack.c.bf16 %v901_v57, %v900_v60 }
 0x145   :  { %vm870_vm4 = vcmp.gt.f32.partialorder %v800_v58, 0.0  ;;  %v886_v61 = vmul.f32 0.01, %v800_v58  ;;  %v11413_v16 = vpop.f32.mrb[36].mxu0 }
 0x146   :  { %v815_v3 = vadd.f32 %v11413_v16, %v13590_v8  ;;  %v809_v22 = vpop.f32.mrb[37].mxu0  ;;  %12448 = vmatprep.subr.bf16.mxu1 %v12447_v29  ;;  %v903_v38 = vsel %vm871_vm3, %v805_v18, %v887_v53  ;;  %v919_v16 = vld [vmem:[%s17183_s3 + $0x18] sm:$0xff]  ;;  %vm1181_vm3 = vcmask 130048  }
 0x147   :  { %v810_v4 = vadd.f32 %v809_v22, %v13587_v0  ;;  %12450 = vmatpush3.bf16.msra.mxu1 %v12447_v29  ;;  %v902_v52 = vsel %vm870_vm4, %v800_v58, %v886_v61  ;;  %v921_v22 = vld [vmem:[%s17183_s3 + $0x28] sm:$0xff]  ;;  %vm1271_vm4 = vcmask 15360  }
 0x148   :  { %vm873_vm5 = vcmp.gt.f32.partialorder %v815_v3, 0.0  ;;  %v889_v5 = vmul.f32 0.01, %v815_v3  ;;  %v12451_v6 = vpack.c.bf16 %v903_v38, %v902_v52  ;;  %v922_v38 = vld [vmem:[%s17183_s3 + $0x30] sm:$0xff]  ;;  %v1077_v52 = vld [vmem:[%s17184_s5] sm:$0xff] }
 0x149   :  { %vm872_vm6 = vcmp.gt.f32.partialorder %v810_v4, 0.0  ;;  %v888_v40 = vmul.f32 0.01, %v810_v4  ;;  %v11416_v7 = vpop.f32.mrb[38].mxu0 }
 0x14a   :  { %v825_v10 = vadd.f32 %v11416_v7, %v13596_v30  ;;  %v819_v25 = vpop.f32.mrb[39].mxu0  ;;  %12452 = vmatprep.subr.bf16.mxu1 %v12451_v6  ;;  %v905_v41 = vsel %vm873_vm5, %v815_v3, %v889_v5  ;;  %v920_v3 = vld [vmem:[%s17183_s3 + $0x20] sm:$0xff]  ;;  %vm1255_vm5 = vcmask 9216  }
 0x14b   :  { %v820_v8 = vadd.f32 %v819_v25, %v13593_v17  ;;  %12454 = vmatpush3.bf16.msra.mxu1 %v12451_v6  ;;  %v904_v11 = vsel %vm872_vm6, %v810_v4, %v888_v40  ;;  %v923_v4 = vld [vmem:[%s17183_s3 + $0x38] sm:$0xff]  ;;  %vm1278_vm6 = vcmask 1041408  }
 0x14c   :  { %vm875_vm7 = vcmp.gt.f32.partialorder %v825_v10, 0.0  ;;  %v891_v12 = vmul.f32 0.01, %v825_v10  ;;  %v12455_v0 = vpack.c.bf16 %v905_v41, %v904_v11  ;;  %v960_v11 = vpop.permute.xlu1 %959 }
 0x14d   :  { %vm874_vm8 = vcmp.gt.f32.partialorder %v820_v8, 0.0  ;;  %v890_v13 = vmul.f32 0.01, %v820_v8  ;;  %v11419_v14 = vpop.f32.mrb[40].mxu0 }
 0x14e   :  { %v835_v20 = vadd.f32 %v11419_v14, %v13602_v54  ;;  %v829_v28 = vpop.f32.mrb[41].mxu0  ;;  %12456 = vmatprep.subr.bf16.mxu1 %v12455_v0  ;;  %v907_v42 = vsel %vm875_vm7, %v825_v10, %v891_v12 }
 0x14f   :  { %v830_v30 = vadd.f32 %v829_v28, %v13599_v43  ;;  %12458 = vmatpush3.bf16.msra.mxu1 %v12455_v0  ;;  %v906_v23 = vsel %vm874_vm8, %v820_v8, %v890_v13 }
 0x150   :  { %vm877_vm9 = vcmp.gt.f32.partialorder %v835_v20, 0.0  ;;  %v893_v24 = vmul.f32 0.01, %v835_v20  ;;  %v12459_v17 = vpack.c.bf16 %v907_v42, %v906_v23 }
 0x151   :  { %vm876_vm10 = vcmp.gt.f32.partialorder %v830_v30, 0.0  ;;  %v892_v26 = vmul.f32 0.01, %v830_v30  ;;  %v11422_v27 = vpop.f32.mrb[42].mxu0 }
 0x152   :  { %v845_v15 = vadd.f32 %v11422_v27, %v13608_v9  ;;  %v839_v31 = vpop.f32.mrb[43].mxu0  ;;  %12460 = vmatprep.subr.bf16.mxu1 %v12459_v17  ;;  %v909_v45 = vsel %vm877_vm9, %v835_v20, %v893_v24 }
 0x153   :  { %v840_v54 = vadd.f32 %v839_v31, %v13605_v2  ;;  %12462 = vmatpush3.bf16.msra.mxu1 %v12459_v17  ;;  %v908_v34 = vsel %vm876_vm10, %v830_v30, %v892_v26  ;;  %v965_v30 = vpop.permute.xlu0 %964  ;;  %v1078_v17 = vld [vmem:[%s17184_s5 + $0x8] sm:$0xff]  ;;  %v12702_v26 = vmov 0.0  }
 0x154   :  { %vm879_vm11 = vcmp.gt.f32.partialorder %v845_v15, 0.0  ;;  %v895_v36 = vmul.f32 0.01, %v845_v15  ;;  %v12463_v43 = vpack.c.bf16 %v909_v45, %v908_v34 }
 0x155   :  { %vm878_vm12 = vcmp.gt.f32.partialorder %v840_v54, 0.0  ;;  %v894_v37 = vmul.f32 0.01, %v840_v54  ;;  %v11425_v39 = vpop.f32.mrb[44].mxu0 }
 0x156   :  { %v855_v21 = vadd.f32 %v11425_v39, %v13614_v33  ;;  %v849_v32 = vpop.f32.mrb[45].mxu0  ;;  %12464 = vmatprep.subr.bf16.mxu1 %v12463_v43  ;;  %v911_v48 = vsel %vm879_vm11, %v845_v15, %v895_v36  ;;  %v1174_v39 = vld [vmem:[%s17185_s7] sm:$0x3] }
 0x157   :  { %v850_v9 = vadd.f32 %v849_v32, %v13611_v19  ;;  %12466 = vmatpush3.bf16.msra.mxu1 %v12463_v43  ;;  %v910_v46 = vsel %vm878_vm12, %v840_v54, %v894_v37  ;;  %v1084_v31 = vpop.permute.xlu0 %1083 }
 0x158   :  { %vm881_vm13 = vcmp.gt.f32.partialorder %v855_v21, 0.0  ;;  %v897_v47 = vmul.f32 0.01, %v855_v21  ;;  %v12467_v2 = vpack.c.bf16 %v911_v48, %v910_v46 }
 0x159   :  { %vm880_vm14 = vcmp.gt.f32.partialorder %v850_v9, 0.0  ;;  %v896_v50 = vmul.f32 0.01, %v850_v9  ;;  %v11428_v51 = vpop.f32.mrb[46].mxu0 }
 0x15a   :  { %v865_v55 = vadd.f32 %v11428_v51, %v13622_v49  ;;  %v859_v18 = vpop.f32.mrb[47].mxu0  ;;  %12468 = vmatprep.subr.bf16.mxu1 %v12467_v2  ;;  %v913_v35 = vsel %vm881_vm13, %v855_v21, %v897_v47  ;;  %v917_v49 = vld [vmem:[%s17183_s3 + $0x8] sm:$0xff]  ;;  %v1257_v21 = vld [vmem:[%s17186_s9] sm:$0xff] }
 0x15b   :  { %v860_v33 = vadd.f32 %v859_v18, %v13617_v44  ;;  %12470 = vmatpush3.bf16.msra.mxu1 %v12467_v2  ;;  %v912_v57 = vsel %vm880_vm14, %v850_v9, %v896_v50  ;;  %v918_v44 = vld [vmem:[%s17183_s3 + $0x10] sm:$0xff]  ;;  %v1179_v32 = vpop.permute.xlu0 %1178  ;;  %v1258_v47 = vld [vmem:[%s17186_s9 + $0x8] sm:$0xff]  ;;  %v1359_v2 = vld [vmem:[%s17188_s11] sm:$0xff] }
 0x15c   :  { %vm883_vm15 = vcmp.gt.f32.partialorder %v865_v55, 0.0  ;;  %v899_v58 = vmul.f32 0.01, %v865_v55  ;;  %v12471_v19 = vpack.c.bf16 %v913_v35, %v912_v57 }
 0x15d   :  { %vm882_vm1 = vcmp.gt.f32.partialorder %v860_v33, 0.0  ;;  %v898_v60 = vmul.f32 0.01, %v860_v33 }
 0x15e   :  { %12472 = vmatprep.subr.bf16.mxu1 %v12471_v19  ;;  %v915_v53 = vsel %vm883_vm15, %v865_v55, %v899_v58 }
 0x15f   :  { %12474 = vmatpush3.bf16.msra.mxu1 %v12471_v19  ;;  %v914_v29 = vsel %vm882_vm1, %v860_v33, %v898_v60  ;;  %v1269_v50 = vpop.permute.xlu0 %1268  ;;  %v1360_v60 = vld [vmem:[%s17188_s11 + $0x8] sm:$0xff] }
 0x160   :  { %v12475_v61 = vpack.c.bf16 %v915_v53, %v914_v29  ;;  %v1361_v53 = vld [vmem:[%s17188_s11 + $0x10] sm:$0xff]  ;;  %v1362_v29 = vld [vmem:[%s17188_s11 + $0x18] sm:$0xff] }
 0x162   :  { %12476 = vmatprep.subr.bf16.mxu1 %v12475_v61 }
 0x163   :  { %12478 = vmatpush3.bf16.msra.mxu1 %v12475_v61  ;;  %v1363_v61 = vld [vmem:[%s17188_s11 + $0x20] sm:$0xff] }
 0x166   :  { %11462 = vmatmul.mubr.f32.vlgmr.msra.gmra.mrb[32].mxu1 %v917_v49  ;;  %v1364_v49 = vld [vmem:[%s17188_s11 + $0x28] sm:$0xff] }
 0x167   :  { %11464 = vmatprep.mubr.f32.mxu1 %v918_v44  ;;  %v1365_v44 = vld [vmem:[%s17188_s11 + $0x30] sm:$0xff] }
 0x16a   :  { %11465 = vmatmul.mubr.f32.gmra.mrb[34].mxu1 %v919_v16  ;;  %v1366_v16 = vld [vmem:[%s17188_s11 + $0x38] sm:$0xff] }
 0x16b   :  { %11467 = vmatprep.mubr.f32.mxu1 %v920_v3  ;;  %v1552_v3 = vld [vmem:[%s17189_s13] sm:$0xff] }
 0x16c   :  { %11536 = vmatprep.mubr.msk.f32.mxu0 %vm384_vm0, %v1552_v3 }
 0x16e   :  { %11468 = vmatmul.mubr.f32.gmra.mrb[36].mxu1 %v921_v22  ;;  %v1383_v22 = vpop.permute.xlu0 %1382 }
 0x16f   :  { %11470 = vmatprep.mubr.f32.mxu1 %v922_v38 }
 0x172   :  { %11471 = vmatmul.mubr.f32.gmra.mrb[38].mxu1 %v923_v4  ;;  %v1393_v4 = vpop.permute.xlu0 %1392 }
 0x173   :  { %11489 = vmatprep.mubr.msk.f32.mxu1 %vm384_vm0, %v1077_v52 }
 0x239   :  { %v11463_v5 = vpop.f32.mrb[32].mxu1 }
 0x23a   :  { %v1044_v6 = vadd.f32 %v11463_v5, %v13557_v59  ;;  %v1038_v40 = vpop.f32.mrb[33].mxu1  ;;  %v970_v59 = vpop.permute.xlu1 %969 }
 0x23b   :  { %v1039_v7 = vadd.f32 %v1038_v40, %v13549_v56 }
 0x23d   :  { %v12479_v10 = vpack.c.bf16 %v1044_v6, %v1039_v7  ;;  %v11466_v25 = vpop.f32.mrb[34].mxu1 }
 0x23e   :  { %v1054_v41 = vadd.f32 %v11466_v25, %v13567_v63  ;;  %v1048_v8 = vpop.f32.mrb[35].mxu1  ;;  %v1089_v27 = vpop.permute.xlu1 %1088 }
 0x23f   :  { %v1049_v12 = vadd.f32 %v1048_v8, %v13565_v62  ;;  %12480 = vmatprep.subr.bf16.mxu1 %v12479_v10 }
 0x240   :  { %12482 = vmatpush3.bf16.msra.mxu1 %v12479_v10 }
 0x241   :  { %v12483_v0 = vpack.c.bf16 %v1054_v41, %v1049_v12  ;;  %v11469_v13 = vpop.f32.mrb[36].mxu1  ;;  %v1403_v12 = vpop.permute.xlu0 %1402 }
 0x242   :  { %v1064_v14 = vadd.f32 %v11469_v13, %v960_v11  ;;  %v1058_v20 = vpop.f32.mrb[37].mxu1  ;;  %v1264_v55 = vpop.permute.xlu1 %1263 }
 0x243   :  { %v1059_v28 = vadd.f32 %v1058_v20, %v13572_v1  ;;  %12484 = vmatprep.subr.bf16.mxu1 %v12483_v0  ;;  %v12700_v1 = vmov 0.0|0.0  }
 0x244   :  { %12486 = vmatpush3.bf16.msra.mxu1 %v12483_v0 }
 0x245   :  { %v12487_v56 = vpack.c.bf16 %v1064_v14, %v1059_v28  ;;  %v11472_v42 = vpop.f32.mrb[38].mxu1 }
 0x246   :  { %v1074_v23 = vadd.f32 %v11472_v42, %v970_v59  ;;  %v1068_v63 = vpop.f32.mrb[39].mxu1  ;;  %v1378_v38 = vpop.permute.xlu1 %1377 }
 0x247   :  { %v1069_v24 = vadd.f32 %v1068_v63, %v965_v30  ;;  %12488 = vmatprep.subr.bf16.mxu1 %v12487_v56 }
 0x248   :  { %12490 = vmatpush3.bf16.msra.mxu1 %v12487_v56 }
 0x249   :  { %v12491_v62 = vpack.c.bf16 %v1074_v23, %v1069_v24  ;;  %v1413_v24 = vpop.permute.xlu0 %1412 }
 0x24a   :  { %v1388_v5 = vpop.permute.xlu1 %1387 }
 0x24b   :  { %12492 = vmatprep.subr.bf16.mxu1 %v12491_v62 }
 0x24c   :  { %12494 = vmatpush3.bf16.msra.mxu1 %v12491_v62 }
 0x24d   :  { %12495 = vmatprep.subr.bf16.mxu1 %v12700_v1 }
 0x24e   :  { %v1398_v14 = vpop.permute.xlu1 %1397 }
 0x24f   :  { %11490 = vmatmul.mubr.msk.f32.vlgmr.msra.gmra.mrb[40].mxu1 %vm384_vm0, %v1078_v17 }
 0x250   :  { %11496 = vmatprep.mubr.msk.f32.mxu1 %vm12701_vm2, %v12702_v26 }
 0x252   :  { %v1408_v1 = vpop.permute.xlu1 %1407 }
 0x322   :  { %v11491_v15 = vpop.f32.mrb[40].mxu1 }
 0x323   :  { %v1169_v45 = vadd.f32 %v11491_v15, %v1089_v27  ;;  %v1163_v54 = vpop.f32.mrb[41].mxu1 }
 0x324   :  { %v1164_v34 = vadd.f32 %v1163_v54, %v1084_v31 }
 0x325   :  { %v1173_v36 = vmax.f32 %v1169_v45, 0.0 }
 0x326   :  { %v1172_v43 = vmax.f32 %v1164_v34, 0.0 }
 0x328   :  { %v12496_v37 = vpack.c.bf16 %v1173_v36, %v1172_v43  ;;  %v1553_v36 = vld [vmem:[%s17189_s13 + $0x8] sm:$0xff]  ;;  %v1554_v43 = vld [vmem:[%s17189_s13 + $0x10] sm:$0xff] }
 0x32a   :  { %12497 = vmatpush3.bf16.msra.mxu1 %v12496_v37  ;;  %v1555_v37 = vld [vmem:[%s17189_s13 + $0x18] sm:$0xff] }
 0x32d   :  { %11497 = vmatmul.mubr.msk.f32.vlgmr.msra.gmra.mrb[42].mxu1 %vm1181_vm3, %v1174_v39  ;;  %v1556_v39 = vld [vmem:[%s17189_s13 + $0x20] sm:$0xff] }
 0x32e   :  { %11501 = vmatprep.mubr.msk.f32.mxu1 %vm1271_vm4, %v1257_v21  ;;  %v1557_v21 = vld [vmem:[%s17189_s13 + $0x28] sm:$0xff] }
 0x400   :  { %v1251_v48 = vpop.f32.mrb[42].mxu1 }
 0x401   :  { %v1252_v9 = vadd.f32 %v1251_v48, %v1179_v32  ;;  %v11498_v46 = vpop.f32.mrb[43].mxu1  ;;  %v1558_v32 = vld [vmem:[%s17189_s13 + $0x30] sm:$0xff]  ;;  %v1559_v48 = vld [vmem:[%s17189_s13 + $0x38] sm:$0xff] }
 0x402   :  { %v1561_v46 = vld [vmem:[%s17189_s13 + $0x48] sm:$0xff] }
 0x403   :  { %1256 = vst.msk [vmem:[%s17187_s19] sm:$0x3] %vm1255_vm5, %v1252_v9  ;;  %11499 = vmatprep.subr.msk.mxu1 %vm1278_vm6, %v1252_v9 }
 0x404   :  { %11500 = vmatpush3.msk.msra.mxu1 %vm1278_vm6, %v1252_v9  ;;  %v1560_v9 = vld [vmem:[%s17189_s13 + $0x40] sm:$0xff] }
 0x405   :  { %11502 = vmatmul.mubr.msk.f32.vlgmr.msra.gmra.mrb[44].mxu1 %vm1271_vm4, %v1258_v47  ;;  %v1562_v47 = vld [vmem:[%s17189_s13 + $0x50] sm:$0xff] }
 0x406   :  { %11508 = vmatprep.mubr.msk.f32.mxu1 %vm1181_vm3, %v1359_v2  ;;  %v1563_v2 = vld [vmem:[%s17189_s13 + $0x58] sm:$0xff] }
 0x4d8   :  { %v11503_v51 = vpop.f32.mrb[44].mxu1 }
 0x4d9   :  { %v1354_v18 = vadd.f32 %v11503_v51, %v1269_v50  ;;  %v1348_v35 = vpop.f32.mrb[45].mxu1  ;;  %v1564_v50 = vld [vmem:[%s17189_s13 + $0x60] sm:$0xff]  ;;  %v1565_v51 = vld [vmem:[%s17189_s13 + $0x68] sm:$0xff] }
 0x4da   :  { %v1349_v33 = vadd.f32 %v1348_v35, %v1264_v55  ;;  %v1566_v55 = vld [vmem:[%s17189_s13 + $0x70] sm:$0xff]  ;;  %v1873_v35 = vld [vmem:[%s17190_s15] sm:$0xff] }
 0x4db   :  { %v1358_v57 = vmax.f32 %v1354_v18, 0.0  ;;  %v1567_v18 = vld [vmem:[%s17189_s13 + $0x78] sm:$0xff] }
 0x4dc   :  { %v1357_v58 = vmax.f32 %v1349_v33, 0.0  ;;  %v1592_v33 = vpop.permute.xlu0 %1591 }
 0x4de   :  { %v12498_v19 = vpack.c.bf16 %v1358_v57, %v1357_v58  ;;  %v1587_v57 = vpop.permute.xlu1 %1586 }
 0x4e0   :  { %12499 = vmatprep.subr.bf16.mxu1 %v12498_v19  ;;  %v1602_v58 = vpop.permute.xlu0 %1601 }
 0x4e1   :  { %12501 = vmatpush3.bf16.msra.mxu1 %v12498_v19 }
 0x4e2   :  { %v1597_v19 = vpop.permute.xlu1 %1596 }
 0x4e4   :  { %11509 = vmatmul.mubr.msk.f32.vlgmr.msra.gmra.mrb[46].mxu1 %vm1181_vm3, %v1360_v60  ;;  %v1612_v60 = vpop.permute.xlu0 %1611 }
 0x4e5   :  { %11511 = vmatprep.mubr.msk.f32.mxu1 %vm1181_vm3, %v1361_v53 }
 0x4e6   :  { %v1607_v53 = vpop.permute.xlu1 %1606 }
 0x4e8   :  { %11512 = vmatmul.mubr.msk.f32.gmra.mrb[48].mxu1 %vm1181_vm3, %v1362_v29  ;;  %v1622_v3 = vpop.permute.xlu0 %1621 }
 0x4e9   :  { %11514 = vmatprep.mubr.msk.f32.mxu1 %vm1181_vm3, %v1363_v61 }
 0x4ec   :  { %11515 = vmatmul.mubr.msk.f32.gmra.mrb[50].mxu1 %vm1181_vm3, %v1364_v49 }
 0x4ed   :  { %11517 = vmatprep.mubr.msk.f32.mxu1 %vm1181_vm3, %v1365_v44 }
 0x4f0   :  { %11518 = vmatmul.mubr.msk.f32.gmra.mrb[52].mxu1 %vm1181_vm3, %v1366_v16 }
 0x4f1   :  { %11592 = vmatprep.mubr.f32.mxu1 %v1873_v35 }
 0x5b7   :  { %v11510_v52 = vpop.f32.mrb[46].mxu1 }
 0x5b8   :  { %v1511_v6 = vadd.f32 %v11510_v52, %v1383_v22  ;;  %v1505_v40 = vpop.f32.mrb[47].mxu1 }
 0x5b9   :  { %v1506_v7 = vadd.f32 %v1505_v40, %v1378_v38 }
 0x5ba   :  { %v1545_v10 = vmax.f32 %v1511_v6, 0.0 }
 0x5bb   :  { %v1544_v25 = vmax.f32 %v1506_v7, 0.0  ;;  %v11513_v41 = vpop.f32.mrb[48].mxu1 }
 0x5bc   :  { %v1521_v8 = vadd.f32 %v11513_v41, %v1393_v4  ;;  %v1515_v11 = vpop.f32.mrb[49].mxu1  ;;  %v1617_v4 = vpop.permute.xlu1 %1616 }
 0x5bd   :  { %v12502_v0 = vpack.c.bf16 %v1545_v10, %v1544_v25  ;;  %v1516_v13 = vadd.f32 %v1515_v11, %v1388_v5  ;;  %v1632_v11 = vpop.permute.xlu0 %1631 }
 0x5be   :  { %v1547_v20 = vmax.f32 %v1521_v8, 0.0 }
 0x5bf   :  { %v1546_v28 = vmax.f32 %v1516_v13, 0.0  ;;  %v11516_v59 = vpop.f32.mrb[50].mxu1  ;;  %12503 = vmatprep.subr.bf16.mxu0 %v12502_v0 }
 0x5c0   :  { %v1531_v56 = vadd.f32 %v11516_v59, %v1403_v12  ;;  %v1525_v42 = vpop.f32.mrb[51].mxu1  ;;  %12505 = vmatpush3.bf16.msra.mxu0 %v12502_v0  ;;  %v1627_v13 = vpop.permute.xlu1 %1626 }
 0x5c1   :  { %v12506_v30 = vpack.c.bf16 %v1547_v20, %v1546_v28  ;;  %v1526_v23 = vadd.f32 %v1525_v42, %v1398_v14 }
 0x5c2   :  { %v1549_v63 = vmax.f32 %v1531_v56, 0.0 }
 0x5c3   :  { %v1548_v62 = vmax.f32 %v1526_v23, 0.0  ;;  %v11519_v17 = vpop.f32.mrb[52].mxu1  ;;  %12507 = vmatprep.subr.bf16.mxu0 %v12506_v30 }
 0x5c4   :  { %v1541_v26 = vadd.f32 %v11519_v17, %v1413_v24  ;;  %v1535_v27 = vpop.f32.mrb[53].mxu1  ;;  %12509 = vmatpush3.bf16.msra.mxu0 %v12506_v30  ;;  %v1637_v17 = vpop.permute.xlu1 %1636 }
 0x5c5   :  { %v12510_v15 = vpack.c.bf16 %v1549_v63, %v1548_v62  ;;  %v1536_v31 = vadd.f32 %v1535_v27, %v1408_v1  ;;  %v1642_v63 = vpop.permute.xlu0 %1641 }
 0x5c6   :  { %v1551_v45 = vmax.f32 %v1541_v26, 0.0 }
 0x5c7   :  { %v1550_v54 = vmax.f32 %v1536_v31, 0.0  ;;  %12511 = vmatprep.subr.bf16.mxu0 %v12510_v15 }
 0x5c8   :  { %12513 = vmatpush3.bf16.msra.mxu0 %v12510_v15 }
 0x5c9   :  { %v12514_v34 = vpack.c.bf16 %v1551_v45, %v1550_v54 }
 0x5cb   :  { %12515 = vmatprep.subr.bf16.mxu0 %v12514_v34 }
 0x5cc   :  { %12517 = vmatpush3.bf16.msra.mxu0 %v12514_v34 }
 0x5cf   :  { %11537 = vmatmul.mubr.msk.f32.vlgmr.msra.gmra.mrb[48].mxu0 %vm384_vm0, %v1553_v36 }
 0x5d0   :  { %11539 = vmatprep.mubr.msk.f32.mxu0 %vm384_vm0, %v1554_v43  ;;  %v1652_v43 = vpop.permute.xlu0 %1651 }
 0x5d3   :  { %11540 = vmatmul.mubr.msk.f32.gmra.mrb[50].mxu0 %vm384_vm0, %v1555_v37 }
 0x5d4   :  { %11542 = vmatprep.mubr.msk.f32.mxu0 %vm384_vm0, %v1556_v39 }
 0x5d7   :  { %11543 = vmatmul.mubr.msk.f32.gmra.mrb[52].mxu0 %vm384_vm0, %v1557_v21  ;;  %v1647_v21 = vpop.permute.xlu1 %1646 }
 0x5d8   :  { %11545 = vmatprep.mubr.msk.f32.mxu0 %vm384_vm0, %v1558_v32 }
 0x5db   :  { %11546 = vmatmul.mubr.msk.f32.gmra.mrb[54].mxu0 %vm384_vm0, %v1559_v48 }
 0x5dc   :  { %11548 = vmatprep.mubr.msk.f32.mxu0 %vm384_vm0, %v1560_v9 }
 0x5df   :  { %11549 = vmatmul.mubr.msk.f32.gmra.mrb[56].mxu0 %vm384_vm0, %v1561_v46 }
 0x5e0   :  { %11551 = vmatprep.mubr.msk.f32.mxu0 %vm384_vm0, %v1562_v47 }
 0x5e3   :  { %11552 = vmatmul.mubr.msk.f32.gmra.mrb[58].mxu0 %vm384_vm0, %v1563_v2 }
 0x5e4   :  { %11554 = vmatprep.mubr.msk.f32.mxu0 %vm384_vm0, %v1564_v50 }
 0x5e7   :  { %11555 = vmatmul.mubr.msk.f32.gmra.mrb[60].mxu0 %vm384_vm0, %v1565_v51 }
 0x5e8   :  { %11557 = vmatprep.mubr.msk.f32.mxu0 %vm384_vm0, %v1566_v55  ;;  %v1662_v55 = vpop.permute.xlu0 %1661 }
 0x5eb   :  { %11558 = vmatmul.mubr.msk.f32.gmra.mrb[62].mxu0 %vm384_vm0, %v1567_v18  ;;  %vm2973_vm0 = vcmask 11264  }
 0x6a2   :  { %v11538_v29 = vpop.f32.mrb[48].mxu0 }
 0x6a3   :  { %v1784_v61 = vadd.f32 %v11538_v29, %v1592_v33  ;;  %v1778_v49 = vpop.f32.mrb[49].mxu0  ;;  %v1657_v33 = vpop.permute.xlu1 %1656 }
 0x6a4   :  { %v1779_v44 = vadd.f32 %v1778_v49, %v1587_v57  ;;  %v1874_v49 = vld [vmem:[%s17190_s15 + $0x8] sm:$0xff] }
 0x6a5   :  { %v1858_v16 = vmax.f32 %v1784_v61, 0.0 }
 0x6a6   :  { %v1857_v22 = vmax.f32 %v1779_v44, 0.0  ;;  %v11541_v38 = vpop.f32.mrb[50].mxu0  ;;  %v1875_v44 = vld [vmem:[%s17190_s15 + $0x10] sm:$0xff] }
 0x6a7   :  { %v1794_v52 = vadd.f32 %v11541_v38, %v1602_v58  ;;  %v1788_v5 = vpop.f32.mrb[51].mxu0  ;;  %v1879_v38 = vld [vmem:[%s17190_s15 + $0x30] sm:$0xff] }
 0x6a8   :  { %v12518_v6 = vpack.c.bf16 %v1858_v16, %v1857_v22  ;;  %v1789_v40 = vadd.f32 %v1788_v5, %v1597_v19  ;;  %v1876_v16 = vld [vmem:[%s17190_s15 + $0x18] sm:$0xff]  ;;  %v1878_v22 = vld [vmem:[%s17190_s15 + $0x28] sm:$0xff] }
 0x6a9   :  { %v1860_v7 = vmax.f32 %v1794_v52, 0.0  ;;  %v1881_v52 = vld [vmem:[%s17190_s15 + $0x40] sm:$0xff]  ;;  %v1882_v5 = vld [vmem:[%s17190_s15 + $0x48] sm:$0xff] }
 0x6aa   :  { %v1859_v10 = vmax.f32 %v1789_v40, 0.0  ;;  %v11544_v25 = vpop.f32.mrb[52].mxu0  ;;  %12519 = vmatprep.subr.bf16.mxu1 %v12518_v6  ;;  %v1884_v40 = vld [vmem:[%s17190_s15 + $0x58] sm:$0xff] }
 0x6ab   :  { %v1804_v41 = vadd.f32 %v11544_v25, %v1612_v60  ;;  %v1798_v8 = vpop.f32.mrb[53].mxu0  ;;  %12521 = vmatpush3.bf16.msra.mxu1 %v12518_v6  ;;  %v1883_v6 = vld [vmem:[%s17190_s15 + $0x50] sm:$0xff] }
 0x6ac   :  { %v12522_v12 = vpack.c.bf16 %v1860_v7, %v1859_v10  ;;  %v1799_v0 = vadd.f32 %v1798_v8, %v1607_v53  ;;  %v1885_v7 = vld [vmem:[%s17190_s15 + $0x60] sm:$0xff]  ;;  %v1886_v10 = vld [vmem:[%s17190_s15 + $0x68] sm:$0xff]  ;;  %v1887_v25 = vld [vmem:[%s17190_s15 + $0x70] sm:$0xff] }
 0x6ad   :  { %v1862_v14 = vmax.f32 %v1804_v41, 0.0  ;;  %v1888_v41 = vld [vmem:[%s17190_s15 + $0x78] sm:$0xff]  ;;  %v1889_v8 = vld [vmem:[%s17190_s15 + $0x80] sm:$0xff] }
 0x6ae   :  { %v1861_v20 = vmax.f32 %v1799_v0, 0.0  ;;  %v11547_v28 = vpop.f32.mrb[54].mxu0  ;;  %12523 = vmatprep.subr.bf16.mxu1 %v12522_v12  ;;  %v1892_v0 = vld [vmem:[%s17190_s15 + $0x98] sm:$0xff] }
 0x6af   :  { %v1814_v59 = vadd.f32 %v11547_v28, %v1622_v3  ;;  %v1808_v56 = vpop.f32.mrb[55].mxu0  ;;  %12525 = vmatpush3.bf16.msra.mxu1 %v12522_v12  ;;  %v1877_v3 = vld [vmem:[%s17190_s15 + $0x20] sm:$0xff]  ;;  %v1891_v12 = vld [vmem:[%s17190_s15 + $0x90] sm:$0xff]  ;;  %v1896_v28 = vld [vmem:[%s17190_s15 + $0xb8] sm:$0xff] }
 0x6b0   :  { %v12526_v42 = vpack.c.bf16 %v1862_v14, %v1861_v20  ;;  %v1809_v30 = vadd.f32 %v1808_v56, %v1617_v4  ;;  %v1880_v4 = vld [vmem:[%s17190_s15 + $0x38] sm:$0xff]  ;;  %v1894_v14 = vld [vmem:[%s17190_s15 + $0xa8] sm:$0xff]  ;;  %v1895_v20 = vld [vmem:[%s17190_s15 + $0xb0] sm:$0xff] }
 0x6b1   :  { %v1864_v23 = vmax.f32 %v1814_v59, 0.0  ;;  %v1897_v59 = vld [vmem:[%s17190_s15 + $0xc0] sm:$0xff]  ;;  %v1898_v56 = vld [vmem:[%s17190_s15 + $0xc8] sm:$0xff] }
 0x6b2   :  { %v1863_v24 = vmax.f32 %v1809_v30, 0.0  ;;  %v11550_v62 = vpop.f32.mrb[56].mxu0  ;;  %12527 = vmatprep.subr.bf16.mxu1 %v12526_v42  ;;  %v1900_v30 = vld [vmem:[%s17190_s15 + $0xd8] sm:$0xff] }
 0x6b3   :  { %v1824_v1 = vadd.f32 %v11550_v62, %v1632_v11  ;;  %v1818_v26 = vpop.f32.mrb[57].mxu0  ;;  %12529 = vmatpush3.bf16.msra.mxu1 %v12526_v42  ;;  %v1890_v11 = vld [vmem:[%s17190_s15 + $0x88] sm:$0xff]  ;;  %v1899_v42 = vld [vmem:[%s17190_s15 + $0xd0] sm:$0xff]  ;;  %v1904_v62 = vld [vmem:[%s17190_s15 + $0xf8] sm:$0xff] }
 0x6b4   :  { %v12530_v27 = vpack.c.bf16 %v1864_v23, %v1863_v24  ;;  %v1819_v15 = vadd.f32 %v1818_v26, %v1627_v13  ;;  %v1893_v13 = vld [vmem:[%s17190_s15 + $0xa0] sm:$0xff]  ;;  %v1903_v24 = vld [vmem:[%s17190_s15 + $0xf0] sm:$0xff] }
 0x6b5   :  { %v1866_v31 = vmax.f32 %v1824_v1, 0.0  ;;  %v1901_v23 = vld [vmem:[%s17190_s15 + $0xe0] sm:$0xff]  ;;  %v1906_v1 = vld [vmem:[%s17190_s15 + $0x108] sm:$0xff]  ;;  %v1907_v26 = vld [vmem:[%s17190_s15 + $0x110] sm:$0xff] }
 0x6b6   :  { %v1865_v45 = vmax.f32 %v1819_v15, 0.0  ;;  %v11553_v54 = vpop.f32.mrb[58].mxu0  ;;  %12531 = vmatprep.subr.bf16.mxu1 %v12530_v27  ;;  %v1909_v15 = vld [vmem:[%s17190_s15 + $0x120] sm:$0xff] }
 0x6b7   :  { %v1834_v34 = vadd.f32 %v11553_v54, %v1642_v63  ;;  %v1828_v36 = vpop.f32.mrb[59].mxu0  ;;  %12533 = vmatpush3.bf16.msra.mxu1 %v12530_v27  ;;  %v1902_v63 = vld [vmem:[%s17190_s15 + $0xe8] sm:$0xff]  ;;  %v1908_v27 = vld [vmem:[%s17190_s15 + $0x118] sm:$0xff] }
 0x6b8   :  { %v12534_v37 = vpack.c.bf16 %v1866_v31, %v1865_v45  ;;  %v1829_v39 = vadd.f32 %v1828_v36, %v1637_v17  ;;  %v1905_v17 = vld [vmem:[%s17190_s15 + $0x100] sm:$0xff]  ;;  %v1910_v31 = vld [vmem:[%s17190_s15 + $0x128] sm:$0xff]  ;;  %v1911_v45 = vld [vmem:[%s17190_s15 + $0x130] sm:$0xff] }
 0x6b9   :  { %v1868_v32 = vmax.f32 %v1834_v34, 0.0  ;;  %v1912_v54 = vld [vmem:[%s17190_s15 + $0x138] sm:$0xff]  ;;  %v1913_v34 = vld [vmem:[%s17190_s15 + $0x140] sm:$0xff]  ;;  %v1914_v36 = vld [vmem:[%s17190_s15 + $0x148] sm:$0xff] }
 0x6ba   :  { %v1867_v48 = vmax.f32 %v1829_v39, 0.0  ;;  %v11556_v9 = vpop.f32.mrb[60].mxu0  ;;  %12535 = vmatprep.subr.bf16.mxu1 %v12534_v37  ;;  %v1917_v39 = vld [vmem:[%s17190_s15 + $0x160] sm:$0xff] }
 0x6bb   :  { %v1844_v46 = vadd.f32 %v11556_v9, %v1652_v43  ;;  %v1838_v47 = vpop.f32.mrb[61].mxu0  ;;  %12537 = vmatpush3.bf16.msra.mxu1 %v12534_v37  ;;  %v1915_v43 = vld [vmem:[%s17190_s15 + $0x150] sm:$0xff]  ;;  %v1916_v37 = vld [vmem:[%s17190_s15 + $0x158] sm:$0xff]  ;;  %v1921_v9 = vld [vmem:[%s17190_s15 + $0x180] sm:$0xff] }
 0x6bc   :  { %v12538_v2 = vpack.c.bf16 %v1868_v32, %v1867_v48  ;;  %v1839_v50 = vadd.f32 %v1838_v47, %v1647_v21  ;;  %v1918_v21 = vld [vmem:[%s17190_s15 + $0x168] sm:$0xff]  ;;  %v1919_v32 = vld [vmem:[%s17190_s15 + $0x170] sm:$0xff]  ;;  %v1920_v48 = vld [vmem:[%s17190_s15 + $0x178] sm:$0xff] }
 0x6bd   :  { %v1870_v51 = vmax.f32 %v1844_v46, 0.0  ;;  %v1922_v46 = vld [vmem:[%s17190_s15 + $0x188] sm:$0xff]  ;;  %v13934_v47 = vld [vmem:[%s17191_s17] sm:$0xff] }
 0x6be   :  { %v1869_v18 = vmax.f32 %v1839_v50, 0.0  ;;  %v11559_v35 = vpop.f32.mrb[62].mxu0  ;;  %12539 = vmatprep.subr.bf16.mxu1 %v12538_v2  ;;  %11671 = vmatprep.mubr.msk.f32.mxu0 %vm1181_vm3, %v13934_v47  ;;  %v1976_v50 = vpop.permute.xlu1 %1975 }
 0x6bf   :  { %v1854_v57 = vadd.f32 %v11559_v35, %v1662_v55  ;;  %v1848_v58 = vpop.f32.mrb[63].mxu0  ;;  %12541 = vmatpush3.bf16.msra.mxu1 %v12538_v2  ;;  %v1981_v2 = vpop.permute.xlu0 %1980 }
 0x6c0   :  { %v12542_v19 = vpack.c.bf16 %v1870_v51, %v1869_v18  ;;  %v1849_v60 = vadd.f32 %v1848_v58, %v1657_v33 }
 0x6c1   :  { %v1872_v53 = vmax.f32 %v1854_v57, 0.0 }
 0x6c2   :  { %v1871_v29 = vmax.f32 %v1849_v60, 0.0  ;;  %12543 = vmatprep.subr.bf16.mxu1 %v12542_v19  ;;  %v1986_v55 = vpop.permute.xlu1 %1985 }
 0x6c3   :  { %12545 = vmatpush3.bf16.msra.mxu1 %v12542_v19  ;;  %v1991_v51 = vpop.permute.xlu0 %1990 }
 0x6c4   :  { %v12546_v61 = vpack.c.bf16 %v1872_v53, %v1871_v29 }
 0x6c6   :  { %12547 = vmatprep.subr.bf16.mxu1 %v12546_v61  ;;  %v1996_v35 = vpop.permute.xlu1 %1995 }
 0x6c7   :  { %12549 = vmatpush3.bf16.msra.mxu1 %v12546_v61  ;;  %v2001_v18 = vpop.permute.xlu0 %2000 }
 0x6ca   :  { %11593 = vmatmul.mubr.f32.vlgmr.msra.gmra.mrb[54].mxu1 %v1874_v49  ;;  %v2006_v57 = vpop.permute.xlu1 %2005 }
 0x6cb   :  { %11595 = vmatprep.mubr.f32.mxu1 %v1875_v44  ;;  %v2011_v33 = vpop.permute.xlu0 %2010 }
 0x6ce   :  { %11596 = vmatmul.mubr.f32.gmra.mrb[56].mxu1 %v1876_v16  ;;  %v2016_v19 = vpop.permute.xlu1 %2015 }
 0x6cf   :  { %11598 = vmatprep.mubr.f32.mxu1 %v1877_v3  ;;  %v2021_v58 = vpop.permute.xlu0 %2020 }
 0x6d2   :  { %11599 = vmatmul.mubr.f32.gmra.mrb[58].mxu1 %v1878_v22  ;;  %v13942_v53 = vpop.permute.xlu1 %2025 }
 0x6d3   :  { %11601 = vmatprep.mubr.f32.mxu1 %v1879_v38  ;;  %v13940_v60 = vpop.permute.xlu0 %2030 }
 0x6d6   :  { %11602 = vmatmul.mubr.f32.gmra.mrb[60].mxu1 %v1880_v4  ;;  %v13946_v61 = vpop.permute.xlu1 %2035 }
 0x6d7   :  { %11604 = vmatprep.mubr.f32.mxu1 %v1881_v52  ;;  %v13944_v29 = vpop.permute.xlu0 %2040 }
 0x6da   :  { %11605 = vmatmul.mubr.f32.gmra.mrb[62].mxu1 %v1882_v5  ;;  %v13950_v44 = vpop.permute.xlu1 %2045 }
 0x6db   :  { %11607 = vmatprep.mubr.f32.mxu1 %v1883_v6  ;;  %v13948_v49 = vpop.permute.xlu0 %2050 }
 0x6de   :  { %11608 = vmatmul.mubr.f32.gmra.mrb[64].mxu1 %v1884_v40  ;;  %v13954_v22 = vpop.permute.xlu1 %2055 }
 0x6df   :  { %11610 = vmatprep.mubr.f32.mxu1 %v1885_v7  ;;  %v13952_v16 = vpop.permute.xlu0 %2060 }
 0x6e2   :  { %11611 = vmatmul.mubr.f32.gmra.mrb[66].mxu1 %v1886_v10 }
 0x6e3   :  { %11613 = vmatprep.mubr.f32.mxu1 %v1887_v25  ;;  %v13956_v25 = vpop.permute.xlu0 %2070 }
 0x6e6   :  { %11614 = vmatmul.mubr.f32.gmra.mrb[68].mxu1 %v1888_v41 }
 0x6e7   :  { %11616 = vmatprep.mubr.f32.mxu1 %v1889_v8 }
 0x6ea   :  { %11617 = vmatmul.mubr.f32.gmra.mrb[70].mxu1 %v1890_v11  ;;  %v13958_v11 = vpop.permute.xlu1 %2065 }
 0x6eb   :  { %11619 = vmatprep.mubr.f32.mxu1 %v1891_v12 }
 0x6ee   :  { %11620 = vmatmul.mubr.f32.gmra.mrb[72].mxu1 %v1892_v0 }
 0x6ef   :  { %11622 = vmatprep.mubr.f32.mxu1 %v1893_v13 }
 0x6f2   :  { %11623 = vmatmul.mubr.f32.gmra.mrb[74].mxu1 %v1894_v14 }
 0x6f3   :  { %11625 = vmatprep.mubr.f32.mxu1 %v1895_v20 }
 0x6f6   :  { %11626 = vmatmul.mubr.f32.gmra.mrb[76].mxu1 %v1896_v28  ;;  %v13963_v28 = vld [vmem:[%s17191_s17 + $0x8] sm:$0xff] }
 0x6f7   :  { %11628 = vmatprep.mubr.f32.mxu1 %v1897_v59 }
 0x6fa   :  { %11629 = vmatmul.mubr.f32.gmra.mrb[78].mxu1 %v1898_v56 }
 0x6fb   :  { %11631 = vmatprep.mubr.f32.mxu1 %v1899_v42  ;;  %v13968_v42 = vld [vmem:[%s17191_s17 + $0x10] sm:$0xff] }
 0x6fe   :  { %11632 = vmatmul.mubr.f32.gmra.mrb[80].mxu1 %v1900_v30 }
 0x6ff   :  { %11634 = vmatprep.mubr.f32.mxu1 %v1901_v23  ;;  %v13970_v23 = vpop.permute.xlu0 %2080 }
 0x702   :  { %11635 = vmatmul.mubr.f32.gmra.mrb[82].mxu1 %v1902_v63 }
 0x703   :  { %11637 = vmatprep.mubr.f32.mxu1 %v1903_v24 }
 0x706   :  { %11638 = vmatmul.mubr.f32.gmra.mrb[84].mxu1 %v1904_v62  ;;  %v13974_v62 = vpop.permute.xlu1 %2075 }
 0x707   :  { %11640 = vmatprep.mubr.f32.mxu1 %v1905_v17 }
 0x70a   :  { %11641 = vmatmul.mubr.f32.gmra.mrb[86].mxu1 %v1906_v1 }
 0x70b   :  { %11643 = vmatprep.mubr.f32.mxu1 %v1907_v26  ;;  %v13981_v26 = vld [vmem:[%s17191_s17 + $0x18] sm:$0xff] }
 0x70e   :  { %11644 = vmatmul.mubr.f32.gmra.mrb[88].mxu1 %v1908_v27 }
 0x70f   :  { %11646 = vmatprep.mubr.f32.mxu1 %v1909_v15 }
 0x712   :  { %11647 = vmatmul.mubr.f32.gmra.mrb[90].mxu1 %v1910_v31  ;;  %v13988_v31 = vld [vmem:[%s17191_s17 + $0x20] sm:$0xff] }
 0x713   :  { %11649 = vmatprep.mubr.f32.mxu1 %v1911_v45 }
 0x716   :  { %11650 = vmatmul.mubr.f32.gmra.mrb[92].mxu1 %v1912_v54 }
 0x717   :  { %11652 = vmatprep.mubr.f32.mxu1 %v1913_v34 }
 0x71a   :  { %11653 = vmatmul.mubr.f32.gmra.mrb[94].mxu1 %v1914_v36 }
 0x71b   :  { %11655 = vmatprep.mubr.f32.mxu1 %v1915_v43 }
 0x71e   :  { %11656 = vmatmul.mubr.f32.gmra.mrb[96].mxu1 %v1916_v37  ;;  %v13998_v37 = vld [vmem:[%s17191_s17 + $0x28] sm:$0xff] }
 0x71f   :  { %11658 = vmatprep.mubr.f32.mxu1 %v1917_v39  ;;  %v14000_v39 = vpop.permute.xlu0 %2090 }
 0x722   :  { %11659 = vmatmul.mubr.f32.gmra.mrb[98].mxu1 %v1918_v21 }
 0x723   :  { %11661 = vmatprep.mubr.f32.mxu1 %v1919_v32 }
 0x726   :  { %11662 = vmatmul.mubr.f32.gmra.mrb[100].mxu1 %v1920_v48  ;;  %v14007_v48 = vld [vmem:[%s17191_s17 + $0x30] sm:$0xff] }
 0x727   :  { %11664 = vmatprep.mubr.f32.mxu1 %v1921_v9  ;;  %v14009_v9 = vpop.permute.xlu1 %2085 }
 0x72a   :  { %11665 = vmatmul.mubr.f32.gmra.mrb[102].mxu1 %v1922_v46 }
 0x72b   :  { %11783 = vmatprep.mubr.msk.f32.mxu1 %vm1181_vm3, %v13934_v47 }
 0x79d   :  { %v11594_v3 = vpop.f32.mrb[54].mxu1 }
 0x79e   :  { %v2295_v38 = vadd.f32 %v11594_v3, %v1981_v2  ;;  %v2289_v4 = vpop.f32.mrb[55].mxu1 }
 0x79f   :  { %v2290_v52 = vadd.f32 %v2289_v4, %v1976_v50 }
 0x7a0   :  { %v2539_v5 = vmax.f32 %v2295_v38, 0.0  ;;  %v14031_v38 = vpop.permute.xlu1 %2095 }
 0x7a1   :  { %v2538_v6 = vmax.f32 %v2290_v52, 0.0  ;;  %v11597_v40 = vpop.f32.mrb[56].mxu1 }
 0x7a2   :  { %v2305_v7 = vadd.f32 %v11597_v40, %v1991_v51  ;;  %v2299_v10 = vpop.f32.mrb[57].mxu1  ;;  %v14047_v40 = vld [vmem:[%s17191_s17 + $0x50] sm:$0xff] }
 0x7a3   :  { %v12550_v41 = vpack.c.bf16 %v2539_v5, %v2538_v6  ;;  %v2300_v8 = vadd.f32 %v2299_v10, %v1986_v55 }
 0x7a4   :  { %v2541_v12 = vmax.f32 %v2305_v7, 0.0 }
 0x7a5   :  { %v2540_v0 = vmax.f32 %v2300_v8, 0.0  ;;  %v11600_v13 = vpop.f32.mrb[58].mxu1  ;;  %12551 = vmatprep.subr.bf16.mxu0 %v12550_v41 }
 0x7a6   :  { %v2315_v14 = vadd.f32 %v11600_v13, %v2001_v18  ;;  %v2309_v20 = vpop.f32.mrb[59].mxu1  ;;  %12553 = vmatpush3.bf16.msra.mxu0 %v12550_v41  ;;  %v14019_v18 = vld [vmem:[%s17191_s17 + $0x38] sm:$0xff] }
 0x7a7   :  { %v12554_v59 = vpack.c.bf16 %v2541_v12, %v2540_v0  ;;  %v2310_v56 = vadd.f32 %v2309_v20, %v1996_v35 }
 0x7a8   :  { %v2543_v30 = vmax.f32 %v2315_v14, 0.0  ;;  %v14071_v14 = vpop.permute.xlu1 %2105 }
 0x7a9   :  { %v2542_v63 = vmax.f32 %v2310_v56, 0.0  ;;  %v11603_v24 = vpop.f32.mrb[60].mxu1  ;;  %11672 = vmatmul.mubr.msk.f32.vlgmr.msra.gmra.mrb[64].mxu0 %vm1181_vm3, %v13963_v28  ;;  %12555 = vmatprep.subr.bf16.mxu0 %v12554_v59 }
 0x7aa   :  { %v2325_v17 = vadd.f32 %v11603_v24, %v2011_v33  ;;  %v2319_v1 = vpop.f32.mrb[61].mxu1  ;;  %12557 = vmatpush3.bf16.msra.mxu0 %v12554_v59  ;;  %11674 = vmatprep.mubr.msk.f32.mxu0 %vm1181_vm3, %v13968_v42 }
 0x7ab   :  { %v13983_v27 = vpack.c.bf16 %v2543_v30, %v2542_v63  ;;  %v2320_v15 = vadd.f32 %v2319_v1, %v2006_v57  ;;  %v14025_v57 = vld [vmem:[%s17191_s17 + $0x40] sm:$0xff]  ;;  %v14083_v63 = vld [vmem:[%s17191_s17 + $0x68] sm:$0xff] }
 0x7ac   :  { %v2545_v45 = vmax.f32 %v2325_v17, 0.0 }
 0x7ad   :  { %v2544_v54 = vmax.f32 %v2320_v15, 0.0  ;;  %v11606_v34 = vpop.f32.mrb[62].mxu1  ;;  %11675 = vmatmul.mubr.msk.f32.gmra.mrb[66].mxu0 %vm1181_vm3, %v13981_v26  ;;  %12559 = vmatprep.subr.bf16.mxu0 %v13983_v27 }
 0x7ae   :  { %v2335_v36 = vadd.f32 %v11606_v34, %v2021_v58  ;;  %v2329_v43 = vpop.f32.mrb[63].mxu1  ;;  %11677 = vmatprep.mubr.msk.f32.mxu0 %vm1181_vm3, %v13988_v31 }
 0x7af   :  { %v14002_v21 = vpack.c.bf16 %v2545_v45, %v2544_v54  ;;  %v2330_v32 = vadd.f32 %v2329_v43, %v2016_v19  ;;  %v14027_v19 = vpop.permute.xlu0 %2100  ;;  %v14111_v43 = vld [vmem:[%s17191_s17 + $0x78] sm:$0xff] }
 0x7b0   :  { %v2547_v46 = vmax.f32 %v2335_v36, 0.0 }
 0x7b1   :  { %v2546_v2 = vmax.f32 %v2330_v32, 0.0  ;;  %v11609_v50 = vpop.f32.mrb[64].mxu1  ;;  %11678 = vmatmul.mubr.msk.f32.gmra.mrb[68].mxu0 %vm1181_vm3, %v13998_v37 }
 0x7b2   :  { %v2345_v51 = vadd.f32 %v11609_v50, %v13940_v60  ;;  %v2339_v55 = vpop.f32.mrb[65].mxu1  ;;  %11680 = vmatprep.mubr.msk.f32.mxu0 %vm1181_vm3, %v14007_v48 }
 0x7b3   :  { %v12566_v35 = vpack.c.bf16 %v2547_v46, %v2546_v2  ;;  %v2340_v33 = vadd.f32 %v2339_v55, %v13942_v53  ;;  %v14039_v53 = vld [vmem:[%s17191_s17 + $0x48] sm:$0xff]  ;;  %v14063_v12 = vpop.permute.xlu0 %2110 }
 0x7b4   :  { %v2549_v58 = vmax.f32 %v2345_v51, 0.0 }
 0x7b5   :  { %v2548_v60 = vmax.f32 %v2340_v33, 0.0  ;;  %v11612_v3 = vpop.f32.mrb[66].mxu1  ;;  %11681 = vmatmul.mubr.msk.f32.gmra.mrb[70].mxu0 %vm1181_vm3, %v14019_v18  ;;  %12567 = vmatprep.subr.bf16.mxu1 %v12566_v35 }
 0x7b6   :  { %v2355_v4 = vadd.f32 %v11612_v3, %v13944_v29  ;;  %v2349_v52 = vpop.f32.mrb[67].mxu1  ;;  %12569 = vmatpush3.bf16.msra.mxu1 %v12566_v35  ;;  %11683 = vmatprep.mubr.msk.f32.mxu0 %vm1181_vm3, %v14025_v57 }
 0x7b7   :  { %v14041_v5 = vpack.c.bf16 %v2549_v58, %v2548_v60  ;;  %v2350_v6 = vadd.f32 %v2349_v52, %v13946_v61  ;;  %v14061_v61 = vld [vmem:[%s17191_s17 + $0x58] sm:$0xff]  ;;  %v14095_v15 = vpop.permute.xlu0 %2120 }
 0x7b8   :  { %v2551_v29 = vmax.f32 %v2355_v4, 0.0 }
 0x7b9   :  { %v2550_v7 = vmax.f32 %v2350_v6, 0.0  ;;  %v11615_v10 = vpop.f32.mrb[68].mxu1  ;;  %11684 = vmatmul.mubr.msk.f32.gmra.mrb[72].mxu0 %vm1181_vm3, %v14039_v53  ;;  %11784 = vmatmul.mubr.msk.f32.vlgmr.msra.gmra.mrb[104].mxu1 %vm1181_vm3, %v13963_v28 }
 0x7ba   :  { %v2365_v41 = vadd.f32 %v11615_v10, %v13948_v49  ;;  %v2359_v8 = vpop.f32.mrb[69].mxu1  ;;  %11686 = vmatprep.mubr.msk.f32.mxu0 %vm1181_vm3, %v14047_v40  ;;  %11786 = vmatprep.mubr.msk.f32.mxu1 %vm1181_vm3, %v13968_v42  ;;  %v14069_v49 = vld [vmem:[%s17191_s17 + $0x60] sm:$0xff] }
 0x7bb   :  { %v12574_v0 = vpack.c.bf16 %v2551_v29, %v2550_v7  ;;  %v2360_v13 = vadd.f32 %v2359_v8, %v13950_v44  ;;  %v2131_v35 = vpop.permute.xlu0 %2130 }
 0x7bc   :  { %v2553_v20 = vmax.f32 %v2365_v41, 0.0 }
 0x7bd   :  { %v2552_v59 = vmax.f32 %v2360_v13, 0.0  ;;  %v11618_v56 = vpop.f32.mrb[70].mxu1  ;;  %11687 = vmatmul.mubr.msk.f32.gmra.mrb[74].mxu0 %vm1181_vm3, %v14061_v61  ;;  %11787 = vmatmul.mubr.msk.f32.gmra.mrb[106].mxu1 %vm1181_vm3, %v13981_v26 }
 0x7be   :  { %v2375_v30 = vadd.f32 %v11618_v56, %v13952_v16  ;;  %12575 = vmatprep.subr.bf16.mxu1 %v12574_v0  ;;  %v2369_v44 = vpop.f32.mrb[71].mxu1  ;;  %11689 = vmatprep.mubr.msk.f32.mxu0 %vm1181_vm3, %v14069_v49  ;;  %v14093_v16 = vld [vmem:[%s17191_s17 + $0x70] sm:$0xff] }
 0x7bf   :  { %v14085_v24 = vpack.c.bf16 %v2553_v20, %v2552_v59  ;;  %v2370_v17 = vadd.f32 %v2369_v44, %v13954_v22  ;;  %12577 = vmatpush3.bf16.msra.mxu1 %v12574_v0  ;;  %11789 = vmatprep.mubr.msk.f32.mxu1 %vm1181_vm3, %v13988_v31  ;;  %v14101_v22 = vpop.permute.xlu1 %2115  ;;  %v2141_v7 = vpop.permute.xlu0 %2140 }
 0x7c0   :  { %v2555_v1 = vmax.f32 %v2375_v30, 0.0 }
 0x7c1   :  { %v2554_v45 = vmax.f32 %v2370_v17, 0.0  ;;  %v11621_v54 = vpop.f32.mrb[72].mxu1  ;;  %11690 = vmatmul.mubr.msk.f32.gmra.mrb[76].mxu0 %vm1181_vm3, %v14083_v63  ;;  %11790 = vmatmul.mubr.msk.f32.gmra.mrb[108].mxu1 %vm1181_vm3, %v13998_v37 }
 0x7c2   :  { %v2385_v34 = vadd.f32 %v11621_v54, %v13956_v25  ;;  %v2379_v36 = vpop.f32.mrb[73].mxu1  ;;  %11692 = vmatprep.mubr.msk.f32.mxu0 %vm1181_vm3, %v14093_v16  ;;  %11792 = vmatprep.mubr.msk.f32.mxu1 %vm1181_vm3, %v14007_v48 }
 0x7c3   :  { %v14113_v32 = vpack.c.bf16 %v2555_v1, %v2554_v45  ;;  %v2380_v46 = vadd.f32 %v2379_v36, %v13958_v11  ;;  %v14129_v58 = vpop.permute.xlu1 %2125  ;;  %v2151_v30 = vpop.permute.xlu0 %2150 }
 0x7c4   :  { %v2557_v2 = vmax.f32 %v2385_v34, 0.0 }
 0x7c5   :  { %v2556_v50 = vmax.f32 %v2380_v46, 0.0  ;;  %v11624_v51 = vpop.f32.mrb[74].mxu1  ;;  %11693 = vmatmul.mubr.msk.f32.gmra.mrb[78].mxu0 %vm1181_vm3, %v14111_v43  ;;  %11793 = vmatmul.mubr.msk.f32.gmra.mrb[110].mxu1 %vm1181_vm3, %v14019_v18 }
 0x7c6   :  { %v2395_v25 = vadd.f32 %v11624_v51, %v13970_v23  ;;  %12583 = vmatprep.subr.bf16.mxu1 %v14113_v32  ;;  %v2389_v55 = vpop.f32.mrb[75].mxu1  ;;  %11699 = vmatprep.mubr.msk.f32.mxu0 %vm1181_vm3, %v13934_v47 }
 0x7c7   :  { %v14124_v33 = vpack.c.bf16 %v2557_v2, %v2556_v50  ;;  %v2390_v11 = vadd.f32 %v2389_v55, %v13974_v62  ;;  %11795 = vmatprep.mubr.msk.f32.mxu1 %vm1181_vm3, %v14025_v57  ;;  %v2161_v2 = vpop.permute.xlu0 %2160 }
 0x7c8   :  { %v2559_v60 = vmax.f32 %v2395_v25, 0.0 }
 0x7c9   :  { %v2558_v3 = vmax.f32 %v2390_v11, 0.0  ;;  %v11627_v4 = vpop.f32.mrb[76].mxu1  ;;  %11700 = vmatmul.mubr.msk.f32.vlgmr.msra.gmra.mrb[80].mxu0 %vm1181_vm3, %v13963_v28  ;;  %11796 = vmatmul.mubr.msk.f32.gmra.mrb[112].mxu1 %vm1181_vm3, %v14039_v53 }
 0x7ca   :  { %v2405_v23 = vadd.f32 %v11627_v4, %v14000_v39  ;;  %12561 = vmatpush3.bf16.msra.mxu0 %v13983_v27  ;;  %v2399_v52 = vpop.f32.mrb[77].mxu1  ;;  %11702 = vmatprep.mubr.msk.f32.mxu0 %vm1181_vm3, %v13968_v42  ;;  %v2136_v27 = vpop.permute.xlu1 %2135 }
 0x7cb   :  { %v14139_v62 = vpack.c.bf16 %v2559_v60, %v2558_v3  ;;  %v2400_v6 = vadd.f32 %v2399_v52, %v14009_v9  ;;  %12563 = vmatprep.subr.bf16.mxu0 %v14002_v21  ;;  %11798 = vmatprep.mubr.msk.f32.mxu1 %vm1181_vm3, %v14047_v40 }
 0x7cc   :  { %v2561_v29 = vmax.f32 %v2405_v23, 0.0 }
 0x7cd   :  { %v2560_v10 = vmax.f32 %v2400_v6, 0.0  ;;  %v11630_v41 = vpop.f32.mrb[78].mxu1  ;;  %11703 = vmatmul.mubr.msk.f32.gmra.mrb[82].mxu0 %vm1181_vm3, %v13981_v26  ;;  %11799 = vmatmul.mubr.msk.f32.gmra.mrb[114].mxu1 %vm1181_vm3, %v14061_v61 }
 0x7ce   :  { %v2415_v39 = vadd.f32 %v11630_v41, %v14027_v19  ;;  %v2409_v8 = vpop.f32.mrb[79].mxu1  ;;  %11705 = vmatprep.mubr.msk.f32.mxu0 %vm1181_vm3, %v13988_v31  ;;  %11801 = vmatprep.mubr.msk.f32.mxu1 %vm1181_vm3, %v14069_v49  ;;  %v2146_v17 = vpop.permute.xlu1 %2145 }
 0x7cf   :  { %v14154_v9 = vpack.c.bf16 %v2561_v29, %v2560_v10  ;;  %v2410_v0 = vadd.f32 %v2409_v8, %v14031_v38 }
 0x7d0   :  { %v2563_v13 = vmax.f32 %v2415_v39, 0.0 }
 0x7d1   :  { %v2562_v20 = vmax.f32 %v2410_v0, 0.0  ;;  %v11633_v59 = vpop.f32.mrb[80].mxu1  ;;  %11706 = vmatmul.mubr.msk.f32.gmra.mrb[84].mxu0 %vm1181_vm3, %v13998_v37  ;;  %11802 = vmatmul.mubr.msk.f32.gmra.mrb[116].mxu1 %vm1181_vm3, %v14083_v63 }
 0x7d2   :  { %v2425_v19 = vadd.f32 %v11633_v59, %v14063_v12  ;;  %v2419_v56 = vpop.f32.mrb[81].mxu1  ;;  %11708 = vmatprep.mubr.msk.f32.mxu0 %vm1181_vm3, %v14007_v48  ;;  %11804 = vmatprep.mubr.msk.f32.mxu1 %vm1181_vm3, %v14093_v16 }
 0x7d3   :  { %v14166_v38 = vpack.c.bf16 %v2563_v13, %v2562_v20  ;;  %v2420_v44 = vadd.f32 %v2419_v56, %v14071_v14 }
 0x7d4   :  { %v2565_v1 = vmax.f32 %v2425_v19, 0.0 }
 0x7d5   :  { %v2564_v45 = vmax.f32 %v2420_v44, 0.0  ;;  %v11636_v54 = vpop.f32.mrb[82].mxu1  ;;  %11709 = vmatmul.mubr.msk.f32.gmra.mrb[86].mxu0 %vm1181_vm3, %v14019_v18  ;;  %11805 = vmatmul.mubr.msk.f32.gmra.mrb[118].mxu1 %vm1181_vm3, %v14111_v43 }
 0x7d6   :  { %v2435_v12 = vadd.f32 %v11636_v54, %v14095_v15  ;;  %v2429_v34 = vpop.f32.mrb[83].mxu1  ;;  %11711 = vmatprep.mubr.msk.f32.mxu0 %vm1181_vm3, %v14025_v57  ;;  %11839 = vmatprep.mubr.msk.f32.mxu1 %vm1181_vm3, %v13934_v47  ;;  %v2156_v15 = vpop.permute.xlu1 %2155 }
 0x7d7   :  { %v14178_v14 = vpack.c.bf16 %v2565_v1, %v2564_v45  ;;  %v2430_v36 = vadd.f32 %v2429_v34, %v14101_v22 }
 0x7d8   :  { %v2567_v46 = vmax.f32 %v2435_v12, 0.0 }
 0x7d9   :  { %v2566_v50 = vmax.f32 %v2430_v36, 0.0  ;;  %v11639_v51 = vpop.f32.mrb[84].mxu1  ;;  %11712 = vmatmul.mubr.msk.f32.gmra.mrb[88].mxu0 %vm1181_vm3, %v14039_v53  ;;  %11840 = vmatmul.mubr.msk.f32.vlgmr.msra.gmra.mrb[120].mxu1 %vm1181_vm3, %v13963_v28 }
 0x7da   :  { %v2445_v25 = vadd.f32 %v11639_v51, %v2131_v35  ;;  %12585 = vmatpush3.bf16.msra.mxu1 %v14113_v32  ;;  %v2439_v55 = vpop.f32.mrb[85].mxu1  ;;  %11714 = vmatprep.mubr.msk.f32.mxu0 %vm1181_vm3, %v14047_v40  ;;  %v2166_v6 = vpop.permute.xlu1 %2165 }
 0x7db   :  { %v14188_v11 = vpack.c.bf16 %v2567_v46, %v2566_v50  ;;  %v2440_v22 = vadd.f32 %v2439_v55, %v14129_v58  ;;  %12591 = vmatprep.subr.bf16.mxu1 %v14139_v62  ;;  %11842 = vmatprep.mubr.msk.f32.mxu1 %vm1181_vm3, %v13968_v42  ;;  %v2171_v58 = vpop.permute.xlu0 %2170 }
 0x7dc   :  { %v2569_v60 = vmax.f32 %v2445_v25, 0.0 }
 0x7dd   :  { %v2568_v3 = vmax.f32 %v2440_v22, 0.0  ;;  %v11642_v4 = vpop.f32.mrb[86].mxu1  ;;  %11715 = vmatmul.mubr.msk.f32.gmra.mrb[90].mxu0 %vm1181_vm3, %v14061_v61  ;;  %11843 = vmatmul.mubr.msk.f32.gmra.mrb[122].mxu1 %vm1181_vm3, %v13981_v26 }
 0x7de   :  { %v2455_v32 = vadd.f32 %v11642_v4, %v2141_v7  ;;  %v2449_v35 = vpop.f32.mrb[87].mxu1  ;;  %11717 = vmatprep.mubr.msk.f32.mxu0 %vm1181_vm3, %v14069_v49  ;;  %11845 = vmatprep.mubr.msk.f32.mxu1 %vm1181_vm3, %v13988_v31  ;;  %v2176_v19 = vpop.permute.xlu1 %2175 }
 0x7df   :  { %v14202_v23 = vpack.c.bf16 %v2569_v60, %v2568_v3  ;;  %v2450_v52 = vadd.f32 %v2449_v35, %v2136_v27  ;;  %v2181_v13 = vpop.permute.xlu0 %2180 }
 0x7e0   :  { %v2571_v29 = vmax.f32 %v2455_v32, 0.0 }
 0x7e1   :  { %v2570_v10 = vmax.f32 %v2450_v52, 0.0  ;;  %v11645_v41 = vpop.f32.mrb[88].mxu1  ;;  %11718 = vmatmul.mubr.msk.f32.gmra.mrb[92].mxu0 %vm1181_vm3, %v14083_v63  ;;  %11846 = vmatmul.mubr.msk.f32.gmra.mrb[124].mxu1 %vm1181_vm3, %v13998_v37 }
 0x7e2   :  { %v2465_v7 = vadd.f32 %v11645_v41, %v2151_v30  ;;  %v2459_v39 = vpop.f32.mrb[89].mxu1  ;;  %11720 = vmatprep.mubr.msk.f32.mxu0 %vm1181_vm3, %v14093_v16  ;;  %11848 = vmatprep.mubr.msk.f32.mxu1 %vm1181_vm3, %v14007_v48  ;;  %v2186_v50 = vpop.permute.xlu1 %2185 }
 0x7e3   :  { %v14212_v8 = vpack.c.bf16 %v2571_v29, %v2570_v10  ;;  %v2460_v27 = vadd.f32 %v2459_v39, %v2146_v17  ;;  %v2191_v36 = vpop.permute.xlu0 %2190 }
 0x7e4   :  { %v2573_v0 = vmax.f32 %v2465_v7, 0.0 }
 0x7e5   :  { %v2572_v20 = vmax.f32 %v2460_v27, 0.0  ;;  %v11648_v59 = vpop.f32.mrb[90].mxu1  ;;  %11721 = vmatmul.mubr.msk.f32.gmra.mrb[94].mxu0 %vm1181_vm3, %v14111_v43  ;;  %11849 = vmatmul.mubr.msk.f32.gmra.mrb[126].mxu1 %vm1181_vm3, %v14019_v18 }
 0x7e6   :  { %v2475_v56 = vadd.f32 %v11648_v59, %v2161_v2  ;;  %v2469_v30 = vpop.f32.mrb[91].mxu1  ;;  %11727 = vmatprep.mubr.msk.f32.mxu0 %vm1181_vm3, %v13934_v47  ;;  %11851 = vmatprep.mubr.msk.f32.mxu1 %vm1181_vm3, %v14025_v57 }
 0x7e7   :  { %v14222_v44 = vpack.c.bf16 %v2573_v0, %v2572_v20  ;;  %v2470_v17 = vadd.f32 %v2469_v30, %v2156_v15  ;;  %v2201_v4 = vpop.permute.xlu0 %2200 }
 0x7e8   :  { %v2575_v1 = vmax.f32 %v2475_v56, 0.0 }
 0x7e9   :  { %v2574_v45 = vmax.f32 %v2470_v17, 0.0  ;;  %v11651_v54 = vpop.f32.mrb[92].mxu1  ;;  %11728 = vmatmul.mubr.msk.f32.vlgmr.msra.gmra.mrb[96].mxu0 %vm1181_vm3, %v13963_v28  ;;  %11852 = vmatmul.mubr.msk.f32.gmra.mrb[128].mxu1 %vm1181_vm3, %v14039_v53 }
 0x7ea   :  { %v2485_v12 = vadd.f32 %v11651_v54, %v2171_v58  ;;  %12565 = vmatpush3.bf16.msra.mxu0 %v14002_v21  ;;  %v2479_v34 = vpop.f32.mrb[93].mxu1  ;;  %11730 = vmatprep.mubr.msk.f32.mxu0 %vm1181_vm3, %v13968_v42  ;;  %v2196_v58 = vpop.permute.xlu1 %2195 }
 0x7eb   :  { %v14231_v46 = vpack.c.bf16 %v2575_v1, %v2574_v45  ;;  %v2480_v2 = vadd.f32 %v2479_v34, %v2166_v6  ;;  %12571 = vmatprep.subr.bf16.mxu0 %v14041_v5  ;;  %11854 = vmatprep.mubr.msk.f32.mxu1 %vm1181_vm3, %v14047_v40 }
 0x7ec   :  { %v2577_v51 = vmax.f32 %v2485_v12, 0.0 }
 0x7ed   :  { %v2576_v15 = vmax.f32 %v2480_v2, 0.0  ;;  %v11654_v25 = vpop.f32.mrb[94].mxu1  ;;  %11731 = vmatmul.mubr.msk.f32.gmra.mrb[98].mxu0 %vm1181_vm3, %v13981_v26  ;;  %11855 = vmatmul.mubr.msk.f32.gmra.mrb[130].mxu1 %vm1181_vm3, %v14061_v61 }
 0x7ee   :  { %v2495_v21 = vadd.f32 %v11654_v25, %v2181_v13  ;;  %v2489_v55 = vpop.f32.mrb[95].mxu1  ;;  %11733 = vmatprep.mubr.msk.f32.mxu0 %vm1181_vm3, %v13988_v31  ;;  %11857 = vmatprep.mubr.msk.f32.mxu1 %vm1181_vm3, %v14069_v49  ;;  %v2211_v13 = vpop.permute.xlu0 %2210 }
 0x7ef   :  { %v14244_v22 = vpack.c.bf16 %v2577_v51, %v2576_v15  ;;  %v2490_v60 = vadd.f32 %v2489_v55, %v2176_v19  ;;  %v2206_v19 = vpop.permute.xlu1 %2205 }
 0x7f0   :  { %v2579_v3 = vmax.f32 %v2495_v21, 0.0 }
 0x7f1   :  { %v2578_v32 = vmax.f32 %v2490_v60, 0.0  ;;  %v11657_v35 = vpop.f32.mrb[96].mxu1  ;;  %11734 = vmatmul.mubr.msk.f32.gmra.mrb[100].mxu0 %vm1181_vm3, %v13998_v37  ;;  %11858 = vmatmul.mubr.msk.f32.gmra.mrb[132].mxu1 %vm1181_vm3, %v14083_v63 }
 0x7f2   :  { %v2505_v52 = vadd.f32 %v11657_v35, %v2191_v36  ;;  %v2499_v6 = vpop.f32.mrb[97].mxu1  ;;  %11736 = vmatprep.mubr.msk.f32.mxu0 %vm1181_vm3, %v14007_v48  ;;  %11860 = vmatprep.mubr.msk.f32.mxu1 %vm1181_vm3, %v14093_v16  ;;  %v2221_v36 = vpop.permute.xlu0 %2220 }
 0x7f3   :  { %v14254_v29 = vpack.c.bf16 %v2579_v3, %v2578_v32  ;;  %v2500_v10 = vadd.f32 %v2499_v6, %v2186_v50 }
 0x7f4   :  { %v2581_v41 = vmax.f32 %v2505_v52, 0.0 }
 0x7f5   :  { %v2580_v7 = vmax.f32 %v2500_v10, 0.0  ;;  %v11660_v39 = vpop.f32.mrb[98].mxu1  ;;  %11737 = vmatmul.mubr.msk.f32.gmra.mrb[102].mxu0 %vm1181_vm3, %v14019_v18  ;;  %11861 = vmatmul.mubr.msk.f32.gmra.mrb[134].mxu1 %vm1181_vm3, %v14111_v43 }
 0x7f6   :  { %v2515_v27 = vadd.f32 %v11660_v39, %v2201_v4  ;;  %v2509_v0 = vpop.f32.mrb[99].mxu1  ;;  %11739 = vmatprep.mubr.msk.f32.mxu0 %vm1181_vm3, %v14025_v57  ;;  %11895 = vmatprep.mubr.msk.f32.mxu1 %vm1181_vm3, %v13934_v47 }
 0x7f7   :  { %v14264_v20 = vpack.c.bf16 %v2581_v41, %v2580_v7  ;;  %v2510_v59 = vadd.f32 %v2509_v0, %v2196_v58 }
 0x7f8   :  { %v2583_v56 = vmax.f32 %v2515_v27, 0.0 }
 0x7f9   :  { %v2582_v30 = vmax.f32 %v2510_v59, 0.0  ;;  %v11663_v17 = vpop.f32.mrb[100].mxu1  ;;  %11740 = vmatmul.mubr.msk.f32.gmra.mrb[104].mxu0 %vm1181_vm3, %v14039_v53  ;;  %11896 = vmatmul.mubr.msk.f32.vlgmr.msra.gmra.mrb[136].mxu1 %vm1181_vm3, %v13963_v28 }
 0x7fa   :  { %v2525_v1 = vadd.f32 %v11663_v17, %v2211_v13  ;;  %12593 = vmatpush3.bf16.msra.mxu1 %v14139_v62  ;;  %v2519_v45 = vpop.f32.mrb[101].mxu1  ;;  %11742 = vmatprep.mubr.msk.f32.mxu0 %vm1181_vm3, %v14047_v40  ;;  %v2216_v62 = vpop.permute.xlu1 %2215 }
 0x7fb   :  { %v14273_v54 = vpack.c.bf16 %v2583_v56, %v2582_v30  ;;  %v2520_v12 = vadd.f32 %v2519_v45, %v2206_v19  ;;  %12599 = vmatprep.subr.bf16.mxu1 %v14166_v38  ;;  %11898 = vmatprep.mubr.msk.f32.mxu1 %vm1181_vm3, %v13968_v42 }
 0x7fc   :  { %v2585_v34 = vmax.f32 %v2525_v1, 0.0 }
 0x7fd   :  { %v2584_v2 = vmax.f32 %v2520_v12, 0.0  ;;  %v11666_v50 = vpop.f32.mrb[102].mxu1  ;;  %11743 = vmatmul.mubr.msk.f32.gmra.mrb[106].mxu0 %vm1181_vm3, %v14061_v61  ;;  %11899 = vmatmul.mubr.msk.f32.gmra.mrb[138].mxu1 %vm1181_vm3, %v13981_v26  ;;  %v14611_v12 = vld [vmem:[%s17191_s17] sm:$0xff] }
 0x7fe   :  { %v2535_v51 = vadd.f32 %v11666_v50, %v2221_v36  ;;  %v2529_v15 = vpop.f32.mrb[103].mxu1  ;;  %11745 = vmatprep.mubr.msk.f32.mxu0 %vm1181_vm3, %v14069_v49  ;;  %11901 = vmatprep.mubr.msk.f32.mxu1 %vm1181_vm3, %v13988_v31 }
 0x7ff   :  { %v14286_v25 = vpack.c.bf16 %v2585_v34, %v2584_v2  ;;  %v2530_v21 = vadd.f32 %v2529_v15, %v2216_v62 }
 0x800   :  { %v2587_v55 = vmax.f32 %v2535_v51, 0.0 }
 0x801   :  { %v2586_v60 = vmax.f32 %v2530_v21, 0.0  ;;  %11746 = vmatmul.mubr.msk.f32.gmra.mrb[108].mxu0 %vm1181_vm3, %v14083_v63  ;;  %11902 = vmatmul.mubr.msk.f32.gmra.mrb[140].mxu1 %vm1181_vm3, %v13998_v37 }
 0x802   :  { %11748 = vmatprep.mubr.msk.f32.mxu0 %vm1181_vm3, %v14093_v16  ;;  %11904 = vmatprep.mubr.msk.f32.mxu1 %vm1181_vm3, %v14007_v48 }
 0x803   :  { %v14296_v3 = vpack.c.bf16 %v2587_v55, %v2586_v60 }
 0x805   :  { %11749 = vmatmul.mubr.msk.f32.gmra.mrb[110].mxu0 %vm1181_vm3, %v14111_v43  ;;  %11905 = vmatmul.mubr.msk.f32.gmra.mrb[142].mxu1 %vm1181_vm3, %v14019_v18 }
 0x806   :  { %11755 = vmatprep.mubr.msk.f32.mxu0 %vm1181_vm3, %v13934_v47  ;;  %11907 = vmatprep.mubr.msk.f32.mxu1 %vm1181_vm3, %v14025_v57 }
 0x809   :  { %11756 = vmatmul.mubr.msk.f32.vlgmr.msra.gmra.mrb[112].mxu0 %vm1181_vm3, %v13963_v28  ;;  %11908 = vmatmul.mubr.msk.f32.gmra.mrb[144].mxu1 %vm1181_vm3, %v14039_v53 }
 0x80a   :  { %12573 = vmatpush3.bf16.msra.mxu0 %v14041_v5  ;;  %11758 = vmatprep.mubr.msk.f32.mxu0 %vm1181_vm3, %v13968_v42  ;;  %v14514_v5 = vpop.permute.xlu1 %2622 }
 0x80b   :  { %12579 = vmatprep.subr.bf16.mxu0 %v14085_v24  ;;  %11910 = vmatprep.mubr.msk.f32.mxu1 %vm1181_vm3, %v14047_v40 }
 0x80d   :  { %11759 = vmatmul.mubr.msk.f32.gmra.mrb[114].mxu0 %vm1181_vm3, %v13981_v26  ;;  %11911 = vmatmul.mubr.msk.f32.gmra.mrb[146].mxu1 %vm1181_vm3, %v14061_v61 }
 0x80e   :  { %11761 = vmatprep.mubr.msk.f32.mxu0 %vm1181_vm3, %v13988_v31  ;;  %11913 = vmatprep.mubr.msk.f32.mxu1 %vm1181_vm3, %v14069_v49 }
 0x811   :  { %11762 = vmatmul.mubr.msk.f32.gmra.mrb[116].mxu0 %vm1181_vm3, %v13998_v37  ;;  %11914 = vmatmul.mubr.msk.f32.gmra.mrb[148].mxu1 %vm1181_vm3, %v14083_v63 }
 0x812   :  { %11764 = vmatprep.mubr.msk.f32.mxu0 %vm1181_vm3, %v14007_v48  ;;  %11916 = vmatprep.mubr.msk.f32.mxu1 %vm1181_vm3, %v14093_v16 }
 0x815   :  { %11765 = vmatmul.mubr.msk.f32.gmra.mrb[118].mxu0 %vm1181_vm3, %v14019_v18  ;;  %11917 = vmatmul.mubr.msk.f32.gmra.mrb[150].mxu1 %vm1181_vm3, %v14111_v43 }
 0x816   :  { %11767 = vmatprep.mubr.msk.f32.mxu0 %vm1181_vm3, %v14025_v57  ;;  %11951 = vmatprep.mubr.msk.f32.mxu1 %vm1181_vm3, %v13934_v47 }
 0x819   :  { %11768 = vmatmul.mubr.msk.f32.gmra.mrb[120].mxu0 %vm1181_vm3, %v14039_v53  ;;  %11952 = vmatmul.mubr.msk.f32.vlgmr.msra.gmra.mrb[152].mxu1 %vm1181_vm3, %v13963_v28 }
 0x81a   :  { %12601 = vmatpush3.bf16.msra.mxu1 %v14166_v38  ;;  %11770 = vmatprep.mubr.msk.f32.mxu0 %vm1181_vm3, %v14047_v40 }
 0x81b   :  { %12607 = vmatprep.subr.bf16.mxu1 %v14188_v11  ;;  %11954 = vmatprep.mubr.msk.f32.mxu1 %vm1181_vm3, %v13968_v42 }
 0x81d   :  { %11771 = vmatmul.mubr.msk.f32.gmra.mrb[122].mxu0 %vm1181_vm3, %v14061_v61  ;;  %11955 = vmatmul.mubr.msk.f32.gmra.mrb[154].mxu1 %vm1181_vm3, %v13981_v26 }
 0x81e   :  { %11773 = vmatprep.mubr.msk.f32.mxu0 %vm1181_vm3, %v14069_v49  ;;  %11957 = vmatprep.mubr.msk.f32.mxu1 %vm1181_vm3, %v13988_v31 }
 0x821   :  { %11774 = vmatmul.mubr.msk.f32.gmra.mrb[124].mxu0 %vm1181_vm3, %v14083_v63  ;;  %11958 = vmatmul.mubr.msk.f32.gmra.mrb[156].mxu1 %vm1181_vm3, %v13998_v37 }
 0x822   :  { %11776 = vmatprep.mubr.msk.f32.mxu0 %vm1181_vm3, %v14093_v16  ;;  %11960 = vmatprep.mubr.msk.f32.mxu1 %vm1181_vm3, %v14007_v48 }
 0x825   :  { %11777 = vmatmul.mubr.msk.f32.gmra.mrb[126].mxu0 %vm1181_vm3, %v14111_v43  ;;  %11961 = vmatmul.mubr.msk.f32.gmra.mrb[158].mxu1 %vm1181_vm3, %v14019_v18 }
 0x826   :  { %11811 = vmatprep.mubr.msk.f32.mxu0 %vm1181_vm3, %v13934_v47  ;;  %11963 = vmatprep.mubr.msk.f32.mxu1 %vm1181_vm3, %v14025_v57 }
 0x829   :  { %11812 = vmatmul.mubr.msk.f32.vlgmr.msra.gmra.mrb[128].mxu0 %vm1181_vm3, %v13963_v28  ;;  %11964 = vmatmul.mubr.msk.f32.gmra.mrb[160].mxu1 %vm1181_vm3, %v14039_v53 }
 0x82a   :  { %12581 = vmatpush3.bf16.msra.mxu0 %v14085_v24  ;;  %11814 = vmatprep.mubr.msk.f32.mxu0 %vm1181_vm3, %v13968_v42  ;;  %v14519_v24 = vpop.permute.xlu0 %2627 }
 0x82b   :  { %12587 = vmatprep.subr.bf16.mxu0 %v14124_v33  ;;  %11966 = vmatprep.mubr.msk.f32.mxu1 %vm1181_vm3, %v14047_v40 }
 0x82d   :  { %11815 = vmatmul.mubr.msk.f32.gmra.mrb[130].mxu0 %vm1181_vm3, %v13981_v26  ;;  %11967 = vmatmul.mubr.msk.f32.gmra.mrb[162].mxu1 %vm1181_vm3, %v14061_v61 }
 0x82e   :  { %11817 = vmatprep.mubr.msk.f32.mxu0 %vm1181_vm3, %v13988_v31  ;;  %11969 = vmatprep.mubr.msk.f32.mxu1 %vm1181_vm3, %v14069_v49 }
 0x831   :  { %11818 = vmatmul.mubr.msk.f32.gmra.mrb[132].mxu0 %vm1181_vm3, %v13998_v37  ;;  %11970 = vmatmul.mubr.msk.f32.gmra.mrb[164].mxu1 %vm1181_vm3, %v14083_v63 }
 0x832   :  { %11820 = vmatprep.mubr.msk.f32.mxu0 %vm1181_vm3, %v14007_v48  ;;  %11972 = vmatprep.mubr.msk.f32.mxu1 %vm1181_vm3, %v14093_v16 }
 0x835   :  { %11821 = vmatmul.mubr.msk.f32.gmra.mrb[134].mxu0 %vm1181_vm3, %v14019_v18  ;;  %11973 = vmatmul.mubr.msk.f32.gmra.mrb[166].mxu1 %vm1181_vm3, %v14111_v43 }
 0x836   :  { %11823 = vmatprep.mubr.msk.f32.mxu0 %vm1181_vm3, %v14025_v57  ;;  %12007 = vmatprep.mubr.msk.f32.mxu1 %vm1181_vm3, %v13934_v47 }
 0x839   :  { %11824 = vmatmul.mubr.msk.f32.gmra.mrb[136].mxu0 %vm1181_vm3, %v14039_v53  ;;  %12008 = vmatmul.mubr.msk.f32.vlgmr.msra.gmra.mrb[168].mxu1 %vm1181_vm3, %v13963_v28 }
 0x83a   :  { %12609 = vmatpush3.bf16.msra.mxu1 %v14188_v11  ;;  %11826 = vmatprep.mubr.msk.f32.mxu0 %vm1181_vm3, %v14047_v40 }
 0x83b   :  { %12615 = vmatprep.subr.bf16.mxu1 %v14212_v8  ;;  %12010 = vmatprep.mubr.msk.f32.mxu1 %vm1181_vm3, %v13968_v42 }
 0x83d   :  { %11827 = vmatmul.mubr.msk.f32.gmra.mrb[138].mxu0 %vm1181_vm3, %v14061_v61  ;;  %12011 = vmatmul.mubr.msk.f32.gmra.mrb[170].mxu1 %vm1181_vm3, %v13981_v26 }
 0x83e   :  { %11829 = vmatprep.mubr.msk.f32.mxu0 %vm1181_vm3, %v14069_v49  ;;  %12013 = vmatprep.mubr.msk.f32.mxu1 %vm1181_vm3, %v13988_v31 }
 0x841   :  { %11830 = vmatmul.mubr.msk.f32.gmra.mrb[140].mxu0 %vm1181_vm3, %v14083_v63  ;;  %12014 = vmatmul.mubr.msk.f32.gmra.mrb[172].mxu1 %vm1181_vm3, %v13998_v37 }
 0x842   :  { %11832 = vmatprep.mubr.msk.f32.mxu0 %vm1181_vm3, %v14093_v16  ;;  %12016 = vmatprep.mubr.msk.f32.mxu1 %vm1181_vm3, %v14007_v48 }
 0x845   :  { %11833 = vmatmul.mubr.msk.f32.gmra.mrb[142].mxu0 %vm1181_vm3, %v14111_v43  ;;  %12017 = vmatmul.mubr.msk.f32.gmra.mrb[174].mxu1 %vm1181_vm3, %v14019_v18 }
 0x846   :  { %11867 = vmatprep.mubr.msk.f32.mxu0 %vm1181_vm3, %v13934_v47  ;;  %12019 = vmatprep.mubr.msk.f32.mxu1 %vm1181_vm3, %v14025_v57 }
 0x849   :  { %11868 = vmatmul.mubr.msk.f32.vlgmr.msra.gmra.mrb[144].mxu0 %vm1181_vm3, %v13963_v28  ;;  %12020 = vmatmul.mubr.msk.f32.gmra.mrb[176].mxu1 %vm1181_vm3, %v14039_v53 }
 0x84a   :  { %12589 = vmatpush3.bf16.msra.mxu0 %v14124_v33  ;;  %11870 = vmatprep.mubr.msk.f32.mxu0 %vm1181_vm3, %v13968_v42  ;;  %v14532_v33 = vpop.permute.xlu1 %2632 }
 0x84b   :  { %12595 = vmatprep.subr.bf16.mxu0 %v14154_v9  ;;  %12022 = vmatprep.mubr.msk.f32.mxu1 %vm1181_vm3, %v14047_v40 }
 0x84d   :  { %11871 = vmatmul.mubr.msk.f32.gmra.mrb[146].mxu0 %vm1181_vm3, %v13981_v26  ;;  %12023 = vmatmul.mubr.msk.f32.gmra.mrb[178].mxu1 %vm1181_vm3, %v14061_v61 }
 0x84e   :  { %11873 = vmatprep.mubr.msk.f32.mxu0 %vm1181_vm3, %v13988_v31  ;;  %12025 = vmatprep.mubr.msk.f32.mxu1 %vm1181_vm3, %v14069_v49  ;;  %v14548_v38 = vpop.permute.xlu1 %2642 }
 0x851   :  { %11874 = vmatmul.mubr.msk.f32.gmra.mrb[148].mxu0 %vm1181_vm3, %v13998_v37  ;;  %12026 = vmatmul.mubr.msk.f32.gmra.mrb[180].mxu1 %vm1181_vm3, %v14083_v63 }
 0x852   :  { %11876 = vmatprep.mubr.msk.f32.mxu0 %vm1181_vm3, %v14007_v48  ;;  %12028 = vmatprep.mubr.msk.f32.mxu1 %vm1181_vm3, %v14093_v16 }
 0x855   :  { %11877 = vmatmul.mubr.msk.f32.gmra.mrb[150].mxu0 %vm1181_vm3, %v14019_v18  ;;  %12029 = vmatmul.mubr.msk.f32.gmra.mrb[182].mxu1 %vm1181_vm3, %v14111_v43 }
 0x856   :  { %11879 = vmatprep.mubr.msk.f32.mxu0 %vm1181_vm3, %v14025_v57  ;;  %12063 = vmatprep.mubr.msk.f32.mxu1 %vm1181_vm3, %v13934_v47 }
 0x859   :  { %11880 = vmatmul.mubr.msk.f32.gmra.mrb[152].mxu0 %vm1181_vm3, %v14039_v53  ;;  %12064 = vmatmul.mubr.msk.f32.vlgmr.msra.gmra.mrb[184].mxu1 %vm1181_vm3, %v13963_v28 }
 0x85a   :  { %12617 = vmatpush3.bf16.msra.mxu1 %v14212_v8  ;;  %11882 = vmatprep.mubr.msk.f32.mxu0 %vm1181_vm3, %v14047_v40  ;;  %v14566_v8 = vpop.permute.xlu1 %2652 }
 0x85b   :  { %12623 = vmatprep.subr.bf16.mxu1 %v14231_v46  ;;  %12066 = vmatprep.mubr.msk.f32.mxu1 %vm1181_vm3, %v13968_v42 }
 0x85d   :  { %11883 = vmatmul.mubr.msk.f32.gmra.mrb[154].mxu0 %vm1181_vm3, %v14061_v61  ;;  %12067 = vmatmul.mubr.msk.f32.gmra.mrb[186].mxu1 %vm1181_vm3, %v13981_v26 }
 0x85e   :  { %11885 = vmatprep.mubr.msk.f32.mxu0 %vm1181_vm3, %v14069_v49  ;;  %12069 = vmatprep.mubr.msk.f32.mxu1 %vm1181_vm3, %v13988_v31  ;;  %v14585_v39 = vpop.permute.xlu1 %2662 }
 0x861   :  { %11886 = vmatmul.mubr.msk.f32.gmra.mrb[156].mxu0 %vm1181_vm3, %v14083_v63  ;;  %12070 = vmatmul.mubr.msk.f32.gmra.mrb[188].mxu1 %vm1181_vm3, %v13998_v37 }
 0x862   :  { %11888 = vmatprep.mubr.msk.f32.mxu0 %vm1181_vm3, %v14093_v16  ;;  %12072 = vmatprep.mubr.msk.f32.mxu1 %vm1181_vm3, %v14007_v48  ;;  %v14621_v34 = vpop.permute.xlu1 %2672 }
 0x865   :  { %11889 = vmatmul.mubr.msk.f32.gmra.mrb[158].mxu0 %vm1181_vm3, %v14111_v43  ;;  %12073 = vmatmul.mubr.msk.f32.gmra.mrb[190].mxu1 %vm1181_vm3, %v14019_v18 }
 0x866   :  { %11923 = vmatprep.mubr.msk.f32.mxu0 %vm1181_vm3, %v13934_v47  ;;  %12075 = vmatprep.mubr.msk.f32.mxu1 %vm1181_vm3, %v14025_v57 }
 0x869   :  { %11924 = vmatmul.mubr.msk.f32.vlgmr.msra.gmra.mrb[160].mxu0 %vm1181_vm3, %v13963_v28  ;;  %12076 = vmatmul.mubr.msk.f32.gmra.mrb[192].mxu1 %vm1181_vm3, %v14039_v53 }
 0x86a   :  { %12597 = vmatpush3.bf16.msra.mxu0 %v14154_v9  ;;  %11926 = vmatprep.mubr.msk.f32.mxu0 %vm1181_vm3, %v13968_v42  ;;  %v14534_v9 = vpop.permute.xlu0 %2637 }
 0x86b   :  { %12603 = vmatprep.subr.bf16.mxu0 %v14178_v14  ;;  %12078 = vmatprep.mubr.msk.f32.mxu1 %vm1181_vm3, %v14047_v40 }
 0x86d   :  { %11927 = vmatmul.mubr.msk.f32.gmra.mrb[162].mxu0 %vm1181_vm3, %v13981_v26  ;;  %12079 = vmatmul.mubr.msk.f32.gmra.mrb[194].mxu1 %vm1181_vm3, %v14061_v61 }
 0x86e   :  { %11929 = vmatprep.mubr.msk.f32.mxu0 %vm1181_vm3, %v13988_v31  ;;  %12081 = vmatprep.mubr.msk.f32.mxu1 %vm1181_vm3, %v14069_v49  ;;  %v14554_v11 = vpop.permute.xlu0 %2647 }
 0x871   :  { %11930 = vmatmul.mubr.msk.f32.gmra.mrb[164].mxu0 %vm1181_vm3, %v13998_v37  ;;  %12082 = vmatmul.mubr.msk.f32.gmra.mrb[196].mxu1 %vm1181_vm3, %v14083_v63 }
 0x872   :  { %11932 = vmatprep.mubr.msk.f32.mxu0 %vm1181_vm3, %v14007_v48  ;;  %12084 = vmatprep.mubr.msk.f32.mxu1 %vm1181_vm3, %v14093_v16  ;;  %v14568_v4 = vpop.permute.xlu0 %2657 }
 0x875   :  { %11933 = vmatmul.mubr.msk.f32.gmra.mrb[166].mxu0 %vm1181_vm3, %v14019_v18  ;;  %12085 = vmatmul.mubr.msk.f32.gmra.mrb[198].mxu1 %vm1181_vm3, %v14111_v43 }
 0x876   :  { %11935 = vmatprep.mubr.msk.f32.mxu0 %vm1181_vm3, %v14025_v57  ;;  %12119 = vmatprep.mubr.msk.f32.mxu1 %vm1181_vm3, %v13934_v47  ;;  %v14592_v13 = vpop.permute.xlu0 %2667 }
 0x879   :  { %11936 = vmatmul.mubr.msk.f32.gmra.mrb[168].mxu0 %vm1181_vm3, %v14039_v53  ;;  %12120 = vmatmul.mubr.msk.f32.vlgmr.msra.gmra.mrb[200].mxu1 %vm1181_vm3, %v13963_v28 }
 0x87a   :  { %12625 = vmatpush3.bf16.msra.mxu1 %v14231_v46  ;;  %11938 = vmatprep.mubr.msk.f32.mxu0 %vm1181_vm3, %v14047_v40  ;;  %v14627_v50 = vpop.permute.xlu0 %2677 }
 0x87b   :  { %12631 = vmatprep.subr.bf16.mxu1 %v14254_v29  ;;  %12122 = vmatprep.mubr.msk.f32.mxu1 %vm1181_vm3, %v13968_v42 }
 0x87c   :  { %v11673_v47 = vpop.f32.mrb[64].mxu0 }
 0x87d   :  { %v2820_v32 = vadd.f32 %v11673_v47, %v14519_v24  ;;  %v2814_v35 = vpop.f32.mrb[65].mxu0  ;;  %11939 = vmatmul.mubr.msk.f32.gmra.mrb[170].mxu0 %vm1181_vm3, %v14061_v61  ;;  %12123 = vmatmul.mubr.msk.f32.gmra.mrb[202].mxu1 %vm1181_vm3, %v13981_v26 }
 0x87e   :  { %v2815_v46 = vadd.f32 %v2814_v35, %v14514_v5  ;;  %11941 = vmatprep.mubr.msk.f32.mxu0 %vm1181_vm3, %v14069_v49  ;;  %12125 = vmatprep.mubr.msk.f32.mxu1 %vm1181_vm3, %v13988_v31 }
 0x87f   :  { %v2894_v58 = vmax.f32 %v2820_v32, 0.0 }
 0x880   :  { %v2893_v52 = vmax.f32 %v2815_v46, 0.0  ;;  %v11676_v6 = vpop.f32.mrb[66].mxu0 }
 0x881   :  { %v10037_v10 = vpack.c.bf16 %v2894_v58, %v2894_v58  ;;  %v2830_v41 = vadd.f32 %v11676_v6, %v14534_v9  ;;  %v2824_v7 = vpop.f32.mrb[67].mxu0  ;;  %11942 = vmatmul.mubr.msk.f32.gmra.mrb[172].mxu0 %vm1181_vm3, %v14083_v63  ;;  %12126 = vmatmul.mubr.msk.f32.gmra.mrb[204].mxu1 %vm1181_vm3, %v13998_v37  ;;  %v14663_v6 = vpop.permute.xlu0 %2687 }
 0x882   :  { %v10036_v27 = vpack.c.bf16 %v2893_v52, %v2893_v52  ;;  %v2825_v0 = vadd.f32 %v2824_v7, %v14532_v33  ;;  %11944 = vmatprep.mubr.msk.f32.mxu0 %vm1181_vm3, %v14093_v16  ;;  %12128 = vmatprep.mubr.msk.f32.mxu1 %vm1181_vm3, %v14007_v48  ;;  %v14661_v52 = vpop.permute.xlu1 %2682 }
 0x883   :  { %2975 = vst.msk [vmem:[%s17192_s20 + $0x4] sm:$0xf] %vm2973_vm0, %v10037_v10  ;;  %v2896_v59 = vmax.f32 %v2830_v41, 0.0 }
 0x884   :  { %2974 = vst.msk [vmem:[%s17192_s20] sm:$0xf] %vm2973_vm0, %v10036_v27  ;;  %v2895_v19 = vmax.f32 %v2825_v0, 0.0  ;;  %v11679_v56 = vpop.f32.mrb[68].mxu0 }
 0x885   :  { %v10039_v30 = vpack.c.bf16 %v2896_v59, %v2896_v59  ;;  %v2840_v17 = vadd.f32 %v11679_v56, %v14554_v11  ;;  %v2834_v1 = vpop.f32.mrb[69].mxu0  ;;  %11945 = vmatmul.mubr.msk.f32.gmra.mrb[174].mxu0 %vm1181_vm3, %v14111_v43  ;;  %12129 = vmatmul.mubr.msk.f32.gmra.mrb[206].mxu1 %vm1181_vm3, %v14019_v18 }
 0x886   :  { %v10038_v48 = vpack.c.bf16 %v2895_v19, %v2895_v19  ;;  %v2835_v45 = vadd.f32 %v2834_v1, %v14548_v38  ;;  %11979 = vmatprep.mubr.msk.f32.mxu0 %vm1181_vm3, %v14611_v12  ;;  %12131 = vmatprep.mubr.msk.f32.mxu1 %vm1181_vm3, %v14025_v57 }
 0x887   :  { %2977 = vst.msk [vmem:[%s17192_s20 + $0xc] sm:$0xf] %vm2973_vm0, %v10039_v30  ;;  %v2898_v18 = vmax.f32 %v2840_v17, 0.0 }
 0x888   :  { %2976 = vst.msk [vmem:[%s17192_s20 + $0x8] sm:$0xf] %vm2973_vm0, %v10038_v48  ;;  %v2897_v36 = vmax.f32 %v2835_v45, 0.0  ;;  %v11682_v2 = vpop.f32.mrb[70].mxu0 }
 0x889   :  { %v10041_v62 = vpack.c.bf16 %v2898_v18, %v2898_v18  ;;  %v2850_v57 = vadd.f32 %v11682_v2, %v14568_v4  ;;  %v2844_v51 = vpop.f32.mrb[71].mxu0  ;;  %11980 = vmatmul.mubr.msk.f32.vlgmr.msra.gmra.mrb[176].mxu0 %vm1181_vm3, %v13963_v28  ;;  %12132 = vmatmul.mubr.msk.f32.gmra.mrb[208].mxu1 %vm1181_vm3, %v14039_v53  ;;  %v14692_v18 = vld [vmem:[%s17191_s17 + $0x30] sm:$0xff] }
 0x88a   :  { %v10040_v15 = vpack.c.bf16 %v2897_v36, %v2897_v36  ;;  %v2845_v21 = vadd.f32 %v2844_v51, %v14566_v8  ;;  %12605 = vmatpush3.bf16.msra.mxu0 %v14178_v14  ;;  %11982 = vmatprep.mubr.msk.f32.mxu0 %vm1181_vm3, %v13968_v42 }
 0x88b   :  { %2979 = vst.msk [vmem:[%s17192_s20 + $0x14] sm:$0xf] %vm2973_vm0, %v10041_v62  ;;  %v2900_v55 = vmax.f32 %v2850_v57, 0.0  ;;  %12611 = vmatprep.subr.bf16.mxu0 %v14202_v23  ;;  %12134 = vmatprep.mubr.msk.f32.mxu1 %vm1181_vm3, %v14047_v40 }
 0x88c   :  { %2978 = vst.msk [vmem:[%s17192_s20 + $0x10] sm:$0xf] %vm2973_vm0, %v10040_v15  ;;  %v2899_v28 = vmax.f32 %v2845_v21, 0.0  ;;  %v11685_v53 = vpop.f32.mrb[72].mxu0  ;;  %v11785_v14 = vpop.f32.mrb[104].mxu1 }
 0x88d   :  { %v10043_v42 = vpack.c.bf16 %v2900_v55, %v2900_v55  ;;  %v2860_v60 = vadd.f32 %v11685_v53, %v14592_v13  ;;  %v3788_v47 = vadd.f32 %v11785_v14, %v14519_v24  ;;  %v2854_v32 = vpop.f32.mrb[73].mxu0  ;;  %v3782_v35 = vpop.f32.mrb[105].mxu1  ;;  %11983 = vmatmul.mubr.msk.f32.gmra.mrb[178].mxu0 %vm1181_vm3, %v13981_v26  ;;  %12135 = vmatmul.mubr.msk.f32.gmra.mrb[210].mxu1 %vm1181_vm3, %v14061_v61 }
 0x88e   :  { %v10042_v40 = vpack.c.bf16 %v2899_v28, %v2899_v28  ;;  %v2855_v46 = vadd.f32 %v2854_v32, %v14585_v39  ;;  %v3783_v58 = vadd.f32 %v3782_v35, %v14514_v5  ;;  %11985 = vmatprep.mubr.msk.f32.mxu0 %vm1181_vm3, %v13988_v31  ;;  %12137 = vmatprep.mubr.msk.f32.mxu1 %vm1181_vm3, %v14069_v49  ;;  %v14711_v28 = vld [vmem:[%s17191_s17 + $0x38] sm:$0xff]  ;;  %v14721_v32 = vpop.permute.xlu0 %2697 }
 0x88f   :  { %2981 = vst.msk [vmem:[%s17192_s20 + $0x1c] sm:$0xf] %vm2973_vm0, %v10043_v42  ;;  %v2902_v26 = vmax.f32 %v2860_v60, 0.0  ;;  %v3862_v61 = vmax.f32 %v3788_v47, 0.0  ;;  %v14719_v47 = vpop.permute.xlu1 %2692 }
 0x890   :  { %2980 = vst.msk [vmem:[%s17192_s20 + $0x18] sm:$0xf] %vm2973_vm0, %v10042_v40  ;;  %v2901_v31 = vmax.f32 %v2855_v46, 0.0  ;;  %v3861_v10 = vmax.f32 %v3783_v58, 0.0  ;;  %v11688_v41 = vpop.f32.mrb[74].mxu0  ;;  %v11788_v49 = vpop.f32.mrb[106].mxu1 }
 0x891   :  { %v10045_v7 = vpack.c.bf16 %v2902_v26, %v2902_v26  ;;  %v10101_v27 = vpack.c.bf16 %v3862_v61, %v3862_v61  ;;  %v2870_v0 = vadd.f32 %v11688_v41, %v14627_v50  ;;  %v3798_v59 = vadd.f32 %v11788_v49, %v14534_v9  ;;  %v2864_v19 = vpop.f32.mrb[75].mxu0  ;;  %v3792_v56 = vpop.f32.mrb[107].mxu1  ;;  %11986 = vmatmul.mubr.msk.f32.gmra.mrb[180].mxu0 %vm1181_vm3, %v13998_v37 }
 0x892   :  { %v10044_v30 = vpack.c.bf16 %v2901_v31, %v2901_v31  ;;  %v10100_v17 = vpack.c.bf16 %v3861_v10, %v3861_v10  ;;  %v2865_v1 = vadd.f32 %v2864_v19, %v14621_v34  ;;  %v3793_v48 = vadd.f32 %v3792_v56, %v14532_v33  ;;  %12138 = vmatmul.mubr.msk.f32.gmra.mrb[212].mxu1 %vm1181_vm3, %v14083_v63 }
 0x893   :  { %2983 = vst.msk [vmem:[%s17192_s20 + $0x24] sm:$0xf] %vm2973_vm0, %v10045_v7  ;;  %9061 = vst.msk [vmem:[%s17192_s20 + $0x104] sm:$0xf] %vm2973_vm0, %v10101_v27  ;;  %v2904_v37 = vmax.f32 %v2870_v0, 0.0  ;;  %v3864_v45 = vmax.f32 %v3798_v59, 0.0  ;;  %11988 = vmatprep.mubr.msk.f32.mxu0 %vm1181_vm3, %v14692_v18  ;;  %12140 = vmatprep.mubr.msk.f32.mxu1 %vm1181_vm3, %v14093_v16 }
 0x894   :  { %2982 = vst.msk [vmem:[%s17192_s20 + $0x20] sm:$0xf] %vm2973_vm0, %v10044_v30  ;;  %9060 = vst.msk [vmem:[%s17192_s20 + $0x100] sm:$0xf] %vm2973_vm0, %v10100_v17  ;;  %v2903_v63 = vmax.f32 %v2865_v1, 0.0  ;;  %v3863_v36 = vmax.f32 %v3793_v48, 0.0 }
 0x895   :  { %v11691_v2 = vpop.f32.mrb[76].mxu0  ;;  %v11791_v62 = vpop.f32.mrb[108].mxu1  ;;  %v10047_v57 = vpack.c.bf16 %v2904_v37, %v2904_v37  ;;  %v10103_v51 = vpack.c.bf16 %v3864_v45, %v3864_v45  ;;  %11989 = vmatmul.mubr.msk.f32.gmra.mrb[182].mxu0 %vm1181_vm3, %v14711_v28  ;;  %v14753_v0 = vld [vmem:[%s17191_s17 + $0x48] sm:$0xff]  ;;  %v14778_v37 = vld [vmem:[%s17191_s17 + $0x50] sm:$0xff] }
 0x896   :  { %v2880_v15 = vadd.f32 %v11691_v2, %v14663_v6  ;;  %v3808_v16 = vadd.f32 %v11791_v62, %v14554_v11  ;;  %v2874_v21 = vpop.f32.mrb[77].mxu0  ;;  %v3802_v55 = vpop.f32.mrb[109].mxu1  ;;  %v10046_v53 = vpack.c.bf16 %v2903_v63, %v2903_v63  ;;  %v10102_v14 = vpack.c.bf16 %v3863_v36, %v3863_v36  ;;  %12141 = vmatmul.mubr.msk.f32.gmra.mrb[214].mxu1 %vm1181_vm3, %v14111_v43  ;;  %v14734_v43 = vld [vmem:[%s17191_s17 + $0x40] sm:$0xff]  ;;  %v14762_v17 = vld [vmem:[%s17191_s17 + $0x8] sm:$0xff]  ;;  %v14794_v2 = vld [vmem:[%s17191_s17 + $0x10] sm:$0xff] }
 0x897   :  { %v2875_v42 = vadd.f32 %v2874_v21, %v14661_v52  ;;  %v3803_v60 = vadd.f32 %v3802_v55, %v14548_v38  ;;  %2985 = vst.msk [vmem:[%s17192_s20 + $0x2c] sm:$0xf] %vm2973_vm0, %v10047_v57  ;;  %9063 = vst.msk [vmem:[%s17192_s20 + $0x10c] sm:$0xf] %vm2973_vm0, %v10103_v51  ;;  %11991 = vmatprep.mubr.msk.f32.mxu0 %vm1181_vm3, %v14734_v43  ;;  %12175 = vmatprep.mubr.msk.f32.mxu1 %vm1181_vm3, %v14611_v12  ;;  %v14803_v55 = vld [vmem:[%s17191_s17 + $0x58] sm:$0xff] }
 0x898   :  { %v2906_v35 = vmax.f32 %v2880_v15, 0.0  ;;  %v3866_v40 = vmax.f32 %v3808_v16, 0.0  ;;  %2984 = vst.msk [vmem:[%s17192_s20 + $0x28] sm:$0xf] %vm2973_vm0, %v10046_v53  ;;  %9062 = vst.msk [vmem:[%s17192_s20 + $0x108] sm:$0xf] %vm2973_vm0, %v10102_v14 }
 0x899   :  { %v2905_v46 = vmax.f32 %v2875_v42, 0.0  ;;  %v3865_v58 = vmax.f32 %v3803_v60, 0.0  ;;  %v11694_v26 = vpop.f32.mrb[78].mxu0  ;;  %v11794_v61 = vpop.f32.mrb[110].mxu1  ;;  %11992 = vmatmul.mubr.msk.f32.gmra.mrb[184].mxu0 %vm1181_vm3, %v14753_v0 }
 0x89a   :  { %v10049_v31 = vpack.c.bf16 %v2906_v35, %v2906_v35  ;;  %v10105_v10 = vpack.c.bf16 %v3866_v40, %v3866_v40  ;;  %v2890_v41 = vadd.f32 %v11694_v26, %v14721_v32  ;;  %v3818_v49 = vadd.f32 %v11794_v61, %v14568_v4  ;;  %v2884_v7 = vpop.f32.mrb[79].mxu0  ;;  %v3812_v27 = vpop.f32.mrb[111].mxu1  ;;  %12176 = vmatmul.mubr.msk.f32.vlgmr.msra.gmra.mrb[216].mxu1 %vm1181_vm3, %v14762_v17  ;;  %v14812_v35 = vld [vmem:[%s17191_s17 + $0x18] sm:$0xff]  ;;  %v14834_v26 = vld [vmem:[%s17191_s17 + $0x20] sm:$0xff] }
 0x89b   :  { %v10048_v59 = vpack.c.bf16 %v2905_v46, %v2905_v46  ;;  %v10104_v19 = vpack.c.bf16 %v3865_v58, %v3865_v58  ;;  %v2885_v56 = vadd.f32 %v2884_v7, %v14719_v47  ;;  %v3813_v30 = vadd.f32 %v3812_v27, %v14566_v8  ;;  %12633 = vmatpush3.bf16.msra.mxu1 %v14254_v29  ;;  %v14827_v58 = vld [vmem:[%s17191_s17 + $0x60] sm:$0xff] }
 0x89c   :  { %2987 = vst.msk [vmem:[%s17192_s20 + $0x34] sm:$0xf] %vm2973_vm0, %v10049_v31  ;;  %9065 = vst.msk [vmem:[%s17192_s20 + $0x114] sm:$0xf] %vm2973_vm0, %v10105_v10  ;;  %v2908_v1 = vmax.f32 %v2890_v41, 0.0  ;;  %v3868_v48 = vmax.f32 %v3818_v49, 0.0  ;;  %11994 = vmatprep.mubr.msk.f32.mxu0 %vm1181_vm3, %v14778_v37  ;;  %12639 = vmatprep.subr.bf16.mxu1 %v14273_v54 }
 0x89d   :  { %2986 = vst.msk [vmem:[%s17192_s20 + $0x30] sm:$0xf] %vm2973_vm0, %v10048_v59  ;;  %9064 = vst.msk [vmem:[%s17192_s20 + $0x110] sm:$0xf] %vm2973_vm0, %v10104_v19  ;;  %v2907_v45 = vmax.f32 %v2885_v56, 0.0  ;;  %v3867_v29 = vmax.f32 %v3813_v30, 0.0  ;;  %12178 = vmatprep.mubr.msk.f32.mxu1 %vm1181_vm3, %v14794_v2  ;;  %11995 = vmatmul.mubr.msk.f32.gmra.mrb[186].mxu0 %vm1181_vm3, %v14803_v55 }
 0x89e   :  { %v11701_v63 = vpop.f32.mrb[80].mxu0  ;;  %v11797_v36 = vpop.f32.mrb[112].mxu1  ;;  %v10051_v62 = vpack.c.bf16 %v2908_v1, %v2908_v1  ;;  %v10107_v57 = vpack.c.bf16 %v3868_v48, %v3868_v48  ;;  %12179 = vmatmul.mubr.msk.f32.gmra.mrb[218].mxu1 %vm1181_vm3, %v14812_v35  ;;  %11997 = vmatprep.mubr.msk.f32.mxu0 %vm1181_vm3, %v14827_v58  ;;  %v14851_v30 = vld [vmem:[%s17191_s17 + $0x68] sm:$0xff] }
 0x89f   :  { %v3062_v51 = vadd.f32 %v11701_v63, %v14519_v24  ;;  %v3828_v15 = vadd.f32 %v11797_v36, %v14592_v13  ;;  %v3056_v16 = vpop.f32.mrb[81].mxu0  ;;  %v3822_v21 = vpop.f32.mrb[113].mxu1  ;;  %v10050_v53 = vpack.c.bf16 %v2907_v45, %v2907_v45  ;;  %v10106_v14 = vpack.c.bf16 %v3867_v29, %v3867_v29  ;;  %12181 = vmatprep.mubr.msk.f32.mxu1 %vm1181_vm3, %v14834_v26  ;;  %v14860_v63 = vld [vmem:[%s17191_s17 + $0x28] sm:$0xff] }
 0x8a0   :  { %v3057_v42 = vadd.f32 %v3056_v16, %v14514_v5  ;;  %v3823_v60 = vadd.f32 %v3822_v21, %v14585_v39  ;;  %2989 = vst.msk [vmem:[%s17192_s20 + $0x3c] sm:$0xf] %vm2973_vm0, %v10051_v62  ;;  %9067 = vst.msk [vmem:[%s17192_s20 + $0x11c] sm:$0xf] %vm2973_vm0, %v10107_v57  ;;  %v11704_v10 = vpop.f32.mrb[82].mxu0  ;;  %v11800_v41 = vpop.f32.mrb[114].mxu1 }
 0x8a1   :  { %v3136_v40 = vmax.f32 %v3062_v51, 0.0  ;;  %v3870_v46 = vmax.f32 %v3828_v15, 0.0  ;;  %2988 = vst.msk [vmem:[%s17192_s20 + $0x38] sm:$0xf] %vm2973_vm0, %v10050_v53  ;;  %9066 = vst.msk [vmem:[%s17192_s20 + $0x118] sm:$0xf] %vm2973_vm0, %v10106_v14  ;;  %v3072_v27 = vadd.f32 %v11704_v10, %v14534_v9  ;;  %v3838_v59 = vadd.f32 %v11800_v41, %v14627_v50  ;;  %11998 = vmatmul.mubr.msk.f32.gmra.mrb[188].mxu0 %vm1181_vm3, %v14851_v30 }
 0x8a2   :  { %v3135_v61 = vmax.f32 %v3057_v42, 0.0  ;;  %v3869_v31 = vmax.f32 %v3823_v60, 0.0  ;;  %v3066_v19 = vpop.f32.mrb[83].mxu0  ;;  %v3832_v56 = vpop.f32.mrb[115].mxu1  ;;  %12182 = vmatmul.mubr.msk.f32.gmra.mrb[220].mxu1 %vm1181_vm3, %v14860_v63  ;;  %v14875_v57 = vld [vmem:[%s17191_s17 + $0x70] sm:$0xff] }
 0x8a3   :  { %v10053_v49 = vpack.c.bf16 %v3136_v40, %v3136_v40  ;;  %v10109_v7 = vpack.c.bf16 %v3870_v46, %v3870_v46  ;;  %v3067_v45 = vadd.f32 %v3066_v19, %v14532_v33  ;;  %v3833_v29 = vadd.f32 %v3832_v56, %v14621_v34  ;;  %12000 = vmatprep.mubr.msk.f32.mxu0 %vm1181_vm3, %v14875_v57 }
 0x8a4   :  { %v10052_v1 = vpack.c.bf16 %v3135_v61, %v3135_v61  ;;  %v10108_v48 = vpack.c.bf16 %v3869_v31, %v3869_v31  ;;  %v3138_v36 = vmax.f32 %v3072_v27, 0.0  ;;  %v3872_v62 = vmax.f32 %v3838_v59, 0.0  ;;  %12184 = vmatprep.mubr.msk.f32.mxu1 %vm1181_vm3, %v14692_v18  ;;  %v11707_v16 = vpop.f32.mrb[84].mxu0  ;;  %v11803_v21 = vpop.f32.mrb[116].mxu1  ;;  %v14894_v61 = vld [vmem:[%s17191_s17 + $0x78] sm:$0xff] }
 0x8a5   :  { %8917 = vst.msk [vmem:[%s17192_s20 + $0x44] sm:$0xf] %vm2973_vm0, %v10053_v49  ;;  %9069 = vst.msk [vmem:[%s17192_s20 + $0x124] sm:$0xf] %vm2973_vm0, %v10109_v7  ;;  %v3137_v51 = vmax.f32 %v3067_v45, 0.0  ;;  %v3871_v15 = vmax.f32 %v3833_v29, 0.0  ;;  %v3082_v42 = vadd.f32 %v11707_v16, %v14554_v11  ;;  %v3848_v60 = vadd.f32 %v11803_v21, %v14663_v6  ;;  %12001 = vmatmul.mubr.msk.f32.gmra.mrb[190].mxu0 %vm1181_vm3, %v14894_v61 }
 0x8a6   :  { %8916 = vst.msk [vmem:[%s17192_s20 + $0x40] sm:$0xf] %vm2973_vm0, %v10052_v1  ;;  %9068 = vst.msk [vmem:[%s17192_s20 + $0x120] sm:$0xf] %vm2973_vm0, %v10108_v48  ;;  %v10055_v53 = vpack.c.bf16 %v3138_v36, %v3138_v36  ;;  %v10111_v14 = vpack.c.bf16 %v3872_v62, %v3872_v62  ;;  %v3076_v40 = vpop.f32.mrb[85].mxu0  ;;  %v3842_v46 = vpop.f32.mrb[117].mxu1  ;;  %12185 = vmatmul.mubr.msk.f32.gmra.mrb[222].mxu1 %vm1181_vm3, %v14711_v28  ;;  %12035 = vmatprep.mubr.msk.f32.mxu0 %vm1181_vm3, %v14611_v12 }
 0x8a7   :  { %v10054_v31 = vpack.c.bf16 %v3137_v51, %v3137_v51  ;;  %v10110_v10 = vpack.c.bf16 %v3871_v15, %v3871_v15  ;;  %v3077_v41 = vadd.f32 %v3076_v40, %v14548_v38  ;;  %v3843_v49 = vadd.f32 %v3842_v46, %v14661_v52  ;;  %12187 = vmatprep.mubr.msk.f32.mxu1 %vm1181_vm3, %v14734_v43 }
 0x8a8   :  { %8919 = vst.msk [vmem:[%s17192_s20 + $0x4c] sm:$0xf] %vm2973_vm0, %v10055_v53  ;;  %9071 = vst.msk [vmem:[%s17192_s20 + $0x12c] sm:$0xf] %vm2973_vm0, %v10111_v14  ;;  %v3140_v7 = vmax.f32 %v3082_v42, 0.0  ;;  %v3874_v27 = vmax.f32 %v3848_v60, 0.0 }
 0x8a9   :  { %8918 = vst.msk [vmem:[%s17192_s20 + $0x48] sm:$0xf] %vm2973_vm0, %v10054_v31  ;;  %9070 = vst.msk [vmem:[%s17192_s20 + $0x128] sm:$0xf] %vm2973_vm0, %v10110_v10  ;;  %v3139_v59 = vmax.f32 %v3077_v41, 0.0  ;;  %v3873_v19 = vmax.f32 %v3843_v49, 0.0  ;;  %12036 = vmatmul.mubr.msk.f32.vlgmr.msra.gmra.mrb[192].mxu0 %vm1181_vm3, %v14762_v17 }
 0x8aa   :  { %v11710_v56 = vpop.f32.mrb[86].mxu0  ;;  %v11806_v1 = vpop.f32.mrb[118].mxu1  ;;  %v10057_v48 = vpack.c.bf16 %v3140_v7, %v3140_v7  ;;  %v10113_v45 = vpack.c.bf16 %v3874_v27, %v3874_v27  ;;  %12613 = vmatpush3.bf16.msra.mxu0 %v14202_v23  ;;  %12188 = vmatmul.mubr.msk.f32.gmra.mrb[224].mxu1 %vm1181_vm3, %v14753_v0 }
 0x8ab   :  { %v3092_v29 = vadd.f32 %v11710_v56, %v14568_v4  ;;  %v3858_v36 = vadd.f32 %v11806_v1, %v14721_v32  ;;  %v3086_v62 = vpop.f32.mrb[87].mxu0  ;;  %v3852_v51 = vpop.f32.mrb[119].mxu1  ;;  %v10056_v15 = vpack.c.bf16 %v3139_v59, %v3139_v59  ;;  %v10112_v16 = vpack.c.bf16 %v3873_v19, %v3873_v19  ;;  %12619 = vmatprep.subr.bf16.mxu0 %v14222_v44 }
 0x8ac   :  { %v3087_v21 = vadd.f32 %v3086_v62, %v14566_v8  ;;  %v3853_v53 = vadd.f32 %v3852_v51, %v14719_v47  ;;  %8921 = vst.msk [vmem:[%s17192_s20 + $0x54] sm:$0xf] %vm2973_vm0, %v10057_v48  ;;  %9073 = vst.msk [vmem:[%s17192_s20 + $0x134] sm:$0xf] %vm2973_vm0, %v10113_v45  ;;  %v11713_v40 = vpop.f32.mrb[88].mxu0  ;;  %v11841_v46 = vpop.f32.mrb[120].mxu1  ;;  %12038 = vmatprep.mubr.msk.f32.mxu0 %vm1181_vm3, %v14794_v2  ;;  %12190 = vmatprep.mubr.msk.f32.mxu1 %vm1181_vm3, %v14778_v37 }
 0x8ad   :  { %v3142_v14 = vmax.f32 %v3092_v29, 0.0  ;;  %v3876_v42 = vmax.f32 %v3858_v36, 0.0  ;;  %8920 = vst.msk [vmem:[%s17192_s20 + $0x50] sm:$0xf] %vm2973_vm0, %v10056_v15  ;;  %9072 = vst.msk [vmem:[%s17192_s20 + $0x130] sm:$0xf] %vm2973_vm0, %v10112_v16  ;;  %v3102_v41 = vadd.f32 %v11713_v40, %v14592_v13  ;;  %v4272_v49 = vadd.f32 %v11841_v46, %v14519_v24  ;;  %12039 = vmatmul.mubr.msk.f32.gmra.mrb[194].mxu0 %vm1181_vm3, %v14812_v35 }
 0x8ae   :  { %v3141_v23 = vmax.f32 %v3087_v21, 0.0  ;;  %v3875_v60 = vmax.f32 %v3853_v53, 0.0  ;;  %v3096_v7 = vpop.f32.mrb[89].mxu0  ;;  %v4266_v27 = vpop.f32.mrb[121].mxu1  ;;  %12041 = vmatprep.mubr.msk.f32.mxu0 %vm1181_vm3, %v14834_v26  ;;  %12191 = vmatmul.mubr.msk.f32.gmra.mrb[226].mxu1 %vm1181_vm3, %v14803_v55 }
 0x8af   :  { %v10059_v31 = vpack.c.bf16 %v3142_v14, %v3142_v14  ;;  %v10115_v10 = vpack.c.bf16 %v3876_v42, %v3876_v42  ;;  %v3097_v56 = vadd.f32 %v3096_v7, %v14585_v39  ;;  %v4267_v1 = vadd.f32 %v4266_v27, %v14514_v5  ;;  %12193 = vmatprep.mubr.msk.f32.mxu1 %vm1181_vm3, %v14827_v58 }
 0x8b0   :  { %v10058_v59 = vpack.c.bf16 %v3141_v23, %v3141_v23  ;;  %v10114_v19 = vpack.c.bf16 %v3875_v60, %v3875_v60  ;;  %v3144_v48 = vmax.f32 %v3102_v41, 0.0  ;;  %v4346_v45 = vmax.f32 %v4272_v49, 0.0  ;;  %v11716_v62 = vpop.f32.mrb[90].mxu0  ;;  %v11844_v51 = vpop.f32.mrb[122].mxu1 }
 0x8b1   :  { %8923 = vst.msk [vmem:[%s17192_s20 + $0x5c] sm:$0xf] %vm2973_vm0, %v10059_v31  ;;  %9075 = vst.msk [vmem:[%s17192_s20 + $0x13c] sm:$0xf] %vm2973_vm0, %v10115_v10  ;;  %v3143_v29 = vmax.f32 %v3097_v56, 0.0  ;;  %v4345_v36 = vmax.f32 %v4267_v1, 0.0  ;;  %v3112_v21 = vadd.f32 %v11716_v62, %v14627_v50  ;;  %v4282_v53 = vadd.f32 %v11844_v51, %v14534_v9  ;;  %12042 = vmatmul.mubr.msk.f32.gmra.mrb[196].mxu0 %vm1181_vm3, %v14860_v63 }
 0x8b2   :  { %8922 = vst.msk [vmem:[%s17192_s20 + $0x58] sm:$0xf] %vm2973_vm0, %v10058_v59  ;;  %9074 = vst.msk [vmem:[%s17192_s20 + $0x138] sm:$0xf] %vm2973_vm0, %v10114_v19  ;;  %v10061_v15 = vpack.c.bf16 %v3144_v48, %v3144_v48  ;;  %v10133_v16 = vpack.c.bf16 %v4346_v45, %v4346_v45  ;;  %v3106_v14 = vpop.f32.mrb[91].mxu0  ;;  %v4276_v42 = vpop.f32.mrb[123].mxu1  ;;  %12044 = vmatprep.mubr.msk.f32.mxu0 %vm1181_vm3, %v14692_v18  ;;  %12194 = vmatmul.mubr.msk.f32.gmra.mrb[228].mxu1 %vm1181_vm3, %v14851_v30 }
 0x8b3   :  { %v10060_v23 = vpack.c.bf16 %v3143_v29, %v3143_v29  ;;  %v10132_v60 = vpack.c.bf16 %v4345_v36, %v4345_v36  ;;  %v3107_v40 = vadd.f32 %v3106_v14, %v14621_v34  ;;  %v4277_v46 = vadd.f32 %v4276_v42, %v14532_v33  ;;  %12196 = vmatprep.mubr.msk.f32.mxu1 %vm1181_vm3, %v14875_v57 }
 0x8b4   :  { %8925 = vst.msk [vmem:[%s17192_s20 + $0x64] sm:$0xf] %vm2973_vm0, %v10061_v15  ;;  %9157 = vst.msk [vmem:[%s17192_s20 + $0x184] sm:$0xf] %vm2973_vm0, %v10133_v16  ;;  %v3146_v31 = vmax.f32 %v3112_v21, 0.0  ;;  %v4348_v10 = vmax.f32 %v4282_v53, 0.0 }
 0x8b5   :  { %8924 = vst.msk [vmem:[%s17192_s20 + $0x60] sm:$0xf] %vm2973_vm0, %v10060_v23  ;;  %9156 = vst.msk [vmem:[%s17192_s20 + $0x180] sm:$0xf] %vm2973_vm0, %v10132_v60  ;;  %v3145_v41 = vmax.f32 %v3107_v40, 0.0  ;;  %v4347_v49 = vmax.f32 %v4277_v46, 0.0  ;;  %12045 = vmatmul.mubr.msk.f32.gmra.mrb[198].mxu0 %vm1181_vm3, %v14711_v28 }
 0x8b6   :  { %v11719_v7 = vpop.f32.mrb[92].mxu0  ;;  %v11847_v27 = vpop.f32.mrb[124].mxu1  ;;  %v10063_v59 = vpack.c.bf16 %v3146_v31, %v3146_v31  ;;  %v10135_v19 = vpack.c.bf16 %v4348_v10, %v4348_v10  ;;  %12047 = vmatprep.mubr.msk.f32.mxu0 %vm1181_vm3, %v14734_v43  ;;  %12197 = vmatmul.mubr.msk.f32.gmra.mrb[230].mxu1 %vm1181_vm3, %v14894_v61 }
 0x8b7   :  { %v3122_v56 = vadd.f32 %v11719_v7, %v14663_v6  ;;  %v4292_v1 = vadd.f32 %v11847_v27, %v14554_v11  ;;  %v3116_v48 = vpop.f32.mrb[93].mxu0  ;;  %v4286_v45 = vpop.f32.mrb[125].mxu1  ;;  %v10062_v29 = vpack.c.bf16 %v3145_v41, %v3145_v41  ;;  %v10134_v36 = vpack.c.bf16 %v4347_v49, %v4347_v49  ;;  %12231 = vmatprep.mubr.msk.f32.mxu1 %vm1181_vm3, %v14611_v12 }
 0x8b8   :  { %v3117_v62 = vadd.f32 %v3116_v48, %v14661_v52  ;;  %v4287_v51 = vadd.f32 %v4286_v45, %v14548_v38  ;;  %8927 = vst.msk [vmem:[%s17192_s20 + $0x6c] sm:$0xf] %vm2973_vm0, %v10063_v59  ;;  %9159 = vst.msk [vmem:[%s17192_s20 + $0x18c] sm:$0xf] %vm2973_vm0, %v10135_v19  ;;  %v11722_v14 = vpop.f32.mrb[94].mxu0  ;;  %v11850_v42 = vpop.f32.mrb[126].mxu1 }
 0x8b9   :  { %v3148_v15 = vmax.f32 %v3122_v56, 0.0  ;;  %v4350_v16 = vmax.f32 %v4292_v1, 0.0  ;;  %8926 = vst.msk [vmem:[%s17192_s20 + $0x68] sm:$0xf] %vm2973_vm0, %v10062_v29  ;;  %9158 = vst.msk [vmem:[%s17192_s20 + $0x188] sm:$0xf] %vm2973_vm0, %v10134_v36  ;;  %v3132_v40 = vadd.f32 %v11722_v14, %v14721_v32  ;;  %v4302_v46 = vadd.f32 %v11850_v42, %v14568_v4  ;;  %12048 = vmatmul.mubr.msk.f32.gmra.mrb[200].mxu0 %vm1181_vm3, %v14753_v0 }
 0x8ba   :  { %v3147_v21 = vmax.f32 %v3117_v62, 0.0  ;;  %v4349_v53 = vmax.f32 %v4287_v51, 0.0  ;;  %v3126_v31 = vpop.f32.mrb[95].mxu0  ;;  %v4296_v10 = vpop.f32.mrb[127].mxu1  ;;  %12050 = vmatprep.mubr.msk.f32.mxu0 %vm1181_vm3, %v14778_v37  ;;  %12232 = vmatmul.mubr.msk.f32.vlgmr.msra.gmra.mrb[232].mxu1 %vm1181_vm3, %v14762_v17 }
 0x8bb   :  { %v10065_v23 = vpack.c.bf16 %v3148_v15, %v3148_v15  ;;  %v10137_v60 = vpack.c.bf16 %v4350_v16, %v4350_v16  ;;  %v3127_v7 = vadd.f32 %v3126_v31, %v14719_v47  ;;  %v4297_v27 = vadd.f32 %v4296_v10, %v14566_v8  ;;  %12641 = vmatpush3.bf16.msra.mxu1 %v14273_v54 }
 0x8bc   :  { %v10064_v41 = vpack.c.bf16 %v3147_v21, %v3147_v21  ;;  %v10136_v49 = vpack.c.bf16 %v4349_v53, %v4349_v53  ;;  %v3150_v59 = vmax.f32 %v3132_v40, 0.0  ;;  %v4352_v19 = vmax.f32 %v4302_v46, 0.0  ;;  %v11729_v48 = vpop.f32.mrb[96].mxu0  ;;  %v11853_v45 = vpop.f32.mrb[128].mxu1  ;;  %12234 = vmatprep.mubr.msk.f32.mxu1 %vm1181_vm3, %v14794_v2  ;;  %12647 = vmatprep.subr.bf16.mxu1 %v14296_v3 }
 0x8bd   :  { %8929 = vst.msk [vmem:[%s17192_s20 + $0x74] sm:$0xf] %vm2973_vm0, %v10065_v23  ;;  %9161 = vst.msk [vmem:[%s17192_s20 + $0x194] sm:$0xf] %vm2973_vm0, %v10137_v60  ;;  %v3149_v56 = vmax.f32 %v3127_v7, 0.0  ;;  %v4351_v1 = vmax.f32 %v4297_v27, 0.0  ;;  %v3304_v62 = vadd.f32 %v11729_v48, %v14519_v24  ;;  %v4312_v51 = vadd.f32 %v11853_v45, %v14592_v13  ;;  %12051 = vmatmul.mubr.msk.f32.gmra.mrb[202].mxu0 %vm1181_vm3, %v14803_v55 }
 0x8be   :  { %8928 = vst.msk [vmem:[%s17192_s20 + $0x70] sm:$0xf] %vm2973_vm0, %v10064_v41  ;;  %9160 = vst.msk [vmem:[%s17192_s20 + $0x190] sm:$0xf] %vm2973_vm0, %v10136_v49  ;;  %v10067_v29 = vpack.c.bf16 %v3150_v59, %v3150_v59  ;;  %v10139_v36 = vpack.c.bf16 %v4352_v19, %v4352_v19  ;;  %v3298_v15 = vpop.f32.mrb[97].mxu0  ;;  %v4306_v16 = vpop.f32.mrb[129].mxu1  ;;  %12235 = vmatmul.mubr.msk.f32.gmra.mrb[234].mxu1 %vm1181_vm3, %v14812_v35  ;;  %12053 = vmatprep.mubr.msk.f32.mxu0 %vm1181_vm3, %v14827_v58 }
 0x8bf   :  { %v10066_v21 = vpack.c.bf16 %v3149_v56, %v3149_v56  ;;  %v10138_v53 = vpack.c.bf16 %v4351_v1, %v4351_v1  ;;  %v3299_v14 = vadd.f32 %v3298_v15, %v14514_v5  ;;  %v4307_v54 = vadd.f32 %v4306_v16, %v14585_v39  ;;  %12237 = vmatprep.mubr.msk.f32.mxu1 %vm1181_vm3, %v14834_v26 }
 0x8c0   :  { %8931 = vst.msk [vmem:[%s17192_s20 + $0x7c] sm:$0xf] %vm2973_vm0, %v10067_v29  ;;  %9163 = vst.msk [vmem:[%s17192_s20 + $0x19c] sm:$0xf] %vm2973_vm0, %v10139_v36  ;;  %v3378_v42 = vmax.f32 %v3304_v62, 0.0  ;;  %v4354_v23 = vmax.f32 %v4312_v51, 0.0 }
 0x8c1   :  { %8930 = vst.msk [vmem:[%s17192_s20 + $0x78] sm:$0xf] %vm2973_vm0, %v10066_v21  ;;  %9162 = vst.msk [vmem:[%s17192_s20 + $0x198] sm:$0xf] %vm2973_vm0, %v10138_v53  ;;  %v3377_v60 = vmax.f32 %v3299_v14, 0.0  ;;  %v4353_v40 = vmax.f32 %v4307_v54, 0.0  ;;  %12054 = vmatmul.mubr.msk.f32.gmra.mrb[204].mxu0 %vm1181_vm3, %v14851_v30 }
 0x8c2   :  { %v11732_v46 = vpop.f32.mrb[98].mxu0  ;;  %v11856_v31 = vpop.f32.mrb[130].mxu1  ;;  %v10069_v10 = vpack.c.bf16 %v3378_v42, %v3378_v42  ;;  %v10141_v41 = vpack.c.bf16 %v4354_v23, %v4354_v23  ;;  %12238 = vmatmul.mubr.msk.f32.gmra.mrb[236].mxu1 %vm1181_vm3, %v14860_v63  ;;  %12056 = vmatprep.mubr.msk.f32.mxu0 %vm1181_vm3, %v14875_v57 }
 0x8c3   :  { %v3314_v49 = vadd.f32 %v11732_v46, %v14534_v9  ;;  %v4322_v7 = vadd.f32 %v11856_v31, %v14627_v50  ;;  %v3308_v27 = vpop.f32.mrb[99].mxu0  ;;  %v4316_v59 = vpop.f32.mrb[131].mxu1  ;;  %v10068_v19 = vpack.c.bf16 %v3377_v60, %v3377_v60  ;;  %v10140_v56 = vpack.c.bf16 %v4353_v40, %v4353_v40  ;;  %12240 = vmatprep.mubr.msk.f32.mxu1 %vm1181_vm3, %v14692_v18 }
 0x8c4   :  { %v3309_v1 = vadd.f32 %v3308_v27, %v14532_v33  ;;  %v4317_v48 = vadd.f32 %v4316_v59, %v14621_v34  ;;  %8965 = vst.msk [vmem:[%s17192_s20 + $0x84] sm:$0xf] %vm2973_vm0, %v10069_v10  ;;  %9165 = vst.msk [vmem:[%s17192_s20 + $0x1a4] sm:$0xf] %vm2973_vm0, %v10141_v41  ;;  %v11735_v51 = vpop.f32.mrb[100].mxu0  ;;  %v11859_v15 = vpop.f32.mrb[132].mxu1 }
 0x8c5   :  { %v3380_v45 = vmax.f32 %v3314_v49, 0.0  ;;  %v4356_v29 = vmax.f32 %v4322_v7, 0.0  ;;  %8964 = vst.msk [vmem:[%s17192_s20 + $0x80] sm:$0xf] %vm2973_vm0, %v10068_v19  ;;  %9164 = vst.msk [vmem:[%s17192_s20 + $0x1a0] sm:$0xf] %vm2973_vm0, %v10140_v56  ;;  %v3324_v53 = vadd.f32 %v11735_v51, %v14554_v11  ;;  %v4332_v14 = vadd.f32 %v11859_v15, %v14663_v6  ;;  %12057 = vmatmul.mubr.msk.f32.gmra.mrb[206].mxu0 %vm1181_vm3, %v14894_v61 }
 0x8c6   :  { %v3379_v36 = vmax.f32 %v3309_v1, 0.0  ;;  %v4355_v62 = vmax.f32 %v4317_v48, 0.0  ;;  %v3318_v54 = vpop.f32.mrb[101].mxu0  ;;  %v4326_v42 = vpop.f32.mrb[133].mxu1  ;;  %12241 = vmatmul.mubr.msk.f32.gmra.mrb[238].mxu1 %vm1181_vm3, %v14711_v28  ;;  %12091 = vmatprep.mubr.msk.f32.mxu0 %vm1181_vm3, %v14611_v12 }
 0x8c7   :  { %v10071_v16 = vpack.c.bf16 %v3380_v45, %v3380_v45  ;;  %v10143_v21 = vpack.c.bf16 %v4356_v29, %v4356_v29  ;;  %v3319_v40 = vadd.f32 %v3318_v54, %v14548_v38  ;;  %v4327_v46 = vadd.f32 %v4326_v42, %v14661_v52  ;;  %12243 = vmatprep.mubr.msk.f32.mxu1 %vm1181_vm3, %v14734_v43 }
 0x8c8   :  { %v10070_v23 = vpack.c.bf16 %v3379_v36, %v3379_v36  ;;  %v10142_v60 = vpack.c.bf16 %v4355_v62, %v4355_v62  ;;  %v3382_v31 = vmax.f32 %v3324_v53, 0.0  ;;  %v4358_v10 = vmax.f32 %v4332_v14, 0.0  ;;  %v11738_v7 = vpop.f32.mrb[102].mxu0  ;;  %v11862_v27 = vpop.f32.mrb[134].mxu1 }
 0x8c9   :  { %8967 = vst.msk [vmem:[%s17192_s20 + $0x8c] sm:$0xf] %vm2973_vm0, %v10071_v16  ;;  %9167 = vst.msk [vmem:[%s17192_s20 + $0x1ac] sm:$0xf] %vm2973_vm0, %v10143_v21  ;;  %v3381_v41 = vmax.f32 %v3319_v40, 0.0  ;;  %v4357_v49 = vmax.f32 %v4327_v46, 0.0  ;;  %v3334_v56 = vadd.f32 %v11738_v7, %v14568_v4  ;;  %v4342_v1 = vadd.f32 %v11862_v27, %v14721_v32  ;;  %12092 = vmatmul.mubr.msk.f32.vlgmr.msra.gmra.mrb[208].mxu0 %vm1181_vm3, %v14762_v17 }
 0x8ca   :  { %8966 = vst.msk [vmem:[%s17192_s20 + $0x88] sm:$0xf] %vm2973_vm0, %v10070_v23  ;;  %9166 = vst.msk [vmem:[%s17192_s20 + $0x1a8] sm:$0xf] %vm2973_vm0, %v10142_v60  ;;  %v10073_v59 = vpack.c.bf16 %v3382_v31, %v3382_v31  ;;  %v10145_v19 = vpack.c.bf16 %v4358_v10, %v4358_v10  ;;  %v3328_v48 = vpop.f32.mrb[103].mxu0  ;;  %v4336_v45 = vpop.f32.mrb[135].mxu1  ;;  %12621 = vmatpush3.bf16.msra.mxu0 %v14222_v44  ;;  %12244 = vmatmul.mubr.msk.f32.gmra.mrb[240].mxu1 %vm1181_vm3, %v14753_v0 }
 0x8cb   :  { %v10072_v29 = vpack.c.bf16 %v3381_v41, %v3381_v41  ;;  %v10144_v36 = vpack.c.bf16 %v4357_v49, %v4357_v49  ;;  %v3329_v62 = vadd.f32 %v3328_v48, %v14566_v8  ;;  %v4337_v51 = vadd.f32 %v4336_v45, %v14719_v47  ;;  %12627 = vmatprep.subr.bf16.mxu0 %v14244_v22 }
 0x8cc   :  { %8969 = vst.msk [vmem:[%s17192_s20 + $0x94] sm:$0xf] %vm2973_vm0, %v10073_v59  ;;  %9169 = vst.msk [vmem:[%s17192_s20 + $0x1b4] sm:$0xf] %vm2973_vm0, %v10145_v19  ;;  %v3384_v15 = vmax.f32 %v3334_v56, 0.0  ;;  %v4360_v16 = vmax.f32 %v4342_v1, 0.0  ;;  %12094 = vmatprep.mubr.msk.f32.mxu0 %vm1181_vm3, %v14794_v2  ;;  %12246 = vmatprep.mubr.msk.f32.mxu1 %vm1181_vm3, %v14778_v37 }
 0x8cd   :  { %8968 = vst.msk [vmem:[%s17192_s20 + $0x90] sm:$0xf] %vm2973_vm0, %v10072_v29  ;;  %9168 = vst.msk [vmem:[%s17192_s20 + $0x1b0] sm:$0xf] %vm2973_vm0, %v10144_v36  ;;  %v3383_v21 = vmax.f32 %v3329_v62, 0.0  ;;  %v4359_v53 = vmax.f32 %v4337_v51, 0.0  ;;  %12095 = vmatmul.mubr.msk.f32.gmra.mrb[210].mxu0 %vm1181_vm3, %v14812_v35 }
 0x8ce   :  { %v11741_v14 = vpop.f32.mrb[104].mxu0  ;;  %v11897_v54 = vpop.f32.mrb[136].mxu1  ;;  %v10075_v44 = vpack.c.bf16 %v3384_v15, %v3384_v15  ;;  %v10147_v42 = vpack.c.bf16 %v4360_v16, %v4360_v16  ;;  %12247 = vmatmul.mubr.msk.f32.gmra.mrb[242].mxu1 %vm1181_vm3, %v14803_v55  ;;  %12097 = vmatprep.mubr.msk.f32.mxu0 %vm1181_vm3, %v14834_v26 }
 0x8cf   :  { %v3344_v23 = vadd.f32 %v11741_v14, %v14592_v13  ;;  %v4756_v60 = vadd.f32 %v11897_v54, %v14519_v24  ;;  %v3338_v40 = vpop.f32.mrb[105].mxu0  ;;  %v4750_v46 = vpop.f32.mrb[137].mxu1  ;;  %v10074_v31 = vpack.c.bf16 %v3383_v21, %v3383_v21  ;;  %v10146_v10 = vpack.c.bf16 %v4359_v53, %v4359_v53  ;;  %12249 = vmatprep.mubr.msk.f32.mxu1 %vm1181_vm3, %v14827_v58 }
 0x8d0   :  { %v3339_v41 = vadd.f32 %v3338_v40, %v14585_v39  ;;  %v4751_v49 = vadd.f32 %v4750_v46, %v14514_v5  ;;  %8971 = vst.msk [vmem:[%s17192_s20 + $0x9c] sm:$0xf] %vm2973_vm0, %v10075_v44  ;;  %9171 = vst.msk [vmem:[%s17192_s20 + $0x1bc] sm:$0xf] %vm2973_vm0, %v10147_v42  ;;  %v11744_v56 = vpop.f32.mrb[106].mxu0  ;;  %v11900_v1 = vpop.f32.mrb[138].mxu1 }
 0x8d1   :  { %v3386_v7 = vmax.f32 %v3344_v23, 0.0  ;;  %v4830_v27 = vmax.f32 %v4756_v60, 0.0  ;;  %8970 = vst.msk [vmem:[%s17192_s20 + $0x98] sm:$0xf] %vm2973_vm0, %v10074_v31  ;;  %9170 = vst.msk [vmem:[%s17192_s20 + $0x1b8] sm:$0xf] %vm2973_vm0, %v10146_v10  ;;  %v3354_v29 = vadd.f32 %v11744_v56, %v14627_v50  ;;  %v4766_v36 = vadd.f32 %v11900_v1, %v14534_v9  ;;  %12098 = vmatmul.mubr.msk.f32.gmra.mrb[212].mxu0 %vm1181_vm3, %v14860_v63 }
 0x8d2   :  { %v3385_v59 = vmax.f32 %v3339_v41, 0.0  ;;  %v4829_v19 = vmax.f32 %v4751_v49, 0.0  ;;  %v3348_v62 = vpop.f32.mrb[107].mxu0  ;;  %v4760_v51 = vpop.f32.mrb[139].mxu1  ;;  %12250 = vmatmul.mubr.msk.f32.gmra.mrb[244].mxu1 %vm1181_vm3, %v14851_v30  ;;  %12100 = vmatprep.mubr.msk.f32.mxu0 %vm1181_vm3, %v14692_v18 }
 0x8d3   :  { %v10077_v48 = vpack.c.bf16 %v3386_v7, %v3386_v7  ;;  %v10165_v45 = vpack.c.bf16 %v4830_v27, %v4830_v27  ;;  %v3349_v21 = vadd.f32 %v3348_v62, %v14621_v34  ;;  %v4761_v53 = vadd.f32 %v4760_v51, %v14532_v33  ;;  %12252 = vmatprep.mubr.msk.f32.mxu1 %vm1181_vm3, %v14875_v57 }
 0x8d4   :  { %v10076_v15 = vpack.c.bf16 %v3385_v59, %v3385_v59  ;;  %v10164_v16 = vpack.c.bf16 %v4829_v19, %v4829_v19  ;;  %v3388_v14 = vmax.f32 %v3354_v29, 0.0  ;;  %v4832_v54 = vmax.f32 %v4766_v36, 0.0  ;;  %v11747_v23 = vpop.f32.mrb[108].mxu0  ;;  %v11903_v60 = vpop.f32.mrb[140].mxu1 }
 0x8d5   :  { %8973 = vst.msk [vmem:[%s17192_s20 + $0xa4] sm:$0xf] %vm2973_vm0, %v10077_v48  ;;  %9253 = vst.msk [vmem:[%s17192_s20 + $0x204] sm:$0xf] %vm2973_vm0, %v10165_v45  ;;  %v3387_v44 = vmax.f32 %v3349_v21, 0.0  ;;  %v4831_v42 = vmax.f32 %v4761_v53, 0.0  ;;  %v3364_v31 = vadd.f32 %v11747_v23, %v14663_v6  ;;  %v4776_v10 = vadd.f32 %v11903_v60, %v14554_v11  ;;  %12101 = vmatmul.mubr.msk.f32.gmra.mrb[214].mxu0 %vm1181_vm3, %v14711_v28 }
 0x8d6   :  { %8972 = vst.msk [vmem:[%s17192_s20 + $0xa0] sm:$0xf] %vm2973_vm0, %v10076_v15  ;;  %9252 = vst.msk [vmem:[%s17192_s20 + $0x200] sm:$0xf] %vm2973_vm0, %v10164_v16  ;;  %v10079_v40 = vpack.c.bf16 %v3388_v14, %v3388_v14  ;;  %v10167_v46 = vpack.c.bf16 %v4832_v54, %v4832_v54  ;;  %v3358_v41 = vpop.f32.mrb[109].mxu0  ;;  %v4770_v49 = vpop.f32.mrb[141].mxu1  ;;  %12253 = vmatmul.mubr.msk.f32.gmra.mrb[246].mxu1 %vm1181_vm3, %v14894_v61  ;;  %12103 = vmatprep.mubr.msk.f32.mxu0 %vm1181_vm3, %v14734_v43 }
 0x8d7   :  { %v10078_v7 = vpack.c.bf16 %v3387_v44, %v3387_v44  ;;  %v10166_v27 = vpack.c.bf16 %v4831_v42, %v4831_v42  ;;  %v3359_v59 = vadd.f32 %v3358_v41, %v14661_v52  ;;  %v4771_v19 = vadd.f32 %v4770_v49, %v14548_v38  ;;  %12287 = vmatprep.mubr.msk.f32.mxu1 %vm1181_vm3, %v14611_v12 }
 0x8d8   :  { %8975 = vst.msk [vmem:[%s17192_s20 + $0xac] sm:$0xf] %vm2973_vm0, %v10079_v40  ;;  %9255 = vst.msk [vmem:[%s17192_s20 + $0x20c] sm:$0xf] %vm2973_vm0, %v10167_v46  ;;  %v3390_v56 = vmax.f32 %v3364_v31, 0.0  ;;  %v4834_v1 = vmax.f32 %v4776_v10, 0.0 }
 0x8d9   :  { %8974 = vst.msk [vmem:[%s17192_s20 + $0xa8] sm:$0xf] %vm2973_vm0, %v10078_v7  ;;  %9254 = vst.msk [vmem:[%s17192_s20 + $0x208] sm:$0xf] %vm2973_vm0, %v10166_v27  ;;  %v3389_v48 = vmax.f32 %v3359_v59, 0.0  ;;  %v4833_v45 = vmax.f32 %v4771_v19, 0.0  ;;  %12104 = vmatmul.mubr.msk.f32.gmra.mrb[216].mxu0 %vm1181_vm3, %v14753_v0 }
 0x8da   :  { %v11750_v29 = vpop.f32.mrb[110].mxu0  ;;  %v11906_v36 = vpop.f32.mrb[142].mxu1  ;;  %v10081_v62 = vpack.c.bf16 %v3390_v56, %v3390_v56  ;;  %v10169_v51 = vpack.c.bf16 %v4834_v1, %v4834_v1  ;;  %12288 = vmatmul.mubr.msk.f32.vlgmr.msra.gmra.mrb[248].mxu1 %vm1181_vm3, %v14762_v17  ;;  %12106 = vmatprep.mubr.msk.f32.mxu0 %vm1181_vm3, %v14778_v37 }
 0x8db   :  { %v3374_v15 = vadd.f32 %v11750_v29, %v14721_v32  ;;  %v4786_v16 = vadd.f32 %v11906_v36, %v14568_v4  ;;  %v3368_v21 = vpop.f32.mrb[111].mxu0  ;;  %v4780_v53 = vpop.f32.mrb[143].mxu1  ;;  %v10080_v14 = vpack.c.bf16 %v3389_v48, %v3389_v48  ;;  %v10168_v54 = vpack.c.bf16 %v4833_v45, %v4833_v45  ;;  %12649 = vmatpush3.bf16.msra.mxu1 %v14296_v3 }
 0x8dc   :  { %v3369_v44 = vadd.f32 %v3368_v21, %v14719_v47  ;;  %v4781_v42 = vadd.f32 %v4780_v53, %v14566_v8  ;;  %8977 = vst.msk [vmem:[%s17192_s20 + $0xb4] sm:$0xf] %vm2973_vm0, %v10081_v62  ;;  %9257 = vst.msk [vmem:[%s17192_s20 + $0x214] sm:$0xf] %vm2973_vm0, %v10169_v51  ;;  %v11757_v46 = vpop.f32.mrb[112].mxu0  ;;  %v11909_v31 = vpop.f32.mrb[144].mxu1  ;;  %12290 = vmatprep.mubr.msk.f32.mxu1 %vm1181_vm3, %v14794_v2 }
 0x8dd   :  { %v3392_v12 = vmax.f32 %v3374_v15, 0.0  ;;  %v4836_v23 = vmax.f32 %v4786_v16, 0.0  ;;  %8976 = vst.msk [vmem:[%s17192_s20 + $0xb0] sm:$0xf] %vm2973_vm0, %v10080_v14  ;;  %9256 = vst.msk [vmem:[%s17192_s20 + $0x210] sm:$0xf] %vm2973_vm0, %v10168_v54  ;;  %v3546_v49 = vadd.f32 %v11757_v46, %v14519_v24  ;;  %v4796_v7 = vadd.f32 %v11909_v31, %v14592_v13  ;;  %12107 = vmatmul.mubr.msk.f32.gmra.mrb[218].mxu0 %vm1181_vm3, %v14803_v55 }
 0x8de   :  { %v3391_v60 = vmax.f32 %v3369_v44, 0.0  ;;  %v4835_v40 = vmax.f32 %v4781_v42, 0.0  ;;  %v3540_v27 = vpop.f32.mrb[113].mxu0  ;;  %v4790_v59 = vpop.f32.mrb[145].mxu1  ;;  %12291 = vmatmul.mubr.msk.f32.gmra.mrb[250].mxu1 %vm1181_vm3, %v14812_v35  ;;  %12109 = vmatprep.mubr.msk.f32.mxu0 %vm1181_vm3, %v14827_v58 }
 0x8df   :  { %v10083_v10 = vpack.c.bf16 %v3392_v12, %v3392_v12  ;;  %v10171_v41 = vpack.c.bf16 %v4836_v23, %v4836_v23  ;;  %v3541_v1 = vadd.f32 %v3540_v27, %v14514_v5  ;;  %v4791_v48 = vadd.f32 %v4790_v59, %v14585_v39  ;;  %12293 = vmatprep.mubr.msk.f32.mxu1 %vm1181_vm3, %v14834_v26 }
 0x8e0   :  { %v10082_v19 = vpack.c.bf16 %v3391_v60, %v3391_v60  ;;  %v10170_v56 = vpack.c.bf16 %v4835_v40, %v4835_v40  ;;  %v3620_v3 = vmax.f32 %v3546_v49, 0.0  ;;  %v4838_v45 = vmax.f32 %v4796_v7, 0.0  ;;  %v11760_v62 = vpop.f32.mrb[114].mxu0  ;;  %v11912_v51 = vpop.f32.mrb[146].mxu1 }
 0x8e1   :  { %8979 = vst.msk [vmem:[%s17192_s20 + $0xbc] sm:$0xf] %vm2973_vm0, %v10083_v10  ;;  %9259 = vst.msk [vmem:[%s17192_s20 + $0x21c] sm:$0xf] %vm2973_vm0, %v10171_v41  ;;  %v3619_v29 = vmax.f32 %v3541_v1, 0.0  ;;  %v4837_v36 = vmax.f32 %v4791_v48, 0.0  ;;  %v3556_v21 = vadd.f32 %v11760_v62, %v14534_v9  ;;  %v4806_v53 = vadd.f32 %v11912_v51, %v14627_v50  ;;  %12110 = vmatmul.mubr.msk.f32.gmra.mrb[220].mxu0 %vm1181_vm3, %v14851_v30 }
 0x8e2   :  { %8978 = vst.msk [vmem:[%s17192_s20 + $0xb8] sm:$0xf] %vm2973_vm0, %v10082_v19  ;;  %9258 = vst.msk [vmem:[%s17192_s20 + $0x218] sm:$0xf] %vm2973_vm0, %v10170_v56  ;;  %v10085_v15 = vpack.c.bf16 %v3620_v3, %v3620_v3  ;;  %v10173_v16 = vpack.c.bf16 %v4838_v45, %v4838_v45  ;;  %v3550_v14 = vpop.f32.mrb[115].mxu0  ;;  %v4800_v54 = vpop.f32.mrb[147].mxu1  ;;  %12294 = vmatmul.mubr.msk.f32.gmra.mrb[252].mxu1 %vm1181_vm3, %v14860_v63  ;;  %12112 = vmatprep.mubr.msk.f32.mxu0 %vm1181_vm3, %v14875_v57 }
 0x8e3   :  { %v10084_v44 = vpack.c.bf16 %v3619_v29, %v3619_v29  ;;  %v10172_v42 = vpack.c.bf16 %v4837_v36, %v4837_v36  ;;  %v3551_v12 = vadd.f32 %v3550_v14, %v14532_v33  ;;  %v4801_v23 = vadd.f32 %v4800_v54, %v14621_v34  ;;  %12296 = vmatprep.mubr.msk.f32.mxu1 %vm1181_vm3, %v14692_v18  ;;  %v15368_v36 = vld [vmem:[%s17191_s17] sm:$0xff] }
 0x8e4   :  { %9013 = vst.msk [vmem:[%s17192_s20 + $0xc4] sm:$0xf] %vm2973_vm0, %v10085_v15  ;;  %9261 = vst.msk [vmem:[%s17192_s20 + $0x224] sm:$0xf] %vm2973_vm0, %v10173_v16  ;;  %v3622_v60 = vmax.f32 %v3556_v21, 0.0  ;;  %v4840_v40 = vmax.f32 %v4806_v53, 0.0 }
 0x8e5   :  { %9012 = vst.msk [vmem:[%s17192_s20 + $0xc0] sm:$0xf] %vm2973_vm0, %v10084_v44  ;;  %9260 = vst.msk [vmem:[%s17192_s20 + $0x220] sm:$0xf] %vm2973_vm0, %v10172_v42  ;;  %v3621_v46 = vmax.f32 %v3551_v12, 0.0  ;;  %v4839_v31 = vmax.f32 %v4801_v23, 0.0  ;;  %12113 = vmatmul.mubr.msk.f32.gmra.mrb[222].mxu0 %vm1181_vm3, %v14894_v61 }
 0x8e6   :  { %v11763_v10 = vpop.f32.mrb[116].mxu0  ;;  %v11915_v41 = vpop.f32.mrb[148].mxu1  ;;  %v10087_v49 = vpack.c.bf16 %v3622_v60, %v3622_v60  ;;  %v10175_v7 = vpack.c.bf16 %v4840_v40, %v4840_v40  ;;  %12297 = vmatmul.mubr.msk.f32.gmra.mrb[254].mxu1 %vm1181_vm3, %v14711_v28  ;;  %12147 = vmatprep.mubr.msk.f32.mxu0 %vm1181_vm3, %v15368_v36 }
 0x8e7   :  { %v3566_v27 = vadd.f32 %v11763_v10, %v14554_v11  ;;  %v4816_v59 = vadd.f32 %v11915_v41, %v14663_v6  ;;  %v3560_v19 = vpop.f32.mrb[117].mxu0  ;;  %v4810_v56 = vpop.f32.mrb[149].mxu1  ;;  %v10086_v1 = vpack.c.bf16 %v3621_v46, %v3621_v46  ;;  %v10174_v48 = vpack.c.bf16 %v4839_v31, %v4839_v31  ;;  %12299 = vmatprep.mubr.msk.f32.mxu1 %vm1181_vm3, %v14734_v43 }
 0x8e8   :  { %v3561_v3 = vadd.f32 %v3560_v19, %v14548_v38  ;;  %v4811_v45 = vadd.f32 %v4810_v56, %v14661_v52  ;;  %9015 = vst.msk [vmem:[%s17192_s20 + $0xcc] sm:$0xf] %vm2973_vm0, %v10087_v49  ;;  %9263 = vst.msk [vmem:[%s17192_s20 + $0x22c] sm:$0xf] %vm2973_vm0, %v10175_v7  ;;  %v11766_v51 = vpop.f32.mrb[118].mxu0  ;;  %v11918_v15 = vpop.f32.mrb[150].mxu1 }
 0x8e9   :  { %v3624_v18 = vmax.f32 %v3566_v27, 0.0  ;;  %v4842_v29 = vmax.f32 %v4816_v59, 0.0  ;;  %9014 = vst.msk [vmem:[%s17192_s20 + $0xc8] sm:$0xf] %vm2973_vm0, %v10086_v1  ;;  %9262 = vst.msk [vmem:[%s17192_s20 + $0x228] sm:$0xf] %vm2973_vm0, %v10174_v48  ;;  %v3576_v53 = vadd.f32 %v11766_v51, %v14568_v4  ;;  %v4826_v14 = vadd.f32 %v11918_v15, %v14721_v32  ;;  %12148 = vmatmul.mubr.msk.f32.vlgmr.msra.gmra.mrb[224].mxu0 %vm1181_vm3, %v14762_v17 }
 0x8ea   :  { %v3623_v62 = vmax.f32 %v3561_v3, 0.0  ;;  %v4841_v28 = vmax.f32 %v4811_v45, 0.0  ;;  %v3570_v54 = vpop.f32.mrb[119].mxu0  ;;  %v4820_v44 = vpop.f32.mrb[151].mxu1  ;;  %12629 = vmatpush3.bf16.msra.mxu0 %v14244_v22  ;;  %12300 = vmatmul.mubr.msk.f32.gmra.mrb[0].mxu1 %vm1181_vm3, %v14753_v0 }
 0x8eb   :  { %v10089_v16 = vpack.c.bf16 %v3624_v18, %v3624_v18  ;;  %v10177_v21 = vpack.c.bf16 %v4842_v29, %v4842_v29  ;;  %v3571_v23 = vadd.f32 %v3570_v54, %v14566_v8  ;;  %v4821_v60 = vadd.f32 %v4820_v44, %v14719_v47  ;;  %12635 = vmatprep.subr.bf16.mxu0 %v14264_v20 }
 0x8ec   :  { %v10088_v42 = vpack.c.bf16 %v3623_v62, %v3623_v62  ;;  %v10176_v12 = vpack.c.bf16 %v4841_v28, %v4841_v28  ;;  %v3626_v43 = vmax.f32 %v3576_v53, 0.0  ;;  %v4844_v40 = vmax.f32 %v4826_v14, 0.0  ;;  %v11769_v31 = vpop.f32.mrb[120].mxu0  ;;  %v11953_v10 = vpop.f32.mrb[152].mxu1  ;;  %12150 = vmatprep.mubr.msk.f32.mxu0 %vm1181_vm3, %v14794_v2  ;;  %12302 = vmatprep.mubr.msk.f32.mxu1 %vm1181_vm3, %v14778_v37  ;;  %v15459_v14 = vld [vmem:[%s17191_s17 + $0x30] sm:$0xff] }
 0x8ed   :  { %9017 = vst.msk [vmem:[%s17192_s20 + $0xd4] sm:$0xf] %vm2973_vm0, %v10089_v16  ;;  %9265 = vst.msk [vmem:[%s17192_s20 + $0x234] sm:$0xf] %vm2973_vm0, %v10177_v21  ;;  %v3625_v17 = vmax.f32 %v3571_v23, 0.0  ;;  %v4843_v46 = vmax.f32 %v4821_v60, 0.0  ;;  %v3586_v41 = vadd.f32 %v11769_v31, %v14592_v13  ;;  %v5240_v49 = vadd.f32 %v11953_v10, %v14519_v24  ;;  %12151 = vmatmul.mubr.msk.f32.gmra.mrb[226].mxu0 %vm1181_vm3, %v14812_v35 }
 0x8ee   :  { %9016 = vst.msk [vmem:[%s17192_s20 + $0xd0] sm:$0xf] %vm2973_vm0, %v10088_v42  ;;  %9264 = vst.msk [vmem:[%s17192_s20 + $0x230] sm:$0xf] %vm2973_vm0, %v10176_v12  ;;  %v10091_v22 = vpack.c.bf16 %v3626_v43, %v3626_v43  ;;  %v10179_v0 = vpack.c.bf16 %v4844_v40, %v4844_v40  ;;  %v3580_v7 = vpop.f32.mrb[121].mxu0  ;;  %v5234_v27 = vpop.f32.mrb[153].mxu1  ;;  %12303 = vmatmul.mubr.msk.f32.gmra.mrb[2].mxu1 %vm1181_vm3, %v14803_v55  ;;  %12153 = vmatprep.mubr.msk.f32.mxu0 %vm1181_vm3, %v14834_v26 }
 0x8ef   :  { %v10090_v59 = vpack.c.bf16 %v3625_v17, %v3625_v17  ;;  %v10178_v19 = vpack.c.bf16 %v4843_v46, %v4843_v46  ;;  %v3581_v56 = vadd.f32 %v3580_v7, %v14585_v39  ;;  %v5235_v1 = vadd.f32 %v5234_v27, %v14514_v5  ;;  %12305 = vmatprep.mubr.msk.f32.mxu1 %vm1181_vm3, %v14827_v58 }
 0x8f0   :  { %9019 = vst.msk [vmem:[%s17192_s20 + $0xdc] sm:$0xf] %vm2973_vm0, %v10091_v22  ;;  %9267 = vst.msk [vmem:[%s17192_s20 + $0x23c] sm:$0xf] %vm2973_vm0, %v10179_v0  ;;  %v3628_v37 = vmax.f32 %v3586_v41, 0.0  ;;  %v5314_v2 = vmax.f32 %v5240_v49, 0.0 }
 0x8f1   :  { %9018 = vst.msk [vmem:[%s17192_s20 + $0xd8] sm:$0xf] %vm2973_vm0, %v10090_v59  ;;  %9266 = vst.msk [vmem:[%s17192_s20 + $0x238] sm:$0xf] %vm2973_vm0, %v10178_v19  ;;  %v3627_v35 = vmax.f32 %v3581_v56, 0.0  ;;  %v5313_v48 = vmax.f32 %v5235_v1, 0.0  ;;  %12154 = vmatmul.mubr.msk.f32.gmra.mrb[228].mxu0 %vm1181_vm3, %v14860_v63 }
 0x8f2   :  { %v11772_v3 = vpop.f32.mrb[122].mxu0  ;;  %v11956_v45 = vpop.f32.mrb[154].mxu1  ;;  %v10093_v55 = vpack.c.bf16 %v3628_v37, %v3628_v37  ;;  %v10197_v18 = vpack.c.bf16 %v5314_v2, %v5314_v2  ;;  %12306 = vmatmul.mubr.msk.f32.gmra.mrb[4].mxu1 %vm1181_vm3, %v14851_v30  ;;  %12156 = vmatprep.mubr.msk.f32.mxu0 %vm1181_vm3, %v15459_v14  ;;  %v15480_v22 = vld [vmem:[%s17191_s17 + $0x38] sm:$0xff]  ;;  %v15497_v41 = vld [vmem:[%s17191_s17 + $0x40] sm:$0xff] }
 0x8f3   :  { %v3596_v26 = vadd.f32 %v11772_v3, %v14627_v50  ;;  %v5250_v29 = vadd.f32 %v11956_v45, %v14534_v9  ;;  %v3590_v62 = vpop.f32.mrb[123].mxu0  ;;  %v5244_v28 = vpop.f32.mrb[155].mxu1  ;;  %v10092_v51 = vpack.c.bf16 %v3627_v35, %v3627_v35  ;;  %v10196_v15 = vpack.c.bf16 %v5313_v48, %v5313_v48  ;;  %12308 = vmatprep.mubr.msk.f32.mxu1 %vm1181_vm3, %v14875_v57 }
 0x8f4   :  { %v3591_v16 = vadd.f32 %v3590_v62, %v14621_v34  ;;  %v5245_v21 = vadd.f32 %v5244_v28, %v14532_v33  ;;  %9021 = vst.msk [vmem:[%s17192_s20 + $0xe4] sm:$0xf] %vm2973_vm0, %v10093_v55  ;;  %9349 = vst.msk [vmem:[%s17192_s20 + $0x284] sm:$0xf] %vm2973_vm0, %v10197_v18  ;;  %v11775_v54 = vpop.f32.mrb[124].mxu0  ;;  %v11959_v44 = vpop.f32.mrb[156].mxu1 }
 0x8f5   :  { %v3630_v58 = vmax.f32 %v3596_v26, 0.0  ;;  %v5316_v53 = vmax.f32 %v5250_v29, 0.0  ;;  %9020 = vst.msk [vmem:[%s17192_s20 + $0xe0] sm:$0xf] %vm2973_vm0, %v10092_v51  ;;  %9348 = vst.msk [vmem:[%s17192_s20 + $0x280] sm:$0xf] %vm2973_vm0, %v10196_v15  ;;  %v3606_v23 = vadd.f32 %v11775_v54, %v14663_v6  ;;  %v5260_v60 = vadd.f32 %v11959_v44, %v14554_v11  ;;  %12157 = vmatmul.mubr.msk.f32.gmra.mrb[230].mxu0 %vm1181_vm3, %v15480_v22 }
 0x8f6   :  { %v3629_v63 = vmax.f32 %v3591_v16, 0.0  ;;  %v5315_v30 = vmax.f32 %v5245_v21, 0.0  ;;  %v3600_v43 = vpop.f32.mrb[125].mxu0  ;;  %v5254_v40 = vpop.f32.mrb[157].mxu1  ;;  %12309 = vmatmul.mubr.msk.f32.gmra.mrb[6].mxu1 %vm1181_vm3, %v14894_v61  ;;  %12159 = vmatprep.mubr.msk.f32.mxu0 %vm1181_vm3, %v15497_v41  ;;  %v15518_v55 = vld [vmem:[%s17191_s17 + $0x48] sm:$0xff]  ;;  %v15540_v62 = vld [vmem:[%s17191_s17 + $0x50] sm:$0xff] }
 0x8f7   :  { %v10095_v42 = vpack.c.bf16 %v3630_v58, %v3630_v58  ;;  %v10199_v12 = vpack.c.bf16 %v5316_v53, %v5316_v53  ;;  %v3601_v31 = vadd.f32 %v3600_v43, %v14661_v52  ;;  %v5255_v10 = vadd.f32 %v5254_v40, %v14548_v38  ;;  %12343 = vmatprep.mubr.msk.f32.mxu1 %vm1181_vm3, %v15368_v36  ;;  %v15533_v29 = vld [vmem:[%s17191_s17 + $0x8] sm:$0xff]  ;;  %v15555_v21 = vld [vmem:[%s17191_s17 + $0x10] sm:$0xff]  ;;  %v15566_v43 = vld [vmem:[%s17191_s17 + $0x58] sm:$0xff] }
 0x8f8   :  { %v10094_v17 = vpack.c.bf16 %v3629_v63, %v3629_v63  ;;  %v10198_v46 = vpack.c.bf16 %v5315_v30, %v5315_v30  ;;  %v3632_v57 = vmax.f32 %v3606_v23, 0.0  ;;  %v5318_v0 = vmax.f32 %v5260_v60, 0.0  ;;  %v11778_v7 = vpop.f32.mrb[126].mxu0  ;;  %v11962_v27 = vpop.f32.mrb[158].mxu1 }
 0x8f9   :  { %9023 = vst.msk [vmem:[%s17192_s20 + $0xec] sm:$0xf] %vm2973_vm0, %v10095_v42  ;;  %9351 = vst.msk [vmem:[%s17192_s20 + $0x28c] sm:$0xf] %vm2973_vm0, %v10199_v12  ;;  %v3631_v49 = vmax.f32 %v3601_v31, 0.0  ;;  %v5317_v61 = vmax.f32 %v5255_v10, 0.0  ;;  %v3616_v56 = vadd.f32 %v11778_v7, %v14721_v32  ;;  %v5270_v1 = vadd.f32 %v11962_v27, %v14568_v4  ;;  %12160 = vmatmul.mubr.msk.f32.gmra.mrb[232].mxu0 %vm1181_vm3, %v15518_v55 }
 0x8fa   :  { %9022 = vst.msk [vmem:[%s17192_s20 + $0xe8] sm:$0xf] %vm2973_vm0, %v10094_v17  ;;  %9350 = vst.msk [vmem:[%s17192_s20 + $0x288] sm:$0xf] %vm2973_vm0, %v10198_v46  ;;  %v10097_v59 = vpack.c.bf16 %v3632_v57, %v3632_v57  ;;  %v10201_v19 = vpack.c.bf16 %v5318_v0, %v5318_v0  ;;  %v3610_v37 = vpop.f32.mrb[127].mxu0  ;;  %v5264_v2 = vpop.f32.mrb[159].mxu1  ;;  %12344 = vmatmul.mubr.msk.f32.vlgmr.msra.gmra.mrb[8].mxu1 %vm1181_vm3, %v15533_v29  ;;  %12162 = vmatprep.mubr.msk.f32.mxu0 %vm1181_vm3, %v15540_v62 }
 0x8fb   :  { %v10096_v35 = vpack.c.bf16 %v3631_v49, %v3631_v49  ;;  %v10200_v48 = vpack.c.bf16 %v5317_v61, %v5317_v61  ;;  %v3611_v3 = vadd.f32 %v3610_v37, %v14719_v47  ;;  %v5265_v45 = vadd.f32 %v5264_v2, %v14566_v8  ;;  %12346 = vmatprep.mubr.msk.f32.mxu1 %vm1181_vm3, %v15555_v21  ;;  %v15581_v46 = vld [vmem:[%s17191_s17 + $0x18] sm:$0xff]  ;;  %v15588_v31 = vld [vmem:[%s17191_s17 + $0x60] sm:$0xff] }
 0x8fc   :  { %9025 = vst.msk [vmem:[%s17192_s20 + $0xf4] sm:$0xf] %vm2973_vm0, %v10097_v59  ;;  %9353 = vst.msk [vmem:[%s17192_s20 + $0x294] sm:$0xf] %vm2973_vm0, %v10201_v19  ;;  %v3634_v18 = vmax.f32 %v3616_v56, 0.0  ;;  %v5320_v26 = vmax.f32 %v5270_v1, 0.0 }
 0x8fd   :  { %9024 = vst.msk [vmem:[%s17192_s20 + $0xf0] sm:$0xf] %vm2973_vm0, %v10096_v35  ;;  %9352 = vst.msk [vmem:[%s17192_s20 + $0x290] sm:$0xf] %vm2973_vm0, %v10200_v48  ;;  %v3633_v28 = vmax.f32 %v3611_v3, 0.0  ;;  %v5319_v51 = vmax.f32 %v5265_v45, 0.0  ;;  %12163 = vmatmul.mubr.msk.f32.gmra.mrb[234].mxu0 %vm1181_vm3, %v15566_v43 }
 0x8fe   :  { %v11813_v15 = vpop.f32.mrb[128].mxu0  ;;  %v11965_v16 = vpop.f32.mrb[160].mxu1  ;;  %v10099_v58 = vpack.c.bf16 %v3634_v18, %v3634_v18  ;;  %v10203_v53 = vpack.c.bf16 %v5320_v26, %v5320_v26  ;;  %12347 = vmatmul.mubr.msk.f32.gmra.mrb[10].mxu1 %vm1181_vm3, %v15581_v46  ;;  %12165 = vmatprep.mubr.msk.f32.mxu0 %vm1181_vm3, %v15588_v31  ;;  %v15603_v61 = vld [vmem:[%s17191_s17 + $0x20] sm:$0xff]  ;;  %v15614_v3 = vld [vmem:[%s17191_s17 + $0x68] sm:$0xff] }
 0x8ff   :  { %v4030_v63 = vadd.f32 %v11813_v15, %v14519_v24  ;;  %v5280_v30 = vadd.f32 %v11965_v16, %v14592_v13  ;;  %v4024_v54 = vpop.f32.mrb[129].mxu0  ;;  %v5274_v44 = vpop.f32.mrb[161].mxu1  ;;  %v10098_v42 = vpack.c.bf16 %v3633_v28, %v3633_v28  ;;  %v10202_v12 = vpack.c.bf16 %v5319_v51, %v5319_v51  ;;  %12349 = vmatprep.mubr.msk.f32.mxu1 %vm1181_vm3, %v15603_v61  ;;  %v15629_v26 = vld [vmem:[%s17191_s17 + $0x28] sm:$0xff]  ;;  %v15636_v28 = vld [vmem:[%s17191_s17 + $0x70] sm:$0xff] }
 0x900   :  { %v4025_v23 = vadd.f32 %v4024_v54, %v14514_v5  ;;  %v5275_v60 = vadd.f32 %v5274_v44, %v14585_v39  ;;  %9027 = vst.msk [vmem:[%s17192_s20 + $0xfc] sm:$0xf] %vm2973_vm0, %v10099_v58  ;;  %9355 = vst.msk [vmem:[%s17192_s20 + $0x29c] sm:$0xf] %vm2973_vm0, %v10203_v53  ;;  %v11816_v0 = vpop.f32.mrb[130].mxu0  ;;  %v11968_v49 = vpop.f32.mrb[162].mxu1 }
 0x901   :  { %v4104_v40 = vmax.f32 %v4030_v63, 0.0  ;;  %v5322_v17 = vmax.f32 %v5280_v30, 0.0  ;;  %9026 = vst.msk [vmem:[%s17192_s20 + $0xf8] sm:$0xf] %vm2973_vm0, %v10098_v42  ;;  %9354 = vst.msk [vmem:[%s17192_s20 + $0x298] sm:$0xf] %vm2973_vm0, %v10202_v12  ;;  %v4040_v59 = vadd.f32 %v11816_v0, %v14534_v9  ;;  %v5290_v19 = vadd.f32 %v11968_v49, %v14627_v50  ;;  %12166 = vmatmul.mubr.msk.f32.gmra.mrb[236].mxu0 %vm1181_vm3, %v15614_v3 }
 0x902   :  { %v4103_v10 = vmax.f32 %v4025_v23, 0.0  ;;  %v5321_v57 = vmax.f32 %v5275_v60, 0.0  ;;  %v4034_v56 = vpop.f32.mrb[131].mxu0  ;;  %v5284_v1 = vpop.f32.mrb[163].mxu1  ;;  %12350 = vmatmul.mubr.msk.f32.gmra.mrb[12].mxu1 %vm1181_vm3, %v15629_v26  ;;  %12168 = vmatprep.mubr.msk.f32.mxu0 %vm1181_vm3, %v15636_v28 }
 0x903   :  { %v10117_v7 = vpack.c.bf16 %v4104_v40, %v4104_v40  ;;  %v10205_v27 = vpack.c.bf16 %v5322_v17, %v5322_v17  ;;  %v4035_v35 = vadd.f32 %v4034_v56, %v14532_v33  ;;  %v5285_v48 = vadd.f32 %v5284_v1, %v14621_v34  ;;  %12352 = vmatprep.mubr.msk.f32.mxu1 %vm1181_vm3, %v15459_v14  ;;  %v15657_v17 = vld [vmem:[%s17191_s17 + $0x78] sm:$0xff] }
 0x904   :  { %v10116_v37 = vpack.c.bf16 %v4103_v10, %v4103_v10  ;;  %v10204_v2 = vpack.c.bf16 %v5321_v57, %v5321_v57  ;;  %v4106_v45 = vmax.f32 %v4040_v59, 0.0  ;;  %v5324_v18 = vmax.f32 %v5290_v19, 0.0  ;;  %v11819_v16 = vpop.f32.mrb[132].mxu0  ;;  %v11971_v58 = vpop.f32.mrb[164].mxu1 }
 0x905   :  { %9109 = vst.msk [vmem:[%s17192_s20 + $0x144] sm:$0xf] %vm2973_vm0, %v10117_v7  ;;  %9357 = vst.msk [vmem:[%s17192_s20 + $0x2a4] sm:$0xf] %vm2973_vm0, %v10205_v27  ;;  %v4105_v51 = vmax.f32 %v4035_v35, 0.0  ;;  %v5323_v15 = vmax.f32 %v5285_v48, 0.0  ;;  %v4050_v30 = vadd.f32 %v11819_v16, %v14554_v11  ;;  %v5300_v54 = vadd.f32 %v11971_v58, %v14663_v6  ;;  %12169 = vmatmul.mubr.msk.f32.gmra.mrb[238].mxu0 %vm1181_vm3, %v15657_v17 }
 0x906   :  { %9108 = vst.msk [vmem:[%s17192_s20 + $0x140] sm:$0xf] %vm2973_vm0, %v10116_v37  ;;  %9356 = vst.msk [vmem:[%s17192_s20 + $0x2a0] sm:$0xf] %vm2973_vm0, %v10204_v2  ;;  %v10119_v53 = vpack.c.bf16 %v4106_v45, %v4106_v45  ;;  %v10207_v63 = vpack.c.bf16 %v5324_v18, %v5324_v18  ;;  %v4044_v44 = vpop.f32.mrb[133].mxu0  ;;  %v5294_v42 = vpop.f32.mrb[165].mxu1  ;;  %12353 = vmatmul.mubr.msk.f32.gmra.mrb[14].mxu1 %vm1181_vm3, %v15480_v22  ;;  %12203 = vmatprep.mubr.msk.f32.mxu0 %vm1181_vm3, %v15368_v36 }
 0x907   :  { %v10118_v12 = vpack.c.bf16 %v4105_v51, %v4105_v51  ;;  %v10206_v23 = vpack.c.bf16 %v5323_v15, %v5323_v15  ;;  %v4045_v60 = vadd.f32 %v4044_v44, %v14548_v38  ;;  %v5295_v40 = vadd.f32 %v5294_v42, %v14661_v52  ;;  %12355 = vmatprep.mubr.msk.f32.mxu1 %vm1181_vm3, %v15497_v41 }
 0x908   :  { %9111 = vst.msk [vmem:[%s17192_s20 + $0x14c] sm:$0xf] %vm2973_vm0, %v10119_v53  ;;  %9359 = vst.msk [vmem:[%s17192_s20 + $0x2ac] sm:$0xf] %vm2973_vm0, %v10207_v63  ;;  %v4108_v10 = vmax.f32 %v4050_v30, 0.0  ;;  %v5326_v57 = vmax.f32 %v5300_v54, 0.0 }
 0x909   :  { %9110 = vst.msk [vmem:[%s17192_s20 + $0x148] sm:$0xf] %vm2973_vm0, %v10118_v12  ;;  %9358 = vst.msk [vmem:[%s17192_s20 + $0x2a8] sm:$0xf] %vm2973_vm0, %v10206_v23  ;;  %v4107_v0 = vmax.f32 %v4045_v60, 0.0  ;;  %v5325_v49 = vmax.f32 %v5295_v40, 0.0  ;;  %12204 = vmatmul.mubr.msk.f32.vlgmr.msra.gmra.mrb[240].mxu0 %vm1181_vm3, %v15533_v29 }
 0x90a   :  { %v11822_v7 = vpop.f32.mrb[134].mxu0  ;;  %v11974_v27 = vpop.f32.mrb[166].mxu1  ;;  %v10121_v59 = vpack.c.bf16 %v4108_v10, %v4108_v10  ;;  %v10209_v19 = vpack.c.bf16 %v5326_v57, %v5326_v57  ;;  %12637 = vmatpush3.bf16.msra.mxu0 %v14264_v20  ;;  %12356 = vmatmul.mubr.msk.f32.gmra.mrb[16].mxu1 %vm1181_vm3, %v15518_v55 }
 0x90b   :  { %v4060_v56 = vadd.f32 %v11822_v7, %v14568_v4  ;;  %v5310_v1 = vadd.f32 %v11974_v27, %v14721_v32  ;;  %v4054_v37 = vpop.f32.mrb[135].mxu0  ;;  %v5304_v2 = vpop.f32.mrb[167].mxu1  ;;  %v10120_v35 = vpack.c.bf16 %v4107_v0, %v4107_v0  ;;  %v10208_v48 = vpack.c.bf16 %v5325_v49, %v5325_v49  ;;  %12643 = vmatprep.subr.bf16.mxu0 %v14286_v25 }
 0x90c   :  { %v4055_v45 = vadd.f32 %v4054_v37, %v14566_v8  ;;  %v5305_v18 = vadd.f32 %v5304_v2, %v14719_v47  ;;  %9113 = vst.msk [vmem:[%s17192_s20 + $0x154] sm:$0xf] %vm2973_vm0, %v10121_v59  ;;  %9361 = vst.msk [vmem:[%s17192_s20 + $0x2b4] sm:$0xf] %vm2973_vm0, %v10209_v19  ;;  %v11825_v53 = vpop.f32.mrb[136].mxu0  ;;  %v12009_v63 = vpop.f32.mrb[168].mxu1  ;;  %12206 = vmatprep.mubr.msk.f32.mxu0 %vm1181_vm3, %v15555_v21  ;;  %12358 = vmatprep.mubr.msk.f32.mxu1 %vm1181_vm3, %v15540_v62 }
 0x90d   :  { %v4110_v51 = vmax.f32 %v4060_v56, 0.0  ;;  %v5328_v15 = vmax.f32 %v5310_v1, 0.0  ;;  %9112 = vst.msk [vmem:[%s17192_s20 + $0x150] sm:$0xf] %vm2973_vm0, %v10120_v35  ;;  %9360 = vst.msk [vmem:[%s17192_s20 + $0x2b0] sm:$0xf] %vm2973_vm0, %v10208_v48  ;;  %v4070_v54 = vadd.f32 %v11825_v53, %v14592_v13  ;;  %v5724_v44 = vadd.f32 %v12009_v63, %v14519_v24  ;;  %12207 = vmatmul.mubr.msk.f32.gmra.mrb[242].mxu0 %vm1181_vm3, %v15581_v46 }
 0x90e   :  { %v4109_v16 = vmax.f32 %v4055_v45, 0.0  ;;  %v5327_v58 = vmax.f32 %v5305_v18, 0.0  ;;  %v4064_v42 = vpop.f32.mrb[137].mxu0  ;;  %v5718_v12 = vpop.f32.mrb[169].mxu1  ;;  %12359 = vmatmul.mubr.msk.f32.gmra.mrb[18].mxu1 %vm1181_vm3, %v15566_v43  ;;  %12209 = vmatprep.mubr.msk.f32.mxu0 %vm1181_vm3, %v15603_v61 }
 0x90f   :  { %v10123_v20 = vpack.c.bf16 %v4110_v51, %v4110_v51  ;;  %v10211_v30 = vpack.c.bf16 %v5328_v15, %v5328_v15  ;;  %v4065_v40 = vadd.f32 %v4064_v42, %v14585_v39  ;;  %v5719_v10 = vadd.f32 %v5718_v12, %v14514_v5  ;;  %12361 = vmatprep.mubr.msk.f32.mxu1 %vm1181_vm3, %v15588_v31 }
 0x910   :  { %v10122_v23 = vpack.c.bf16 %v4109_v16, %v4109_v16  ;;  %v10210_v60 = vpack.c.bf16 %v5327_v58, %v5327_v58  ;;  %v4112_v57 = vmax.f32 %v4070_v54, 0.0  ;;  %v5798_v0 = vmax.f32 %v5724_v44, 0.0  ;;  %v11828_v27 = vpop.f32.mrb[138].mxu0  ;;  %v12012_v59 = vpop.f32.mrb[170].mxu1 }
 0x911   :  { %9115 = vst.msk [vmem:[%s17192_s20 + $0x15c] sm:$0xf] %vm2973_vm0, %v10123_v20  ;;  %9363 = vst.msk [vmem:[%s17192_s20 + $0x2bc] sm:$0xf] %vm2973_vm0, %v10211_v30  ;;  %v4111_v49 = vmax.f32 %v4065_v40, 0.0  ;;  %v5797_v7 = vmax.f32 %v5719_v10, 0.0  ;;  %v4080_v1 = vadd.f32 %v11828_v27, %v14627_v50  ;;  %v5734_v37 = vadd.f32 %v12012_v59, %v14534_v9  ;;  %12210 = vmatmul.mubr.msk.f32.gmra.mrb[244].mxu0 %vm1181_vm3, %v15629_v26 }
 0x912   :  { %9114 = vst.msk [vmem:[%s17192_s20 + $0x158] sm:$0xf] %vm2973_vm0, %v10122_v23  ;;  %9362 = vst.msk [vmem:[%s17192_s20 + $0x2b8] sm:$0xf] %vm2973_vm0, %v10210_v60  ;;  %v10125_v19 = vpack.c.bf16 %v4112_v57, %v4112_v57  ;;  %v10229_v56 = vpack.c.bf16 %v5798_v0, %v5798_v0  ;;  %v4074_v2 = vpop.f32.mrb[139].mxu0  ;;  %v5728_v35 = vpop.f32.mrb[171].mxu1  ;;  %12362 = vmatmul.mubr.msk.f32.gmra.mrb[20].mxu1 %vm1181_vm3, %v15614_v3  ;;  %12212 = vmatprep.mubr.msk.f32.mxu0 %vm1181_vm3, %v15459_v14 }
 0x913   :  { %v10124_v48 = vpack.c.bf16 %v4111_v49, %v4111_v49  ;;  %v10228_v45 = vpack.c.bf16 %v5797_v7, %v5797_v7  ;;  %v4075_v18 = vadd.f32 %v4074_v2, %v14621_v34  ;;  %v5729_v51 = vadd.f32 %v5728_v35, %v14532_v33  ;;  %12364 = vmatprep.mubr.msk.f32.mxu1 %vm1181_vm3, %v15636_v28 }
 0x914   :  { %9117 = vst.msk [vmem:[%s17192_s20 + $0x164] sm:$0xf] %vm2973_vm0, %v10125_v19  ;;  %9445 = vst.msk [vmem:[%s17192_s20 + $0x304] sm:$0xf] %vm2973_vm0, %v10229_v56  ;;  %v4114_v15 = vmax.f32 %v4080_v1, 0.0  ;;  %v5800_v16 = vmax.f32 %v5734_v37, 0.0 }
 0x915   :  { %9116 = vst.msk [vmem:[%s17192_s20 + $0x160] sm:$0xf] %vm2973_vm0, %v10124_v48  ;;  %9444 = vst.msk [vmem:[%s17192_s20 + $0x300] sm:$0xf] %vm2973_vm0, %v10228_v45  ;;  %v4113_v58 = vmax.f32 %v4075_v18, 0.0  ;;  %v5799_v53 = vmax.f32 %v5729_v51, 0.0  ;;  %12213 = vmatmul.mubr.msk.f32.gmra.mrb[246].mxu0 %vm1181_vm3, %v15480_v22 }
 0x916   :  { %v11831_v63 = vpop.f32.mrb[140].mxu0  ;;  %v12015_v20 = vpop.f32.mrb[172].mxu1  ;;  %v10127_v30 = vpack.c.bf16 %v4114_v15, %v4114_v15  ;;  %v10231_v54 = vpack.c.bf16 %v5800_v16, %v5800_v16  ;;  %12365 = vmatmul.mubr.msk.f32.gmra.mrb[22].mxu1 %vm1181_vm3, %v15657_v17  ;;  %12215 = vmatprep.mubr.msk.f32.mxu0 %vm1181_vm3, %v15497_v41 }
 0x917   :  { %v4090_v44 = vadd.f32 %v11831_v63, %v14663_v6  ;;  %v5744_v42 = vadd.f32 %v12015_v20, %v14554_v11  ;;  %v4084_v12 = vpop.f32.mrb[141].mxu0  ;;  %v5738_v23 = vpop.f32.mrb[173].mxu1  ;;  %v10126_v60 = vpack.c.bf16 %v4113_v58, %v4113_v58  ;;  %v10230_v40 = vpack.c.bf16 %v5799_v53, %v5799_v53 }
 0x918   :  { %v4085_v10 = vadd.f32 %v4084_v12, %v14661_v52  ;;  %v5739_v57 = vadd.f32 %v5738_v23, %v14548_v38  ;;  %9119 = vst.msk [vmem:[%s17192_s20 + $0x16c] sm:$0xf] %vm2973_vm0, %v10127_v30  ;;  %9447 = vst.msk [vmem:[%s17192_s20 + $0x30c] sm:$0xf] %vm2973_vm0, %v10231_v54  ;;  %v11834_v59 = vpop.f32.mrb[142].mxu0  ;;  %v12018_v19 = vpop.f32.mrb[174].mxu1 }
 0x919   :  { %v4116_v0 = vmax.f32 %v4090_v44, 0.0  ;;  %v5802_v49 = vmax.f32 %v5744_v42, 0.0  ;;  %9118 = vst.msk [vmem:[%s17192_s20 + $0x168] sm:$0xf] %vm2973_vm0, %v10126_v60  ;;  %9446 = vst.msk [vmem:[%s17192_s20 + $0x308] sm:$0xf] %vm2973_vm0, %v10230_v40  ;;  %v4100_v37 = vadd.f32 %v11834_v59, %v14721_v32  ;;  %v5754_v2 = vadd.f32 %v12018_v19, %v14568_v4  ;;  %12216 = vmatmul.mubr.msk.f32.gmra.mrb[248].mxu0 %vm1181_vm3, %v15518_v55 }
 0x91a   :  { %v4115_v7 = vmax.f32 %v4085_v10, 0.0  ;;  %v5801_v27 = vmax.f32 %v5739_v57, 0.0  ;;  %v4094_v35 = vpop.f32.mrb[143].mxu0  ;;  %v5748_v48 = vpop.f32.mrb[175].mxu1  ;;  %12218 = vmatprep.mubr.msk.f32.mxu0 %vm1181_vm3, %v15540_v62 }
 0x91b   :  { %v10129_v56 = vpack.c.bf16 %v4116_v0, %v4116_v0  ;;  %v10233_v1 = vpack.c.bf16 %v5802_v49, %v5802_v49  ;;  %v4095_v51 = vadd.f32 %v4094_v35, %v14719_v47  ;;  %v5749_v15 = vadd.f32 %v5748_v48, %v14566_v8 }
 0x91c   :  { %v10128_v45 = vpack.c.bf16 %v4115_v7, %v4115_v7  ;;  %v10232_v18 = vpack.c.bf16 %v5801_v27, %v5801_v27  ;;  %v4118_v16 = vmax.f32 %v4100_v37, 0.0  ;;  %v5804_v58 = vmax.f32 %v5754_v2, 0.0  ;;  %v11869_v20 = vpop.f32.mrb[144].mxu0  ;;  %v12021_v30 = vpop.f32.mrb[176].mxu1 }
 0x91d   :  { %9121 = vst.msk [vmem:[%s17192_s20 + $0x174] sm:$0xf] %vm2973_vm0, %v10129_v56  ;;  %9449 = vst.msk [vmem:[%s17192_s20 + $0x314] sm:$0xf] %vm2973_vm0, %v10233_v1  ;;  %v4117_v53 = vmax.f32 %v4095_v51, 0.0  ;;  %v5803_v63 = vmax.f32 %v5749_v15, 0.0  ;;  %v4514_v42 = vadd.f32 %v11869_v20, %v14519_v24  ;;  %v5764_v12 = vadd.f32 %v12021_v30, %v14592_v13  ;;  %12219 = vmatmul.mubr.msk.f32.gmra.mrb[250].mxu0 %vm1181_vm3, %v15566_v43 }
 0x91e   :  { %9120 = vst.msk [vmem:[%s17192_s20 + $0x170] sm:$0xf] %vm2973_vm0, %v10128_v45  ;;  %9448 = vst.msk [vmem:[%s17192_s20 + $0x310] sm:$0xf] %vm2973_vm0, %v10232_v18  ;;  %v10131_v54 = vpack.c.bf16 %v4118_v16, %v4118_v16  ;;  %v10235_v44 = vpack.c.bf16 %v5804_v58, %v5804_v58  ;;  %v4508_v23 = vpop.f32.mrb[145].mxu0  ;;  %v5758_v60 = vpop.f32.mrb[177].mxu1  ;;  %12221 = vmatprep.mubr.msk.f32.mxu0 %vm1181_vm3, %v15588_v31 }
 0x91f   :  { %v10130_v40 = vpack.c.bf16 %v4117_v53, %v4117_v53  ;;  %v10234_v10 = vpack.c.bf16 %v5803_v63, %v5803_v63  ;;  %v4509_v57 = vadd.f32 %v4508_v23, %v14514_v5  ;;  %v5759_v0 = vadd.f32 %v5758_v60, %v14585_v39 }
 0x920   :  { %9123 = vst.msk [vmem:[%s17192_s20 + $0x17c] sm:$0xf] %vm2973_vm0, %v10131_v54  ;;  %9451 = vst.msk [vmem:[%s17192_s20 + $0x31c] sm:$0xf] %vm2973_vm0, %v10235_v44  ;;  %v4588_v49 = vmax.f32 %v4514_v42, 0.0  ;;  %v5806_v7 = vmax.f32 %v5764_v12, 0.0 }
 0x921   :  { %9122 = vst.msk [vmem:[%s17192_s20 + $0x178] sm:$0xf] %vm2973_vm0, %v10130_v40  ;;  %9450 = vst.msk [vmem:[%s17192_s20 + $0x318] sm:$0xf] %vm2973_vm0, %v10234_v10  ;;  %v4587_v27 = vmax.f32 %v4509_v57, 0.0  ;;  %v5805_v59 = vmax.f32 %v5759_v0, 0.0  ;;  %12222 = vmatmul.mubr.msk.f32.gmra.mrb[252].mxu0 %vm1181_vm3, %v15614_v3 }
 0x922   :  { %v11872_v19 = vpop.f32.mrb[146].mxu0  ;;  %v12024_v56 = vpop.f32.mrb[178].mxu1  ;;  %v10149_v1 = vpack.c.bf16 %v4588_v49, %v4588_v49  ;;  %v10237_v37 = vpack.c.bf16 %v5806_v7, %v5806_v7  ;;  %12224 = vmatprep.mubr.msk.f32.mxu0 %vm1181_vm3, %v15636_v28 }
 0x923   :  { %v4524_v2 = vadd.f32 %v11872_v19, %v14534_v9  ;;  %v5774_v35 = vadd.f32 %v12024_v56, %v14627_v50  ;;  %v4518_v48 = vpop.f32.mrb[147].mxu0  ;;  %v5768_v45 = vpop.f32.mrb[179].mxu1  ;;  %v10148_v18 = vpack.c.bf16 %v4587_v27, %v4587_v27  ;;  %v10236_v51 = vpack.c.bf16 %v5805_v59, %v5805_v59 }
 0x924   :  { %v4519_v15 = vadd.f32 %v4518_v48, %v14532_v33  ;;  %v5769_v16 = vadd.f32 %v5768_v45, %v14621_v34  ;;  %9205 = vst.msk [vmem:[%s17192_s20 + $0x1c4] sm:$0xf] %vm2973_vm0, %v10149_v1  ;;  %9453 = vst.msk [vmem:[%s17192_s20 + $0x324] sm:$0xf] %vm2973_vm0, %v10237_v37  ;;  %v11875_v30 = vpop.f32.mrb[148].mxu0  ;;  %v12027_v54 = vpop.f32.mrb[180].mxu1 }
 0x925   :  { %v4590_v58 = vmax.f32 %v4524_v2, 0.0  ;;  %v5808_v53 = vmax.f32 %v5774_v35, 0.0  ;;  %9204 = vst.msk [vmem:[%s17192_s20 + $0x1c0] sm:$0xf] %vm2973_vm0, %v10148_v18  ;;  %9452 = vst.msk [vmem:[%s17192_s20 + $0x320] sm:$0xf] %vm2973_vm0, %v10236_v51  ;;  %v4534_v12 = vadd.f32 %v11875_v30, %v14554_v11  ;;  %v5784_v23 = vadd.f32 %v12027_v54, %v14663_v6  ;;  %12225 = vmatmul.mubr.msk.f32.gmra.mrb[254].mxu0 %vm1181_vm3, %v15657_v17 }
 0x926   :  { %v4589_v63 = vmax.f32 %v4519_v15, 0.0  ;;  %v5807_v20 = vmax.f32 %v5769_v16, 0.0  ;;  %v4528_v60 = vpop.f32.mrb[149].mxu0  ;;  %v5778_v40 = vpop.f32.mrb[181].mxu1  ;;  %12259 = vmatprep.mubr.msk.f32.mxu0 %vm1181_vm3, %v15368_v36 }
 0x927   :  { %v10151_v44 = vpack.c.bf16 %v4590_v58, %v4590_v58  ;;  %v10239_v42 = vpack.c.bf16 %v5808_v53, %v5808_v53  ;;  %v4529_v0 = vadd.f32 %v4528_v60, %v14548_v38  ;;  %v5779_v49 = vadd.f32 %v5778_v40, %v14661_v52 }
 0x928   :  { %v10150_v10 = vpack.c.bf16 %v4589_v63, %v4589_v63  ;;  %v10238_v57 = vpack.c.bf16 %v5807_v20, %v5807_v20  ;;  %v4592_v7 = vmax.f32 %v4534_v12, 0.0  ;;  %v5810_v27 = vmax.f32 %v5784_v23, 0.0  ;;  %v11878_v56 = vpop.f32.mrb[150].mxu0  ;;  %v12030_v1 = vpop.f32.mrb[182].mxu1 }
 0x929   :  { %9207 = vst.msk [vmem:[%s17192_s20 + $0x1cc] sm:$0xf] %vm2973_vm0, %v10151_v44  ;;  %9455 = vst.msk [vmem:[%s17192_s20 + $0x32c] sm:$0xf] %vm2973_vm0, %v10239_v42  ;;  %v4591_v59 = vmax.f32 %v4529_v0, 0.0  ;;  %v5809_v19 = vmax.f32 %v5779_v49, 0.0  ;;  %v4544_v35 = vadd.f32 %v11878_v56, %v14568_v4  ;;  %v5794_v36 = vadd.f32 %v12030_v1, %v14721_v32  ;;  %12260 = vmatmul.mubr.msk.f32.vlgmr.msra.gmra.mrb[0].mxu0 %vm1181_vm3, %v15533_v29 }
 0x92a   :  { %9206 = vst.msk [vmem:[%s17192_s20 + $0x1c8] sm:$0xf] %vm2973_vm0, %v10150_v10  ;;  %9454 = vst.msk [vmem:[%s17192_s20 + $0x328] sm:$0xf] %vm2973_vm0, %v10238_v57  ;;  %v10153_v37 = vpack.c.bf16 %v4592_v7, %v4592_v7  ;;  %v10241_v2 = vpack.c.bf16 %v5810_v27, %v5810_v27  ;;  %v4538_v48 = vpop.f32.mrb[151].mxu0  ;;  %v5788_v45 = vpop.f32.mrb[183].mxu1  ;;  %12645 = vmatpush3.bf16.msra.mxu0 %v14286_v25  ;;  %12262 = vmatprep.mubr.msk.f32.mxu0 %vm1181_vm3, %v15555_v21 }
 0x92b   :  { %v10152_v18 = vpack.c.bf16 %v4591_v59, %v4591_v59  ;;  %v10240_v51 = vpack.c.bf16 %v5809_v19, %v5809_v19  ;;  %v4539_v15 = vadd.f32 %v4538_v48, %v14566_v8  ;;  %v5789_v16 = vadd.f32 %v5788_v45, %v14719_v47 }
 0x92c   :  { %9209 = vst.msk [vmem:[%s17192_s20 + $0x1d4] sm:$0xf] %vm2973_vm0, %v10153_v37  ;;  %9457 = vst.msk [vmem:[%s17192_s20 + $0x334] sm:$0xf] %vm2973_vm0, %v10241_v2  ;;  %v4594_v58 = vmax.f32 %v4544_v35, 0.0  ;;  %v5812_v53 = vmax.f32 %v5794_v36, 0.0 }
 0x92d   :  { %9208 = vst.msk [vmem:[%s17192_s20 + $0x1d0] sm:$0xf] %vm2973_vm0, %v10152_v18  ;;  %9456 = vst.msk [vmem:[%s17192_s20 + $0x330] sm:$0xf] %vm2973_vm0, %v10240_v51  ;;  %v4593_v63 = vmax.f32 %v4539_v15, 0.0  ;;  %v5811_v20 = vmax.f32 %v5789_v16, 0.0  ;;  %12263 = vmatmul.mubr.msk.f32.gmra.mrb[2].mxu0 %vm1181_vm3, %v15581_v46 }
 0x92e   :  { %v11881_v30 = vpop.f32.mrb[152].mxu0  ;;  %v12065_v54 = vpop.f32.mrb[184].mxu1  ;;  %v10155_v44 = vpack.c.bf16 %v4594_v58, %v4594_v58  ;;  %v10243_v42 = vpack.c.bf16 %v5812_v53, %v5812_v53  ;;  %12265 = vmatprep.mubr.msk.f32.mxu0 %vm1181_vm3, %v15603_v61 }
 0x92f   :  { %v4554_v25 = vadd.f32 %v11881_v30, %v14592_v13  ;;  %v6208_v12 = vadd.f32 %v12065_v54, %v14519_v24  ;;  %v4548_v23 = vpop.f32.mrb[153].mxu0  ;;  %v6202_v60 = vpop.f32.mrb[185].mxu1  ;;  %v10154_v40 = vpack.c.bf16 %v4593_v63, %v4593_v63  ;;  %v10242_v10 = vpack.c.bf16 %v5811_v20, %v5811_v20 }
 0x930   :  { %v4549_v57 = vadd.f32 %v4548_v23, %v14585_v39  ;;  %v6203_v0 = vadd.f32 %v6202_v60, %v14514_v5  ;;  %9211 = vst.msk [vmem:[%s17192_s20 + $0x1dc] sm:$0xf] %vm2973_vm0, %v10155_v44  ;;  %9459 = vst.msk [vmem:[%s17192_s20 + $0x33c] sm:$0xf] %vm2973_vm0, %v10243_v42  ;;  %v11884_v19 = vpop.f32.mrb[154].mxu0  ;;  %v12068_v56 = vpop.f32.mrb[186].mxu1 }
 0x931   :  { %v4596_v49 = vmax.f32 %v4554_v25, 0.0  ;;  %v6282_v7 = vmax.f32 %v6208_v12, 0.0  ;;  %9210 = vst.msk [vmem:[%s17192_s20 + $0x1d8] sm:$0xf] %vm2973_vm0, %v10154_v40  ;;  %9458 = vst.msk [vmem:[%s17192_s20 + $0x338] sm:$0xf] %vm2973_vm0, %v10242_v10  ;;  %v4564_v2 = vadd.f32 %v11884_v19, %v14627_v50  ;;  %v6218_v35 = vadd.f32 %v12068_v56, %v14534_v9  ;;  %12266 = vmatmul.mubr.msk.f32.gmra.mrb[4].mxu0 %vm1181_vm3, %v15629_v26 }
 0x932   :  { %v4595_v27 = vmax.f32 %v4549_v57, 0.0  ;;  %v6281_v59 = vmax.f32 %v6203_v0, 0.0  ;;  %v4558_v36 = vpop.f32.mrb[155].mxu0  ;;  %v6212_v48 = vpop.f32.mrb[187].mxu1  ;;  %12268 = vmatprep.mubr.msk.f32.mxu0 %vm1181_vm3, %v15459_v14 }
 0x933   :  { %v10157_v1 = vpack.c.bf16 %v4596_v49, %v4596_v49  ;;  %v10261_v37 = vpack.c.bf16 %v6282_v7, %v6282_v7  ;;  %v4559_v51 = vadd.f32 %v4558_v36, %v14621_v34  ;;  %v6213_v15 = vadd.f32 %v6212_v48, %v14532_v33 }
 0x934   :  { %v10156_v45 = vpack.c.bf16 %v4595_v27, %v4595_v27  ;;  %v10260_v18 = vpack.c.bf16 %v6281_v59, %v6281_v59  ;;  %v4598_v16 = vmax.f32 %v4564_v2, 0.0  ;;  %v6284_v58 = vmax.f32 %v6218_v35, 0.0  ;;  %v11887_v20 = vpop.f32.mrb[156].mxu0  ;;  %v12071_v30 = vpop.f32.mrb[188].mxu1 }
 0x935   :  { %9213 = vst.msk [vmem:[%s17192_s20 + $0x1e4] sm:$0xf] %vm2973_vm0, %v10157_v1  ;;  %9541 = vst.msk [vmem:[%s17192_s20 + $0x384] sm:$0xf] %vm2973_vm0, %v10261_v37  ;;  %v4597_v53 = vmax.f32 %v4559_v51, 0.0  ;;  %v6283_v63 = vmax.f32 %v6213_v15, 0.0  ;;  %v4574_v42 = vadd.f32 %v11887_v20, %v14663_v6  ;;  %v6228_v14 = vadd.f32 %v12071_v30, %v14554_v11  ;;  %12269 = vmatmul.mubr.msk.f32.gmra.mrb[6].mxu0 %vm1181_vm3, %v15480_v22 }
 0x936   :  { %9212 = vst.msk [vmem:[%s17192_s20 + $0x1e0] sm:$0xf] %vm2973_vm0, %v10156_v45  ;;  %9540 = vst.msk [vmem:[%s17192_s20 + $0x380] sm:$0xf] %vm2973_vm0, %v10260_v18  ;;  %v10159_v54 = vpack.c.bf16 %v4598_v16, %v4598_v16  ;;  %v10263_v44 = vpack.c.bf16 %v6284_v58, %v6284_v58  ;;  %v4568_v25 = vpop.f32.mrb[157].mxu0  ;;  %v6222_v12 = vpop.f32.mrb[189].mxu1  ;;  %12271 = vmatprep.mubr.msk.f32.mxu0 %vm1181_vm3, %v15497_v41 }
 0x937   :  { %v10158_v23 = vpack.c.bf16 %v4597_v53, %v4597_v53  ;;  %v10262_v60 = vpack.c.bf16 %v6283_v63, %v6283_v63  ;;  %v4569_v40 = vadd.f32 %v4568_v25, %v14661_v52  ;;  %v6223_v10 = vadd.f32 %v6222_v12, %v14548_v38 }
 0x938   :  { %9215 = vst.msk [vmem:[%s17192_s20 + $0x1ec] sm:$0xf] %vm2973_vm0, %v10159_v54  ;;  %9543 = vst.msk [vmem:[%s17192_s20 + $0x38c] sm:$0xf] %vm2973_vm0, %v10263_v44  ;;  %v4600_v57 = vmax.f32 %v4574_v42, 0.0  ;;  %v6286_v0 = vmax.f32 %v6228_v14, 0.0 }
 0x939   :  { %9214 = vst.msk [vmem:[%s17192_s20 + $0x1e8] sm:$0xf] %vm2973_vm0, %v10158_v23  ;;  %9542 = vst.msk [vmem:[%s17192_s20 + $0x388] sm:$0xf] %vm2973_vm0, %v10262_v60  ;;  %v4599_v22 = vmax.f32 %v4569_v40, 0.0  ;;  %v6285_v49 = vmax.f32 %v6223_v10, 0.0  ;;  %12272 = vmatmul.mubr.msk.f32.gmra.mrb[8].mxu0 %vm1181_vm3, %v15518_v55 }
 0x93a   :  { %v11890_v7 = vpop.f32.mrb[158].mxu0  ;;  %v12074_v27 = vpop.f32.mrb[190].mxu1  ;;  %v10161_v59 = vpack.c.bf16 %v4600_v57, %v4600_v57  ;;  %v10265_v19 = vpack.c.bf16 %v6286_v0, %v6286_v0  ;;  %12274 = vmatprep.mubr.msk.f32.mxu0 %vm1181_vm3, %v15540_v62 }
 0x93b   :  { %v4584_v56 = vadd.f32 %v11890_v7, %v14721_v32  ;;  %v6238_v41 = vadd.f32 %v12074_v27, %v14568_v4  ;;  %v4578_v1 = vpop.f32.mrb[159].mxu0  ;;  %v6232_v37 = vpop.f32.mrb[191].mxu1  ;;  %v10160_v2 = vpack.c.bf16 %v4599_v22, %v4599_v22  ;;  %v10264_v35 = vpack.c.bf16 %v6285_v49, %v6285_v49 }
 0x93c   :  { %v4579_v36 = vadd.f32 %v4578_v1, %v14719_v47  ;;  %v6233_v48 = vadd.f32 %v6232_v37, %v14566_v8  ;;  %9217 = vst.msk [vmem:[%s17192_s20 + $0x1f4] sm:$0xf] %vm2973_vm0, %v10161_v59  ;;  %9545 = vst.msk [vmem:[%s17192_s20 + $0x394] sm:$0xf] %vm2973_vm0, %v10265_v19  ;;  %v11925_v15 = vpop.f32.mrb[160].mxu0  ;;  %v12077_v16 = vpop.f32.mrb[192].mxu1 }
 0x93d   :  { %v4602_v45 = vmax.f32 %v4584_v56, 0.0  ;;  %v6288_v18 = vmax.f32 %v6238_v41, 0.0  ;;  %9216 = vst.msk [vmem:[%s17192_s20 + $0x1f0] sm:$0xf] %vm2973_vm0, %v10160_v2  ;;  %9544 = vst.msk [vmem:[%s17192_s20 + $0x390] sm:$0xf] %vm2973_vm0, %v10264_v35  ;;  %v4998_v63 = vadd.f32 %v11925_v15, %v14519_v24  ;;  %v6248_v62 = vadd.f32 %v12077_v16, %v14592_v13  ;;  %12275 = vmatmul.mubr.msk.f32.gmra.mrb[10].mxu0 %vm1181_vm3, %v15566_v43 }
 0x93e   :  { %v4601_v55 = vmax.f32 %v4579_v36, 0.0  ;;  %v6287_v51 = vmax.f32 %v6233_v48, 0.0  ;;  %v4992_v20 = vpop.f32.mrb[161].mxu0  ;;  %v6242_v30 = vpop.f32.mrb[193].mxu1  ;;  %12277 = vmatprep.mubr.msk.f32.mxu0 %vm1181_vm3, %v15588_v31 }
 0x93f   :  { %v10163_v58 = vpack.c.bf16 %v4602_v45, %v4602_v45  ;;  %v10267_v53 = vpack.c.bf16 %v6288_v18, %v6288_v18  ;;  %v4993_v42 = vadd.f32 %v4992_v20, %v14514_v5  ;;  %v6243_v14 = vadd.f32 %v6242_v30, %v14585_v39 }
 0x940   :  { %v10162_v54 = vpack.c.bf16 %v4601_v55, %v4601_v55  ;;  %v10266_v44 = vpack.c.bf16 %v6287_v51, %v6287_v51  ;;  %v5072_v25 = vmax.f32 %v4998_v63, 0.0  ;;  %v6290_v12 = vmax.f32 %v6248_v62, 0.0  ;;  %v11928_v60 = vpop.f32.mrb[162].mxu0  ;;  %v12080_v40 = vpop.f32.mrb[194].mxu1  ;;  %v12688_v63 = vld [vmem:[%s17191_s17] sm:$0xff] }
 0x941   :  { %9219 = vst.msk [vmem:[%s17192_s20 + $0x1fc] sm:$0xf] %vm2973_vm0, %v10163_v58  ;;  %9547 = vst.msk [vmem:[%s17192_s20 + $0x39c] sm:$0xf] %vm2973_vm0, %v10267_v53  ;;  %v5071_v43 = vmax.f32 %v4993_v42, 0.0  ;;  %v6289_v23 = vmax.f32 %v6243_v14, 0.0  ;;  %v5008_v0 = vadd.f32 %v11928_v60, %v14534_v9  ;;  %v6258_v31 = vadd.f32 %v12080_v40, %v14627_v50  ;;  %12278 = vmatmul.mubr.msk.f32.gmra.mrb[12].mxu0 %vm1181_vm3, %v15614_v3 }
 0x942   :  { %9218 = vst.msk [vmem:[%s17192_s20 + $0x1f8] sm:$0xf] %vm2973_vm0, %v10162_v54  ;;  %9546 = vst.msk [vmem:[%s17192_s20 + $0x398] sm:$0xf] %vm2973_vm0, %v10266_v44  ;;  %v10181_v10 = vpack.c.bf16 %v5072_v25, %v5072_v25  ;;  %v10269_v57 = vpack.c.bf16 %v6290_v12, %v6290_v12  ;;  %v5002_v22 = vpop.f32.mrb[163].mxu0  ;;  %v6252_v49 = vpop.f32.mrb[195].mxu1  ;;  %12280 = vmatprep.mubr.msk.f32.mxu0 %vm1181_vm3, %v15636_v28 }
 0x943   :  { %v10180_v7 = vpack.c.bf16 %v5071_v43, %v5071_v43  ;;  %v10268_v27 = vpack.c.bf16 %v6289_v23, %v6289_v23  ;;  %v5003_v59 = vadd.f32 %v5002_v22, %v14532_v33  ;;  %v6253_v19 = vadd.f32 %v6252_v49, %v14621_v34 }
 0x944   :  { %9301 = vst.msk [vmem:[%s17192_s20 + $0x244] sm:$0xf] %vm2973_vm0, %v10181_v10  ;;  %9549 = vst.msk [vmem:[%s17192_s20 + $0x3a4] sm:$0xf] %vm2973_vm0, %v10269_v57  ;;  %v5074_v56 = vmax.f32 %v5008_v0, 0.0  ;;  %v6292_v41 = vmax.f32 %v6258_v31, 0.0 }
 0x945   :  { %9300 = vst.msk [vmem:[%s17192_s20 + $0x240] sm:$0xf] %vm2973_vm0, %v10180_v7  ;;  %9548 = vst.msk [vmem:[%s17192_s20 + $0x3a0] sm:$0xf] %vm2973_vm0, %v10268_v27  ;;  %v5073_v3 = vmax.f32 %v5003_v59, 0.0  ;;  %v6291_v1 = vmax.f32 %v6253_v19, 0.0  ;;  %12281 = vmatmul.mubr.msk.f32.gmra.mrb[14].mxu0 %vm1181_vm3, %v15657_v17 }
 0x946   :  { %v11931_v37 = vpop.f32.mrb[164].mxu0  ;;  %v12083_v2 = vpop.f32.mrb[196].mxu1  ;;  %v10183_v35 = vpack.c.bf16 %v5074_v56, %v5074_v56  ;;  %v10271_v36 = vpack.c.bf16 %v6292_v41, %v6292_v41  ;;  %12315 = vmatprep.mubr.msk.f32.mxu0 %vm1181_vm3, %v12688_v63 }
 0x947   :  { %v5018_v48 = vadd.f32 %v11931_v37, %v14554_v11  ;;  %v6268_v28 = vadd.f32 %v12083_v2, %v14663_v6  ;;  %v5012_v45 = vpop.f32.mrb[165].mxu0  ;;  %v6262_v18 = vpop.f32.mrb[197].mxu1  ;;  %v10182_v55 = vpack.c.bf16 %v5073_v3, %v5073_v3  ;;  %v10270_v51 = vpack.c.bf16 %v6291_v1, %v6291_v1 }
 0x948   :  { %v5013_v15 = vadd.f32 %v5012_v45, %v14548_v38  ;;  %v6263_v16 = vadd.f32 %v6262_v18, %v14661_v52  ;;  %9303 = vst.msk [vmem:[%s17192_s20 + $0x24c] sm:$0xf] %vm2973_vm0, %v10183_v35  ;;  %9551 = vst.msk [vmem:[%s17192_s20 + $0x3ac] sm:$0xf] %vm2973_vm0, %v10271_v36  ;;  %v11934_v20 = vpop.f32.mrb[166].mxu0  ;;  %v12086_v30 = vpop.f32.mrb[198].mxu1 }
 0x949   :  { %v5076_v58 = vmax.f32 %v5018_v48, 0.0  ;;  %v6294_v53 = vmax.f32 %v6268_v28, 0.0  ;;  %9302 = vst.msk [vmem:[%s17192_s20 + $0x248] sm:$0xf] %vm2973_vm0, %v10182_v55  ;;  %9550 = vst.msk [vmem:[%s17192_s20 + $0x3a8] sm:$0xf] %vm2973_vm0, %v10270_v51  ;;  %v5028_v42 = vadd.f32 %v11934_v20, %v14568_v4  ;;  %v6278_v14 = vadd.f32 %v12086_v30, %v14721_v32  ;;  %12316 = vmatmul.mubr.msk.f32.vlgmr.msra.gmra.mrb[16].mxu0 %vm1181_vm3, %v15533_v29 }
 0x94a   :  { %v5075_v17 = vmax.f32 %v5013_v15, 0.0  ;;  %v6293_v62 = vmax.f32 %v6263_v16, 0.0  ;;  %v5022_v25 = vpop.f32.mrb[167].mxu0  ;;  %v6272_v12 = vpop.f32.mrb[199].mxu1  ;;  %12318 = vmatprep.mubr.msk.f32.mxu0 %vm1181_vm3, %v15555_v21 }
 0x94b   :  { %v10185_v54 = vpack.c.bf16 %v5076_v58, %v5076_v58  ;;  %v10273_v44 = vpack.c.bf16 %v6294_v53, %v6294_v53  ;;  %v5023_v60 = vadd.f32 %v5022_v25, %v14566_v8  ;;  %v6273_v40 = vadd.f32 %v6272_v12, %v14719_v47 }
 0x94c   :  { %v10184_v43 = vpack.c.bf16 %v5075_v17, %v5075_v17  ;;  %v10272_v23 = vpack.c.bf16 %v6293_v62, %v6293_v62  ;;  %v5078_v10 = vmax.f32 %v5028_v42, 0.0  ;;  %v6296_v57 = vmax.f32 %v6278_v14, 0.0  ;;  %v11937_v31 = vpop.f32.mrb[168].mxu0  ;;  %v12121_v22 = vpop.f32.mrb[200].mxu1  ;;  %v12689_v62 = vld [vmem:[%s17191_s17 + $0x30] sm:$0xff] }
 0x94d   :  { %9305 = vst.msk [vmem:[%s17192_s20 + $0x254] sm:$0xf] %vm2973_vm0, %v10185_v54  ;;  %9553 = vst.msk [vmem:[%s17192_s20 + $0x3b4] sm:$0xf] %vm2973_vm0, %v10273_v44  ;;  %v5077_v29 = vmax.f32 %v5023_v60, 0.0  ;;  %v6295_v0 = vmax.f32 %v6273_v40, 0.0  ;;  %v5038_v27 = vadd.f32 %v11937_v31, %v14592_v13  ;;  %v6692_v21 = vadd.f32 %v12121_v22, %v14519_v24  ;;  %12319 = vmatmul.mubr.msk.f32.gmra.mrb[18].mxu0 %vm1181_vm3, %v15581_v46 }
 0x94e   :  { %9304 = vst.msk [vmem:[%s17192_s20 + $0x250] sm:$0xf] %vm2973_vm0, %v10184_v43  ;;  %9552 = vst.msk [vmem:[%s17192_s20 + $0x3b0] sm:$0xf] %vm2973_vm0, %v10272_v23  ;;  %v10187_v49 = vpack.c.bf16 %v5078_v10, %v5078_v10  ;;  %v10275_v7 = vpack.c.bf16 %v6296_v57, %v6296_v57  ;;  %v5032_v59 = vpop.f32.mrb[169].mxu0  ;;  %v6686_v19 = vpop.f32.mrb[201].mxu1  ;;  %12321 = vmatprep.mubr.msk.f32.mxu0 %vm1181_vm3, %v15603_v61 }
 0x94f   :  { %v10186_v56 = vpack.c.bf16 %v5077_v29, %v5077_v29  ;;  %v10274_v41 = vpack.c.bf16 %v6295_v0, %v6295_v0  ;;  %v5033_v3 = vadd.f32 %v5032_v59, %v14585_v39  ;;  %v6687_v1 = vadd.f32 %v6686_v19, %v14514_v5  ;;  %v12690_v57 = vld [vmem:[%s17191_s17 + $0x38] sm:$0xff]  ;;  %v12691_v31 = vld [vmem:[%s17191_s17 + $0x40] sm:$0xff] }
 0x950   :  { %9307 = vst.msk [vmem:[%s17192_s20 + $0x25c] sm:$0xf] %vm2973_vm0, %v10187_v49  ;;  %9555 = vst.msk [vmem:[%s17192_s20 + $0x3bc] sm:$0xf] %vm2973_vm0, %v10275_v7  ;;  %v5080_v37 = vmax.f32 %v5038_v27, 0.0  ;;  %v6766_v2 = vmax.f32 %v6692_v21, 0.0 }
 0x951   :  { %9306 = vst.msk [vmem:[%s17192_s20 + $0x258] sm:$0xf] %vm2973_vm0, %v10186_v56  ;;  %9554 = vst.msk [vmem:[%s17192_s20 + $0x3b8] sm:$0xf] %vm2973_vm0, %v10274_v41  ;;  %v5079_v46 = vmax.f32 %v5033_v3, 0.0  ;;  %v6765_v35 = vmax.f32 %v6687_v1, 0.0  ;;  %12322 = vmatmul.mubr.msk.f32.gmra.mrb[20].mxu0 %vm1181_vm3, %v15629_v26 }
 0x952   :  { %v11940_v36 = vpop.f32.mrb[170].mxu0  ;;  %v12124_v48 = vpop.f32.mrb[202].mxu1  ;;  %v10189_v28 = vpack.c.bf16 %v5080_v37, %v5080_v37  ;;  %v10293_v45 = vpack.c.bf16 %v6766_v2, %v6766_v2  ;;  %12324 = vmatprep.mubr.msk.f32.mxu0 %vm1181_vm3, %v12689_v62 }
 0x953   :  { %v5048_v18 = vadd.f32 %v11940_v36, %v14627_v50  ;;  %v6702_v61 = vadd.f32 %v12124_v48, %v14534_v9  ;;  %v5042_v55 = vpop.f32.mrb[171].mxu0  ;;  %v6696_v51 = vpop.f32.mrb[203].mxu1  ;;  %v10188_v15 = vpack.c.bf16 %v5079_v46, %v5079_v46  ;;  %v10292_v16 = vpack.c.bf16 %v6765_v35, %v6765_v35  ;;  %v12692_v35 = vld [vmem:[%s17191_s17 + $0x48] sm:$0xff] }
 0x954   :  { %v5043_v58 = vadd.f32 %v5042_v55, %v14621_v34  ;;  %v6697_v53 = vadd.f32 %v6696_v51, %v14532_v33  ;;  %9309 = vst.msk [vmem:[%s17192_s20 + $0x264] sm:$0xf] %vm2973_vm0, %v10189_v28  ;;  %9637 = vst.msk [vmem:[%s17192_s20 + $0x404] sm:$0xf] %vm2973_vm0, %v10293_v45  ;;  %v11943_v30 = vpop.f32.mrb[172].mxu0  ;;  %v12127_v54 = vpop.f32.mrb[204].mxu1 }
 0x955   :  { %v5082_v63 = vmax.f32 %v5048_v18, 0.0  ;;  %v6768_v17 = vmax.f32 %v6702_v61, 0.0  ;;  %9308 = vst.msk [vmem:[%s17192_s20 + $0x260] sm:$0xf] %vm2973_vm0, %v10188_v15  ;;  %9636 = vst.msk [vmem:[%s17192_s20 + $0x400] sm:$0xf] %vm2973_vm0, %v10292_v16  ;;  %v5058_v14 = vadd.f32 %v11943_v30, %v14663_v6  ;;  %v6712_v25 = vadd.f32 %v12127_v54, %v14554_v11  ;;  %12325 = vmatmul.mubr.msk.f32.gmra.mrb[22].mxu0 %vm1181_vm3, %v12690_v57 }
 0x956   :  { %v5081_v26 = vmax.f32 %v5043_v58, 0.0  ;;  %v6767_v20 = vmax.f32 %v6697_v53, 0.0  ;;  %v5052_v12 = vpop.f32.mrb[173].mxu0  ;;  %v6706_v43 = vpop.f32.mrb[205].mxu1  ;;  %12327 = vmatprep.mubr.msk.f32.mxu0 %vm1181_vm3, %v12691_v31  ;;  %v12693_v28 = vld [vmem:[%s17191_s17 + $0x50] sm:$0xff]  ;;  %v12694_v30 = vld [vmem:[%s17191_s17 + $0x58] sm:$0xff] }
 0x957   :  { %v10191_v44 = vpack.c.bf16 %v5082_v63, %v5082_v63  ;;  %v10295_v42 = vpack.c.bf16 %v6768_v17, %v6768_v17  ;;  %v5053_v40 = vadd.f32 %v5052_v12, %v14661_v52  ;;  %v6707_v10 = vadd.f32 %v6706_v43, %v14548_v38 }
 0x958   :  { %v10190_v23 = vpack.c.bf16 %v5081_v26, %v5081_v26  ;;  %v10294_v60 = vpack.c.bf16 %v6767_v20, %v6767_v20  ;;  %v5084_v29 = vmax.f32 %v5058_v14, 0.0  ;;  %v6770_v0 = vmax.f32 %v6712_v25, 0.0  ;;  %v11946_v7 = vpop.f32.mrb[174].mxu0  ;;  %v12130_v27 = vpop.f32.mrb[206].mxu1 }
 0x959   :  { %9311 = vst.msk [vmem:[%s17192_s20 + $0x26c] sm:$0xf] %vm2973_vm0, %v10191_v44  ;;  %9639 = vst.msk [vmem:[%s17192_s20 + $0x40c] sm:$0xf] %vm2973_vm0, %v10295_v42  ;;  %v5083_v22 = vmax.f32 %v5053_v40, 0.0  ;;  %v6769_v49 = vmax.f32 %v6707_v10, 0.0  ;;  %v5068_v19 = vadd.f32 %v11946_v7, %v14721_v32  ;;  %v6722_v56 = vadd.f32 %v12130_v27, %v14568_v4  ;;  %12328 = vmatmul.mubr.msk.f32.gmra.mrb[24].mxu0 %vm1181_vm3, %v12692_v35 }
 0x95a   :  { %9310 = vst.msk [vmem:[%s17192_s20 + $0x268] sm:$0xf] %vm2973_vm0, %v10190_v23  ;;  %9638 = vst.msk [vmem:[%s17192_s20 + $0x408] sm:$0xf] %vm2973_vm0, %v10294_v60  ;;  %v10193_v21 = vpack.c.bf16 %v5084_v29, %v5084_v29  ;;  %v10297_v59 = vpack.c.bf16 %v6770_v0, %v6770_v0  ;;  %v5062_v41 = vpop.f32.mrb[175].mxu0  ;;  %v6716_v3 = vpop.f32.mrb[207].mxu1  ;;  %12330 = vmatprep.mubr.msk.f32.mxu0 %vm1181_vm3, %v12693_v28 }
 0x95b   :  { %v10192_v1 = vpack.c.bf16 %v5083_v22, %v5083_v22  ;;  %v10296_v37 = vpack.c.bf16 %v6769_v49, %v6769_v49  ;;  %v5063_v2 = vadd.f32 %v5062_v41, %v14719_v47  ;;  %v6717_v46 = vadd.f32 %v6716_v3, %v14566_v8  ;;  %v12695_v42 = vld [vmem:[%s17191_s17 + $0x60] sm:$0xff]  ;;  %v12696_v7 = vld [vmem:[%s17191_s17 + $0x68] sm:$0xff] }
 0x95c   :  { %9313 = vst.msk [vmem:[%s17192_s20 + $0x274] sm:$0xf] %vm2973_vm0, %v10193_v21  ;;  %9641 = vst.msk [vmem:[%s17192_s20 + $0x414] sm:$0xf] %vm2973_vm0, %v10297_v59  ;;  %v5086_v36 = vmax.f32 %v5068_v19, 0.0  ;;  %v6772_v48 = vmax.f32 %v6722_v56, 0.0 }
 0x95d   :  { %9312 = vst.msk [vmem:[%s17192_s20 + $0x270] sm:$0xf] %vm2973_vm0, %v10192_v1  ;;  %9640 = vst.msk [vmem:[%s17192_s20 + $0x410] sm:$0xf] %vm2973_vm0, %v10296_v37  ;;  %v5085_v45 = vmax.f32 %v5063_v2, 0.0  ;;  %v6771_v18 = vmax.f32 %v6717_v46, 0.0  ;;  %12331 = vmatmul.mubr.msk.f32.gmra.mrb[26].mxu0 %vm1181_vm3, %v12694_v30 }
 0x95e   :  { %v11981_v61 = vpop.f32.mrb[176].mxu0  ;;  %v12133_v55 = vpop.f32.mrb[208].mxu1  ;;  %v10195_v51 = vpack.c.bf16 %v5086_v36, %v5086_v36  ;;  %v10299_v15 = vpack.c.bf16 %v6772_v48, %v6772_v48  ;;  %12333 = vmatprep.mubr.msk.f32.mxu0 %vm1181_vm3, %v12695_v42  ;;  %v12697_v59 = vld [vmem:[%s17191_s17 + $0x70] sm:$0xff] }
 0x95f   :  { %v5482_v16 = vadd.f32 %v11981_v61, %v14519_v24  ;;  %v6732_v58 = vadd.f32 %v12133_v55, %v14592_v13  ;;  %v5476_v53 = vpop.f32.mrb[177].mxu0  ;;  %v6726_v63 = vpop.f32.mrb[209].mxu1  ;;  %v10194_v17 = vpack.c.bf16 %v5085_v45, %v5085_v45  ;;  %v10298_v62 = vpack.c.bf16 %v6771_v18, %v6771_v18  ;;  %v12698_v18 = vld [vmem:[%s17191_s17 + $0x78] sm:$0xff] }
 0x960   :  { %v5477_v26 = vadd.f32 %v5476_v53, %v14514_v5  ;;  %v6727_v20 = vadd.f32 %v6726_v63, %v14585_v39  ;;  %9315 = vst.msk [vmem:[%s17192_s20 + $0x27c] sm:$0xf] %vm2973_vm0, %v10195_v51  ;;  %9643 = vst.msk [vmem:[%s17192_s20 + $0x41c] sm:$0xf] %vm2973_vm0, %v10299_v15  ;;  %v11984_v12 = vpop.f32.mrb[178].mxu0  ;;  %v12136_v43 = vpop.f32.mrb[210].mxu1 }
 0x961   :  { %v5556_v54 = vmax.f32 %v5482_v16, 0.0  ;;  %v6774_v44 = vmax.f32 %v6732_v58, 0.0  ;;  %9314 = vst.msk [vmem:[%s17192_s20 + $0x278] sm:$0xf] %vm2973_vm0, %v10194_v17  ;;  %9642 = vst.msk [vmem:[%s17192_s20 + $0x418] sm:$0xf] %vm2973_vm0, %v10298_v62  ;;  %v5492_v40 = vadd.f32 %v11984_v12, %v14534_v9  ;;  %v6742_v10 = vadd.f32 %v12136_v43, %v14627_v50  ;;  %12334 = vmatmul.mubr.msk.f32.gmra.mrb[28].mxu0 %vm1181_vm3, %v12696_v7 }
 0x962   :  { %v5555_v14 = vmax.f32 %v5477_v26, 0.0  ;;  %v6773_v25 = vmax.f32 %v6727_v20, 0.0  ;;  %v5486_v57 = vpop.f32.mrb[179].mxu0  ;;  %v6736_v29 = vpop.f32.mrb[211].mxu1  ;;  %12336 = vmatprep.mubr.msk.f32.mxu0 %vm1181_vm3, %v12697_v59 }
 0x963   :  { %v10213_v23 = vpack.c.bf16 %v5556_v54, %v5556_v54  ;;  %v10301_v60 = vpack.c.bf16 %v6774_v44, %v6774_v44  ;;  %v5487_v22 = vadd.f32 %v5486_v57, %v14532_v33  ;;  %v6737_v49 = vadd.f32 %v6736_v29, %v14621_v34 }
 0x964   :  { %v10212_v0 = vpack.c.bf16 %v5555_v14, %v5555_v14  ;;  %v10300_v31 = vpack.c.bf16 %v6773_v25, %v6773_v25  ;;  %v5558_v27 = vmax.f32 %v5492_v40, 0.0  ;;  %v6776_v21 = vmax.f32 %v6742_v10, 0.0  ;;  %v11987_v41 = vpop.f32.mrb[180].mxu0 }
 0x965   :  { %9397 = vst.msk [vmem:[%s17192_s20 + $0x2c4] sm:$0xf] %vm2973_vm0, %v10213_v23  ;;  %9645 = vst.msk [vmem:[%s17192_s20 + $0x424] sm:$0xf] %vm2973_vm0, %v10301_v60  ;;  %v5557_v19 = vmax.f32 %v5487_v22, 0.0  ;;  %v6775_v56 = vmax.f32 %v6737_v49, 0.0  ;;  %v5502_v37 = vadd.f32 %v11987_v41, %v14554_v11  ;;  %12337 = vmatmul.mubr.msk.f32.gmra.mrb[30].mxu0 %vm1181_vm3, %v12698_v18 }
 0x966   :  { %9396 = vst.msk [vmem:[%s17192_s20 + $0x2c0] sm:$0xf] %vm2973_vm0, %v10212_v0  ;;  %9644 = vst.msk [vmem:[%s17192_s20 + $0x420] sm:$0xf] %vm2973_vm0, %v10300_v31  ;;  %v10215_v3 = vpack.c.bf16 %v5558_v27, %v5558_v27  ;;  %v10303_v1 = vpack.c.bf16 %v6776_v21, %v6776_v21  ;;  %v12139_v2 = vpop.f32.mrb[212].mxu1  ;;  %v5496_v46 = vpop.f32.mrb[181].mxu0 }
 0x967   :  { %v10214_v35 = vpack.c.bf16 %v5557_v19, %v5557_v19  ;;  %v10302_v36 = vpack.c.bf16 %v6775_v56, %v6775_v56  ;;  %v6752_v48 = vadd.f32 %v12139_v2, %v14663_v6  ;;  %v5497_v28 = vadd.f32 %v5496_v46, %v14548_v38  ;;  %v6746_v45 = vpop.f32.mrb[213].mxu1 }
 0x968   :  { %9399 = vst.msk [vmem:[%s17192_s20 + $0x2cc] sm:$0xf] %vm2973_vm0, %v10215_v3  ;;  %9647 = vst.msk [vmem:[%s17192_s20 + $0x42c] sm:$0xf] %vm2973_vm0, %v10303_v1  ;;  %v5560_v61 = vmax.f32 %v5502_v37, 0.0  ;;  %v6747_v55 = vadd.f32 %v6746_v45, %v14661_v52  ;;  %v11990_v16 = vpop.f32.mrb[182].mxu0 }
 0x969   :  { %9398 = vst.msk [vmem:[%s17192_s20 + $0x2c8] sm:$0xf] %vm2973_vm0, %v10214_v35  ;;  %9646 = vst.msk [vmem:[%s17192_s20 + $0x428] sm:$0xf] %vm2973_vm0, %v10302_v36  ;;  %v6778_v51 = vmax.f32 %v6752_v48, 0.0  ;;  %v5559_v15 = vmax.f32 %v5497_v28, 0.0  ;;  %v5512_v63 = vadd.f32 %v11990_v16, %v14568_v4 }
 0x96a   :  { %v10217_v58 = vpack.c.bf16 %v5560_v61, %v5560_v61  ;;  %v6777_v53 = vmax.f32 %v6747_v55, 0.0  ;;  %v12142_v17 = vpop.f32.mrb[214].mxu1  ;;  %v5506_v62 = vpop.f32.mrb[183].mxu0 }
 0x96b   :  { %v10305_v26 = vpack.c.bf16 %v6778_v51, %v6778_v51  ;;  %v10216_v20 = vpack.c.bf16 %v5559_v15, %v5559_v15  ;;  %v6762_v30 = vadd.f32 %v12142_v17, %v14721_v32  ;;  %v5507_v54 = vadd.f32 %v5506_v62, %v14566_v8  ;;  %v6756_v44 = vpop.f32.mrb[215].mxu1 }
 0x96c   :  { %9401 = vst.msk [vmem:[%s17192_s20 + $0x2d4] sm:$0xf] %vm2973_vm0, %v10217_v58  ;;  %v10304_v42 = vpack.c.bf16 %v6777_v53, %v6777_v53  ;;  %v5562_v14 = vmax.f32 %v5512_v63, 0.0  ;;  %v6757_v25 = vadd.f32 %v6756_v44, %v14719_v47  ;;  %v11993_v23 = vpop.f32.mrb[184].mxu0 }
 0x96d   :  { %9649 = vst.msk [vmem:[%s17192_s20 + $0x434] sm:$0xf] %vm2973_vm0, %v10305_v26  ;;  %9400 = vst.msk [vmem:[%s17192_s20 + $0x2d0] sm:$0xf] %vm2973_vm0, %v10216_v20  ;;  %v6780_v12 = vmax.f32 %v6762_v30, 0.0  ;;  %v5561_v43 = vmax.f32 %v5507_v54, 0.0  ;;  %v5522_v10 = vadd.f32 %v11993_v23, %v14592_v13 }
 0x96e   :  { %9648 = vst.msk [vmem:[%s17192_s20 + $0x430] sm:$0xf] %vm2973_vm0, %v10304_v42  ;;  %v10219_v60 = vpack.c.bf16 %v5562_v14, %v5562_v14  ;;  %v6779_v40 = vmax.f32 %v6757_v25, 0.0  ;;  %v12177_v57 = vpop.f32.mrb[216].mxu1  ;;  %v5516_v29 = vpop.f32.mrb[185].mxu0 }
 0x96f   :  { %v10307_v0 = vpack.c.bf16 %v6780_v12, %v6780_v12  ;;  %v10218_v31 = vpack.c.bf16 %v5561_v43, %v5561_v43  ;;  %v7176_v22 = vadd.f32 %v12177_v57, %v14519_v24  ;;  %v5517_v49 = vadd.f32 %v5516_v29, %v14585_v39  ;;  %v7170_v7 = vpop.f32.mrb[217].mxu1 }
 0x970   :  { %9403 = vst.msk [vmem:[%s17192_s20 + $0x2dc] sm:$0xf] %vm2973_vm0, %v10219_v60  ;;  %v10306_v27 = vpack.c.bf16 %v6779_v40, %v6779_v40  ;;  %v5564_v21 = vmax.f32 %v5522_v10, 0.0  ;;  %v7171_v59 = vadd.f32 %v7170_v7, %v14514_v5  ;;  %v11996_v41 = vpop.f32.mrb[186].mxu0 }
 0x971   :  { %9651 = vst.msk [vmem:[%s17192_s20 + $0x43c] sm:$0xf] %vm2973_vm0, %v10307_v0  ;;  %9402 = vst.msk [vmem:[%s17192_s20 + $0x2d8] sm:$0xf] %vm2973_vm0, %v10218_v31  ;;  %v7250_v19 = vmax.f32 %v7176_v22, 0.0  ;;  %v5563_v56 = vmax.f32 %v5517_v49, 0.0  ;;  %v5532_v37 = vadd.f32 %v11996_v41, %v14627_v50 }
 0x972   :  { %9650 = vst.msk [vmem:[%s17192_s20 + $0x438] sm:$0xf] %vm2973_vm0, %v10306_v27  ;;  %v10221_v3 = vpack.c.bf16 %v5564_v21, %v5564_v21  ;;  %v7249_v1 = vmax.f32 %v7171_v59, 0.0  ;;  %v12180_v2 = vpop.f32.mrb[218].mxu1  ;;  %v5526_v46 = vpop.f32.mrb[187].mxu0 }
 0x973   :  { %v10325_v35 = vpack.c.bf16 %v7250_v19, %v7250_v19  ;;  %v10220_v36 = vpack.c.bf16 %v5563_v56, %v5563_v56  ;;  %v7186_v48 = vadd.f32 %v12180_v2, %v14534_v9  ;;  %v5527_v28 = vadd.f32 %v5526_v46, %v14621_v34  ;;  %v7180_v45 = vpop.f32.mrb[219].mxu1 }
 0x974   :  { %9405 = vst.msk [vmem:[%s17192_s20 + $0x2e4] sm:$0xf] %vm2973_vm0, %v10221_v3  ;;  %v10324_v18 = vpack.c.bf16 %v7249_v1, %v7249_v1  ;;  %v5566_v61 = vmax.f32 %v5532_v37, 0.0  ;;  %v7181_v55 = vadd.f32 %v7180_v45, %v14532_v33  ;;  %v11999_v16 = vpop.f32.mrb[188].mxu0 }
 0x975   :  { %9733 = vst.msk [vmem:[%s17192_s20 + $0x484] sm:$0xf] %vm2973_vm0, %v10325_v35  ;;  %9404 = vst.msk [vmem:[%s17192_s20 + $0x2e0] sm:$0xf] %vm2973_vm0, %v10220_v36  ;;  %v7252_v51 = vmax.f32 %v7186_v48, 0.0  ;;  %v5565_v15 = vmax.f32 %v5527_v28, 0.0  ;;  %v5542_v63 = vadd.f32 %v11999_v16, %v14663_v6 }
 0x976   :  { %9732 = vst.msk [vmem:[%s17192_s20 + $0x480] sm:$0xf] %vm2973_vm0, %v10324_v18  ;;  %v10223_v58 = vpack.c.bf16 %v5566_v61, %v5566_v61  ;;  %v7251_v53 = vmax.f32 %v7181_v55, 0.0  ;;  %v12183_v17 = vpop.f32.mrb[220].mxu1  ;;  %v5536_v62 = vpop.f32.mrb[189].mxu0 }
 0x977   :  { %v10327_v26 = vpack.c.bf16 %v7252_v51, %v7252_v51  ;;  %v10222_v20 = vpack.c.bf16 %v5565_v15, %v5565_v15  ;;  %v7196_v30 = vadd.f32 %v12183_v17, %v14554_v11  ;;  %v5537_v54 = vadd.f32 %v5536_v62, %v14661_v52  ;;  %v7190_v44 = vpop.f32.mrb[221].mxu1 }
 0x978   :  { %9407 = vst.msk [vmem:[%s17192_s20 + $0x2ec] sm:$0xf] %vm2973_vm0, %v10223_v58  ;;  %v10326_v42 = vpack.c.bf16 %v7251_v53, %v7251_v53  ;;  %v5568_v14 = vmax.f32 %v5542_v63, 0.0  ;;  %v7191_v25 = vadd.f32 %v7190_v44, %v14548_v38  ;;  %v12002_v23 = vpop.f32.mrb[190].mxu0 }
 0x979   :  { %9735 = vst.msk [vmem:[%s17192_s20 + $0x48c] sm:$0xf] %vm2973_vm0, %v10327_v26  ;;  %9406 = vst.msk [vmem:[%s17192_s20 + $0x2e8] sm:$0xf] %vm2973_vm0, %v10222_v20  ;;  %v7254_v12 = vmax.f32 %v7196_v30, 0.0  ;;  %v5567_v43 = vmax.f32 %v5537_v54, 0.0  ;;  %v5552_v10 = vadd.f32 %v12002_v23, %v14721_v32 }
 0x97a   :  { %9734 = vst.msk [vmem:[%s17192_s20 + $0x488] sm:$0xf] %vm2973_vm0, %v10326_v42  ;;  %v10225_v60 = vpack.c.bf16 %v5568_v14, %v5568_v14  ;;  %v7253_v40 = vmax.f32 %v7191_v25, 0.0  ;;  %v12186_v57 = vpop.f32.mrb[222].mxu1  ;;  %v5546_v29 = vpop.f32.mrb[191].mxu0 }
 0x97b   :  { %v10329_v0 = vpack.c.bf16 %v7254_v12, %v7254_v12  ;;  %v10224_v31 = vpack.c.bf16 %v5567_v43, %v5567_v43  ;;  %v7206_v22 = vadd.f32 %v12186_v57, %v14568_v4  ;;  %v5547_v49 = vadd.f32 %v5546_v29, %v14719_v47  ;;  %v7200_v7 = vpop.f32.mrb[223].mxu1 }
 0x97c   :  { %9409 = vst.msk [vmem:[%s17192_s20 + $0x2f4] sm:$0xf] %vm2973_vm0, %v10225_v60  ;;  %v10328_v27 = vpack.c.bf16 %v7253_v40, %v7253_v40  ;;  %v5570_v21 = vmax.f32 %v5552_v10, 0.0  ;;  %v7201_v59 = vadd.f32 %v7200_v7, %v14566_v8  ;;  %v12037_v41 = vpop.f32.mrb[192].mxu0 }
 0x97d   :  { %9737 = vst.msk [vmem:[%s17192_s20 + $0x494] sm:$0xf] %vm2973_vm0, %v10329_v0  ;;  %9408 = vst.msk [vmem:[%s17192_s20 + $0x2f0] sm:$0xf] %vm2973_vm0, %v10224_v31  ;;  %v7256_v19 = vmax.f32 %v7206_v22, 0.0  ;;  %v5569_v56 = vmax.f32 %v5547_v49, 0.0  ;;  %v5966_v37 = vadd.f32 %v12037_v41, %v14519_v24 }
 0x97e   :  { %9736 = vst.msk [vmem:[%s17192_s20 + $0x490] sm:$0xf] %vm2973_vm0, %v10328_v27  ;;  %v10227_v3 = vpack.c.bf16 %v5570_v21, %v5570_v21  ;;  %v7255_v1 = vmax.f32 %v7201_v59, 0.0  ;;  %v5960_v2 = vpop.f32.mrb[193].mxu0  ;;  %v12189_v36 = vpop.f32.mrb[224].mxu1 }
 0x97f   :  { %v10331_v46 = vpack.c.bf16 %v7256_v19, %v7256_v19  ;;  %v10226_v35 = vpack.c.bf16 %v5569_v56, %v5569_v56  ;;  %v5961_v48 = vadd.f32 %v5960_v2, %v14514_v5  ;;  %v6040_v45 = vmax.f32 %v5966_v37, 0.0  ;;  %v7210_v61 = vpop.f32.mrb[225].mxu1 }
 0x980   :  { %9411 = vst.msk [vmem:[%s17192_s20 + $0x2fc] sm:$0xf] %vm2973_vm0, %v10227_v3  ;;  %v10330_v28 = vpack.c.bf16 %v7255_v1, %v7255_v1  ;;  %v7216_v18 = vadd.f32 %v12189_v36, %v14592_v13  ;;  %v7211_v51 = vadd.f32 %v7210_v61, %v14585_v39  ;;  %v12040_v15 = vpop.f32.mrb[194].mxu0 }
 0x981   :  { %9739 = vst.msk [vmem:[%s17192_s20 + $0x49c] sm:$0xf] %vm2973_vm0, %v10331_v46  ;;  %9410 = vst.msk [vmem:[%s17192_s20 + $0x2f8] sm:$0xf] %vm2973_vm0, %v10226_v35  ;;  %v6039_v55 = vmax.f32 %v5961_v48, 0.0  ;;  %v10245_v16 = vpack.c.bf16 %v6040_v45, %v6040_v45  ;;  %v5976_v53 = vadd.f32 %v12040_v15, %v14534_v9  ;;  %v5970_v63 = vpop.f32.mrb[195].mxu0 }
 0x982   :  { %9738 = vst.msk [vmem:[%s17192_s20 + $0x498] sm:$0xf] %vm2973_vm0, %v10330_v28  ;;  %v7258_v58 = vmax.f32 %v7216_v18, 0.0  ;;  %v7257_v62 = vmax.f32 %v7211_v51, 0.0  ;;  %v12192_v26 = vpop.f32.mrb[226].mxu1  ;;  %v5971_v20 = vadd.f32 %v5970_v63, %v14532_v33 }
 0x983   :  { %v10244_v17 = vpack.c.bf16 %v6039_v55, %v6039_v55  ;;  %9493 = vst.msk [vmem:[%s17192_s20 + $0x344] sm:$0xf] %vm2973_vm0, %v10245_v16  ;;  %v6042_v54 = vmax.f32 %v5976_v53, 0.0  ;;  %v7226_v44 = vadd.f32 %v12192_v26, %v14627_v50  ;;  %v7220_v42 = vpop.f32.mrb[227].mxu1 }
 0x984   :  { %v10333_v30 = vpack.c.bf16 %v7258_v58, %v7258_v58  ;;  %v10332_v14 = vpack.c.bf16 %v7257_v62, %v7257_v62  ;;  %v6041_v25 = vmax.f32 %v5971_v20, 0.0  ;;  %v7221_v12 = vadd.f32 %v7220_v42, %v14621_v34  ;;  %v12043_v43 = vpop.f32.mrb[196].mxu0 }
 0x985   :  { %9492 = vst.msk [vmem:[%s17192_s20 + $0x340] sm:$0xf] %vm2973_vm0, %v10244_v17  ;;  %v10247_v23 = vpack.c.bf16 %v6042_v54, %v6042_v54  ;;  %v7260_v60 = vmax.f32 %v7226_v44, 0.0  ;;  %v5986_v40 = vadd.f32 %v12043_v43, %v14554_v11  ;;  %v5980_v10 = vpop.f32.mrb[197].mxu0  ;;  %v12195_v0 = vpop.f32.mrb[228].mxu1 }
 0x986   :  { %9741 = vst.msk [vmem:[%s17192_s20 + $0x4a4] sm:$0xf] %vm2973_vm0, %v10333_v30  ;;  %9740 = vst.msk [vmem:[%s17192_s20 + $0x4a0] sm:$0xf] %vm2973_vm0, %v10332_v14  ;;  %v10246_v57 = vpack.c.bf16 %v6041_v25, %v6041_v25  ;;  %v7259_v29 = vmax.f32 %v7221_v12, 0.0  ;;  %v5981_v31 = vadd.f32 %v5980_v10, %v14548_v38  ;;  %v7236_v7 = vadd.f32 %v12195_v0, %v14663_v6  ;;  %v7230_v27 = vpop.f32.mrb[229].mxu1 }
 0x987   :  { %9495 = vst.msk [vmem:[%s17192_s20 + $0x34c] sm:$0xf] %vm2973_vm0, %v10247_v23  ;;  %v10335_v22 = vpack.c.bf16 %v7260_v60, %v7260_v60  ;;  %v6044_v49 = vmax.f32 %v5986_v40, 0.0  ;;  %v7231_v19 = vadd.f32 %v7230_v27, %v14661_v52 }
 0x988   :  { %9494 = vst.msk [vmem:[%s17192_s20 + $0x348] sm:$0xf] %vm2973_vm0, %v10246_v57  ;;  %v10334_v21 = vpack.c.bf16 %v7259_v29, %v7259_v29  ;;  %v6043_v59 = vmax.f32 %v5981_v31, 0.0  ;;  %v12046_v56 = vpop.f32.mrb[198].mxu0  ;;  %v7262_v3 = vmax.f32 %v7236_v7, 0.0 }
 0x989   :  { %9743 = vst.msk [vmem:[%s17192_s20 + $0x4ac] sm:$0xf] %vm2973_vm0, %v10335_v22  ;;  %v10249_v41 = vpack.c.bf16 %v6044_v49, %v6044_v49  ;;  %v5996_v1 = vadd.f32 %v12046_v56, %v14568_v4  ;;  %v5990_v37 = vpop.f32.mrb[199].mxu0  ;;  %v7261_v46 = vmax.f32 %v7231_v19, 0.0  ;;  %v12198_v35 = vpop.f32.mrb[230].mxu1 }
 0x98a   :  { %9742 = vst.msk [vmem:[%s17192_s20 + $0x4a8] sm:$0xf] %vm2973_vm0, %v10334_v21  ;;  %v10248_v2 = vpack.c.bf16 %v6043_v59, %v6043_v59  ;;  %v5991_v36 = vadd.f32 %v5990_v37, %v14566_v8  ;;  %v10337_v48 = vpack.c.bf16 %v7262_v3, %v7262_v3  ;;  %v7246_v45 = vadd.f32 %v12198_v35, %v14721_v32  ;;  %v7240_v18 = vpop.f32.mrb[231].mxu1 }
 0x98b   :  { %9497 = vst.msk [vmem:[%s17192_s20 + $0x354] sm:$0xf] %vm2973_vm0, %v10249_v41  ;;  %v6046_v28 = vmax.f32 %v5996_v1, 0.0  ;;  %v10336_v61 = vpack.c.bf16 %v7261_v46, %v7261_v46  ;;  %v7241_v51 = vadd.f32 %v7240_v18, %v14719_v47 }
 0x98c   :  { %9496 = vst.msk [vmem:[%s17192_s20 + $0x350] sm:$0xf] %vm2973_vm0, %v10248_v2  ;;  %v6045_v55 = vmax.f32 %v5991_v36, 0.0  ;;  %v12049_v15 = vpop.f32.mrb[200].mxu0  ;;  %9745 = vst.msk [vmem:[%s17192_s20 + $0x4b4] sm:$0xf] %vm2973_vm0, %v10337_v48 }
 0x98d   :  { %v10251_v16 = vpack.c.bf16 %v6046_v28, %v6046_v28  ;;  %v7264_v58 = vmax.f32 %v7246_v45, 0.0  ;;  %v6006_v53 = vadd.f32 %v12049_v15, %v14592_v13  ;;  %v6000_v63 = vpop.f32.mrb[201].mxu0  ;;  %9744 = vst.msk [vmem:[%s17192_s20 + $0x4b0] sm:$0xf] %vm2973_vm0, %v10336_v61  ;;  %v7263_v62 = vmax.f32 %v7241_v51, 0.0  ;;  %v12233_v26 = vpop.f32.mrb[232].mxu1 }
 0x98e   :  { %v10250_v17 = vpack.c.bf16 %v6045_v55, %v6045_v55  ;;  %v6001_v20 = vadd.f32 %v6000_v63, %v14585_v39  ;;  %v7660_v44 = vadd.f32 %v12233_v26, %v14519_v24  ;;  %v7654_v42 = vpop.f32.mrb[233].mxu1 }
 0x98f   :  { %9499 = vst.msk [vmem:[%s17192_s20 + $0x35c] sm:$0xf] %vm2973_vm0, %v10251_v16  ;;  %v10339_v30 = vpack.c.bf16 %v7264_v58, %v7264_v58  ;;  %v6048_v54 = vmax.f32 %v6006_v53, 0.0  ;;  %v10338_v14 = vpack.c.bf16 %v7263_v62, %v7263_v62  ;;  %v7655_v12 = vadd.f32 %v7654_v42, %v14514_v5 }
 0x990   :  { %9498 = vst.msk [vmem:[%s17192_s20 + $0x358] sm:$0xf] %vm2973_vm0, %v10250_v17  ;;  %v6047_v25 = vmax.f32 %v6001_v20, 0.0  ;;  %v7734_v23 = vmax.f32 %v7660_v44, 0.0  ;;  %v12052_v60 = vpop.f32.mrb[202].mxu0 }
 0x991   :  { %9747 = vst.msk [vmem:[%s17192_s20 + $0x4bc] sm:$0xf] %vm2973_vm0, %v10339_v30  ;;  %v10253_v43 = vpack.c.bf16 %v6048_v54, %v6048_v54  ;;  %9746 = vst.msk [vmem:[%s17192_s20 + $0x4b8] sm:$0xf] %vm2973_vm0, %v10338_v14  ;;  %v7733_v10 = vmax.f32 %v7655_v12, 0.0  ;;  %v6016_v57 = vadd.f32 %v12052_v60, %v14627_v50  ;;  %v12236_v29 = vpop.f32.mrb[234].mxu1 }
 0x992   :  { %v10252_v40 = vpack.c.bf16 %v6047_v25, %v6047_v25  ;;  %v6010_v0 = vpop.f32.mrb[203].mxu0  ;;  %v10357_v31 = vpack.c.bf16 %v7734_v23, %v7734_v23  ;;  %v7670_v22 = vadd.f32 %v12236_v29, %v14534_v9  ;;  %v7664_v7 = vpop.f32.mrb[235].mxu1 }
 0x993   :  { %9501 = vst.msk [vmem:[%s17192_s20 + $0x364] sm:$0xf] %vm2973_vm0, %v10253_v43  ;;  %v6011_v49 = vadd.f32 %v6010_v0, %v14621_v34  ;;  %v10356_v27 = vpack.c.bf16 %v7733_v10, %v7733_v10  ;;  %v6050_v21 = vmax.f32 %v6016_v57, 0.0  ;;  %v7665_v59 = vadd.f32 %v7664_v7, %v14532_v33 }
 0x994   :  { %9500 = vst.msk [vmem:[%s17192_s20 + $0x360] sm:$0xf] %vm2973_vm0, %v10252_v40  ;;  %9829 = vst.msk [vmem:[%s17192_s20 + $0x504] sm:$0xf] %vm2973_vm0, %v10357_v31  ;;  %v7736_v19 = vmax.f32 %v7670_v22, 0.0  ;;  %v12055_v41 = vpop.f32.mrb[204].mxu0 }
 0x995   :  { %v6049_v56 = vmax.f32 %v6011_v49, 0.0  ;;  %9828 = vst.msk [vmem:[%s17192_s20 + $0x500] sm:$0xf] %vm2973_vm0, %v10356_v27  ;;  %v10255_v3 = vpack.c.bf16 %v6050_v21, %v6050_v21  ;;  %v7735_v1 = vmax.f32 %v7665_v59, 0.0  ;;  %v6026_v37 = vadd.f32 %v12055_v41, %v14663_v6  ;;  %v12239_v2 = vpop.f32.mrb[236].mxu1  ;;  %v6020_v46 = vpop.f32.mrb[205].mxu0 }
 0x996   :  { %v10359_v35 = vpack.c.bf16 %v7736_v19, %v7736_v19  ;;  %v7680_v48 = vadd.f32 %v12239_v2, %v14554_v11  ;;  %v6021_v28 = vadd.f32 %v6020_v46, %v14661_v52  ;;  %v7674_v45 = vpop.f32.mrb[237].mxu1 }
 0x997   :  { %v10254_v36 = vpack.c.bf16 %v6049_v56, %v6049_v56  ;;  %9503 = vst.msk [vmem:[%s17192_s20 + $0x36c] sm:$0xf] %vm2973_vm0, %v10255_v3  ;;  %v10358_v18 = vpack.c.bf16 %v7735_v1, %v7735_v1  ;;  %v6052_v61 = vmax.f32 %v6026_v37, 0.0  ;;  %v7675_v55 = vadd.f32 %v7674_v45, %v14548_v38 }
 0x998   :  { %9831 = vst.msk [vmem:[%s17192_s20 + $0x50c] sm:$0xf] %vm2973_vm0, %v10359_v35  ;;  %v7738_v51 = vmax.f32 %v7680_v48, 0.0  ;;  %v6051_v15 = vmax.f32 %v6021_v28, 0.0  ;;  %v12058_v16 = vpop.f32.mrb[206].mxu0 }
 0x999   :  { %9502 = vst.msk [vmem:[%s17192_s20 + $0x368] sm:$0xf] %vm2973_vm0, %v10254_v36  ;;  %9830 = vst.msk [vmem:[%s17192_s20 + $0x508] sm:$0xf] %vm2973_vm0, %v10358_v18  ;;  %v10257_v58 = vpack.c.bf16 %v6052_v61, %v6052_v61  ;;  %v7737_v53 = vmax.f32 %v7675_v55, 0.0  ;;  %v6036_v63 = vadd.f32 %v12058_v16, %v14721_v32  ;;  %v12242_v17 = vpop.f32.mrb[238].mxu1 }
 0x99a   :  { %v6030_v62 = vpop.f32.mrb[207].mxu0  ;;  %v10361_v26 = vpack.c.bf16 %v7738_v51, %v7738_v51  ;;  %v10256_v20 = vpack.c.bf16 %v6051_v15, %v6051_v15  ;;  %v7690_v30 = vadd.f32 %v12242_v17, %v14568_v4  ;;  %v7684_v44 = vpop.f32.mrb[239].mxu1 }
 0x99b   :  { %v6031_v54 = vadd.f32 %v6030_v62, %v14719_v47  ;;  %9505 = vst.msk [vmem:[%s17192_s20 + $0x374] sm:$0xf] %vm2973_vm0, %v10257_v58  ;;  %v10360_v42 = vpack.c.bf16 %v7737_v53, %v7737_v53  ;;  %v6054_v14 = vmax.f32 %v6036_v63, 0.0  ;;  %v7685_v25 = vadd.f32 %v7684_v44, %v14566_v8 }
 0x99c   :  { %9833 = vst.msk [vmem:[%s17192_s20 + $0x514] sm:$0xf] %vm2973_vm0, %v10361_v26  ;;  %9504 = vst.msk [vmem:[%s17192_s20 + $0x370] sm:$0xf] %vm2973_vm0, %v10256_v20  ;;  %v7740_v12 = vmax.f32 %v7690_v30, 0.0  ;;  %v12093_v23 = vpop.f32.mrb[208].mxu0 }
 0x99d   :  { %v6053_v43 = vmax.f32 %v6031_v54, 0.0  ;;  %9832 = vst.msk [vmem:[%s17192_s20 + $0x510] sm:$0xf] %vm2973_vm0, %v10360_v42  ;;  %v10259_v60 = vpack.c.bf16 %v6054_v14, %v6054_v14  ;;  %v7739_v40 = vmax.f32 %v7685_v25, 0.0  ;;  %v6450_v10 = vadd.f32 %v12093_v23, %v14519_v24  ;;  %v12245_v57 = vpop.f32.mrb[240].mxu1  ;;  %v6444_v29 = vpop.f32.mrb[209].mxu0 }
 0x99e   :  { %v10363_v0 = vpack.c.bf16 %v7740_v12, %v7740_v12  ;;  %v7700_v22 = vadd.f32 %v12245_v57, %v14592_v13  ;;  %v6445_v49 = vadd.f32 %v6444_v29, %v14514_v5  ;;  %v7694_v7 = vpop.f32.mrb[241].mxu1 }
 0x99f   :  { %v10258_v31 = vpack.c.bf16 %v6053_v43, %v6053_v43  ;;  %9507 = vst.msk [vmem:[%s17192_s20 + $0x37c] sm:$0xf] %vm2973_vm0, %v10259_v60  ;;  %v10362_v27 = vpack.c.bf16 %v7739_v40, %v7739_v40  ;;  %v6524_v21 = vmax.f32 %v6450_v10, 0.0  ;;  %v7695_v59 = vadd.f32 %v7694_v7, %v14585_v39 }
 0x9a0   :  { %9835 = vst.msk [vmem:[%s17192_s20 + $0x51c] sm:$0xf] %vm2973_vm0, %v10363_v0  ;;  %v7742_v19 = vmax.f32 %v7700_v22, 0.0  ;;  %v6523_v56 = vmax.f32 %v6445_v49, 0.0  ;;  %v12096_v41 = vpop.f32.mrb[210].mxu0 }
 0x9a1   :  { %9506 = vst.msk [vmem:[%s17192_s20 + $0x378] sm:$0xf] %vm2973_vm0, %v10258_v31  ;;  %9834 = vst.msk [vmem:[%s17192_s20 + $0x518] sm:$0xf] %vm2973_vm0, %v10362_v27  ;;  %v10277_v3 = vpack.c.bf16 %v6524_v21, %v6524_v21  ;;  %v7741_v1 = vmax.f32 %v7695_v59, 0.0  ;;  %v6460_v37 = vadd.f32 %v12096_v41, %v14534_v9  ;;  %v12248_v2 = vpop.f32.mrb[242].mxu1 }
 0x9a2   :  { %v6454_v46 = vpop.f32.mrb[211].mxu0  ;;  %v10365_v35 = vpack.c.bf16 %v7742_v19, %v7742_v19  ;;  %v10276_v36 = vpack.c.bf16 %v6523_v56, %v6523_v56  ;;  %v7710_v48 = vadd.f32 %v12248_v2, %v14627_v50  ;;  %v7704_v45 = vpop.f32.mrb[243].mxu1 }
 0x9a3   :  { %v6455_v28 = vadd.f32 %v6454_v46, %v14532_v33  ;;  %9589 = vst.msk [vmem:[%s17192_s20 + $0x3c4] sm:$0xf] %vm2973_vm0, %v10277_v3  ;;  %v10364_v18 = vpack.c.bf16 %v7741_v1, %v7741_v1  ;;  %v6526_v61 = vmax.f32 %v6460_v37, 0.0  ;;  %v7705_v55 = vadd.f32 %v7704_v45, %v14621_v34 }
 0x9a4   :  { %9837 = vst.msk [vmem:[%s17192_s20 + $0x524] sm:$0xf] %vm2973_vm0, %v10365_v35  ;;  %9588 = vst.msk [vmem:[%s17192_s20 + $0x3c0] sm:$0xf] %vm2973_vm0, %v10276_v36  ;;  %v7744_v51 = vmax.f32 %v7710_v48, 0.0  ;;  %v12099_v16 = vpop.f32.mrb[212].mxu0 }
 0x9a5   :  { %v6525_v15 = vmax.f32 %v6455_v28, 0.0  ;;  %9836 = vst.msk [vmem:[%s17192_s20 + $0x520] sm:$0xf] %vm2973_vm0, %v10364_v18  ;;  %v10279_v58 = vpack.c.bf16 %v6526_v61, %v6526_v61  ;;  %v7743_v53 = vmax.f32 %v7705_v55, 0.0  ;;  %v6470_v63 = vadd.f32 %v12099_v16, %v14554_v11  ;;  %v12251_v17 = vpop.f32.mrb[244].mxu1  ;;  %v6464_v62 = vpop.f32.mrb[213].mxu0 }
 0x9a6   :  { %v10367_v26 = vpack.c.bf16 %v7744_v51, %v7744_v51  ;;  %v7720_v30 = vadd.f32 %v12251_v17, %v14663_v6  ;;  %v6465_v54 = vadd.f32 %v6464_v62, %v14548_v38  ;;  %v7714_v44 = vpop.f32.mrb[245].mxu1 }
 0x9a7   :  { %v10278_v20 = vpack.c.bf16 %v6525_v15, %v6525_v15  ;;  %9591 = vst.msk [vmem:[%s17192_s20 + $0x3cc] sm:$0xf] %vm2973_vm0, %v10279_v58  ;;  %v10366_v42 = vpack.c.bf16 %v7743_v53, %v7743_v53  ;;  %v6528_v14 = vmax.f32 %v6470_v63, 0.0  ;;  %v7715_v25 = vadd.f32 %v7714_v44, %v14661_v52 }
 0x9a8   :  { %9839 = vst.msk [vmem:[%s17192_s20 + $0x52c] sm:$0xf] %vm2973_vm0, %v10367_v26  ;;  %v7746_v12 = vmax.f32 %v7720_v30, 0.0  ;;  %v6527_v43 = vmax.f32 %v6465_v54, 0.0  ;;  %v12102_v23 = vpop.f32.mrb[214].mxu0 }
 0x9a9   :  { %9590 = vst.msk [vmem:[%s17192_s20 + $0x3c8] sm:$0xf] %vm2973_vm0, %v10278_v20  ;;  %9838 = vst.msk [vmem:[%s17192_s20 + $0x528] sm:$0xf] %vm2973_vm0, %v10366_v42  ;;  %v10281_v60 = vpack.c.bf16 %v6528_v14, %v6528_v14  ;;  %v7745_v40 = vmax.f32 %v7715_v25, 0.0  ;;  %v6480_v10 = vadd.f32 %v12102_v23, %v14568_v4  ;;  %v12254_v57 = vpop.f32.mrb[246].mxu1 }
 0x9aa   :  { %v6474_v29 = vpop.f32.mrb[215].mxu0  ;;  %v10369_v0 = vpack.c.bf16 %v7746_v12, %v7746_v12  ;;  %v10280_v31 = vpack.c.bf16 %v6527_v43, %v6527_v43  ;;  %v7730_v22 = vadd.f32 %v12254_v57, %v14721_v32  ;;  %v7724_v7 = vpop.f32.mrb[247].mxu1 }
 0x9ab   :  { %v6475_v49 = vadd.f32 %v6474_v29, %v14566_v8  ;;  %9593 = vst.msk [vmem:[%s17192_s20 + $0x3d4] sm:$0xf] %vm2973_vm0, %v10281_v60  ;;  %v10368_v27 = vpack.c.bf16 %v7745_v40, %v7745_v40  ;;  %v6530_v21 = vmax.f32 %v6480_v10, 0.0  ;;  %v7725_v59 = vadd.f32 %v7724_v7, %v14719_v47 }
 0x9ac   :  { %9841 = vst.msk [vmem:[%s17192_s20 + $0x534] sm:$0xf] %vm2973_vm0, %v10369_v0  ;;  %9592 = vst.msk [vmem:[%s17192_s20 + $0x3d0] sm:$0xf] %vm2973_vm0, %v10280_v31  ;;  %v7748_v19 = vmax.f32 %v7730_v22, 0.0  ;;  %v12105_v41 = vpop.f32.mrb[216].mxu0 }
 0x9ad   :  { %v6529_v56 = vmax.f32 %v6475_v49, 0.0  ;;  %9840 = vst.msk [vmem:[%s17192_s20 + $0x530] sm:$0xf] %vm2973_vm0, %v10368_v27  ;;  %v10283_v3 = vpack.c.bf16 %v6530_v21, %v6530_v21  ;;  %v7747_v1 = vmax.f32 %v7725_v59, 0.0  ;;  %v6490_v37 = vadd.f32 %v12105_v41, %v14592_v13  ;;  %v12289_v2 = vpop.f32.mrb[248].mxu1  ;;  %v6484_v46 = vpop.f32.mrb[217].mxu0 }
 0x9ae   :  { %v10371_v35 = vpack.c.bf16 %v7748_v19, %v7748_v19  ;;  %v8144_v48 = vadd.f32 %v12289_v2, %v14519_v24  ;;  %v6485_v28 = vadd.f32 %v6484_v46, %v14585_v39  ;;  %v8138_v45 = vpop.f32.mrb[249].mxu1 }
 0x9af   :  { %v10282_v36 = vpack.c.bf16 %v6529_v56, %v6529_v56  ;;  %9595 = vst.msk [vmem:[%s17192_s20 + $0x3dc] sm:$0xf] %vm2973_vm0, %v10283_v3  ;;  %v10370_v18 = vpack.c.bf16 %v7747_v1, %v7747_v1  ;;  %v6532_v61 = vmax.f32 %v6490_v37, 0.0  ;;  %v8139_v55 = vadd.f32 %v8138_v45, %v14514_v5 }
 0x9b0   :  { %9843 = vst.msk [vmem:[%s17192_s20 + $0x53c] sm:$0xf] %vm2973_vm0, %v10371_v35  ;;  %v8218_v51 = vmax.f32 %v8144_v48, 0.0  ;;  %v6531_v15 = vmax.f32 %v6485_v28, 0.0  ;;  %v12108_v16 = vpop.f32.mrb[218].mxu0 }
 0x9b1   :  { %9594 = vst.msk [vmem:[%s17192_s20 + $0x3d8] sm:$0xf] %vm2973_vm0, %v10282_v36  ;;  %9842 = vst.msk [vmem:[%s17192_s20 + $0x538] sm:$0xf] %vm2973_vm0, %v10370_v18  ;;  %v10285_v58 = vpack.c.bf16 %v6532_v61, %v6532_v61  ;;  %v8217_v53 = vmax.f32 %v8139_v55, 0.0  ;;  %v6500_v63 = vadd.f32 %v12108_v16, %v14627_v50  ;;  %v12292_v17 = vpop.f32.mrb[250].mxu1 }
 0x9b2   :  { %v6494_v62 = vpop.f32.mrb[219].mxu0  ;;  %v10389_v26 = vpack.c.bf16 %v8218_v51, %v8218_v51  ;;  %v10284_v20 = vpack.c.bf16 %v6531_v15, %v6531_v15  ;;  %v8154_v30 = vadd.f32 %v12292_v17, %v14534_v9  ;;  %v8148_v44 = vpop.f32.mrb[251].mxu1 }
 0x9b3   :  { %v6495_v54 = vadd.f32 %v6494_v62, %v14621_v34  ;;  %9597 = vst.msk [vmem:[%s17192_s20 + $0x3e4] sm:$0xf] %vm2973_vm0, %v10285_v58  ;;  %v10388_v42 = vpack.c.bf16 %v8217_v53, %v8217_v53  ;;  %v6534_v14 = vmax.f32 %v6500_v63, 0.0  ;;  %v8149_v25 = vadd.f32 %v8148_v44, %v14532_v33 }
 0x9b4   :  { %9925 = vst.msk [vmem:[%s17192_s20 + $0x584] sm:$0xf] %vm2973_vm0, %v10389_v26  ;;  %9596 = vst.msk [vmem:[%s17192_s20 + $0x3e0] sm:$0xf] %vm2973_vm0, %v10284_v20  ;;  %v8220_v12 = vmax.f32 %v8154_v30, 0.0  ;;  %v12111_v23 = vpop.f32.mrb[220].mxu0 }
 0x9b5   :  { %v6533_v43 = vmax.f32 %v6495_v54, 0.0  ;;  %9924 = vst.msk [vmem:[%s17192_s20 + $0x580] sm:$0xf] %vm2973_vm0, %v10388_v42  ;;  %v10287_v60 = vpack.c.bf16 %v6534_v14, %v6534_v14  ;;  %v8219_v40 = vmax.f32 %v8149_v25, 0.0  ;;  %v6510_v10 = vadd.f32 %v12111_v23, %v14663_v6  ;;  %v12295_v57 = vpop.f32.mrb[252].mxu1  ;;  %v6504_v29 = vpop.f32.mrb[221].mxu0 }
 0x9b6   :  { %v10391_v0 = vpack.c.bf16 %v8220_v12, %v8220_v12  ;;  %v8164_v22 = vadd.f32 %v12295_v57, %v14554_v11  ;;  %v6505_v49 = vadd.f32 %v6504_v29, %v14661_v52  ;;  %v8158_v7 = vpop.f32.mrb[253].mxu1 }
 0x9b7   :  { %v10286_v31 = vpack.c.bf16 %v6533_v43, %v6533_v43  ;;  %9599 = vst.msk [vmem:[%s17192_s20 + $0x3ec] sm:$0xf] %vm2973_vm0, %v10287_v60  ;;  %v10390_v27 = vpack.c.bf16 %v8219_v40, %v8219_v40  ;;  %v6536_v21 = vmax.f32 %v6510_v10, 0.0  ;;  %v8159_v59 = vadd.f32 %v8158_v7, %v14548_v38 }
 0x9b8   :  { %9927 = vst.msk [vmem:[%s17192_s20 + $0x58c] sm:$0xf] %vm2973_vm0, %v10391_v0  ;;  %v8222_v19 = vmax.f32 %v8164_v22, 0.0  ;;  %v6535_v56 = vmax.f32 %v6505_v49, 0.0  ;;  %v12114_v41 = vpop.f32.mrb[222].mxu0 }
 0x9b9   :  { %9598 = vst.msk [vmem:[%s17192_s20 + $0x3e8] sm:$0xf] %vm2973_vm0, %v10286_v31  ;;  %9926 = vst.msk [vmem:[%s17192_s20 + $0x588] sm:$0xf] %vm2973_vm0, %v10390_v27  ;;  %v10289_v3 = vpack.c.bf16 %v6536_v21, %v6536_v21  ;;  %v8221_v1 = vmax.f32 %v8159_v59, 0.0  ;;  %v6520_v37 = vadd.f32 %v12114_v41, %v14721_v32  ;;  %v12298_v2 = vpop.f32.mrb[254].mxu1 }
 0x9ba   :  { %v6514_v46 = vpop.f32.mrb[223].mxu0  ;;  %v10393_v35 = vpack.c.bf16 %v8222_v19, %v8222_v19  ;;  %v10288_v36 = vpack.c.bf16 %v6535_v56, %v6535_v56  ;;  %v8174_v48 = vadd.f32 %v12298_v2, %v14568_v4  ;;  %v8168_v45 = vpop.f32.mrb[255].mxu1 }
 0x9bb   :  { %v6515_v28 = vadd.f32 %v6514_v46, %v14719_v47  ;;  %9601 = vst.msk [vmem:[%s17192_s20 + $0x3f4] sm:$0xf] %vm2973_vm0, %v10289_v3  ;;  %v10392_v18 = vpack.c.bf16 %v8221_v1, %v8221_v1  ;;  %v6538_v61 = vmax.f32 %v6520_v37, 0.0  ;;  %v8169_v55 = vadd.f32 %v8168_v45, %v14566_v8 }
 0x9bc   :  { %9929 = vst.msk [vmem:[%s17192_s20 + $0x594] sm:$0xf] %vm2973_vm0, %v10393_v35  ;;  %9600 = vst.msk [vmem:[%s17192_s20 + $0x3f0] sm:$0xf] %vm2973_vm0, %v10288_v36  ;;  %v8224_v51 = vmax.f32 %v8174_v48, 0.0  ;;  %v12149_v16 = vpop.f32.mrb[224].mxu0 }
 0x9bd   :  { %v6537_v15 = vmax.f32 %v6515_v28, 0.0  ;;  %9928 = vst.msk [vmem:[%s17192_s20 + $0x590] sm:$0xf] %vm2973_vm0, %v10392_v18  ;;  %v10291_v58 = vpack.c.bf16 %v6538_v61, %v6538_v61  ;;  %v8223_v53 = vmax.f32 %v8169_v55, 0.0  ;;  %v6934_v63 = vadd.f32 %v12149_v16, %v14519_v24  ;;  %v12301_v17 = vpop.f32.mrb[0].mxu1  ;;  %v6928_v62 = vpop.f32.mrb[225].mxu0 }
 0x9be   :  { %v10395_v26 = vpack.c.bf16 %v8224_v51, %v8224_v51  ;;  %v8184_v30 = vadd.f32 %v12301_v17, %v14592_v13  ;;  %v6929_v54 = vadd.f32 %v6928_v62, %v14514_v5  ;;  %v8178_v44 = vpop.f32.mrb[1].mxu1 }
 0x9bf   :  { %v10290_v20 = vpack.c.bf16 %v6537_v15, %v6537_v15  ;;  %9603 = vst.msk [vmem:[%s17192_s20 + $0x3fc] sm:$0xf] %vm2973_vm0, %v10291_v58  ;;  %v10394_v42 = vpack.c.bf16 %v8223_v53, %v8223_v53  ;;  %v7008_v14 = vmax.f32 %v6934_v63, 0.0  ;;  %v8179_v25 = vadd.f32 %v8178_v44, %v14585_v39 }
 0x9c0   :  { %9931 = vst.msk [vmem:[%s17192_s20 + $0x59c] sm:$0xf] %vm2973_vm0, %v10395_v26  ;;  %v8226_v12 = vmax.f32 %v8184_v30, 0.0  ;;  %v7007_v43 = vmax.f32 %v6929_v54, 0.0  ;;  %v12152_v23 = vpop.f32.mrb[226].mxu0 }
 0x9c1   :  { %9602 = vst.msk [vmem:[%s17192_s20 + $0x3f8] sm:$0xf] %vm2973_vm0, %v10290_v20  ;;  %9930 = vst.msk [vmem:[%s17192_s20 + $0x598] sm:$0xf] %vm2973_vm0, %v10394_v42  ;;  %v10309_v60 = vpack.c.bf16 %v7008_v14, %v7008_v14  ;;  %v8225_v40 = vmax.f32 %v8179_v25, 0.0  ;;  %v6944_v10 = vadd.f32 %v12152_v23, %v14534_v9  ;;  %v12304_v57 = vpop.f32.mrb[2].mxu1 }
 0x9c2   :  { %v6938_v29 = vpop.f32.mrb[227].mxu0  ;;  %v10397_v0 = vpack.c.bf16 %v8226_v12, %v8226_v12  ;;  %v10308_v31 = vpack.c.bf16 %v7007_v43, %v7007_v43  ;;  %v8194_v22 = vadd.f32 %v12304_v57, %v14627_v50  ;;  %v8188_v7 = vpop.f32.mrb[3].mxu1 }
 0x9c3   :  { %v6939_v49 = vadd.f32 %v6938_v29, %v14532_v33  ;;  %9685 = vst.msk [vmem:[%s17192_s20 + $0x444] sm:$0xf] %vm2973_vm0, %v10309_v60  ;;  %v10396_v27 = vpack.c.bf16 %v8225_v40, %v8225_v40  ;;  %v7010_v21 = vmax.f32 %v6944_v10, 0.0  ;;  %v8189_v59 = vadd.f32 %v8188_v7, %v14621_v34 }
 0x9c4   :  { %9933 = vst.msk [vmem:[%s17192_s20 + $0x5a4] sm:$0xf] %vm2973_vm0, %v10397_v0  ;;  %9684 = vst.msk [vmem:[%s17192_s20 + $0x440] sm:$0xf] %vm2973_vm0, %v10308_v31  ;;  %v8228_v19 = vmax.f32 %v8194_v22, 0.0  ;;  %v12155_v41 = vpop.f32.mrb[228].mxu0 }
 0x9c5   :  { %v7009_v56 = vmax.f32 %v6939_v49, 0.0  ;;  %9932 = vst.msk [vmem:[%s17192_s20 + $0x5a0] sm:$0xf] %vm2973_vm0, %v10396_v27  ;;  %v10311_v3 = vpack.c.bf16 %v7010_v21, %v7010_v21  ;;  %v8227_v1 = vmax.f32 %v8189_v59, 0.0  ;;  %v6954_v37 = vadd.f32 %v12155_v41, %v14554_v11  ;;  %v12307_v2 = vpop.f32.mrb[4].mxu1  ;;  %v6948_v46 = vpop.f32.mrb[229].mxu0 }
 0x9c6   :  { %v10399_v35 = vpack.c.bf16 %v8228_v19, %v8228_v19  ;;  %v8204_v48 = vadd.f32 %v12307_v2, %v14663_v6  ;;  %v6949_v28 = vadd.f32 %v6948_v46, %v14548_v38  ;;  %v8198_v45 = vpop.f32.mrb[5].mxu1 }
 0x9c7   :  { %v10310_v36 = vpack.c.bf16 %v7009_v56, %v7009_v56  ;;  %9687 = vst.msk [vmem:[%s17192_s20 + $0x44c] sm:$0xf] %vm2973_vm0, %v10311_v3  ;;  %v10398_v18 = vpack.c.bf16 %v8227_v1, %v8227_v1  ;;  %v7012_v61 = vmax.f32 %v6954_v37, 0.0  ;;  %v8199_v55 = vadd.f32 %v8198_v45, %v14661_v52 }
 0x9c8   :  { %9935 = vst.msk [vmem:[%s17192_s20 + $0x5ac] sm:$0xf] %vm2973_vm0, %v10399_v35  ;;  %v8230_v51 = vmax.f32 %v8204_v48, 0.0  ;;  %v7011_v15 = vmax.f32 %v6949_v28, 0.0  ;;  %v12158_v16 = vpop.f32.mrb[230].mxu0 }
 0x9c9   :  { %9686 = vst.msk [vmem:[%s17192_s20 + $0x448] sm:$0xf] %vm2973_vm0, %v10310_v36  ;;  %9934 = vst.msk [vmem:[%s17192_s20 + $0x5a8] sm:$0xf] %vm2973_vm0, %v10398_v18  ;;  %v10313_v58 = vpack.c.bf16 %v7012_v61, %v7012_v61  ;;  %v8229_v53 = vmax.f32 %v8199_v55, 0.0  ;;  %v6964_v63 = vadd.f32 %v12158_v16, %v14568_v4  ;;  %v12310_v17 = vpop.f32.mrb[6].mxu1 }
 0x9ca   :  { %v6958_v62 = vpop.f32.mrb[231].mxu0  ;;  %v10401_v26 = vpack.c.bf16 %v8230_v51, %v8230_v51  ;;  %v10312_v20 = vpack.c.bf16 %v7011_v15, %v7011_v15  ;;  %v8214_v30 = vadd.f32 %v12310_v17, %v14721_v32  ;;  %v8208_v44 = vpop.f32.mrb[7].mxu1 }
 0x9cb   :  { %v6959_v54 = vadd.f32 %v6958_v62, %v14566_v8  ;;  %9689 = vst.msk [vmem:[%s17192_s20 + $0x454] sm:$0xf] %vm2973_vm0, %v10313_v58  ;;  %v10400_v42 = vpack.c.bf16 %v8229_v53, %v8229_v53  ;;  %v7014_v14 = vmax.f32 %v6964_v63, 0.0  ;;  %v8209_v25 = vadd.f32 %v8208_v44, %v14719_v47 }
 0x9cc   :  { %9937 = vst.msk [vmem:[%s17192_s20 + $0x5b4] sm:$0xf] %vm2973_vm0, %v10401_v26  ;;  %9688 = vst.msk [vmem:[%s17192_s20 + $0x450] sm:$0xf] %vm2973_vm0, %v10312_v20  ;;  %v8232_v12 = vmax.f32 %v8214_v30, 0.0  ;;  %v12161_v23 = vpop.f32.mrb[232].mxu0 }
 0x9cd   :  { %v7013_v43 = vmax.f32 %v6959_v54, 0.0  ;;  %9936 = vst.msk [vmem:[%s17192_s20 + $0x5b0] sm:$0xf] %vm2973_vm0, %v10400_v42  ;;  %v10315_v60 = vpack.c.bf16 %v7014_v14, %v7014_v14  ;;  %v8231_v40 = vmax.f32 %v8209_v25, 0.0  ;;  %v6974_v10 = vadd.f32 %v12161_v23, %v14592_v13  ;;  %v12345_v57 = vpop.f32.mrb[8].mxu1  ;;  %v6968_v29 = vpop.f32.mrb[233].mxu0 }
 0x9ce   :  { %v10403_v0 = vpack.c.bf16 %v8232_v12, %v8232_v12  ;;  %v8628_v22 = vadd.f32 %v12345_v57, %v14519_v24  ;;  %v6969_v49 = vadd.f32 %v6968_v29, %v14585_v39  ;;  %v8622_v7 = vpop.f32.mrb[9].mxu1 }
 0x9cf   :  { %v10314_v31 = vpack.c.bf16 %v7013_v43, %v7013_v43  ;;  %9691 = vst.msk [vmem:[%s17192_s20 + $0x45c] sm:$0xf] %vm2973_vm0, %v10315_v60  ;;  %v10402_v27 = vpack.c.bf16 %v8231_v40, %v8231_v40  ;;  %v7016_v21 = vmax.f32 %v6974_v10, 0.0  ;;  %v8623_v59 = vadd.f32 %v8622_v7, %v14514_v5 }
 0x9d0   :  { %9939 = vst.msk [vmem:[%s17192_s20 + $0x5bc] sm:$0xf] %vm2973_vm0, %v10403_v0  ;;  %v8702_v19 = vmax.f32 %v8628_v22, 0.0  ;;  %v7015_v56 = vmax.f32 %v6969_v49, 0.0  ;;  %v12164_v41 = vpop.f32.mrb[234].mxu0 }
 0x9d1   :  { %9690 = vst.msk [vmem:[%s17192_s20 + $0x458] sm:$0xf] %vm2973_vm0, %v10314_v31  ;;  %9938 = vst.msk [vmem:[%s17192_s20 + $0x5b8] sm:$0xf] %vm2973_vm0, %v10402_v27  ;;  %v10317_v3 = vpack.c.bf16 %v7016_v21, %v7016_v21  ;;  %v8701_v1 = vmax.f32 %v8623_v59, 0.0  ;;  %v6984_v37 = vadd.f32 %v12164_v41, %v14627_v50  ;;  %v12348_v2 = vpop.f32.mrb[10].mxu1 }
 0x9d2   :  { %v6978_v46 = vpop.f32.mrb[235].mxu0  ;;  %v10421_v35 = vpack.c.bf16 %v8702_v19, %v8702_v19  ;;  %v10316_v36 = vpack.c.bf16 %v7015_v56, %v7015_v56  ;;  %v8638_v48 = vadd.f32 %v12348_v2, %v14534_v9  ;;  %v8632_v45 = vpop.f32.mrb[11].mxu1 }
 0x9d3   :  { %v6979_v28 = vadd.f32 %v6978_v46, %v14621_v34  ;;  %9693 = vst.msk [vmem:[%s17192_s20 + $0x464] sm:$0xf] %vm2973_vm0, %v10317_v3  ;;  %v10420_v18 = vpack.c.bf16 %v8701_v1, %v8701_v1  ;;  %v7018_v61 = vmax.f32 %v6984_v37, 0.0  ;;  %v8633_v55 = vadd.f32 %v8632_v45, %v14532_v33 }
 0x9d4   :  { %10021 = vst.msk [vmem:[%s17192_s20 + $0x604] sm:$0xf] %vm2973_vm0, %v10421_v35  ;;  %9692 = vst.msk [vmem:[%s17192_s20 + $0x460] sm:$0xf] %vm2973_vm0, %v10316_v36  ;;  %v8704_v51 = vmax.f32 %v8638_v48, 0.0  ;;  %v12167_v16 = vpop.f32.mrb[236].mxu0 }
 0x9d5   :  { %v7017_v15 = vmax.f32 %v6979_v28, 0.0  ;;  %10020 = vst.msk [vmem:[%s17192_s20 + $0x600] sm:$0xf] %vm2973_vm0, %v10420_v18  ;;  %v10319_v58 = vpack.c.bf16 %v7018_v61, %v7018_v61  ;;  %v8703_v53 = vmax.f32 %v8633_v55, 0.0  ;;  %v6994_v63 = vadd.f32 %v12167_v16, %v14663_v6  ;;  %v12351_v17 = vpop.f32.mrb[12].mxu1  ;;  %v6988_v62 = vpop.f32.mrb[237].mxu0 }
 0x9d6   :  { %v10423_v26 = vpack.c.bf16 %v8704_v51, %v8704_v51  ;;  %v8648_v30 = vadd.f32 %v12351_v17, %v14554_v11  ;;  %v6989_v54 = vadd.f32 %v6988_v62, %v14661_v52  ;;  %v8642_v44 = vpop.f32.mrb[13].mxu1 }
 0x9d7   :  { %v10318_v20 = vpack.c.bf16 %v7017_v15, %v7017_v15  ;;  %9695 = vst.msk [vmem:[%s17192_s20 + $0x46c] sm:$0xf] %vm2973_vm0, %v10319_v58  ;;  %v10422_v42 = vpack.c.bf16 %v8703_v53, %v8703_v53  ;;  %v7020_v14 = vmax.f32 %v6994_v63, 0.0  ;;  %v8643_v25 = vadd.f32 %v8642_v44, %v14548_v38 }
 0x9d8   :  { %10023 = vst.msk [vmem:[%s17192_s20 + $0x60c] sm:$0xf] %vm2973_vm0, %v10423_v26  ;;  %v8706_v12 = vmax.f32 %v8648_v30, 0.0  ;;  %v7019_v43 = vmax.f32 %v6989_v54, 0.0  ;;  %v12170_v23 = vpop.f32.mrb[238].mxu0 }
 0x9d9   :  { %9694 = vst.msk [vmem:[%s17192_s20 + $0x468] sm:$0xf] %vm2973_vm0, %v10318_v20  ;;  %10022 = vst.msk [vmem:[%s17192_s20 + $0x608] sm:$0xf] %vm2973_vm0, %v10422_v42  ;;  %v10321_v60 = vpack.c.bf16 %v7020_v14, %v7020_v14  ;;  %v8705_v40 = vmax.f32 %v8643_v25, 0.0  ;;  %v7004_v10 = vadd.f32 %v12170_v23, %v14721_v32  ;;  %v12354_v57 = vpop.f32.mrb[14].mxu1 }
 0x9da   :  { %v6998_v29 = vpop.f32.mrb[239].mxu0  ;;  %v10425_v0 = vpack.c.bf16 %v8706_v12, %v8706_v12  ;;  %v10320_v31 = vpack.c.bf16 %v7019_v43, %v7019_v43  ;;  %v8658_v22 = vadd.f32 %v12354_v57, %v14568_v4  ;;  %v8652_v7 = vpop.f32.mrb[15].mxu1 }
 0x9db   :  { %v6999_v49 = vadd.f32 %v6998_v29, %v14719_v47  ;;  %9697 = vst.msk [vmem:[%s17192_s20 + $0x474] sm:$0xf] %vm2973_vm0, %v10321_v60  ;;  %v10424_v27 = vpack.c.bf16 %v8705_v40, %v8705_v40  ;;  %v7022_v21 = vmax.f32 %v7004_v10, 0.0  ;;  %v8653_v59 = vadd.f32 %v8652_v7, %v14566_v8 }
 0x9dc   :  { %10025 = vst.msk [vmem:[%s17192_s20 + $0x614] sm:$0xf] %vm2973_vm0, %v10425_v0  ;;  %9696 = vst.msk [vmem:[%s17192_s20 + $0x470] sm:$0xf] %vm2973_vm0, %v10320_v31  ;;  %v8708_v19 = vmax.f32 %v8658_v22, 0.0  ;;  %v12205_v41 = vpop.f32.mrb[240].mxu0 }
 0x9dd   :  { %v7021_v56 = vmax.f32 %v6999_v49, 0.0  ;;  %10024 = vst.msk [vmem:[%s17192_s20 + $0x610] sm:$0xf] %vm2973_vm0, %v10424_v27  ;;  %v10323_v3 = vpack.c.bf16 %v7022_v21, %v7022_v21  ;;  %v8707_v1 = vmax.f32 %v8653_v59, 0.0  ;;  %v7418_v37 = vadd.f32 %v12205_v41, %v14519_v24  ;;  %v12357_v2 = vpop.f32.mrb[16].mxu1  ;;  %v7412_v46 = vpop.f32.mrb[241].mxu0 }
 0x9de   :  { %v10427_v35 = vpack.c.bf16 %v8708_v19, %v8708_v19  ;;  %v8668_v48 = vadd.f32 %v12357_v2, %v14592_v13  ;;  %v7413_v28 = vadd.f32 %v7412_v46, %v14514_v5  ;;  %v8662_v45 = vpop.f32.mrb[17].mxu1 }
 0x9df   :  { %v10322_v36 = vpack.c.bf16 %v7021_v56, %v7021_v56  ;;  %9699 = vst.msk [vmem:[%s17192_s20 + $0x47c] sm:$0xf] %vm2973_vm0, %v10323_v3  ;;  %v10426_v18 = vpack.c.bf16 %v8707_v1, %v8707_v1  ;;  %v7492_v61 = vmax.f32 %v7418_v37, 0.0  ;;  %v8663_v55 = vadd.f32 %v8662_v45, %v14585_v39 }
 0x9e0   :  { %10027 = vst.msk [vmem:[%s17192_s20 + $0x61c] sm:$0xf] %vm2973_vm0, %v10427_v35  ;;  %v8710_v51 = vmax.f32 %v8668_v48, 0.0  ;;  %v7491_v15 = vmax.f32 %v7413_v28, 0.0  ;;  %v12208_v16 = vpop.f32.mrb[242].mxu0 }
 0x9e1   :  { %9698 = vst.msk [vmem:[%s17192_s20 + $0x478] sm:$0xf] %vm2973_vm0, %v10322_v36  ;;  %10026 = vst.msk [vmem:[%s17192_s20 + $0x618] sm:$0xf] %vm2973_vm0, %v10426_v18  ;;  %v10341_v58 = vpack.c.bf16 %v7492_v61, %v7492_v61  ;;  %v8709_v53 = vmax.f32 %v8663_v55, 0.0  ;;  %v7428_v63 = vadd.f32 %v12208_v16, %v14534_v9  ;;  %v12360_v17 = vpop.f32.mrb[18].mxu1 }
 0x9e2   :  { %v7422_v62 = vpop.f32.mrb[243].mxu0  ;;  %v10429_v26 = vpack.c.bf16 %v8710_v51, %v8710_v51  ;;  %v10340_v20 = vpack.c.bf16 %v7491_v15, %v7491_v15  ;;  %v8678_v30 = vadd.f32 %v12360_v17, %v14627_v50  ;;  %v8672_v44 = vpop.f32.mrb[19].mxu1 }
 0x9e3   :  { %v7423_v54 = vadd.f32 %v7422_v62, %v14532_v33  ;;  %9781 = vst.msk [vmem:[%s17192_s20 + $0x4c4] sm:$0xf] %vm2973_vm0, %v10341_v58  ;;  %v10428_v42 = vpack.c.bf16 %v8709_v53, %v8709_v53  ;;  %v7494_v14 = vmax.f32 %v7428_v63, 0.0  ;;  %v8673_v25 = vadd.f32 %v8672_v44, %v14621_v34 }
 0x9e4   :  { %10029 = vst.msk [vmem:[%s17192_s20 + $0x624] sm:$0xf] %vm2973_vm0, %v10429_v26  ;;  %9780 = vst.msk [vmem:[%s17192_s20 + $0x4c0] sm:$0xf] %vm2973_vm0, %v10340_v20  ;;  %v8712_v12 = vmax.f32 %v8678_v30, 0.0  ;;  %v12211_v23 = vpop.f32.mrb[244].mxu0 }
 0x9e5   :  { %v7493_v43 = vmax.f32 %v7423_v54, 0.0  ;;  %10028 = vst.msk [vmem:[%s17192_s20 + $0x620] sm:$0xf] %vm2973_vm0, %v10428_v42  ;;  %v10343_v60 = vpack.c.bf16 %v7494_v14, %v7494_v14  ;;  %v8711_v40 = vmax.f32 %v8673_v25, 0.0  ;;  %v7438_v10 = vadd.f32 %v12211_v23, %v14554_v11  ;;  %v12363_v57 = vpop.f32.mrb[20].mxu1  ;;  %v7432_v29 = vpop.f32.mrb[245].mxu0 }
 0x9e6   :  { %v10431_v0 = vpack.c.bf16 %v8712_v12, %v8712_v12  ;;  %v8688_v22 = vadd.f32 %v12363_v57, %v14663_v6  ;;  %v7433_v49 = vadd.f32 %v7432_v29, %v14548_v38  ;;  %v8682_v7 = vpop.f32.mrb[21].mxu1 }
 0x9e7   :  { %v10342_v31 = vpack.c.bf16 %v7493_v43, %v7493_v43  ;;  %9783 = vst.msk [vmem:[%s17192_s20 + $0x4cc] sm:$0xf] %vm2973_vm0, %v10343_v60  ;;  %v10430_v27 = vpack.c.bf16 %v8711_v40, %v8711_v40  ;;  %v7496_v21 = vmax.f32 %v7438_v10, 0.0  ;;  %v8683_v59 = vadd.f32 %v8682_v7, %v14661_v52 }
 0x9e8   :  { %10031 = vst.msk [vmem:[%s17192_s20 + $0x62c] sm:$0xf] %vm2973_vm0, %v10431_v0  ;;  %v8714_v19 = vmax.f32 %v8688_v22, 0.0  ;;  %v7495_v56 = vmax.f32 %v7433_v49, 0.0  ;;  %v12214_v41 = vpop.f32.mrb[246].mxu0 }
 0x9e9   :  { %9782 = vst.msk [vmem:[%s17192_s20 + $0x4c8] sm:$0xf] %vm2973_vm0, %v10342_v31  ;;  %10030 = vst.msk [vmem:[%s17192_s20 + $0x628] sm:$0xf] %vm2973_vm0, %v10430_v27  ;;  %v10345_v3 = vpack.c.bf16 %v7496_v21, %v7496_v21  ;;  %v8713_v1 = vmax.f32 %v8683_v59, 0.0  ;;  %v7448_v37 = vadd.f32 %v12214_v41, %v14568_v4  ;;  %v12366_v2 = vpop.f32.mrb[22].mxu1 }
 0x9ea   :  { %v7442_v46 = vpop.f32.mrb[247].mxu0  ;;  %v10433_v35 = vpack.c.bf16 %v8714_v19, %v8714_v19  ;;  %v10344_v36 = vpack.c.bf16 %v7495_v56, %v7495_v56  ;;  %v8698_v48 = vadd.f32 %v12366_v2, %v14721_v32  ;;  %v8692_v45 = vpop.f32.mrb[23].mxu1 }
 0x9eb   :  { %v7443_v28 = vadd.f32 %v7442_v46, %v14566_v8  ;;  %9785 = vst.msk [vmem:[%s17192_s20 + $0x4d4] sm:$0xf] %vm2973_vm0, %v10345_v3  ;;  %v10432_v18 = vpack.c.bf16 %v8713_v1, %v8713_v1  ;;  %v7498_v61 = vmax.f32 %v7448_v37, 0.0  ;;  %v8693_v55 = vadd.f32 %v8692_v45, %v14719_v47 }
 0x9ec   :  { %10033 = vst.msk [vmem:[%s17192_s20 + $0x634] sm:$0xf] %vm2973_vm0, %v10433_v35  ;;  %9784 = vst.msk [vmem:[%s17192_s20 + $0x4d0] sm:$0xf] %vm2973_vm0, %v10344_v36  ;;  %v8716_v51 = vmax.f32 %v8698_v48, 0.0  ;;  %v12217_v16 = vpop.f32.mrb[248].mxu0 }
 0x9ed   :  { %v7497_v15 = vmax.f32 %v7443_v28, 0.0  ;;  %10032 = vst.msk [vmem:[%s17192_s20 + $0x630] sm:$0xf] %vm2973_vm0, %v10432_v18  ;;  %v10347_v58 = vpack.c.bf16 %v7498_v61, %v7498_v61  ;;  %v8715_v53 = vmax.f32 %v8693_v55, 0.0  ;;  %v7458_v63 = vadd.f32 %v12217_v16, %v14592_v13  ;;  %v7452_v17 = vpop.f32.mrb[249].mxu0 }
 0x9ee   :  { %v10435_v62 = vpack.c.bf16 %v8716_v51, %v8716_v51  ;;  %v7453_v20 = vadd.f32 %v7452_v17, %v14585_v39 }
 0x9ef   :  { %v10346_v26 = vpack.c.bf16 %v7497_v15, %v7497_v15  ;;  %9787 = vst.msk [vmem:[%s17192_s20 + $0x4dc] sm:$0xf] %vm2973_vm0, %v10347_v58  ;;  %v10434_v30 = vpack.c.bf16 %v8715_v53, %v8715_v53  ;;  %v7500_v54 = vmax.f32 %v7458_v63, 0.0 }
 0x9f0   :  { %10035 = vst.msk [vmem:[%s17192_s20 + $0x63c] sm:$0xf] %vm2973_vm0, %v10435_v62  ;;  %v7499_v44 = vmax.f32 %v7453_v20, 0.0  ;;  %v12220_v42 = vpop.f32.mrb[250].mxu0 }
 0x9f1   :  { %9786 = vst.msk [vmem:[%s17192_s20 + $0x4d8] sm:$0xf] %vm2973_vm0, %v10346_v26  ;;  %10034 = vst.msk [vmem:[%s17192_s20 + $0x638] sm:$0xf] %vm2973_vm0, %v10434_v30  ;;  %v10349_v14 = vpack.c.bf16 %v7500_v54, %v7500_v54  ;;  %v7468_v25 = vadd.f32 %v12220_v42, %v14627_v50  ;;  %v7462_v12 = vpop.f32.mrb[251].mxu0 }
 0x9f2   :  { %v10348_v43 = vpack.c.bf16 %v7499_v44, %v7499_v44  ;;  %v7463_v23 = vadd.f32 %v7462_v12, %v14621_v34 }
 0x9f3   :  { %9789 = vst.msk [vmem:[%s17192_s20 + $0x4e4] sm:$0xf] %vm2973_vm0, %v10349_v14  ;;  %v7502_v60 = vmax.f32 %v7468_v25, 0.0 }
 0x9f4   :  { %9788 = vst.msk [vmem:[%s17192_s20 + $0x4e0] sm:$0xf] %vm2973_vm0, %v10348_v43  ;;  %v7501_v40 = vmax.f32 %v7463_v23, 0.0  ;;  %v12223_v10 = vpop.f32.mrb[252].mxu0 }
 0x9f5   :  { %v10351_v57 = vpack.c.bf16 %v7502_v60, %v7502_v60  ;;  %v7478_v29 = vadd.f32 %v12223_v10, %v14663_v6  ;;  %v7472_v0 = vpop.f32.mrb[253].mxu0 }
 0x9f6   :  { %v10350_v31 = vpack.c.bf16 %v7501_v40, %v7501_v40  ;;  %v7473_v22 = vadd.f32 %v7472_v0, %v14661_v52 }
 0x9f7   :  { %9791 = vst.msk [vmem:[%s17192_s20 + $0x4ec] sm:$0xf] %vm2973_vm0, %v10351_v57  ;;  %v7504_v49 = vmax.f32 %v7478_v29, 0.0 }
 0x9f8   :  { %9790 = vst.msk [vmem:[%s17192_s20 + $0x4e8] sm:$0xf] %vm2973_vm0, %v10350_v31  ;;  %v7503_v7 = vmax.f32 %v7473_v22, 0.0  ;;  %v12226_v27 = vpop.f32.mrb[254].mxu0 }
 0x9f9   :  { %v10353_v21 = vpack.c.bf16 %v7504_v49, %v7504_v49  ;;  %v7488_v59 = vadd.f32 %v12226_v27, %v14721_v32  ;;  %v7482_v19 = vpop.f32.mrb[255].mxu0 }
 0x9fa   :  { %v10352_v56 = vpack.c.bf16 %v7503_v7, %v7503_v7  ;;  %v7483_v41 = vadd.f32 %v7482_v19, %v14719_v47 }
 0x9fb   :  { %9793 = vst.msk [vmem:[%s17192_s20 + $0x4f4] sm:$0xf] %vm2973_vm0, %v10353_v21  ;;  %v7506_v3 = vmax.f32 %v7488_v59, 0.0 }
 0x9fc   :  { %9792 = vst.msk [vmem:[%s17192_s20 + $0x4f0] sm:$0xf] %vm2973_vm0, %v10352_v56  ;;  %v7505_v1 = vmax.f32 %v7483_v41, 0.0  ;;  %v12261_v37 = vpop.f32.mrb[0].mxu0 }
 0x9fd   :  { %v10355_v2 = vpack.c.bf16 %v7506_v3, %v7506_v3  ;;  %v7902_v46 = vadd.f32 %v12261_v37, %v14519_v24  ;;  %v7896_v35 = vpop.f32.mrb[1].mxu0 }
 0x9fe   :  { %v10354_v36 = vpack.c.bf16 %v7505_v1, %v7505_v1  ;;  %v7897_v48 = vadd.f32 %v7896_v35, %v14514_v5 }
 0x9ff   :  { %9795 = vst.msk [vmem:[%s17192_s20 + $0x4fc] sm:$0xf] %vm2973_vm0, %v10355_v2  ;;  %v7976_v28 = vmax.f32 %v7902_v46, 0.0 }
 0xa00   :  { %9794 = vst.msk [vmem:[%s17192_s20 + $0x4f8] sm:$0xf] %vm2973_vm0, %v10354_v36  ;;  %v7975_v45 = vmax.f32 %v7897_v48, 0.0  ;;  %v12264_v18 = vpop.f32.mrb[2].mxu0 }
 0xa01   :  { %v10373_v61 = vpack.c.bf16 %v7976_v28, %v7976_v28  ;;  %v7912_v55 = vadd.f32 %v12264_v18, %v14534_v9  ;;  %v7906_v51 = vpop.f32.mrb[3].mxu0 }
 0xa02   :  { %v10372_v15 = vpack.c.bf16 %v7975_v45, %v7975_v45  ;;  %v7907_v16 = vadd.f32 %v7906_v51, %v14532_v33 }
 0xa03   :  { %9877 = vst.msk [vmem:[%s17192_s20 + $0x544] sm:$0xf] %vm2973_vm0, %v10373_v61  ;;  %v7978_v58 = vmax.f32 %v7912_v55, 0.0 }
 0xa04   :  { %9876 = vst.msk [vmem:[%s17192_s20 + $0x540] sm:$0xf] %vm2973_vm0, %v10372_v15  ;;  %v7977_v53 = vmax.f32 %v7907_v16, 0.0  ;;  %v12267_v63 = vpop.f32.mrb[4].mxu0 }
 0xa05   :  { %v10375_v17 = vpack.c.bf16 %v7978_v58, %v7978_v58  ;;  %v7922_v62 = vadd.f32 %v12267_v63, %v14554_v11  ;;  %v7916_v26 = vpop.f32.mrb[5].mxu0 }
 0xa06   :  { %v10374_v20 = vpack.c.bf16 %v7977_v53, %v7977_v53  ;;  %v7917_v30 = vadd.f32 %v7916_v26, %v14548_v38 }
 0xa07   :  { %9879 = vst.msk [vmem:[%s17192_s20 + $0x54c] sm:$0xf] %vm2973_vm0, %v10375_v17  ;;  %v7980_v54 = vmax.f32 %v7922_v62, 0.0 }
 0xa08   :  { %9878 = vst.msk [vmem:[%s17192_s20 + $0x548] sm:$0xf] %vm2973_vm0, %v10374_v20  ;;  %v7979_v44 = vmax.f32 %v7917_v30, 0.0  ;;  %v12270_v42 = vpop.f32.mrb[6].mxu0 }
 0xa09   :  { %v10377_v14 = vpack.c.bf16 %v7980_v54, %v7980_v54  ;;  %v7932_v25 = vadd.f32 %v12270_v42, %v14568_v4  ;;  %v7926_v12 = vpop.f32.mrb[7].mxu0 }
 0xa0a   :  { %v10376_v43 = vpack.c.bf16 %v7979_v44, %v7979_v44  ;;  %v7927_v23 = vadd.f32 %v7926_v12, %v14566_v8 }
 0xa0b   :  { %9881 = vst.msk [vmem:[%s17192_s20 + $0x554] sm:$0xf] %vm2973_vm0, %v10377_v14  ;;  %v7982_v60 = vmax.f32 %v7932_v25, 0.0 }
 0xa0c   :  { %9880 = vst.msk [vmem:[%s17192_s20 + $0x550] sm:$0xf] %vm2973_vm0, %v10376_v43  ;;  %v7981_v40 = vmax.f32 %v7927_v23, 0.0  ;;  %v12273_v10 = vpop.f32.mrb[8].mxu0 }
 0xa0d   :  { %v10379_v57 = vpack.c.bf16 %v7982_v60, %v7982_v60  ;;  %v7942_v29 = vadd.f32 %v12273_v10, %v14592_v13  ;;  %v7936_v0 = vpop.f32.mrb[9].mxu0 }
 0xa0e   :  { %v10378_v31 = vpack.c.bf16 %v7981_v40, %v7981_v40  ;;  %v7937_v22 = vadd.f32 %v7936_v0, %v14585_v39 }
 0xa0f   :  { %9883 = vst.msk [vmem:[%s17192_s20 + $0x55c] sm:$0xf] %vm2973_vm0, %v10379_v57  ;;  %v7984_v49 = vmax.f32 %v7942_v29, 0.0 }
 0xa10   :  { %9882 = vst.msk [vmem:[%s17192_s20 + $0x558] sm:$0xf] %vm2973_vm0, %v10378_v31  ;;  %v7983_v7 = vmax.f32 %v7937_v22, 0.0  ;;  %v12276_v27 = vpop.f32.mrb[10].mxu0 }
 0xa11   :  { %v10381_v21 = vpack.c.bf16 %v7984_v49, %v7984_v49  ;;  %v7952_v59 = vadd.f32 %v12276_v27, %v14627_v50  ;;  %v7946_v19 = vpop.f32.mrb[11].mxu0 }
 0xa12   :  { %v10380_v56 = vpack.c.bf16 %v7983_v7, %v7983_v7  ;;  %v7947_v41 = vadd.f32 %v7946_v19, %v14621_v34 }
 0xa13   :  { %9885 = vst.msk [vmem:[%s17192_s20 + $0x564] sm:$0xf] %vm2973_vm0, %v10381_v21  ;;  %v7986_v3 = vmax.f32 %v7952_v59, 0.0 }
 0xa14   :  { %9884 = vst.msk [vmem:[%s17192_s20 + $0x560] sm:$0xf] %vm2973_vm0, %v10380_v56  ;;  %v7985_v1 = vmax.f32 %v7947_v41, 0.0  ;;  %v12279_v37 = vpop.f32.mrb[12].mxu0 }
 0xa15   :  { %v10383_v2 = vpack.c.bf16 %v7986_v3, %v7986_v3  ;;  %v7962_v46 = vadd.f32 %v12279_v37, %v14663_v6  ;;  %v7956_v35 = vpop.f32.mrb[13].mxu0 }
 0xa16   :  { %v10382_v36 = vpack.c.bf16 %v7985_v1, %v7985_v1  ;;  %v7957_v48 = vadd.f32 %v7956_v35, %v14661_v52 }
 0xa17   :  { %9887 = vst.msk [vmem:[%s17192_s20 + $0x56c] sm:$0xf] %vm2973_vm0, %v10383_v2  ;;  %v7988_v28 = vmax.f32 %v7962_v46, 0.0 }
 0xa18   :  { %9886 = vst.msk [vmem:[%s17192_s20 + $0x568] sm:$0xf] %vm2973_vm0, %v10382_v36  ;;  %v7987_v45 = vmax.f32 %v7957_v48, 0.0  ;;  %v12282_v18 = vpop.f32.mrb[14].mxu0 }
 0xa19   :  { %v10385_v61 = vpack.c.bf16 %v7988_v28, %v7988_v28  ;;  %v7972_v55 = vadd.f32 %v12282_v18, %v14721_v32  ;;  %v7966_v51 = vpop.f32.mrb[15].mxu0 }
 0xa1a   :  { %v10384_v15 = vpack.c.bf16 %v7987_v45, %v7987_v45  ;;  %v7967_v16 = vadd.f32 %v7966_v51, %v14719_v47 }
 0xa1b   :  { %9889 = vst.msk [vmem:[%s17192_s20 + $0x574] sm:$0xf] %vm2973_vm0, %v10385_v61  ;;  %v7990_v58 = vmax.f32 %v7972_v55, 0.0 }
 0xa1c   :  { %9888 = vst.msk [vmem:[%s17192_s20 + $0x570] sm:$0xf] %vm2973_vm0, %v10384_v15  ;;  %v7989_v53 = vmax.f32 %v7967_v16, 0.0  ;;  %v12317_v63 = vpop.f32.mrb[16].mxu0 }
 0xa1d   :  { %v10387_v17 = vpack.c.bf16 %v7990_v58, %v7990_v58  ;;  %v8386_v62 = vadd.f32 %v12317_v63, %v14519_v24  ;;  %v8380_v26 = vpop.f32.mrb[17].mxu0 }
 0xa1e   :  { %v10386_v20 = vpack.c.bf16 %v7989_v53, %v7989_v53  ;;  %v8381_v30 = vadd.f32 %v8380_v26, %v14514_v5 }
 0xa1f   :  { %9891 = vst.msk [vmem:[%s17192_s20 + $0x57c] sm:$0xf] %vm2973_vm0, %v10387_v17  ;;  %v8460_v54 = vmax.f32 %v8386_v62, 0.0 }
 0xa20   :  { %9890 = vst.msk [vmem:[%s17192_s20 + $0x578] sm:$0xf] %vm2973_vm0, %v10386_v20  ;;  %v8459_v44 = vmax.f32 %v8381_v30, 0.0  ;;  %v12320_v42 = vpop.f32.mrb[18].mxu0 }
 0xa21   :  { %v10405_v14 = vpack.c.bf16 %v8460_v54, %v8460_v54  ;;  %v8396_v24 = vadd.f32 %v12320_v42, %v14534_v9  ;;  %v8390_v25 = vpop.f32.mrb[19].mxu0 }
 0xa22   :  { %v10404_v12 = vpack.c.bf16 %v8459_v44, %v8459_v44  ;;  %v8391_v5 = vadd.f32 %v8390_v25, %v14532_v33 }
 0xa23   :  { %9973 = vst.msk [vmem:[%s17192_s20 + $0x5c4] sm:$0xf] %vm2973_vm0, %v10405_v14  ;;  %v8462_v43 = vmax.f32 %v8396_v24, 0.0 }
 0xa24   :  { %9972 = vst.msk [vmem:[%s17192_s20 + $0x5c0] sm:$0xf] %vm2973_vm0, %v10404_v12  ;;  %v8461_v23 = vmax.f32 %v8391_v5, 0.0  ;;  %v12323_v60 = vpop.f32.mrb[20].mxu0 }
 0xa25   :  { %v10407_v40 = vpack.c.bf16 %v8462_v43, %v8462_v43  ;;  %v8406_v9 = vadd.f32 %v12323_v60, %v14554_v11  ;;  %v8400_v10 = vpop.f32.mrb[21].mxu0 }
 0xa26   :  { %v10406_v57 = vpack.c.bf16 %v8461_v23, %v8461_v23  ;;  %v8401_v33 = vadd.f32 %v8400_v10, %v14548_v38 }
 0xa27   :  { %9975 = vst.msk [vmem:[%s17192_s20 + $0x5cc] sm:$0xf] %vm2973_vm0, %v10407_v40  ;;  %v8464_v29 = vmax.f32 %v8406_v9, 0.0 }
 0xa28   :  { %9974 = vst.msk [vmem:[%s17192_s20 + $0x5c8] sm:$0xf] %vm2973_vm0, %v10406_v57  ;;  %v8463_v0 = vmax.f32 %v8401_v33, 0.0  ;;  %v12326_v31 = vpop.f32.mrb[22].mxu0 }
 0xa29   :  { %v10409_v22 = vpack.c.bf16 %v8464_v29, %v8464_v29  ;;  %v8416_v11 = vadd.f32 %v12326_v31, %v14568_v4  ;;  %v8410_v49 = vpop.f32.mrb[23].mxu0 }
 0xa2a   :  { %v10408_v7 = vpack.c.bf16 %v8463_v0, %v8463_v0  ;;  %v8411_v38 = vadd.f32 %v8410_v49, %v14566_v8 }
 0xa2b   :  { %9977 = vst.msk [vmem:[%s17192_s20 + $0x5d4] sm:$0xf] %vm2973_vm0, %v10409_v22  ;;  %v8466_v27 = vmax.f32 %v8416_v11, 0.0 }
 0xa2c   :  { %9976 = vst.msk [vmem:[%s17192_s20 + $0x5d0] sm:$0xf] %vm2973_vm0, %v10408_v7  ;;  %v8465_v21 = vmax.f32 %v8411_v38, 0.0  ;;  %v12329_v59 = vpop.f32.mrb[24].mxu0 }
 0xa2d   :  { %v10411_v19 = vpack.c.bf16 %v8466_v27, %v8466_v27  ;;  %v8426_v4 = vadd.f32 %v12329_v59, %v14592_v13  ;;  %v8420_v56 = vpop.f32.mrb[25].mxu0 }
 0xa2e   :  { %v10410_v41 = vpack.c.bf16 %v8465_v21, %v8465_v21  ;;  %v8421_v8 = vadd.f32 %v8420_v56, %v14585_v39 }
 0xa2f   :  { %9979 = vst.msk [vmem:[%s17192_s20 + $0x5dc] sm:$0xf] %vm2973_vm0, %v10411_v19  ;;  %v8468_v3 = vmax.f32 %v8426_v4, 0.0 }
 0xa30   :  { %9978 = vst.msk [vmem:[%s17192_s20 + $0x5d8] sm:$0xf] %vm2973_vm0, %v10410_v41  ;;  %v8467_v1 = vmax.f32 %v8421_v8, 0.0  ;;  %v12332_v37 = vpop.f32.mrb[26].mxu0 }
 0xa31   :  { %v10413_v2 = vpack.c.bf16 %v8468_v3, %v8468_v3  ;;  %v8436_v13 = vadd.f32 %v12332_v37, %v14627_v50  ;;  %v8430_v46 = vpop.f32.mrb[27].mxu0 }
 0xa32   :  { %v10412_v35 = vpack.c.bf16 %v8467_v1, %v8467_v1  ;;  %v8431_v39 = vadd.f32 %v8430_v46, %v14621_v34 }
 0xa33   :  { %9981 = vst.msk [vmem:[%s17192_s20 + $0x5e4] sm:$0xf] %vm2973_vm0, %v10413_v2  ;;  %v8470_v36 = vmax.f32 %v8436_v13, 0.0 }
 0xa34   :  { %9980 = vst.msk [vmem:[%s17192_s20 + $0x5e0] sm:$0xf] %vm2973_vm0, %v10412_v35  ;;  %v8469_v48 = vmax.f32 %v8431_v39, 0.0  ;;  %v12335_v28 = vpop.f32.mrb[28].mxu0 }
 0xa35   :  { %v10415_v45 = vpack.c.bf16 %v8470_v36, %v8470_v36  ;;  %v8446_v50 = vadd.f32 %v12335_v28, %v14663_v6  ;;  %v8440_v18 = vpop.f32.mrb[29].mxu0 }
 0xa36   :  { %v10414_v61 = vpack.c.bf16 %v8469_v48, %v8469_v48  ;;  %v8441_v34 = vadd.f32 %v8440_v18, %v14661_v52 }
 0xa37   :  { %9983 = vst.msk [vmem:[%s17192_s20 + $0x5ec] sm:$0xf] %vm2973_vm0, %v10415_v45  ;;  %v8472_v55 = vmax.f32 %v8446_v50, 0.0 }
 0xa38   :  { %9982 = vst.msk [vmem:[%s17192_s20 + $0x5e8] sm:$0xf] %vm2973_vm0, %v10414_v61  ;;  %v8471_v51 = vmax.f32 %v8441_v34, 0.0  ;;  %v12338_v15 = vpop.f32.mrb[30].mxu0 }
 0xa39   :  { %v10417_v16 = vpack.c.bf16 %v8472_v55, %v8472_v55  ;;  %v8456_v6 = vadd.f32 %v12338_v15, %v14721_v32  ;;  %v8450_v58 = vpop.f32.mrb[31].mxu0 }
 0xa3a   :  { %v10416_v53 = vpack.c.bf16 %v8471_v51, %v8471_v51  ;;  %v8451_v52 = vadd.f32 %v8450_v58, %v14719_v47 }
 0xa3b   :  { %9985 = vst.msk [vmem:[%s17192_s20 + $0x5f4] sm:$0xf] %vm2973_vm0, %v10417_v16  ;;  %v8474_v63 = vmax.f32 %v8456_v6, 0.0 }
 0xa3c   :  { %9984 = vst.msk [vmem:[%s17192_s20 + $0x5f0] sm:$0xf] %vm2973_vm0, %v10416_v53  ;;  %v8473_v17 = vmax.f32 %v8451_v52, 0.0 }
 0xa3d   :  { %v10419_v62 = vpack.c.bf16 %v8474_v63, %v8474_v63 }
 0xa3e   :  { %v10418_v26 = vpack.c.bf16 %v8473_v17, %v8473_v17 }
 0xa3f   :  { %9987 = vst.msk [vmem:[%s17192_s20 + $0x5fc] sm:$0xf] %vm2973_vm0, %v10419_v62 }
 0xa40   :  { %9986 = vst.msk [vmem:[%s17192_s20 + $0x5f8] sm:$0xf] %vm2973_vm0, %v10418_v26 }

// kernel: autoencoder_forward.11
= control target key start
LH: loop header
LB: loop body
LE: loop exit
PB: predicated region body
PF: predicated region fallthrough
CT: control target
= control target key end

     0   :  { %v40_v0 = vlaneseq  ;;  %v1267_v2 = vmov 1983009808   ;;  %v1268_v4 = vmov 0   ;;  %vm149_vm0 = vcmask 1041408   ;;  %s1458_s2 = inlined_call_operand.vmem [shape: bf16[4,3200], index: 2, kind: input, shape index: {}]   ;;  %s1459_s1 = inlined_call_operand.vmem [shape: f32[4,1], index: 1, kind: input, shape index: {}]   ;;  %s1460_s0 = inlined_call_operand.vmem [shape: bf16[4,4], index: 0, kind: input, shape index: {}]   ;;  %s1461_s3 = inlined_call_operand.vmem [shape: bf16[4,3200], index: 3, kind: output, shape index: {}]  }
   0x1   :  { %v16_v1 = vld [vmem:[%s1458_s2] sm:$0xff]  ;;  %v38_v3 = vunpack.c.l.s4 %v1267_v2  ;;  %257 = vmatprep.mubr.bf16.mxu0 %v1268_v4  ;;  %298 = vmatprep.mubr.bf16.mxu1 %v1268_v4  ;;  %v17_v5 = vld [vmem:[%s1458_s2 + $0x8] sm:$0xff]  ;;  %v18_v10 = vld [vmem:[%s1458_s2 + $0x10] sm:$0xff]  ;;  %vm145_vm1 = vcmask 31744   ;;  %v1269_v57 = vmov 0.0   ;;  %vm1270_vm2 = vmmov 0  }
   0x2   :  { %v41_v6 = vshrl.u32 %v40_v0, 7  ;;  %1160 = vset.pattern.permute.xlu0 %v1268_v4  ;;  %v36_v8 = vcombine.high %v16_v1, %v16_v1  ;;  %v53_v9 = vcombine.high %v17_v5, %v17_v5  ;;  %v23_v11 = vld [vmem:[%s1459_s1] sm:$0xf]  ;;  %v70_v13 = vcombine.high %v18_v10, %v18_v10  ;;  %v19_v26 = vld [vmem:[%s1458_s2 + $0x18] sm:$0xff]  ;;  %v21_v43 = vld [vmem:[%s1458_s2 + $0x28] sm:$0xff] }
   0x3   :  { %v39_v7 = vunpack.c.0.s8 %v38_v3  ;;  %26 = vperm.xlu0 %1160, %v23_v11   ;;  %v1324_v27 = vld [vmem:[%s1460_s0] sm:$0x3]  ;;  %v87_v32 = vcombine.high %v19_v26, %v19_v26  ;;  %v121_v48 = vcombine.high %v21_v43, %v21_v43  ;;  %v1084_v58 = vld.sshfl [vmem:[%s1458_s2 + $0x30] sm:$0x3 pattern:$0x76325410] }
   0x4   :  { %v20_v35 = vld [vmem:[%s1458_s2 + $0x20] sm:$0xff]  ;;  %v223_v59 = vsel %vm149_vm0, %v1084_v58, 0 }
   0x5   :  { %v1306_v12 = vsub.s32 %v39_v7, %v41_v6  ;;  %v104_v40 = vcombine.high %v20_v35, %v20_v35 }
   0x7   :  { %v43_v14 = vrot.slane %v16_v1, %v1306_v12  ;;  %v50_v15 = vrot.slane %v36_v8, %v1306_v12  ;;  %v60_v16 = vrot.slane %v17_v5, %v1306_v12  ;;  %v67_v17 = vrot.slane %v53_v9, %v1306_v12 }
   0x8   :  { %v77_v24 = vrot.slane %v18_v10, %v1306_v12  ;;  %v84_v25 = vrot.slane %v70_v13, %v1306_v12  ;;  %v94_v33 = vrot.slane %v19_v26, %v1306_v12  ;;  %v101_v34 = vrot.slane %v87_v32, %v1306_v12 }
   0x9   :  { %v51_v18 = vcombine.high %v43_v14, %v43_v14  ;;  %v52_v19 = vcombine.high %v50_v15, %v50_v15  ;;  %v151_v20 = vsel %vm149_vm0, %v43_v14, 0  ;;  %v157_v21 = vsel %vm149_vm0, %v50_v15, 0 }
   0xa   :  { %v68_v22 = vcombine.high %v60_v16, %v60_v16  ;;  %v69_v23 = vcombine.high %v67_v17, %v67_v17  ;;  %v163_v28 = vsel %vm149_vm0, %v60_v16, 0  ;;  %v169_v29 = vsel %vm149_vm0, %v67_v17, 0 }
   0xb   :  { %1085 = vmatprep.subr.msk.bf16.mxu0 %vm149_vm0, %v51_v18  ;;  %1087 = vmatprep.subr.msk.bf16.mxu1 %vm149_vm0, %v52_v19  ;;  %v85_v30 = vcombine.high %v77_v24, %v77_v24  ;;  %v86_v31 = vcombine.high %v84_v25, %v84_v25  ;;  %v175_v36 = vsel %vm149_vm0, %v77_v24, 0  ;;  %v181_v37 = vsel %vm149_vm0, %v84_v25, 0 }
   0xc   :  { %226 = vmatpush1.bf16.msra.mxu0 %v151_v20  ;;  %267 = vmatpush1.bf16.msra.mxu1 %v157_v21  ;;  %v102_v38 = vcombine.high %v94_v33, %v94_v33  ;;  %v103_v39 = vcombine.high %v101_v34, %v101_v34  ;;  %v111_v41 = vrot.slane %v20_v35, %v1306_v12  ;;  %v187_v44 = vsel %vm149_vm0, %v94_v33, 0 }
   0xd   :  { %1089 = vmatprep.subr.msk.bf16.mxu0 %vm149_vm0, %v68_v22  ;;  %1091 = vmatprep.subr.msk.bf16.mxu1 %vm149_vm0, %v69_v23  ;;  %v118_v42 = vrot.slane %v104_v40, %v1306_v12  ;;  %v193_v45 = vsel %vm149_vm0, %v101_v34, 0  ;;  %v128_v49 = vrot.slane %v21_v43, %v1306_v12  ;;  %v135_v50 = vrot.slane %v121_v48, %v1306_v12 }
   0xe   :  { %v119_v46 = vcombine.high %v111_v41, %v111_v41  ;;  %v199_v51 = vsel %vm149_vm0, %v111_v41, 0 }
   0xf   :  { %1086 = vmatmul.mubr.msk.bf16.vlgmr.msra.gmra.mrb[0].mxu0 %vm145_vm1, %v1324_v27  ;;  %1088 = vmatmul.mubr.msk.bf16.vlgmr.msra.gmra.mrb[0].mxu1 %vm145_vm1, %v1324_v27  ;;  %v120_v47 = vcombine.high %v118_v42, %v118_v42  ;;  %v205_v52 = vsel %vm149_vm0, %v118_v42, 0  ;;  %v136_v53 = vcombine.high %v128_v49, %v128_v49  ;;  %v137_v54 = vcombine.high %v135_v50, %v135_v50 }
  0x10   :  { %308 = vmatpush1.bf16.msra.mxu0 %v163_v28  ;;  %349 = vmatpush1.bf16.msra.mxu1 %v169_v29  ;;  %v211_v55 = vsel %vm149_vm0, %v128_v49, 0  ;;  %v217_v56 = vsel %vm149_vm0, %v135_v50, 0 }
  0x11   :  { %339 = vmatprep.mubr.bf16.mxu0 %v1268_v4  ;;  %380 = vmatprep.mubr.bf16.mxu1 %v1268_v4 }
  0x12   :  { %1093 = vmatprep.subr.msk.bf16.mxu0 %vm149_vm0, %v85_v30  ;;  %1095 = vmatprep.subr.msk.bf16.mxu1 %vm149_vm0, %v86_v31 }
  0x17   :  { %1090 = vmatmul.mubr.msk.bf16.vlgmr.msra.gmra.mrb[4].mxu0 %vm145_vm1, %v1324_v27  ;;  %1092 = vmatmul.mubr.msk.bf16.vlgmr.msra.gmra.mrb[4].mxu1 %vm145_vm1, %v1324_v27 }
  0x18   :  { %390 = vmatpush1.bf16.msra.mxu0 %v175_v36  ;;  %431 = vmatpush1.bf16.msra.mxu1 %v181_v37 }
  0x19   :  { %421 = vmatprep.mubr.bf16.mxu0 %v1268_v4  ;;  %462 = vmatprep.mubr.bf16.mxu1 %v1268_v4 }
  0x1a   :  { %1097 = vmatprep.subr.msk.bf16.mxu0 %vm149_vm0, %v102_v38  ;;  %1099 = vmatprep.subr.msk.bf16.mxu1 %vm149_vm0, %v103_v39 }
  0x1f   :  { %1094 = vmatmul.mubr.msk.bf16.vlgmr.msra.gmra.mrb[8].mxu0 %vm145_vm1, %v1324_v27  ;;  %1096 = vmatmul.mubr.msk.bf16.vlgmr.msra.gmra.mrb[8].mxu1 %vm145_vm1, %v1324_v27 }
  0x20   :  { %472 = vmatpush1.bf16.msra.mxu0 %v187_v44  ;;  %513 = vmatpush1.bf16.msra.mxu1 %v193_v45 }
  0x21   :  { %503 = vmatprep.mubr.bf16.mxu0 %v1268_v4  ;;  %544 = vmatprep.mubr.bf16.mxu1 %v1268_v4 }
  0x22   :  { %1101 = vmatprep.subr.msk.bf16.mxu0 %vm149_vm0, %v119_v46  ;;  %1103 = vmatprep.subr.msk.bf16.mxu1 %vm149_vm0, %v120_v47 }
  0x27   :  { %1098 = vmatmul.mubr.msk.bf16.vlgmr.msra.gmra.mrb[12].mxu0 %vm145_vm1, %v1324_v27  ;;  %1100 = vmatmul.mubr.msk.bf16.vlgmr.msra.gmra.mrb[12].mxu1 %vm145_vm1, %v1324_v27 }
  0x28   :  { %554 = vmatpush1.bf16.msra.mxu0 %v199_v51  ;;  %595 = vmatpush1.bf16.msra.mxu1 %v205_v52 }
  0x29   :  { %585 = vmatprep.mubr.bf16.mxu0 %v1268_v4  ;;  %626 = vmatprep.mubr.bf16.mxu1 %v1268_v4 }
  0x2a   :  { %1105 = vmatprep.subr.msk.bf16.mxu0 %vm149_vm0, %v136_v53  ;;  %1107 = vmatprep.subr.msk.bf16.mxu1 %vm149_vm0, %v137_v54 }
  0x2f   :  { %1102 = vmatmul.mubr.msk.bf16.vlgmr.msra.gmra.mrb[16].mxu0 %vm145_vm1, %v1324_v27  ;;  %1104 = vmatmul.mubr.msk.bf16.vlgmr.msra.gmra.mrb[16].mxu1 %vm145_vm1, %v1324_v27 }
  0x30   :  { %636 = vmatpush1.bf16.msra.mxu0 %v211_v55  ;;  %677 = vmatpush1.bf16.msra.mxu1 %v217_v56 }
  0x31   :  { %667 = vmatprep.mubr.bf16.mxu0 %v1268_v4  ;;  %708 = vmatprep.mubr.bf16.mxu1 %v1268_v4 }
  0x32   :  { %1150 = vmatprep.subr.bf16.mxu0 %v1269_v57 }
  0x37   :  { %1106 = vmatmul.mubr.msk.bf16.vlgmr.msra.gmra.mrb[20].mxu0 %vm145_vm1, %v1324_v27  ;;  %1108 = vmatmul.mubr.msk.bf16.vlgmr.msra.gmra.mrb[20].mxu1 %vm145_vm1, %v1324_v27 }
  0x38   :  { %1151 = vmatpush3.bf16.msra.mxu0 %v223_v59  ;;  %1152 = vmatprep.mubr.msk.bf16.mxu0 %vm1270_vm2, %v1269_v57 }
  0x3f   :  { %1153 = vmatmul.mubr.msk.bf16.vlgmr.msra.gmra.mrb[24].mxu0 %vm145_vm1, %v1324_v27 }
  0x82   :  { %v1398_v60 = vpop.permute.xlu0 %26 }
  0xe2   :  { %v259_v61 = vpop.f32.mrb[0].mxu0  ;;  %v300_v62 = vpop.f32.mrb[0].mxu1 }
  0xe3   :  { %v260_v63 = vadd.f32 %v259_v61, %v1398_v60  ;;  %v261_v0 = vpop.f32.mrb[1].mxu0  ;;  %v301_v1 = vadd.f32 %v300_v62, %v1398_v60  ;;  %v302_v2 = vpop.f32.mrb[1].mxu1 }
  0xe4   :  { %v262_v3 = vadd.f32 %v261_v0, %v1398_v60  ;;  %v303_v4 = vadd.f32 %v302_v2, %v1398_v60  ;;  %v263_v5 = vpop.f32.mrb[2].mxu0  ;;  %v304_v6 = vpop.f32.mrb[2].mxu1 }
  0xe5   :  { %v1110_v7 = vmul.f32 -1.442695, %v260_v63  ;;  %v1112_v8 = vmul.f32 -1.442695, %v301_v1  ;;  %v264_v9 = vpop.f32.mrb[3].mxu0  ;;  %v305_v10 = vpop.f32.mrb[3].mxu1 }
  0xe6   :  { %v1111_v11 = vmul.f32 -1.442695, %v262_v3  ;;  %v1113_v13 = vmul.f32 -1.442695, %v303_v4 }
  0xe7   :  { %1167 = vpow2.f32 %v1110_v7 }
  0xe8   :  { %1169 = vpow2.f32 %v1111_v11 }
  0xe9   :  { %1171 = vpow2.f32 %v1112_v8 }
  0xea   :  { %1173 = vpow2.f32 %v1113_v13  ;;  %v341_v14 = vpop.f32.mrb[4].mxu0  ;;  %v382_v15 = vpop.f32.mrb[4].mxu1 }
  0xeb   :  { %v342_v16 = vadd.f32 %v341_v14, %v1398_v60  ;;  %v383_v17 = vadd.f32 %v382_v15, %v1398_v60  ;;  %v343_v18 = vpop.f32.mrb[5].mxu0  ;;  %v384_v19 = vpop.f32.mrb[5].mxu1 }
  0xec   :  { %v344_v20 = vadd.f32 %v343_v18, %v1398_v60  ;;  %v385_v21 = vadd.f32 %v384_v19, %v1398_v60  ;;  %v345_v22 = vpop.f32.mrb[6].mxu0  ;;  %v386_v23 = vpop.f32.mrb[6].mxu1 }
  0xed   :  { %v1114_v24 = vmul.f32 -1.442695, %v342_v16  ;;  %v1116_v25 = vmul.f32 -1.442695, %v383_v17  ;;  %v346_v26 = vpop.f32.mrb[7].mxu0  ;;  %v387_v27 = vpop.f32.mrb[7].mxu1 }
  0xee   :  { %v1115_v28 = vmul.f32 -1.442695, %v344_v20  ;;  %v1117_v29 = vmul.f32 -1.442695, %v385_v21 }
  0xef   :  { %1175 = vpow2.f32 %v1114_v24 }
  0xf0   :  { %1177 = vpow2.f32 %v1116_v25 }
  0xf1   :  { %v1168_v30 = vpop.eup %1167  ;;  %1179 = vpow2.f32 %v1115_v28 }
  0xf2   :  { %v1170_v31 = vpop.eup %1169  ;;  %v832_v32 = vadd.f32 1.0, %v1168_v30  ;;  %1181 = vpow2.f32 %v1117_v29  ;;  %v423_v33 = vpop.f32.mrb[8].mxu0 }
  0xf3   :  { %v464_v34 = vpop.f32.mrb[8].mxu1  ;;  %v1172_v35 = vpop.eup %1171  ;;  %v833_v36 = vadd.f32 1.0, %v1170_v31  ;;  %v424_v37 = vadd.f32 %v423_v33, %v1398_v60 }
  0xf4   :  { %v465_v38 = vadd.f32 %v464_v34, %v1398_v60  ;;  %v425_v39 = vpop.f32.mrb[9].mxu0  ;;  %v466_v40 = vpop.f32.mrb[9].mxu1  ;;  %1183 = vrcp.f32 %v832_v32  ;;  %v834_v42 = vadd.f32 1.0, %v1172_v35 }
  0xf5   :  { %v1174_v41 = vpop.eup %1173  ;;  %v426_v43 = vadd.f32 %v425_v39, %v1398_v60  ;;  %v467_v44 = vadd.f32 %v466_v40, %v1398_v60  ;;  %v427_v45 = vpop.f32.mrb[10].mxu0  ;;  %1185 = vrcp.f32 %v833_v36  ;;  %v1118_v48 = vmul.f32 -1.442695, %v424_v37 }
  0xf6   :  { %v468_v46 = vpop.f32.mrb[10].mxu1  ;;  %v835_v47 = vadd.f32 1.0, %v1174_v41  ;;  %v1120_v49 = vmul.f32 -1.442695, %v465_v38  ;;  %v428_v50 = vpop.f32.mrb[11].mxu0  ;;  %1187 = vrcp.f32 %v834_v42 }
  0xf7   :  { %v1119_v51 = vmul.f32 -1.442695, %v426_v43  ;;  %v469_v52 = vpop.f32.mrb[11].mxu1  ;;  %v1121_v53 = vmul.f32 -1.442695, %v467_v44 }
  0xf8   :  { %1189 = vrcp.f32 %v835_v47 }
  0xf9   :  { %1191 = vpow2.f32 %v1118_v48  ;;  %v1176_v54 = vpop.eup %1175 }
  0xfa   :  { %1193 = vpow2.f32 %v1120_v49  ;;  %v1178_v55 = vpop.eup %1177  ;;  %v836_v56 = vadd.f32 1.0, %v1176_v54  ;;  %v505_v57 = vpop.f32.mrb[12].mxu0 }
  0xfb   :  { %1195 = vpow2.f32 %v1119_v51  ;;  %v546_v58 = vpop.f32.mrb[12].mxu1  ;;  %v1180_v59 = vpop.eup %1179  ;;  %v838_v61 = vadd.f32 1.0, %v1178_v55  ;;  %v506_v62 = vadd.f32 %v505_v57, %v1398_v60 }
  0xfc   :  { %1197 = vpow2.f32 %v1121_v53  ;;  %v547_v63 = vadd.f32 %v546_v58, %v1398_v60  ;;  %v507_v0 = vpop.f32.mrb[13].mxu0  ;;  %v548_v1 = vpop.f32.mrb[13].mxu1  ;;  %v837_v3 = vadd.f32 1.0, %v1180_v59 }
  0xfd   :  { %v1182_v2 = vpop.eup %1181  ;;  %1199 = vrcp.f32 %v836_v56  ;;  %v508_v4 = vadd.f32 %v507_v0, %v1398_v60  ;;  %v549_v5 = vadd.f32 %v548_v1, %v1398_v60  ;;  %v509_v6 = vpop.f32.mrb[14].mxu0  ;;  %v1122_v9 = vmul.f32 -1.442695, %v506_v62 }
  0xfe   :  { %v550_v7 = vpop.f32.mrb[14].mxu1  ;;  %1201 = vrcp.f32 %v838_v61  ;;  %v839_v8 = vadd.f32 1.0, %v1182_v2  ;;  %v1124_v10 = vmul.f32 -1.442695, %v547_v63  ;;  %v510_v11 = vpop.f32.mrb[15].mxu0 }
  0xff   :  { %v1184_v13 = vpop.eup %1183  ;;  %1203 = vrcp.f32 %v837_v3  ;;  %v1123_v14 = vmul.f32 -1.442695, %v508_v4  ;;  %v551_v15 = vpop.f32.mrb[15].mxu1  ;;  %v1125_v17 = vmul.f32 -1.442695, %v549_v5 }
 0x100   :  { %v1186_v16 = vpop.eup %1185  ;;  %1205 = vrcp.f32 %v839_v8 }
 0x101   :  { %v1188_v18 = vpop.eup %1187  ;;  %v1135_v19 = vpack.c.bf16 %v1186_v16, %v1184_v13  ;;  %1207 = vpow2.f32 %v1122_v9 }
 0x102   :  { %v1190_v20 = vpop.eup %1189  ;;  %1209 = vpow2.f32 %v1124_v10  ;;  %v587_v24 = vpop.f32.mrb[16].mxu0 }
 0x103   :  { %v1192_v21 = vpop.eup %1191  ;;  %v965_v22 = vrot.slane %v1135_v19, %v1306_v12  ;;  %v1136_v23 = vpack.c.bf16 %v1190_v20, %v1188_v18  ;;  %1211 = vpow2.f32 %v1123_v14  ;;  %v628_v25 = vpop.f32.mrb[16].mxu1  ;;  %v588_v28 = vadd.f32 %v587_v24, %v1398_v60 }
 0x104   :  { %v1194_v26 = vpop.eup %1193  ;;  %v840_v27 = vadd.f32 1.0, %v1192_v21  ;;  %1213 = vpow2.f32 %v1125_v17  ;;  %v629_v29 = vadd.f32 %v628_v25, %v1398_v60  ;;  %v589_v30 = vpop.f32.mrb[17].mxu0 }
 0x105   :  { %v630_v31 = vpop.f32.mrb[17].mxu1  ;;  %v1196_v32 = vpop.eup %1195  ;;  %v972_v33 = vrot.slane %v1136_v23, %v1306_v12  ;;  %v842_v34 = vadd.f32 1.0, %v1194_v26  ;;  %v590_v35 = vadd.f32 %v589_v30, %v1398_v60  ;;  %v1126_v41 = vmul.f32 -1.442695, %v588_v28 }
 0x106   :  { %v631_v36 = vadd.f32 %v630_v31, %v1398_v60  ;;  %v591_v37 = vpop.f32.mrb[18].mxu0  ;;  %v632_v38 = vpop.f32.mrb[18].mxu1  ;;  %1215 = vrcp.f32 %v840_v27  ;;  %v841_v40 = vadd.f32 1.0, %v1196_v32  ;;  %v1128_v46 = vmul.f32 -1.442695, %v629_v29 }
 0x107   :  { %v1198_v39 = vpop.eup %1197  ;;  %v592_v42 = vpop.f32.mrb[19].mxu0  ;;  %v973_v44 = vcombine.low %v965_v22, %v972_v33  ;;  %1217 = vrcp.f32 %v842_v34  ;;  %v1127_v49 = vmul.f32 -1.442695, %v590_v35 }
 0x108   :  { %v1200_v43 = vpop.eup %1199  ;;  %v843_v45 = vadd.f32 1.0, %v1198_v39  ;;  %v633_v47 = vpop.f32.mrb[19].mxu1  ;;  %1219 = vrcp.f32 %v841_v40  ;;  %v1129_v51 = vmul.f32 -1.442695, %v631_v36 }
 0x109   :  { %v1202_v48 = vpop.eup %1201  ;;  %1073 = vst [vmem:[%s1461_s3] sm:$0xff] %v973_v44 }
 0x10a   :  { %v1204_v50 = vpop.eup %1203  ;;  %1221 = vrcp.f32 %v843_v45  ;;  %v669_v56 = vpop.f32.mrb[20].mxu0 }
 0x10b   :  { %v1206_v52 = vpop.eup %1205  ;;  %v1137_v53 = vpack.c.bf16 %v1204_v50, %v1200_v43  ;;  %1223 = vpow2.f32 %v1126_v41  ;;  %v710_v57 = vpop.f32.mrb[20].mxu1  ;;  %v670_v62 = vadd.f32 %v669_v56, %v1398_v60 }
 0x10c   :  { %v1208_v54 = vpop.eup %1207  ;;  %v1138_v55 = vpack.c.bf16 %v1206_v52, %v1202_v48  ;;  %1225 = vpow2.f32 %v1128_v46  ;;  %v671_v63 = vpop.f32.mrb[21].mxu0  ;;  %v711_v4 = vadd.f32 %v710_v57, %v1398_v60 }
 0x10d   :  { %v1210_v58 = vpop.eup %1209  ;;  %v982_v59 = vrot.slane %v1137_v53, %v1306_v12  ;;  %v844_v61 = vadd.f32 1.0, %v1208_v54  ;;  %1227 = vpow2.f32 %v1127_v49  ;;  %v712_v0 = vpop.f32.mrb[21].mxu1  ;;  %v1130_v9 = vmul.f32 -1.442695, %v670_v62 }
 0x10e   :  { %v1212_v1 = vpop.eup %1211  ;;  %v989_v2 = vrot.slane %v1138_v55, %v1306_v12  ;;  %v846_v3 = vadd.f32 1.0, %v1210_v58  ;;  %1229 = vpow2.f32 %v1129_v51  ;;  %v673_v5 = vpop.f32.mrb[22].mxu0  ;;  %v672_v10 = vadd.f32 %v671_v63, %v1398_v60 }
 0x10f   :  { %v714_v6 = vpop.f32.mrb[22].mxu1  ;;  %v1214_v7 = vpop.eup %1213  ;;  %1231 = vrcp.f32 %v844_v61  ;;  %v845_v8 = vadd.f32 1.0, %v1212_v1  ;;  %v1132_v16 = vmul.f32 -1.442695, %v711_v4  ;;  %v713_v19 = vadd.f32 %v712_v0, %v1398_v60 }
 0x110   :  { %v674_v11 = vpop.f32.mrb[23].mxu0  ;;  %v715_v13 = vpop.f32.mrb[23].mxu1  ;;  %v990_v14 = vcombine.low %v982_v59, %v989_v2  ;;  %1233 = vrcp.f32 %v846_v3  ;;  %v847_v15 = vadd.f32 1.0, %v1214_v7  ;;  %v1131_v18 = vmul.f32 -1.442695, %v672_v10 }
 0x111   :  { %v1216_v17 = vpop.eup %1215  ;;  %1235 = vrcp.f32 %v845_v8  ;;  %v1133_v22 = vmul.f32 -1.442695, %v713_v19 }
 0x112   :  { %v1218_v20 = vpop.eup %1217  ;;  %1074 = vst [vmem:[%s1461_s3 + $0x8] sm:$0xff] %v990_v14  ;;  %1237 = vrcp.f32 %v847_v15  ;;  %v751_v25 = vpop.f32.mrb[24].mxu0 }
 0x113   :  { %v1220_v21 = vpop.eup %1219  ;;  %1239 = vpow2.f32 %v1130_v9  ;;  %v752_v28 = vadd.f32 %v751_v25, %v1398_v60  ;;  %v1154_v29 = vpop.f32.mrb[25].mxu0 }
 0x114   :  { %v1222_v23 = vpop.eup %1221  ;;  %v1139_v24 = vpack.c.bf16 %v1220_v21, %v1216_v17  ;;  %1241 = vpow2.f32 %v1132_v16  ;;  %v754_v33 = vpop.f32.mrb[26].mxu0 }
 0x115   :  { %v1224_v26 = vpop.eup %1223  ;;  %v1140_v27 = vpack.c.bf16 %v1222_v23, %v1218_v20  ;;  %1243 = vpow2.f32 %v1131_v18  ;;  %v1155_v37 = vpop.f32.mrb[27].mxu0  ;;  %v1134_v40 = vmul.f32 -1.442695, %v752_v28 }
 0x116   :  { %v1226_v30 = vpop.eup %1225  ;;  %v999_v31 = vrot.slane %v1139_v24, %v1306_v12  ;;  %v848_v32 = vadd.f32 1.0, %v1224_v26  ;;  %1245 = vpow2.f32 %v1133_v22 }
 0x117   :  { %v1228_v34 = vpop.eup %1227  ;;  %v1006_v35 = vrot.slane %v1140_v27, %v1306_v12  ;;  %v850_v36 = vadd.f32 1.0, %v1226_v30 }
 0x118   :  { %v1230_v38 = vpop.eup %1229  ;;  %1247 = vrcp.f32 %v848_v32  ;;  %v849_v39 = vadd.f32 1.0, %v1228_v34 }
 0x119   :  { %v1232_v41 = vpop.eup %1231  ;;  %v1007_v42 = vcombine.low %v999_v31, %v1006_v35  ;;  %1249 = vrcp.f32 %v850_v36  ;;  %v851_v60 = vadd.f32 1.0, %v1230_v38 }
 0x11a   :  { %v1234_v43 = vpop.eup %1233  ;;  %1251 = vrcp.f32 %v849_v39 }
 0x11b   :  { %v1236_v44 = vpop.eup %1235  ;;  %1075 = vst [vmem:[%s1461_s3 + $0x10] sm:$0xff] %v1007_v42  ;;  %1253 = vrcp.f32 %v851_v60 }
 0x11c   :  { %v1238_v45 = vpop.eup %1237  ;;  %v1141_v46 = vpack.c.bf16 %v1236_v44, %v1232_v41  ;;  %1255 = vpow2.f32 %v1134_v40 }
 0x11d   :  { %v1240_v47 = vpop.eup %1239  ;;  %v1142_v48 = vpack.c.bf16 %v1238_v45, %v1234_v43 }
 0x11e   :  { %v1242_v49 = vpop.eup %1241  ;;  %v1016_v50 = vrot.slane %v1141_v46, %v1306_v12  ;;  %v852_v51 = vadd.f32 1.0, %v1240_v47 }
 0x11f   :  { %v1244_v52 = vpop.eup %1243  ;;  %v1023_v53 = vrot.slane %v1142_v48, %v1306_v12  ;;  %v854_v54 = vadd.f32 1.0, %v1242_v49 }
 0x120   :  { %v1246_v55 = vpop.eup %1245  ;;  %1257 = vrcp.f32 %v852_v51  ;;  %v853_v56 = vadd.f32 1.0, %v1244_v52 }
 0x121   :  { %v1024_v57 = vcombine.low %v1016_v50, %v1023_v53  ;;  %1259 = vrcp.f32 %v854_v54  ;;  %v855_v58 = vadd.f32 1.0, %v1246_v55 }
 0x122   :  { %v1248_v59 = vpop.eup %1247  ;;  %1261 = vrcp.f32 %v853_v56 }
 0x123   :  { %v1250_v61 = vpop.eup %1249  ;;  %1076 = vst [vmem:[%s1461_s3 + $0x18] sm:$0xff] %v1024_v57  ;;  %1263 = vrcp.f32 %v855_v58 }
 0x124   :  { %v1252_v62 = vpop.eup %1251 }
 0x125   :  { %v1254_v63 = vpop.eup %1253  ;;  %v1143_v0 = vpack.c.bf16 %v1252_v62, %v1248_v59 }
 0x126   :  { %v1256_v1 = vpop.eup %1255  ;;  %v1144_v2 = vpack.c.bf16 %v1254_v63, %v1250_v61 }
 0x127   :  { %v1033_v3 = vrot.slane %v1143_v0, %v1306_v12  ;;  %v856_v4 = vadd.f32 1.0, %v1256_v1 }
 0x128   :  { %v1040_v5 = vrot.slane %v1144_v2, %v1306_v12 }
 0x129   :  { %1265 = vrcp.f32 %v856_v4 }
 0x12a   :  { %v1258_v6 = vpop.eup %1257  ;;  %v1041_v7 = vcombine.low %v1033_v3, %v1040_v5 }
 0x12b   :  { %v1260_v8 = vpop.eup %1259 }
 0x12c   :  { %v1262_v9 = vpop.eup %1261  ;;  %1077 = vst [vmem:[%s1461_s3 + $0x20] sm:$0xff] %v1041_v7 }
 0x12d   :  { %v1264_v10 = vpop.eup %1263  ;;  %v1145_v11 = vpack.c.bf16 %v1262_v9, %v1258_v6 }
 0x12e   :  { %v1146_v13 = vpack.c.bf16 %v1264_v10, %v1260_v8 }
 0x12f   :  { %v1050_v14 = vrot.slane %v1145_v11, %v1306_v12 }
 0x130   :  { %v1057_v15 = vrot.slane %v1146_v13, %v1306_v12 }
 0x132   :  { %v1058_v16 = vcombine.low %v1050_v14, %v1057_v15 }
 0x133   :  { %v1266_v17 = vpop.eup %1265 }
 0x134   :  { %1078 = vst [vmem:[%s1461_s3 + $0x28] sm:$0xff] %v1058_v16  ;;  %v931_v18 = vpack.c.bf16 %v1266_v17, %v1266_v17 }
 0x136   :  { %1147 = vst.sshfl [vmem:[%s1461_s3 + $0x30] sm:$0x3 pattern:$0x76325410] %v931_v18 }

</bundles_post_ra>
